<compile_context>
chip_gen: v5e
topology: v5e:2x2
jax: 0.10.0
libtpu: 0.0.40
codegen_flags: <defaults>
</compile_context>

<pallas_src>
import numpy as np
import jax
import jax.numpy as jnp
from jax import lax
from jax.experimental import pallas as pl
from jax.experimental.pallas import tpu as pltpu

BN1 = 4     # images per conv1 grid block -> 4 * 196 = 784 phase rows per block (multiple of 8)
BN2 = 64    # max images per stage-2 grid block

_CPARAMS = pltpu.CompilerParams(
    dimension_semantics=("parallel",),          # shard the grid across TensorCores on v7x
    vmem_limit_bytes=32 * 1024 * 1024,          # explicit budget, safe on v5e/v6e/v7x
)


def _const_spec(shape):
    """Whole-array block re-used at every grid step (stays VMEM-resident)."""
    return pl.BlockSpec(shape, lambda i: (0,) * len(shape))


# ----------------------------- Pallas kernels ------------------------------ #

def _conv1_pool_kernel(p00_ref, p01_ref, p10_ref, p11_ref, w_ref, b_ref, o_ref):
    """im2col conv1 + bias + ReLU + 2x2 max-pool for one block of patch rows.

    p?? : (bm, 75) bf16 phase patch matrices (the four 2x2-pool phases)
    w   : (75, 6)  bf16 conv1 weight, rows in (kh, kw, ci) order
    b   : (1, 6)   f32
    o   : (bm, 6)  bf16 pooled conv1 activations
    max-pool commutes with the shared bias add and ReLU, so pool the raw matmuls.
    """
    w = w_ref[...]
    m = jnp.dot(p00_ref[...], w, preferred_element_type=jnp.float32)
    m = jnp.maximum(m, jnp.dot(p01_ref[...], w, preferred_element_type=jnp.float32))
    m = jnp.maximum(m, jnp.dot(p10_ref[...], w, preferred_element_type=jnp.float32))
    m = jnp.maximum(m, jnp.dot(p11_ref[...], w, preferred_element_type=jnp.float32))
    o_ref[...] = jnp.maximum(m + b_ref[...], 0.0).astype(o_ref.dtype)


def _tail_kernel(a_ref, wd_ref, cb_ref, w1_ref, b1_ref, w2_ref, b2_ref,
                 w3_ref, b3_ref, o_ref):
    """conv2 + bias + ReLU + 2x2 pool + flatten + fc1(ReLU) + fc2(ReLU) + fc3.

    a  : (bn, 1176) bf16      flattened (h, w, c) conv1 pooled activations
    wd : (4, 1176, 400) bf16  conv2+pool densified per-phase weight matrices
    cb : (1, 400) f32         conv2 bias tiled over the 25 pooled positions
    w*/b* : fc layers, (in, out) bf16 weights / (1, out) f32 biases
    o  : (bn, 10) f32
    """
    a = a_ref[...]
    s = jnp.dot(a, wd_ref[0], preferred_element_type=jnp.float32)
    s = jnp.maximum(s, jnp.dot(a, wd_ref[1], preferred_element_type=jnp.float32))
    s = jnp.maximum(s, jnp.dot(a, wd_ref[2], preferred_element_type=jnp.float32))
    s = jnp.maximum(s, jnp.dot(a, wd_ref[3], preferred_element_type=jnp.float32))
    h = jnp.maximum(s + cb_ref[...], 0.0).astype(jnp.bfloat16)          # (bn, 400)
    h = jnp.dot(h, w1_ref[...], preferred_element_type=jnp.float32)
    h = jnp.maximum(h + b1_ref[...], 0.0).astype(jnp.bfloat16)          # (bn, 120)
    h = jnp.dot(h, w2_ref[...], preferred_element_type=jnp.float32)
    h = jnp.maximum(h + b2_ref[...], 0.0).astype(jnp.bfloat16)          # (bn, 84)
    o = jnp.dot(h, w3_ref[...], preferred_element_type=jnp.float32) + b3_ref[...]
    o_ref[...] = o.astype(o_ref.dtype)


# ------------------------------ Call wrappers ------------------------------ #

def conv1_relu_pool(x_nhwc, w_mat, b):
    """x_nhwc: (Np, 32, 32, 3) bf16, Np % 8 == 0.
    Returns (Np*14*14, 6) bf16: maxpool2x2(relu(conv1(x)+b)); rows ordered (n, i, j)."""
    npad = x_nhwc.shape[0]
    hp = wp = 14
    kk, cout = 75, 6
    m = npad * hp * wp

    def phase(p, q):   # phase matrices built directly from x (no full im2col tensor)
        cols = [x_nhwc[:, p + di:p + di + 27:2, q + dj:q + dj + 27:2, :]
                for di in range(5) for dj in range(5)]
        return jnp.concatenate(cols, axis=-1).reshape(m, kk)

    phases = [phase(p, q) for p in (0, 1) for q in (0, 1)]

    bm = hp * wp * BN1                       # 784 rows / block
    row_spec = pl.BlockSpec((bm, kk), lambda i: (i, 0))
    return pl.pallas_call(
        _conv1_pool_kernel,
        out_shape=jax.ShapeDtypeStruct((m, cout), jnp.bfloat16),
        grid=(m // bm,),
        in_specs=[row_spec, row_spec, row_spec, row_spec,
                  _const_spec((kk, cout)), _const_spec((1, cout))],
        out_specs=pl.BlockSpec((bm, cout), lambda i: (i, 0)),
        compiler_params=_CPARAMS,
    )(*phases, w_mat, b)


def conv2_pool_mlp(a1, wd, cb, w1, b1, w2, b2, w3, b3):
    """a1: (Np, 1176) bf16 -> (Np, 10) f32 logits, fully fused conv2..fc3."""
    npad = a1.shape[0]
    bn = min(BN2, npad)
    n2 = ((npad + bn - 1) // bn) * bn
    if n2 != npad:
        a1 = jnp.pad(a1, ((0, n2 - npad), (0, 0)))
    out = pl.pallas_call(
        _tail_kernel,
        out_shape=jax.ShapeDtypeStruct((n2, 10), jnp.float32),
        grid=(n2 // bn,),
        in_specs=[pl.BlockSpec((bn, 1176), lambda i: (i, 0)),
                  _const_spec(wd.shape), _const_spec(cb.shape),
                  _const_spec(w1.shape), _const_spec(b1.shape),
                  _const_spec(w2.shape), _const_spec(b2.shape),
                  _const_spec(w3.shape), _const_spec(b3.shape)],
        out_specs=pl.BlockSpec((bn, 10), lambda i: (i, 0)),
        compiler_params=_CPARAMS,
    )(a1, wd, cb, w1, b1, w2, b2, w3, b3)
    return out[:npad]


# ------------------------------- Parameters -------------------------------- #

def init_params(key):
    """Random params in PyTorch layouts: Conv2d (Cout,Cin,k,k), Linear (out,in)."""
    ks = jax.random.split(key, 10)

    def u(k, shape, scale):
        return jax.random.uniform(k, shape, jnp.float32, -1.0, 1.0) * scale

    return {
        "conv1_w": u(ks[0], (6, 3, 5, 5), 0.1),
        "conv1_b": u(ks[1], (6,), 0.1),
        "conv2_w": u(ks[2], (16, 6, 5, 5), 0.1),
        "conv2_b": u(ks[3], (16,), 0.1),
        "fc1_w": u(ks[4], (120, 16 * 5 * 5), 0.05),
        "fc1_b": u(ks[5], (120,), 0.05),
        "fc2_w": u(ks[6], (84, 120), 0.05),
        "fc2_b": u(ks[7], (84,), 0.05),
        "fc3_w": u(ks[8], (10, 84), 0.05),
        "fc3_b": u(ks[9], (10,), 0.05),
    }


def prepare_params(p):
    """Fold every layout permutation (and the conv2+pool densification) into the
    parameters once, outside jit.  Matmul weights are stored in bfloat16."""
    bf16 = jnp.bfloat16

    # conv1 -> (75, 6) im2col weight, rows in (kh, kw, ci) order.
    c1 = jnp.transpose(p["conv1_w"], (2, 3, 1, 0)).reshape(75, 6)

    # conv2 + 2x2 max-pool densified into 4 per-phase (1176, 400) matrices.
    # Rows index the flattened (h, w, c) conv1 pooled output; columns index the
    # flattened (h, w, c) conv2 pooled output (the fc1 input order).
    w2 = np.asarray(p["conv2_w"], np.float32)               # (co=16, ci=6, kh=5, kw=5)
    dense = np.zeros((4, 14 * 14 * 6, 25 * 16), np.float32)
    for ph, (pp, qq) in enumerate(((0, 0), (0, 1), (1, 0), (1, 1))):
        for i in range(5):
            for j in range(5):
                c0 = (i * 5 + j) * 16
                for di in range(5):
                    for dj in range(5):
                        r0 = ((2 * i + pp + di) * 14 + (2 * j + qq + dj)) * 6
                        dense[ph, r0:r0 + 6, c0:c0 + 16] = w2[:, :, di, dj].T
    cb = np.tile(np.asarray(p["conv2_b"], np.float32), 25)  # (400,), (h, w, c) order

    # fc1 columns re-permuted from torch's (C,H,W) flatten to the (H,W,C) flatten
    # produced by the conv2 stage; fc weights stored as (in, out), biases as (1, out).
    fc1 = p["fc1_w"].reshape(120, 16, 5, 5)
    fc1 = jnp.transpose(fc1, (0, 2, 3, 1)).reshape(120, 400)

    return {
        "conv1_w": c1.astype(bf16),
        "conv1_b": p["conv1_b"].reshape(1, -1),
        "conv2_wd": jnp.asarray(dense, bf16),
        "conv2_bt": jnp.asarray(cb, jnp.float32).reshape(1, -1),
        "fc1_w": fc1.T.astype(bf16), "fc1_b": p["fc1_b"].reshape(1, -1),
        "fc2_w": p["fc2_w"].T.astype(bf16), "fc2_b": p["fc2_b"].reshape(1, -1),
        "fc3_w": p["fc3_w"].T.astype(bf16), "fc3_b": p["fc3_b"].reshape(1, -1),
    }


# -------------------------------- Forward ----------------------------------- #

@jax.jit
def net_forward(kp, x_nchw):
    """Mirrors Net.forward.  x_nchw: (N, 3, 32, 32) float32 -> (N, 10) float32."""
    n = x_nchw.shape[0]
    assert x_nchw.shape[1:] == (3, 32, 32)
    npad = ((n + 7) // 8) * 8                                # pad batch to multiple of 8
    x = jnp.transpose(x_nchw, (0, 2, 3, 1)).astype(jnp.bfloat16)        # NHWC bf16
    if npad != n:
        x = jnp.pad(x, ((0, npad - n), (0, 0), (0, 0), (0, 0)))
    a1 = conv1_relu_pool(x, kp["conv1_w"], kp["conv1_b"])               # (npad*196, 6)
    a1 = a1.reshape(npad, 14 * 14 * 6)                                  # (h, w, c) flatten
    out = conv2_pool_mlp(a1, kp["conv2_wd"], kp["conv2_bt"],
                         kp["fc1_w"], kp["fc1_b"],
                         kp["fc2_w"], kp["fc2_b"],
                         kp["fc3_w"], kp["fc3_b"])                      # (npad, 10)
    return out[:n]


# ------------------------------- Reference ---------------------------------- #

def reference_forward(p, x):
    """Pure-XLA f32 reference mirroring the PyTorch Net.forward (PyTorch layouts)."""
    def pool(y):
        n, c, h, w = y.shape
        return y.reshape(n, c, h // 2, 2, w // 2, 2).max(axis=(3, 5))

    dn = ("NCHW", "OIHW", "NCHW")
    y = lax.conv_general_dilated(x, p["conv1_w"], (1, 1), "VALID", dimension_numbers=dn)
    y = pool(jax.nn.relu(y + p["conv1_b"].reshape(1, -1, 1, 1)))
    y = lax.conv_general_dilated(y, p["conv2_w"], (1, 1), "VALID", dimension_numbers=dn)
    y = pool(jax.nn.relu(y + p["conv2_b"].reshape(1, -1, 1, 1)))
    y = y.reshape(y.shape[0], -1)                            # torch (C, H, W) flatten
    y = jax.nn.relu(y @ p["fc1_w"].T + p["fc1_b"])
    y = jax.nn.relu(y @ p["fc2_w"].T + p["fc2_b"])
    return y @ p["fc3_w"].T + p["fc3_b"]


if __name__ == "__main__":
    key = jax.random.PRNGKey(0)
    pkey, xkey = jax.random.split(key)
    raw = init_params(pkey)
    params = prepare_params(raw)
    # Net's shapes imply 32x32 RGB inputs (CIFAR-10); small batch of 6 exercises
    # both the batch padding path (6 -> 8) and a multi-step "parallel" grid.
    x = jax.random.normal(xkey, (6, 3, 32, 32), jnp.float32)
    out = net_forward(params, x)
    jax.block_until_ready(out)
    assert out.shape == (6, 10) and out.dtype == jnp.float32
    assert bool(jnp.all(jnp.isfinite(out)))
    err = float(jnp.max(jnp.abs(out - reference_forward(raw, x))))
    assert err < 2e-2, f"mismatch vs f32 reference: {err}"
    print("KERNEL_OK")
</pallas_src>

<mosaic_0001>
module attributes {stable_mosaic.version = 11 : i64} {
  func.func @_conv1_pool_kernel(%arg0: i32, %arg1: memref<784x75xbf16, #tpu.memory_space<vmem>>, %arg2: memref<784x75xbf16, #tpu.memory_space<vmem>>, %arg3: memref<784x75xbf16, #tpu.memory_space<vmem>>, %arg4: memref<784x75xbf16, #tpu.memory_space<vmem>>, %arg5: memref<75x6xbf16, #tpu.memory_space<vmem>>, %arg6: memref<1x6xf32, #tpu.memory_space<vmem>>, %arg7: memref<784x6xbf16, #tpu.memory_space<vmem>>) attributes {dimension_semantics = [#tpu.dimension_semantics<parallel>], iteration_bounds = array<i64: 2>, scalar_prefetch = 0 : i64, scratch_operands = 0 : i64, tpu.core_type = #tpu.core_type<tc>, window_params = [{transform_indices = @transform_0, window_bounds = array<i64: 784, 75>}, {transform_indices = @transform_1, window_bounds = array<i64: 784, 75>}, {transform_indices = @transform_2, window_bounds = array<i64: 784, 75>}, {transform_indices = @transform_3, window_bounds = array<i64: 784, 75>}, {pipeline_mode = #tpu.pipeline_mode<synchronous>, transform_indices = @transform_4, window_bounds = array<i64: 75, 6>}, {pipeline_mode = #tpu.pipeline_mode<synchronous>, transform_indices = @transform_5, window_bounds = array<i64: 1, 6>}, {transform_indices = @transform_6, window_bounds = array<i64: 784, 6>}]} {
    %c0 = arith.constant 0 : index
    %c0_0 = arith.constant 0 : index
    %0 = vector.load %arg5[%c0, %c0_0] : memref<75x6xbf16, #tpu.memory_space<vmem>>, vector<75x6xbf16>
    %c0_1 = arith.constant 0 : index
    %c0_2 = arith.constant 0 : index
    %1 = vector.load %arg1[%c0_1, %c0_2] : memref<784x75xbf16, #tpu.memory_space<vmem>>, vector<784x75xbf16>
    %cst = arith.constant dense<0.000000e+00> : vector<784x6xf32>
    %2 = tpu.matmul %1, %0, %cst {dimension_numbers = #tpu.dot_dimension_numbers<[1], [0], [0], [1], [0, 0, 1, 1], [], []>} : vector<784x75xbf16>, vector<75x6xbf16>, vector<784x6xf32> -> vector<784x6xf32>
    %c0_3 = arith.constant 0 : index
    %c0_4 = arith.constant 0 : index
    %3 = vector.load %arg2[%c0_3, %c0_4] : memref<784x75xbf16, #tpu.memory_space<vmem>>, vector<784x75xbf16>
    %cst_5 = arith.constant dense<0.000000e+00> : vector<784x6xf32>
    %4 = tpu.matmul %3, %0, %cst_5 {dimension_numbers = #tpu.dot_dimension_numbers<[1], [0], [0], [1], [0, 0, 1, 1], [], []>} : vector<784x75xbf16>, vector<75x6xbf16>, vector<784x6xf32> -> vector<784x6xf32>
    %5 = arith.maximumf %2, %4 : vector<784x6xf32>
    %c0_6 = arith.constant 0 : index
    %c0_7 = arith.constant 0 : index
    %6 = vector.load %arg3[%c0_6, %c0_7] : memref<784x75xbf16, #tpu.memory_space<vmem>>, vector<784x75xbf16>
    %cst_8 = arith.constant dense<0.000000e+00> : vector<784x6xf32>
    %7 = tpu.matmul %6, %0, %cst_8 {dimension_numbers = #tpu.dot_dimension_numbers<[1], [0], [0], [1], [0, 0, 1, 1], [], []>} : vector<784x75xbf16>, vector<75x6xbf16>, vector<784x6xf32> -> vector<784x6xf32>
    %8 = arith.maximumf %5, %7 : vector<784x6xf32>
    %c0_9 = arith.constant 0 : index
    %c0_10 = arith.constant 0 : index
    %9 = vector.load %arg4[%c0_9, %c0_10] : memref<784x75xbf16, #tpu.memory_space<vmem>>, vector<784x75xbf16>
    %cst_11 = arith.constant dense<0.000000e+00> : vector<784x6xf32>
    %10 = tpu.matmul %9, %0, %cst_11 {dimension_numbers = #tpu.dot_dimension_numbers<[1], [0], [0], [1], [0, 0, 1, 1], [], []>} : vector<784x75xbf16>, vector<75x6xbf16>, vector<784x6xf32> -> vector<784x6xf32>
    %11 = arith.maximumf %8, %10 : vector<784x6xf32>
    %c0_12 = arith.constant 0 : index
    %c0_13 = arith.constant 0 : index
    %12 = vector.load %arg6[%c0_12, %c0_13] : memref<1x6xf32, #tpu.memory_space<vmem>>, vector<1x6xf32>
    %13 = vector.broadcast %12 : vector<1x6xf32> to vector<784x6xf32>
    %14 = arith.addf %11, %13 : vector<784x6xf32>
    %cst_14 = arith.constant 0.000000e+00 : f32
    %15 = vector.broadcast %cst_14 : f32 to vector<784x6xf32>
    %16 = arith.maximumf %14, %15 : vector<784x6xf32>
    %17 = arith.truncf %16 : vector<784x6xf32> to vector<784x6xbf16>
    %c0_15 = arith.constant 0 : index
    %c0_16 = arith.constant 0 : index
    %18 = vector.load %arg7[%c0_15, %c0_16] : memref<784x6xbf16, #tpu.memory_space<vmem>>, vector<784x6xbf16>
    tpu.vector_store %arg7[%c0_15, %c0_16], %17 {strides = array<i32>} : memref<784x6xbf16, #tpu.memory_space<vmem>>, vector<784x6xbf16>,
    return
  }
  func.func @transform_0(%arg0: i32) -> (i32, i32) {
    %c0_i32 = arith.constant 0 : i32
    %c0_i32_0 = arith.constant 0 : i32
    return %arg0, %c0_i32 : i32, i32
  }
  func.func @transform_1(%arg0: i32) -> (i32, i32) {
    %c0_i32 = arith.constant 0 : i32
    %c0_i32_0 = arith.constant 0 : i32
    return %arg0, %c0_i32 : i32, i32
  }
  func.func @transform_2(%arg0: i32) -> (i32, i32) {
    %c0_i32 = arith.constant 0 : i32
    %c0_i32_0 = arith.constant 0 : i32
    return %arg0, %c0_i32 : i32, i32
  }
  func.func @transform_3(%arg0: i32) -> (i32, i32) {
    %c0_i32 = arith.constant 0 : i32
    %c0_i32_0 = arith.constant 0 : i32
    return %arg0, %c0_i32 : i32, i32
  }
  func.func @transform_4(%arg0: i32) -> (i32, i32) {
    %c0_i32 = arith.constant 0 : i32
    %c0_i32_0 = arith.constant 0 : i32
    %c0_i32_1 = arith.constant 0 : i32
    return %c0_i32, %c0_i32_0 : i32, i32
  }
  func.func @transform_5(%arg0: i32) -> (i32, i32) {
    %c0_i32 = arith.constant 0 : i32
    %c0_i32_0 = arith.constant 0 : i32
    %c0_i32_1 = arith.constant 0 : i32
    return %c0_i32, %c0_i32_0 : i32, i32
  }
  func.func @transform_6(%arg0: i32) -> (i32, i32) {
    %c0_i32 = arith.constant 0 : i32
    %c0_i32_0 = arith.constant 0 : i32
    return %arg0, %c0_i32 : i32, i32
  }
}

module attributes {stable_mosaic.version = 11 : i64} {
  func.func @_tail_kernel(%arg0: i32, %arg1: memref<8x1176xbf16, #tpu.memory_space<vmem>>, %arg2: memref<4x1176x400xbf16, #tpu.memory_space<vmem>>, %arg3: memref<1x400xf32, #tpu.memory_space<vmem>>, %arg4: memref<400x120xbf16, #tpu.memory_space<vmem>>, %arg5: memref<1x120xf32, #tpu.memory_space<vmem>>, %arg6: memref<120x84xbf16, #tpu.memory_space<vmem>>, %arg7: memref<1x84xf32, #tpu.memory_space<vmem>>, %arg8: memref<84x10xbf16, #tpu.memory_space<vmem>>, %arg9: memref<1x10xf32, #tpu.memory_space<vmem>>, %arg10: memref<8x10xf32, #tpu.memory_space<vmem>>) attributes {dimension_semantics = [#tpu.dimension_semantics<parallel>], iteration_bounds = array<i64: 1>, scalar_prefetch = 0 : i64, scratch_operands = 0 : i64, tpu.core_type = #tpu.core_type<tc>, window_params = [{transform_indices = @transform_0, window_bounds = array<i64: 8, 1176>}, {pipeline_mode = #tpu.pipeline_mode<synchronous>, transform_indices = @transform_1, window_bounds = array<i64: 4, 1176, 400>}, {pipeline_mode = #tpu.pipeline_mode<synchronous>, transform_indices = @transform_2, window_bounds = array<i64: 1, 400>}, {pipeline_mode = #tpu.pipeline_mode<synchronous>, transform_indices = @transform_3, window_bounds = array<i64: 400, 120>}, {pipeline_mode = #tpu.pipeline_mode<synchronous>, transform_indices = @transform_4, window_bounds = array<i64: 1, 120>}, {pipeline_mode = #tpu.pipeline_mode<synchronous>, transform_indices = @transform_5, window_bounds = array<i64: 120, 84>}, {pipeline_mode = #tpu.pipeline_mode<synchronous>, transform_indices = @transform_6, window_bounds = array<i64: 1, 84>}, {pipeline_mode = #tpu.pipeline_mode<synchronous>, transform_indices = @transform_7, window_bounds = array<i64: 84, 10>}, {pipeline_mode = #tpu.pipeline_mode<synchronous>, transform_indices = @transform_8, window_bounds = array<i64: 1, 10>}, {transform_indices = @transform_9, window_bounds = array<i64: 8, 10>}]} {
    %c0 = arith.constant 0 : index
    %c0_0 = arith.constant 0 : index
    %0 = vector.load %arg1[%c0, %c0_0] : memref<8x1176xbf16, #tpu.memory_space<vmem>>, vector<8x1176xbf16>
    %c0_1 = arith.constant 0 : index
    %c0_2 = arith.constant 0 : index
    %c0_3 = arith.constant 0 : index
    %1 = vector.load %arg2[%c0_1, %c0_2, %c0_3] : memref<4x1176x400xbf16, #tpu.memory_space<vmem>>, vector<1x1176x400xbf16>
    %2 = vector.shape_cast %1 : vector<1x1176x400xbf16> to vector<1176x400xbf16>
    %cst = arith.constant dense<0.000000e+00> : vector<8x400xf32>
    %3 = tpu.matmul %0, %2, %cst {dimension_numbers = #tpu.dot_dimension_numbers<[1], [0], [0], [1], [0, 0, 1, 1], [], []>} : vector<8x1176xbf16>, vector<1176x400xbf16>, vector<8x400xf32> -> vector<8x400xf32>
    %c1 = arith.constant 1 : index
    %c0_4 = arith.constant 0 : index
    %c0_5 = arith.constant 0 : index
    %4 = vector.load %arg2[%c1, %c0_4, %c0_5] : memref<4x1176x400xbf16, #tpu.memory_space<vmem>>, vector<1x1176x400xbf16>
    %5 = vector.shape_cast %4 : vector<1x1176x400xbf16> to vector<1176x400xbf16>
    %cst_6 = arith.constant dense<0.000000e+00> : vector<8x400xf32>
    %6 = tpu.matmul %0, %5, %cst_6 {dimension_numbers = #tpu.dot_dimension_numbers<[1], [0], [0], [1], [0, 0, 1, 1], [], []>} : vector<8x1176xbf16>, vector<1176x400xbf16>, vector<8x400xf32> -> vector<8x400xf32>
    %7 = arith.maximumf %3, %6 : vector<8x400xf32>
    %c2 = arith.constant 2 : index
    %c0_7 = arith.constant 0 : index
    %c0_8 = arith.constant 0 : index
    %8 = vector.load %arg2[%c2, %c0_7, %c0_8] : memref<4x1176x400xbf16, #tpu.memory_space<vmem>>, vector<1x1176x400xbf16>
    %9 = vector.shape_cast %8 : vector<1x1176x400xbf16> to vector<1176x400xbf16>
    %cst_9 = arith.constant dense<0.000000e+00> : vector<8x400xf32>
    %10 = tpu.matmul %0, %9, %cst_9 {dimension_numbers = #tpu.dot_dimension_numbers<[1], [0], [0], [1], [0, 0, 1, 1], [], []>} : vector<8x1176xbf16>, vector<1176x400xbf16>, vector<8x400xf32> -> vector<8x400xf32>
    %11 = arith.maximumf %7, %10 : vector<8x400xf32>
    %c3 = arith.constant 3 : index
    %c0_10 = arith.constant 0 : index
    %c0_11 = arith.constant 0 : index
    %12 = vector.load %arg2[%c3, %c0_10, %c0_11] : memref<4x1176x400xbf16, #tpu.memory_space<vmem>>, vector<1x1176x400xbf16>
    %13 = vector.shape_cast %12 : vector<1x1176x400xbf16> to vector<1176x400xbf16>
    %cst_12 = arith.constant dense<0.000000e+00> : vector<8x400xf32>
    %14 = tpu.matmul %0, %13, %cst_12 {dimension_numbers = #tpu.dot_dimension_numbers<[1], [0], [0], [1], [0, 0, 1, 1], [], []>} : vector<8x1176xbf16>, vector<1176x400xbf16>, vector<8x400xf32> -> vector<8x400xf32>
    %15 = arith.maximumf %11, %14 : vector<8x400xf32>
    %c0_13 = arith.constant 0 : index
    %c0_14 = arith.constant 0 : index
    %16 = vector.load %arg3[%c0_13, %c0_14] : memref<1x400xf32, #tpu.memory_space<vmem>>, vector<1x400xf32>
    %17 = vector.broadcast %16 : vector<1x400xf32> to vector<8x400xf32>
    %18 = arith.addf %15, %17 : vector<8x400xf32>
    %cst_15 = arith.constant 0.000000e+00 : f32
    %19 = vector.broadcast %cst_15 : f32 to vector<8x400xf32>
    %20 = arith.maximumf %18, %19 : vector<8x400xf32>
    %21 = arith.truncf %20 : vector<8x400xf32> to vector<8x400xbf16>
    %c0_16 = arith.constant 0 : index
    %c0_17 = arith.constant 0 : index
    %22 = vector.load %arg4[%c0_16, %c0_17] : memref<400x120xbf16, #tpu.memory_space<vmem>>, vector<400x120xbf16>
    %cst_18 = arith.constant dense<0.000000e+00> : vector<8x120xf32>
    %23 = tpu.matmul %21, %22, %cst_18 {dimension_numbers = #tpu.dot_dimension_numbers<[1], [0], [0], [1], [0, 0, 1, 1], [], []>} : vector<8x400xbf16>, vector<400x120xbf16>, vector<8x120xf32> -> vector<8x120xf32>
    %c0_19 = arith.constant 0 : index
    %c0_20 = arith.constant 0 : index
    %24 = vector.load %arg5[%c0_19, %c0_20] : memref<1x120xf32, #tpu.memory_space<vmem>>, vector<1x120xf32>
    %25 = vector.broadcast %24 : vector<1x120xf32> to vector<8x120xf32>
    %26 = arith.addf %23, %25 : vector<8x120xf32>
    %cst_21 = arith.constant 0.000000e+00 : f32
    %27 = vector.broadcast %cst_21 : f32 to vector<8x120xf32>
    %28 = arith.maximumf %26, %27 : vector<8x120xf32>
    %29 = arith.truncf %28 : vector<8x120xf32> to vector<8x120xbf16>
    %c0_22 = arith.constant 0 : index
    %c0_23 = arith.constant 0 : index
    %30 = vector.load %arg6[%c0_22, %c0_23] : memref<120x84xbf16, #tpu.memory_space<vmem>>, vector<120x84xbf16>
    %cst_24 = arith.constant dense<0.000000e+00> : vector<8x84xf32>
    %31 = tpu.matmul %29, %30, %cst_24 {dimension_numbers = #tpu.dot_dimension_numbers<[1], [0], [0], [1], [0, 0, 1, 1], [], []>} : vector<8x120xbf16>, vector<120x84xbf16>, vector<8x84xf32> -> vector<8x84xf32>
    %c0_25 = arith.constant 0 : index
    %c0_26 = arith.constant 0 : index
    %32 = vector.load %arg7[%c0_25, %c0_26] : memref<1x84xf32, #tpu.memory_space<vmem>>, vector<1x84xf32>
    %33 = vector.broadcast %32 : vector<1x84xf32> to vector<8x84xf32>
    %34 = arith.addf %31, %33 : vector<8x84xf32>
    %cst_27 = arith.constant 0.000000e+00 : f32
    %35 = vector.broadcast %cst_27 : f32 to vector<8x84xf32>
    %36 = arith.maximumf %34, %35 : vector<8x84xf32>
    %37 = arith.truncf %36 : vector<8x84xf32> to vector<8x84xbf16>
    %c0_28 = arith.constant 0 : index
    %c0_29 = arith.constant 0 : index
    %38 = vector.load %arg8[%c0_28, %c0_29] : memref<84x10xbf16, #tpu.memory_space<vmem>>, vector<84x10xbf16>
    %cst_30 = arith.constant dense<0.000000e+00> : vector<8x10xf32>
    %39 = tpu.matmul %37, %38, %cst_30 {dimension_numbers = #tpu.dot_dimension_numbers<[1], [0], [0], [1], [0, 0, 1, 1], [], []>} : vector<8x84xbf16>, vector<84x10xbf16>, vector<8x10xf32> -> vector<8x10xf32>
    %c0_31 = arith.constant 0 : index
    %c0_32 = arith.constant 0 : index
    %40 = vector.load %arg9[%c0_31, %c0_32] : memref<1x10xf32, #tpu.memory_space<vmem>>, vector<1x10xf32>
    %41 = vector.broadcast %40 : vector<1x10xf32> to vector<8x10xf32>
    %42 = arith.addf %39, %41 : vector<8x10xf32>
    %c0_33 = arith.constant 0 : index
    %c0_34 = arith.constant 0 : index
    %43 = vector.load %arg10[%c0_33, %c0_34] : memref<8x10xf32, #tpu.memory_space<vmem>>, vector<8x10xf32>
    tpu.vector_store %arg10[%c0_33, %c0_34], %42 {strides = array<i32>} : memref<8x10xf32, #tpu.memory_space<vmem>>, vector<8x10xf32>,
    return
  }
  func.func @transform_0(%arg0: i32) -> (i32, i32) {
    %c0_i32 = arith.constant 0 : i32
    %c0_i32_0 = arith.constant 0 : i32
    return %arg0, %c0_i32 : i32, i32
  }
  func.func @transform_1(%arg0: i32) -> (i32, i32, i32) {
    %c0_i32 = arith.constant 0 : i32
    %c0_i32_0 = arith.constant 0 : i32
    %c0_i32_1 = arith.constant 0 : i32
    %c0_i32_2 = arith.constant 0 : i32
    return %c0_i32, %c0_i32_0, %c0_i32_1 : i32, i32, i32
  }
  func.func @transform_2(%arg0: i32) -> (i32, i32) {
    %c0_i32 = arith.constant 0 : i32
    %c0_i32_0 = arith.constant 0 : i32
    %c0_i32_1 = arith.constant 0 : i32
    return %c0_i32, %c0_i32_0 : i32, i32
  }
  func.func @transform_3(%arg0: i32) -> (i32, i32) {
    %c0_i32 = arith.constant 0 : i32
    %c0_i32_0 = arith.constant 0 : i32
    %c0_i32_1 = arith.constant 0 : i32
    return %c0_i32, %c0_i32_0 : i32, i32
  }
  func.func @transform_4(%arg0: i32) -> (i32, i32) {
    %c0_i32 = arith.constant 0 : i32
    %c0_i32_0 = arith.constant 0 : i32
    %c0_i32_1 = arith.constant 0 : i32
    return %c0_i32, %c0_i32_0 : i32, i32
  }
  func.func @transform_5(%arg0: i32) -> (i32, i32) {
    %c0_i32 = arith.constant 0 : i32
    %c0_i32_0 = arith.constant 0 : i32
    %c0_i32_1 = arith.constant 0 : i32
    return %c0_i32, %c0_i32_0 : i32, i32
  }
  func.func @transform_6(%arg0: i32) -> (i32, i32) {
    %c0_i32 = arith.constant 0 : i32
    %c0_i32_0 = arith.constant 0 : i32
    %c0_i32_1 = arith.constant 0 : i32
    return %c0_i32, %c0_i32_0 : i32, i32
  }
  func.func @transform_7(%arg0: i32) -> (i32, i32) {
    %c0_i32 = arith.constant 0 : i32
    %c0_i32_0 = arith.constant 0 : i32
    %c0_i32_1 = arith.constant 0 : i32
    return %c0_i32, %c0_i32_0 : i32, i32
  }
  func.func @transform_8(%arg0: i32) -> (i32, i32) {
    %c0_i32 = arith.constant 0 : i32
    %c0_i32_0 = arith.constant 0 : i32
    %c0_i32_1 = arith.constant 0 : i32
    return %c0_i32, %c0_i32_0 : i32, i32
  }
  func.func @transform_9(%arg0: i32) -> (i32, i32) {
    %c0_i32 = arith.constant 0 : i32
    %c0_i32_0 = arith.constant 0 : i32
    return %arg0, %c0_i32 : i32, i32
  }
}

</mosaic_0001>

<bundles_post_ra>
// kernel: net_forward.2
= control target key start
LH: loop header
LB: loop body
LE: loop exit
PB: predicated region body
PF: predicated region fallthrough
CT: control target
= control target key end

     0   :  { %s5397_s21 = smov 0   ;;  %s6159_s0 = inlined_call_operand.vmem [shape: bf16[1568,75], index: 0, kind: input, shape index: {}]   ;;  %s6160_s1 = inlined_call_operand.vmem [shape: bf16[1568,75], index: 1, kind: input, shape index: {}]   ;;  %s6161_s2 = inlined_call_operand.vmem [shape: bf16[1568,75], index: 2, kind: input, shape index: {}]   ;;  %s6162_s3 = inlined_call_operand.vmem [shape: bf16[1568,75], index: 3, kind: input, shape index: {}]   ;;  %s6163_s4 = inlined_call_operand.vmem [shape: bf16[75,6], index: 4, kind: input, shape index: {}]   ;;  %s6164_s5 = inlined_call_operand.vmem [shape: f32[1,6], index: 5, kind: input, shape index: {}]   ;;  %s6165_s6 = inlined_call_operand.vmem [shape: bf16[1568,6], index: 6, kind: output, shape index: {}]  }
   0x1 LB: > { %s4128_s22 = sadd.s32 4294967295, %s5359_s21   ;;  %p4132_p0 = scmp.ge.s32.totalorder %s5359_s21, 1  ;;  %s5359_s21 = sphi %s5397_s21, %s16_s21  }
   0x2   : > { %p246_p1 = scmp.lt.s32.totalorder %s5359_s21, 3 }
   0x4   : > { %p247_p2 = pnand %p4132_p0, %p246_p1 }
   0x5   : > { %s291_s27 = smul.u32 (!%p247_p2), 98, %s4128_s22 }
   0x6   : > { %250 = sbr.rel (%p247_p2) target bundleno = 956 (0x3bc), region = 44 }
   0x7   : > { %p292_p3 = scmp.lt.s32.totalorder (!%p247_p2), %s291_s27, 195 }
   0xb   : > { %v4352_v0 = vld [vmem:[%s6163_s4 + $0x20] sm:$0xf]  ;;  %v5144_v1 = vld [vmem:[%s6163_s4 + $0x20] sm:$0x30]  ;;  %vm852_vm0 = vcmask 1044480   ;;  %vm853_vm1 = vcmask 1045504  }
   0xc   : > { %v4353_v2 = vor.u32 %v5144_v1, %v4352_v0  ;;  %v5361_v3 = vmov 65535   ;;  %v5143_v7 = vld [vmem:[%s6163_s4 + $0x18] sm:$0xff]  ;;  %v5142_v8 = vld [vmem:[%s6163_s4 + $0x10] sm:$0xff]  ;;  %s6167_s27 = smov (!%p292_p3, %s291_s27), 195  ;;  %v5141_v9 = vld [vmem:[%s6163_s4 + $0x8] sm:$0xff]  ;;  %vm704_vm2 = vcmask 613376  }
   0xd   : > { %v854_v4 = vsel %vm852_vm0, 4294967295, %v5361_v3  ;;  %s5420_s10 = sshll.u32 %s6167_s27, 2  ;;  %v5140_v10 = vld [vmem:[%s6163_s4] sm:$0xff]  ;;  %vm3937_vm3 = vcmask 44032  }
   0xe   : > { %v855_v5 = vsel %vm853_vm1, %v854_v4, 0  ;;  %s5429_s15 = scalar_lea.vmem %s6159_s0, %s5420_s10  ;;  %s5435_s18 = scalar_lea.vmem %s6160_s1, %s5420_s10  ;;  %v5524_v53 = vld [vmem:[%s6164_s5] ss:$0 sm:$0xff] }
   0xf   : > { %v857_v6 = vand.u32 %v4353_v2, %v855_v5  ;;  %s5441_s22 = scalar_lea.vmem %s6161_s2, %s5420_s10  ;;  %s5447_s25 = scalar_lea.vmem %s6162_s3, %s5420_s10  ;;  %v5145_v11 = vld [vmem:[%s5429_s15] sm:$0xff]  ;;  %v5146_v15 = vld [vmem:[%s5429_s15 + $0x8] sm:$0xff]  ;;  %v5147_v19 = vld [vmem:[%s5429_s15 + $0x10] sm:$0xff] }
  0x10   : > { %v5194_v12 = vld [vmem:[%s5435_s18] sm:$0xff]  ;;  %v5195_v16 = vld [vmem:[%s5435_s18 + $0x8] sm:$0xff]  ;;  %v5196_v20 = vld [vmem:[%s5435_s18 + $0x10] sm:$0xff]  ;;  %s5531_s30 = scalar_lea.vmem %s6165_s6, %s5420_s10 }
  0x11   : > { %862 = vmatpush.bf16.msra.mxu0 %v857_v6  ;;  %1606 = vmatpush.bf16.msra.mxu1 %v857_v6  ;;  %v5243_v13 = vld [vmem:[%s5441_s22] sm:$0xff]  ;;  %v5244_v17 = vld [vmem:[%s5441_s22 + $0x8] sm:$0xff]  ;;  %v5245_v21 = vld [vmem:[%s5441_s22 + $0x10] sm:$0xff] }
  0x12   : > { %2448 = vmatpush.bf16.msra.mxu2 %v857_v6  ;;  %3290 = vmatpush.bf16.msra.mxu3 %v857_v6  ;;  %v5292_v14 = vld [vmem:[%s5447_s25] sm:$0xff]  ;;  %v5293_v18 = vld [vmem:[%s5447_s25 + $0x8] sm:$0xff]  ;;  %v5294_v22 = vld [vmem:[%s5447_s25 + $0x10] sm:$0xff] }
  0x13   : > { %v5148_v23 = vld [vmem:[%s5429_s15 + $0x18] sm:$0xff]  ;;  %v5149_v27 = vld [vmem:[%s5429_s15 + $0x20] sm:$0xff]  ;;  %v5150_v31 = vld [vmem:[%s5429_s15 + $0x28] sm:$0xff] }
  0x14   : > { %v5197_v24 = vld [vmem:[%s5435_s18 + $0x18] sm:$0xff]  ;;  %v5198_v28 = vld [vmem:[%s5435_s18 + $0x20] sm:$0xff]  ;;  %v5199_v32 = vld [vmem:[%s5435_s18 + $0x28] sm:$0xff] }
  0x15   : > { %863 = vmatpush.bf16.msra.mxu0 %v5143_v7  ;;  %1607 = vmatpush.bf16.msra.mxu1 %v5143_v7  ;;  %v5246_v25 = vld [vmem:[%s5441_s22 + $0x18] sm:$0xff]  ;;  %v5247_v29 = vld [vmem:[%s5441_s22 + $0x20] sm:$0xff]  ;;  %v5248_v33 = vld [vmem:[%s5441_s22 + $0x28] sm:$0xff] }
  0x16   : > { %2449 = vmatpush.bf16.msra.mxu2 %v5143_v7  ;;  %3291 = vmatpush.bf16.msra.mxu3 %v5143_v7  ;;  %v5295_v26 = vld [vmem:[%s5447_s25 + $0x18] sm:$0xff]  ;;  %v5296_v30 = vld [vmem:[%s5447_s25 + $0x20] sm:$0xff]  ;;  %v5297_v34 = vld [vmem:[%s5447_s25 + $0x28] sm:$0xff] }
  0x17   : > { %v5151_v35 = vld [vmem:[%s5429_s15 + $0x30] sm:$0xff]  ;;  %v5152_v39 = vld [vmem:[%s5429_s15 + $0x38] sm:$0xff]  ;;  %v5153_v43 = vld [vmem:[%s5429_s15 + $0x40] sm:$0xff] }
  0x18   : > { %v5200_v36 = vld [vmem:[%s5435_s18 + $0x30] sm:$0xff]  ;;  %v5201_v40 = vld [vmem:[%s5435_s18 + $0x38] sm:$0xff]  ;;  %v5202_v44 = vld [vmem:[%s5435_s18 + $0x40] sm:$0xff] }
  0x19   : > { %864 = vmatpush.bf16.msra.mxu0 %v5142_v8  ;;  %1608 = vmatpush.bf16.msra.mxu1 %v5142_v8  ;;  %v5249_v37 = vld [vmem:[%s5441_s22 + $0x30] sm:$0xff]  ;;  %v5250_v41 = vld [vmem:[%s5441_s22 + $0x38] sm:$0xff]  ;;  %v5251_v47 = vld [vmem:[%s5441_s22 + $0x40] sm:$0xff] }
  0x1a   : > { %2450 = vmatpush.bf16.msra.mxu2 %v5142_v8  ;;  %3292 = vmatpush.bf16.msra.mxu3 %v5142_v8  ;;  %v5298_v38 = vld [vmem:[%s5447_s25 + $0x30] sm:$0xff]  ;;  %v5299_v42 = vld [vmem:[%s5447_s25 + $0x38] sm:$0xff]  ;;  %v5300_v48 = vld [vmem:[%s5447_s25 + $0x40] sm:$0xff] }
  0x1b   : > { %v5154_v62 = vld [vmem:[%s5429_s15 + $0x48] sm:$0xff] }
  0x1c   : > { %v5203_v63 = vld [vmem:[%s5435_s18 + $0x48] sm:$0xff] }
  0x1d   : > { %865 = vmatpush.bf16.msra.mxu0 %v5141_v9  ;;  %1609 = vmatpush.bf16.msra.mxu1 %v5141_v9  ;;  %v5252_v4 = vld [vmem:[%s5441_s22 + $0x48] sm:$0xff] }
  0x1e   : > { %2451 = vmatpush.bf16.msra.mxu2 %v5141_v9  ;;  %3293 = vmatpush.bf16.msra.mxu3 %v5141_v9  ;;  %v5301_v5 = vld [vmem:[%s5447_s25 + $0x48] sm:$0xff] }
  0x21   : > { %866 = vmatpush.bf16.msra.mxu0 %v5140_v10  ;;  %1610 = vmatpush.bf16.msra.mxu1 %v5140_v10 }
  0x22   : > { %2452 = vmatpush.bf16.msra.mxu2 %v5140_v10  ;;  %3294 = vmatpush.bf16.msra.mxu3 %v5140_v10 }
  0x24   : > { %4354 = vmatmul.msk.bf16.vlgmr.msra.gmra.mxu0 %vm704_vm2, %v5145_v11  ;;  %4599 = vmatmul.msk.bf16.vlgmr.msra.gmra.mxu1 %vm704_vm2, %v5194_v12 }
  0x25   : > { %4844 = vmatmul.msk.bf16.vlgmr.msra.gmra.mxu2 %vm704_vm2, %v5243_v13  ;;  %5089 = vmatmul.msk.bf16.vlgmr.msra.gmra.mxu3 %vm704_vm2, %v5292_v14 }
  0x34   : > { %4355 = vmatmul.msk.bf16.gmra.mxu0 %vm704_vm2, %v5146_v15  ;;  %4600 = vmatmul.msk.bf16.gmra.mxu1 %vm704_vm2, %v5195_v16 }
  0x35   : > { %4845 = vmatmul.msk.bf16.gmra.mxu2 %vm704_vm2, %v5244_v17  ;;  %5090 = vmatmul.msk.bf16.gmra.mxu3 %vm704_vm2, %v5293_v18 }
  0x44   : > { %4356 = vmatmul.msk.bf16.gmra.mxu0 %vm704_vm2, %v5147_v19  ;;  %4601 = vmatmul.msk.bf16.gmra.mxu1 %vm704_vm2, %v5196_v20 }
  0x45   : > { %4846 = vmatmul.msk.bf16.gmra.mxu2 %vm704_vm2, %v5245_v21  ;;  %5091 = vmatmul.msk.bf16.gmra.mxu3 %vm704_vm2, %v5294_v22  ;;  %v5155_v22 = vld [vmem:[%s5429_s15 + $0x50] sm:$0xff] }
  0x54   : > { %4357 = vmatmul.msk.bf16.gmra.mxu0 %vm704_vm2, %v5148_v23  ;;  %4602 = vmatmul.msk.bf16.gmra.mxu1 %vm704_vm2, %v5197_v24  ;;  %v5204_v23 = vld [vmem:[%s5435_s18 + $0x50] sm:$0xff] }
  0x55   : > { %4847 = vmatmul.msk.bf16.gmra.mxu2 %vm704_vm2, %v5246_v25  ;;  %5092 = vmatmul.msk.bf16.gmra.mxu3 %vm704_vm2, %v5295_v26 }
  0x64   : > { %4358 = vmatmul.msk.bf16.gmra.mxu0 %vm704_vm2, %v5149_v27  ;;  %4603 = vmatmul.msk.bf16.gmra.mxu1 %vm704_vm2, %v5198_v28  ;;  %v5253_v28 = vld [vmem:[%s5441_s22 + $0x50] sm:$0xff] }
  0x65   : > { %4848 = vmatmul.msk.bf16.gmra.mxu2 %vm704_vm2, %v5247_v29  ;;  %5093 = vmatmul.msk.bf16.gmra.mxu3 %vm704_vm2, %v5296_v30  ;;  %v5302_v29 = vld [vmem:[%s5447_s25 + $0x50] sm:$0xff] }
  0x74   : > { %4359 = vmatmul.msk.bf16.gmra.mxu0 %vm704_vm2, %v5150_v31  ;;  %4604 = vmatmul.msk.bf16.gmra.mxu1 %vm704_vm2, %v5199_v32 }
  0x75   : > { %4849 = vmatmul.msk.bf16.gmra.mxu2 %vm704_vm2, %v5248_v33  ;;  %5094 = vmatmul.msk.bf16.gmra.mxu3 %vm704_vm2, %v5297_v34 }
  0x84   : > { %4360 = vmatmul.msk.bf16.gmra.mxu0 %vm704_vm2, %v5151_v35  ;;  %4605 = vmatmul.msk.bf16.gmra.mxu1 %vm704_vm2, %v5200_v36 }
  0x85   : > { %4850 = vmatmul.msk.bf16.gmra.mxu2 %vm704_vm2, %v5249_v37  ;;  %5095 = vmatmul.msk.bf16.gmra.mxu3 %vm704_vm2, %v5298_v38 }
  0x94   : > { %4361 = vmatmul.msk.bf16.gmra.mxu0 %vm704_vm2, %v5152_v39  ;;  %4606 = vmatmul.msk.bf16.gmra.mxu1 %vm704_vm2, %v5201_v40 }
  0x95   : > { %4851 = vmatmul.msk.bf16.gmra.mxu2 %vm704_vm2, %v5250_v41  ;;  %5096 = vmatmul.msk.bf16.gmra.mxu3 %vm704_vm2, %v5299_v42 }
  0xa1   : > { %v868_v45 = vpop.f32.mrf.mxu0  ;;  %v1612_v46 = vpop.f32.mrf.mxu1 }
  0xa2   : > { %v1857_v49 = vmax.f32 %v868_v45, %v1612_v46  ;;  %v5156_v46 = vld [vmem:[%s5429_s15 + $0x58] sm:$0xff] }
  0xa4   : > { %4362 = vmatmul.msk.bf16.gmra.mxu0 %vm704_vm2, %v5153_v43  ;;  %4607 = vmatmul.msk.bf16.gmra.mxu1 %vm704_vm2, %v5202_v44 }
  0xa5   : > { %4852 = vmatmul.msk.bf16.gmra.mxu2 %vm704_vm2, %v5251_v47  ;;  %5097 = vmatmul.msk.bf16.gmra.mxu3 %vm704_vm2, %v5300_v48  ;;  %v5205_v47 = vld [vmem:[%s5435_s18 + $0x58] sm:$0xff] }
  0xa8   : > { %v2454_v50 = vpop.f32.mrf.mxu2  ;;  %v3296_v51 = vpop.f32.mrf.mxu3 }
  0xa9   : > { %v2699_v52 = vmax.f32 %v1857_v49, %v2454_v50  ;;  %v870_v54 = vpop.f32.mrf.mxu0  ;;  %v1614_v55 = vpop.f32.mrf.mxu1 }
  0xaa   : > { %v1858_v59 = vmax.f32 %v870_v54, %v1614_v55  ;;  %v5303_v54 = vld [vmem:[%s5447_s25 + $0x58] sm:$0xff] }
  0xab   : > { %v3541_v56 = vmax.f32 %v2699_v52, %v3296_v51  ;;  %v5254_v52 = vld [vmem:[%s5441_s22 + $0x58] sm:$0xff] }
  0xad   : > { %v3643_v57 = vadd.f32 %v5524_v53, %v3541_v56 }
  0xaf   : > { %v3741_v58 = vmax.f32 %v3643_v57, 0.0 }
  0xb0   : > { %v2456_v60 = vpop.f32.mrf.mxu2  ;;  %v3298_v61 = vpop.f32.mrf.mxu3 }
  0xb1   : > { %v3839_v0 = vpack.c.bf16 %v3741_v58, %v3741_v58  ;;  %v2700_v1 = vmax.f32 %v1858_v59, %v2456_v60  ;;  %v873_v2 = vpop.f32.mrf.mxu0  ;;  %v1617_v3 = vpop.f32.mrf.mxu1 }
  0xb2   : > { %v1859_v8 = vmax.f32 %v873_v2, %v1617_v3 }
  0xb3   : > { %3938 = vst.msk [vmem:[%s5531_s30] sm:$0xf] %vm3937_vm3, %v3839_v0  ;;  %v3542_v6 = vmax.f32 %v2700_v1, %v3298_v61 }
  0xb4   : > { %4363 = vmatmul.msk.bf16.gmra.mxu0 %vm704_vm2, %v5154_v62  ;;  %4608 = vmatmul.msk.bf16.gmra.mxu1 %vm704_vm2, %v5203_v63 }
  0xb5   : > { %v3644_v7 = vadd.f32 %v5524_v53, %v3542_v6  ;;  %4853 = vmatmul.msk.bf16.gmra.mxu2 %vm704_vm2, %v5252_v4  ;;  %5098 = vmatmul.msk.bf16.gmra.mxu3 %vm704_vm2, %v5301_v5 }
  0xb7   : > { %v3742_v9 = vmax.f32 %v3644_v7, 0.0  ;;  %v5157_v7 = vld [vmem:[%s5429_s15 + $0x60] sm:$0xff] }
  0xb8   : > { %v2459_v10 = vpop.f32.mrf.mxu2  ;;  %v3301_v11 = vpop.f32.mrf.mxu3 }
  0xb9   : > { %v3840_v12 = vpack.c.bf16 %v3742_v9, %v3742_v9  ;;  %v2701_v13 = vmax.f32 %v1859_v8, %v2459_v10  ;;  %v875_v14 = vpop.f32.mrf.mxu0  ;;  %v1619_v15 = vpop.f32.mrf.mxu1  ;;  %v5206_v8 = vld [vmem:[%s5435_s18 + $0x60] sm:$0xff] }
  0xba   : > { %v1860_v19 = vmax.f32 %v875_v14, %v1619_v15  ;;  %v5304_v14 = vld [vmem:[%s5447_s25 + $0x60] sm:$0xff] }
  0xbb   : > { %3939 = vst.msk [vmem:[%s5531_s30 + $0x4] sm:$0xf] %vm3937_vm3, %v3840_v12  ;;  %v3543_v16 = vmax.f32 %v2701_v13, %v3301_v11  ;;  %v5255_v13 = vld [vmem:[%s5441_s22 + $0x60] sm:$0xff] }
  0xbd   : > { %v3645_v17 = vadd.f32 %v5524_v53, %v3543_v16 }
  0xbf   : > { %v3743_v18 = vmax.f32 %v3645_v17, 0.0 }
  0xc0   : > { %v2461_v20 = vpop.f32.mrf.mxu2  ;;  %v3303_v21 = vpop.f32.mrf.mxu3 }
  0xc1   : > { %v3841_v24 = vpack.c.bf16 %v3743_v18, %v3743_v18  ;;  %v2702_v25 = vmax.f32 %v1860_v19, %v2461_v20  ;;  %v878_v26 = vpop.f32.mrf.mxu0  ;;  %v1622_v27 = vpop.f32.mrf.mxu1 }
  0xc2   : > { %v1861_v32 = vmax.f32 %v878_v26, %v1622_v27 }
  0xc3   : > { %3940 = vst.msk [vmem:[%s5531_s30 + $0x8] sm:$0xf] %vm3937_vm3, %v3841_v24  ;;  %v3544_v30 = vmax.f32 %v2702_v25, %v3303_v21 }
  0xc4   : > { %4364 = vmatmul.msk.bf16.gmra.mxu0 %vm704_vm2, %v5155_v22  ;;  %4609 = vmatmul.msk.bf16.gmra.mxu1 %vm704_vm2, %v5204_v23 }
  0xc5   : > { %v3646_v31 = vadd.f32 %v5524_v53, %v3544_v30  ;;  %4854 = vmatmul.msk.bf16.gmra.mxu2 %vm704_vm2, %v5253_v28  ;;  %5099 = vmatmul.msk.bf16.gmra.mxu3 %vm704_vm2, %v5302_v29 }
  0xc7   : > { %v3744_v33 = vmax.f32 %v3646_v31, 0.0  ;;  %v5158_v31 = vld [vmem:[%s5429_s15 + $0x68] sm:$0xff] }
  0xc8   : > { %v2464_v34 = vpop.f32.mrf.mxu2  ;;  %v3306_v35 = vpop.f32.mrf.mxu3 }
  0xc9   : > { %v3842_v36 = vpack.c.bf16 %v3744_v33, %v3744_v33  ;;  %v2703_v37 = vmax.f32 %v1861_v32, %v2464_v34  ;;  %v880_v38 = vpop.f32.mrf.mxu0  ;;  %v1624_v39 = vpop.f32.mrf.mxu1  ;;  %v5207_v32 = vld [vmem:[%s5435_s18 + $0x68] sm:$0xff] }
  0xca   : > { %v1862_v43 = vmax.f32 %v880_v38, %v1624_v39  ;;  %v5305_v38 = vld [vmem:[%s5447_s25 + $0x68] sm:$0xff] }
  0xcb   : > { %3941 = vst.msk [vmem:[%s5531_s30 + $0xc] sm:$0xf] %vm3937_vm3, %v3842_v36  ;;  %v3545_v40 = vmax.f32 %v2703_v37, %v3306_v35  ;;  %v5256_v37 = vld [vmem:[%s5441_s22 + $0x68] sm:$0xff] }
  0xcd   : > { %v3647_v41 = vadd.f32 %v5524_v53, %v3545_v40 }
  0xcf   : > { %v3745_v42 = vmax.f32 %v3647_v41, 0.0 }
  0xd0   : > { %v2466_v44 = vpop.f32.mrf.mxu2  ;;  %v3308_v45 = vpop.f32.mrf.mxu3 }
  0xd1   : > { %v3843_v48 = vpack.c.bf16 %v3745_v42, %v3745_v42  ;;  %v2704_v49 = vmax.f32 %v1862_v43, %v2466_v44  ;;  %v883_v50 = vpop.f32.mrf.mxu0  ;;  %v1627_v51 = vpop.f32.mrf.mxu1 }
  0xd2   : > { %v1863_v57 = vmax.f32 %v883_v50, %v1627_v51 }
  0xd3   : > { %3942 = vst.msk [vmem:[%s5531_s30 + $0x10] sm:$0xf] %vm3937_vm3, %v3843_v48  ;;  %v3546_v55 = vmax.f32 %v2704_v49, %v3308_v45 }
  0xd4   : > { %4365 = vmatmul.msk.bf16.gmra.mxu0 %vm704_vm2, %v5156_v46  ;;  %4610 = vmatmul.msk.bf16.gmra.mxu1 %vm704_vm2, %v5205_v47 }
  0xd5   : > { %v3648_v56 = vadd.f32 %v5524_v53, %v3546_v55  ;;  %4855 = vmatmul.msk.bf16.gmra.mxu2 %vm704_vm2, %v5254_v52  ;;  %5100 = vmatmul.msk.bf16.gmra.mxu3 %vm704_vm2, %v5303_v54 }
  0xd7   : > { %v3746_v58 = vmax.f32 %v3648_v56, 0.0  ;;  %v5159_v56 = vld [vmem:[%s5429_s15 + $0x70] sm:$0xff] }
  0xd8   : > { %v2469_v59 = vpop.f32.mrf.mxu2  ;;  %v3311_v60 = vpop.f32.mrf.mxu3 }
  0xd9   : > { %v3844_v61 = vpack.c.bf16 %v3746_v58, %v3746_v58  ;;  %v2705_v62 = vmax.f32 %v1863_v57, %v2469_v59  ;;  %v885_v63 = vpop.f32.mrf.mxu0  ;;  %v1629_v0 = vpop.f32.mrf.mxu1  ;;  %v5208_v57 = vld [vmem:[%s5435_s18 + $0x70] sm:$0xff] }
  0xda   : > { %v1864_v4 = vmax.f32 %v885_v63, %v1629_v0  ;;  %v5306_v63 = vld [vmem:[%s5447_s25 + $0x70] sm:$0xff] }
  0xdb   : > { %3943 = vst.msk [vmem:[%s5531_s30 + $0x14] sm:$0xf] %vm3937_vm3, %v3844_v61  ;;  %v3547_v1 = vmax.f32 %v2705_v62, %v3311_v60  ;;  %v5257_v62 = vld [vmem:[%s5441_s22 + $0x70] sm:$0xff] }
  0xdd   : > { %v3649_v2 = vadd.f32 %v5524_v53, %v3547_v1 }
  0xdf   : > { %v3747_v3 = vmax.f32 %v3649_v2, 0.0 }
  0xe0   : > { %v2471_v5 = vpop.f32.mrf.mxu2  ;;  %v3313_v6 = vpop.f32.mrf.mxu3 }
  0xe1   : > { %v3845_v9 = vpack.c.bf16 %v3747_v3, %v3747_v3  ;;  %v2706_v10 = vmax.f32 %v1864_v4, %v2471_v5  ;;  %v888_v11 = vpop.f32.mrf.mxu0  ;;  %v1632_v12 = vpop.f32.mrf.mxu1 }
  0xe2   : > { %v1865_v17 = vmax.f32 %v888_v11, %v1632_v12 }
  0xe3   : > { %3944 = vst.msk [vmem:[%s5531_s30 + $0x18] sm:$0xf] %vm3937_vm3, %v3845_v9  ;;  %v3548_v15 = vmax.f32 %v2706_v10, %v3313_v6 }
  0xe4   : > { %4366 = vmatmul.msk.bf16.gmra.mxu0 %vm704_vm2, %v5157_v7  ;;  %4611 = vmatmul.msk.bf16.gmra.mxu1 %vm704_vm2, %v5206_v8 }
  0xe5   : > { %v3650_v16 = vadd.f32 %v5524_v53, %v3548_v15  ;;  %4856 = vmatmul.msk.bf16.gmra.mxu2 %vm704_vm2, %v5255_v13  ;;  %5101 = vmatmul.msk.bf16.gmra.mxu3 %vm704_vm2, %v5304_v14 }
  0xe7   : > { %v3748_v18 = vmax.f32 %v3650_v16, 0.0  ;;  %v5160_v16 = vld [vmem:[%s5429_s15 + $0x78] sm:$0xff] }
  0xe8   : > { %v2474_v19 = vpop.f32.mrf.mxu2  ;;  %v3316_v20 = vpop.f32.mrf.mxu3 }
  0xe9   : > { %v3846_v21 = vpack.c.bf16 %v3748_v18, %v3748_v18  ;;  %v2707_v22 = vmax.f32 %v1865_v17, %v2474_v19  ;;  %v890_v23 = vpop.f32.mrf.mxu0  ;;  %v1634_v24 = vpop.f32.mrf.mxu1  ;;  %v5209_v17 = vld [vmem:[%s5435_s18 + $0x78] sm:$0xff] }
  0xea   : > { %v1866_v28 = vmax.f32 %v890_v23, %v1634_v24  ;;  %v5307_v23 = vld [vmem:[%s5447_s25 + $0x78] sm:$0xff] }
  0xeb   : > { %3945 = vst.msk [vmem:[%s5531_s30 + $0x1c] sm:$0xf] %vm3937_vm3, %v3846_v21  ;;  %v3549_v25 = vmax.f32 %v2707_v22, %v3316_v20  ;;  %v5258_v22 = vld [vmem:[%s5441_s22 + $0x78] sm:$0xff] }
  0xed   : > { %v3651_v26 = vadd.f32 %v5524_v53, %v3549_v25 }
  0xef   : > { %v3749_v27 = vmax.f32 %v3651_v26, 0.0 }
  0xf0   : > { %v2476_v29 = vpop.f32.mrf.mxu2  ;;  %v3318_v30 = vpop.f32.mrf.mxu3 }
  0xf1   : > { %v3847_v33 = vpack.c.bf16 %v3749_v27, %v3749_v27  ;;  %v2708_v34 = vmax.f32 %v1866_v28, %v2476_v29  ;;  %v893_v35 = vpop.f32.mrf.mxu0  ;;  %v1637_v36 = vpop.f32.mrf.mxu1 }
  0xf2   : > { %v1867_v41 = vmax.f32 %v893_v35, %v1637_v36 }
  0xf3   : > { %3946 = vst.msk [vmem:[%s5531_s30 + $0x20] sm:$0xf] %vm3937_vm3, %v3847_v33  ;;  %v3550_v39 = vmax.f32 %v2708_v34, %v3318_v30 }
  0xf4   : > { %4367 = vmatmul.msk.bf16.gmra.mxu0 %vm704_vm2, %v5158_v31  ;;  %4612 = vmatmul.msk.bf16.gmra.mxu1 %vm704_vm2, %v5207_v32 }
  0xf5   : > { %v3652_v40 = vadd.f32 %v5524_v53, %v3550_v39  ;;  %4857 = vmatmul.msk.bf16.gmra.mxu2 %vm704_vm2, %v5256_v37  ;;  %5102 = vmatmul.msk.bf16.gmra.mxu3 %vm704_vm2, %v5305_v38 }
  0xf7   : > { %v3750_v42 = vmax.f32 %v3652_v40, 0.0  ;;  %v5161_v40 = vld [vmem:[%s5429_s15 + $0x80] sm:$0xff] }
  0xf8   : > { %v2479_v43 = vpop.f32.mrf.mxu2  ;;  %v3321_v44 = vpop.f32.mrf.mxu3 }
  0xf9   : > { %v3848_v45 = vpack.c.bf16 %v3750_v42, %v3750_v42  ;;  %v2709_v46 = vmax.f32 %v1867_v41, %v2479_v43  ;;  %v895_v47 = vpop.f32.mrf.mxu0  ;;  %v1639_v48 = vpop.f32.mrf.mxu1  ;;  %v5210_v41 = vld [vmem:[%s5435_s18 + $0x80] sm:$0xff] }
  0xfa   : > { %v1868_v52 = vmax.f32 %v895_v47, %v1639_v48  ;;  %v5308_v47 = vld [vmem:[%s5447_s25 + $0x80] sm:$0xff] }
  0xfb   : > { %3947 = vst.msk [vmem:[%s5531_s30 + $0x24] sm:$0xf] %vm3937_vm3, %v3848_v45  ;;  %v3551_v49 = vmax.f32 %v2709_v46, %v3321_v44  ;;  %v5259_v46 = vld [vmem:[%s5441_s22 + $0x80] sm:$0xff] }
  0xfd   : > { %v3653_v50 = vadd.f32 %v5524_v53, %v3551_v49 }
  0xff   : > { %v3751_v51 = vmax.f32 %v3653_v50, 0.0 }
 0x100   : > { %v2481_v54 = vpop.f32.mrf.mxu2  ;;  %v3323_v55 = vpop.f32.mrf.mxu3 }
 0x101   : > { %v3849_v58 = vpack.c.bf16 %v3751_v51, %v3751_v51  ;;  %v2710_v59 = vmax.f32 %v1868_v52, %v2481_v54  ;;  %v898_v60 = vpop.f32.mrf.mxu0  ;;  %v1642_v61 = vpop.f32.mrf.mxu1 }
 0x102   : > { %v1869_v2 = vmax.f32 %v898_v60, %v1642_v61 }
 0x103   : > { %3948 = vst.msk [vmem:[%s5531_s30 + $0x28] sm:$0xf] %vm3937_vm3, %v3849_v58  ;;  %v3552_v0 = vmax.f32 %v2710_v59, %v3323_v55 }
 0x104   : > { %4368 = vmatmul.msk.bf16.gmra.mxu0 %vm704_vm2, %v5159_v56  ;;  %4613 = vmatmul.msk.bf16.gmra.mxu1 %vm704_vm2, %v5208_v57 }
 0x105   : > { %v3654_v1 = vadd.f32 %v5524_v53, %v3552_v0  ;;  %4858 = vmatmul.msk.bf16.gmra.mxu2 %vm704_vm2, %v5257_v62  ;;  %5103 = vmatmul.msk.bf16.gmra.mxu3 %vm704_vm2, %v5306_v63 }
 0x107   : > { %v3752_v3 = vmax.f32 %v3654_v1, 0.0  ;;  %v5162_v1 = vld [vmem:[%s5429_s15 + $0x88] sm:$0xff] }
 0x108   : > { %v2484_v4 = vpop.f32.mrf.mxu2  ;;  %v3326_v5 = vpop.f32.mrf.mxu3 }
 0x109   : > { %v3850_v6 = vpack.c.bf16 %v3752_v3, %v3752_v3  ;;  %v2711_v7 = vmax.f32 %v1869_v2, %v2484_v4  ;;  %v900_v8 = vpop.f32.mrf.mxu0  ;;  %v1644_v9 = vpop.f32.mrf.mxu1  ;;  %v5211_v2 = vld [vmem:[%s5435_s18 + $0x88] sm:$0xff] }
 0x10a   : > { %v1870_v13 = vmax.f32 %v900_v8, %v1644_v9  ;;  %v5309_v8 = vld [vmem:[%s5447_s25 + $0x88] sm:$0xff] }
 0x10b   : > { %3949 = vst.msk [vmem:[%s5531_s30 + $0x2c] sm:$0xf] %vm3937_vm3, %v3850_v6  ;;  %v3553_v10 = vmax.f32 %v2711_v7, %v3326_v5  ;;  %v5260_v7 = vld [vmem:[%s5441_s22 + $0x88] sm:$0xff] }
 0x10d   : > { %v3655_v11 = vadd.f32 %v5524_v53, %v3553_v10 }
 0x10f   : > { %v3753_v12 = vmax.f32 %v3655_v11, 0.0 }
 0x110   : > { %v2486_v14 = vpop.f32.mrf.mxu2  ;;  %v3328_v15 = vpop.f32.mrf.mxu3 }
 0x111   : > { %v3851_v18 = vpack.c.bf16 %v3753_v12, %v3753_v12  ;;  %v2712_v19 = vmax.f32 %v1870_v13, %v2486_v14  ;;  %v903_v20 = vpop.f32.mrf.mxu0  ;;  %v1647_v21 = vpop.f32.mrf.mxu1 }
 0x112   : > { %v1871_v26 = vmax.f32 %v903_v20, %v1647_v21 }
 0x113   : > { %3950 = vst.msk [vmem:[%s5531_s30 + $0x30] sm:$0xf] %vm3937_vm3, %v3851_v18  ;;  %v3554_v24 = vmax.f32 %v2712_v19, %v3328_v15 }
 0x114   : > { %4369 = vmatmul.msk.bf16.gmra.mxu0 %vm704_vm2, %v5160_v16  ;;  %4614 = vmatmul.msk.bf16.gmra.mxu1 %vm704_vm2, %v5209_v17 }
 0x115   : > { %v3656_v25 = vadd.f32 %v5524_v53, %v3554_v24  ;;  %4859 = vmatmul.msk.bf16.gmra.mxu2 %vm704_vm2, %v5258_v22  ;;  %5104 = vmatmul.msk.bf16.gmra.mxu3 %vm704_vm2, %v5307_v23 }
 0x117   : > { %v3754_v27 = vmax.f32 %v3656_v25, 0.0  ;;  %v5163_v25 = vld [vmem:[%s5429_s15 + $0x90] sm:$0xff] }
 0x118   : > { %v2489_v28 = vpop.f32.mrf.mxu2  ;;  %v3331_v29 = vpop.f32.mrf.mxu3 }
 0x119   : > { %v3852_v30 = vpack.c.bf16 %v3754_v27, %v3754_v27  ;;  %v2713_v31 = vmax.f32 %v1871_v26, %v2489_v28  ;;  %v905_v32 = vpop.f32.mrf.mxu0  ;;  %v1649_v33 = vpop.f32.mrf.mxu1  ;;  %v5212_v26 = vld [vmem:[%s5435_s18 + $0x90] sm:$0xff] }
 0x11a   : > { %v1872_v37 = vmax.f32 %v905_v32, %v1649_v33  ;;  %v5310_v32 = vld [vmem:[%s5447_s25 + $0x90] sm:$0xff] }
 0x11b   : > { %3951 = vst.msk [vmem:[%s5531_s30 + $0x34] sm:$0xf] %vm3937_vm3, %v3852_v30  ;;  %v3555_v34 = vmax.f32 %v2713_v31, %v3331_v29  ;;  %v5261_v31 = vld [vmem:[%s5441_s22 + $0x90] sm:$0xff] }
 0x11d   : > { %v3657_v35 = vadd.f32 %v5524_v53, %v3555_v34 }
 0x11f   : > { %v3755_v36 = vmax.f32 %v3657_v35, 0.0 }
 0x120   : > { %v2491_v38 = vpop.f32.mrf.mxu2  ;;  %v3333_v39 = vpop.f32.mrf.mxu3 }
 0x121   : > { %v3853_v42 = vpack.c.bf16 %v3755_v36, %v3755_v36  ;;  %v2714_v43 = vmax.f32 %v1872_v37, %v2491_v38  ;;  %v908_v44 = vpop.f32.mrf.mxu0  ;;  %v1652_v45 = vpop.f32.mrf.mxu1 }
 0x122   : > { %v1873_v50 = vmax.f32 %v908_v44, %v1652_v45 }
 0x123   : > { %3952 = vst.msk [vmem:[%s5531_s30 + $0x38] sm:$0xf] %vm3937_vm3, %v3853_v42  ;;  %v3556_v48 = vmax.f32 %v2714_v43, %v3333_v39 }
 0x124   : > { %4370 = vmatmul.msk.bf16.gmra.mxu0 %vm704_vm2, %v5161_v40  ;;  %4615 = vmatmul.msk.bf16.gmra.mxu1 %vm704_vm2, %v5210_v41 }
 0x125   : > { %v3658_v49 = vadd.f32 %v5524_v53, %v3556_v48  ;;  %4860 = vmatmul.msk.bf16.gmra.mxu2 %vm704_vm2, %v5259_v46  ;;  %5105 = vmatmul.msk.bf16.gmra.mxu3 %vm704_vm2, %v5308_v47 }
 0x127   : > { %v3756_v51 = vmax.f32 %v3658_v49, 0.0  ;;  %v5164_v49 = vld [vmem:[%s5429_s15 + $0x98] sm:$0xff] }
 0x128   : > { %v2494_v52 = vpop.f32.mrf.mxu2  ;;  %v3336_v54 = vpop.f32.mrf.mxu3 }
 0x129   : > { %v3854_v55 = vpack.c.bf16 %v3756_v51, %v3756_v51  ;;  %v2715_v56 = vmax.f32 %v1873_v50, %v2494_v52  ;;  %v910_v57 = vpop.f32.mrf.mxu0  ;;  %v1654_v58 = vpop.f32.mrf.mxu1  ;;  %v5213_v50 = vld [vmem:[%s5435_s18 + $0x98] sm:$0xff] }
 0x12a   : > { %v1874_v62 = vmax.f32 %v910_v57, %v1654_v58  ;;  %v5311_v57 = vld [vmem:[%s5447_s25 + $0x98] sm:$0xff] }
 0x12b   : > { %3953 = vst.msk [vmem:[%s5531_s30 + $0x3c] sm:$0xf] %vm3937_vm3, %v3854_v55  ;;  %v3557_v59 = vmax.f32 %v2715_v56, %v3336_v54  ;;  %v5262_v56 = vld [vmem:[%s5441_s22 + $0x98] sm:$0xff] }
 0x12d   : > { %v3659_v60 = vadd.f32 %v5524_v53, %v3557_v59 }
 0x12f   : > { %v3757_v61 = vmax.f32 %v3659_v60, 0.0 }
 0x130   : > { %v2496_v63 = vpop.f32.mrf.mxu2  ;;  %v3338_v0 = vpop.f32.mrf.mxu3 }
 0x131   : > { %v3855_v3 = vpack.c.bf16 %v3757_v61, %v3757_v61  ;;  %v2716_v4 = vmax.f32 %v1874_v62, %v2496_v63  ;;  %v913_v5 = vpop.f32.mrf.mxu0  ;;  %v1657_v6 = vpop.f32.mrf.mxu1 }
 0x132   : > { %v1875_v11 = vmax.f32 %v913_v5, %v1657_v6 }
 0x133   : > { %3954 = vst.msk [vmem:[%s5531_s30 + $0x40] sm:$0xf] %vm3937_vm3, %v3855_v3  ;;  %v3558_v9 = vmax.f32 %v2716_v4, %v3338_v0 }
 0x134   : > { %4371 = vmatmul.msk.bf16.gmra.mxu0 %vm704_vm2, %v5162_v1  ;;  %4616 = vmatmul.msk.bf16.gmra.mxu1 %vm704_vm2, %v5211_v2 }
 0x135   : > { %v3660_v10 = vadd.f32 %v5524_v53, %v3558_v9  ;;  %4861 = vmatmul.msk.bf16.gmra.mxu2 %vm704_vm2, %v5260_v7  ;;  %5106 = vmatmul.msk.bf16.gmra.mxu3 %vm704_vm2, %v5309_v8 }
 0x137   : > { %v3758_v12 = vmax.f32 %v3660_v10, 0.0  ;;  %v5165_v10 = vld [vmem:[%s5429_s15 + $0xa0] sm:$0xff] }
 0x138   : > { %v2499_v13 = vpop.f32.mrf.mxu2  ;;  %v3341_v14 = vpop.f32.mrf.mxu3 }
 0x139   : > { %v3856_v15 = vpack.c.bf16 %v3758_v12, %v3758_v12  ;;  %v2717_v16 = vmax.f32 %v1875_v11, %v2499_v13  ;;  %v915_v17 = vpop.f32.mrf.mxu0  ;;  %v1659_v18 = vpop.f32.mrf.mxu1  ;;  %v5214_v11 = vld [vmem:[%s5435_s18 + $0xa0] sm:$0xff] }
 0x13a   : > { %v1876_v22 = vmax.f32 %v915_v17, %v1659_v18  ;;  %v5312_v17 = vld [vmem:[%s5447_s25 + $0xa0] sm:$0xff] }
 0x13b   : > { %3955 = vst.msk [vmem:[%s5531_s30 + $0x44] sm:$0xf] %vm3937_vm3, %v3856_v15  ;;  %v3559_v19 = vmax.f32 %v2717_v16, %v3341_v14  ;;  %v5263_v16 = vld [vmem:[%s5441_s22 + $0xa0] sm:$0xff] }
 0x13d   : > { %v3661_v20 = vadd.f32 %v5524_v53, %v3559_v19 }
 0x13f   : > { %v3759_v21 = vmax.f32 %v3661_v20, 0.0 }
 0x140   : > { %v2501_v23 = vpop.f32.mrf.mxu2  ;;  %v3343_v24 = vpop.f32.mrf.mxu3 }
 0x141   : > { %v3857_v27 = vpack.c.bf16 %v3759_v21, %v3759_v21  ;;  %v2718_v28 = vmax.f32 %v1876_v22, %v2501_v23  ;;  %v918_v29 = vpop.f32.mrf.mxu0  ;;  %v1662_v30 = vpop.f32.mrf.mxu1 }
 0x142   : > { %v1877_v35 = vmax.f32 %v918_v29, %v1662_v30 }
 0x143   : > { %3956 = vst.msk [vmem:[%s5531_s30 + $0x48] sm:$0xf] %vm3937_vm3, %v3857_v27  ;;  %v3560_v33 = vmax.f32 %v2718_v28, %v3343_v24 }
 0x144   : > { %4372 = vmatmul.msk.bf16.gmra.mxu0 %vm704_vm2, %v5163_v25  ;;  %4617 = vmatmul.msk.bf16.gmra.mxu1 %vm704_vm2, %v5212_v26 }
 0x145   : > { %v3662_v34 = vadd.f32 %v5524_v53, %v3560_v33  ;;  %4862 = vmatmul.msk.bf16.gmra.mxu2 %vm704_vm2, %v5261_v31  ;;  %5107 = vmatmul.msk.bf16.gmra.mxu3 %vm704_vm2, %v5310_v32 }
 0x147   : > { %v3760_v36 = vmax.f32 %v3662_v34, 0.0  ;;  %v5166_v34 = vld [vmem:[%s5429_s15 + $0xa8] sm:$0xff] }
 0x148   : > { %v2504_v37 = vpop.f32.mrf.mxu2  ;;  %v3346_v38 = vpop.f32.mrf.mxu3 }
 0x149   : > { %v3858_v39 = vpack.c.bf16 %v3760_v36, %v3760_v36  ;;  %v2719_v40 = vmax.f32 %v1877_v35, %v2504_v37  ;;  %v920_v41 = vpop.f32.mrf.mxu0  ;;  %v1664_v42 = vpop.f32.mrf.mxu1  ;;  %v5215_v35 = vld [vmem:[%s5435_s18 + $0xa8] sm:$0xff] }
 0x14a   : > { %v1878_v46 = vmax.f32 %v920_v41, %v1664_v42  ;;  %v5313_v41 = vld [vmem:[%s5447_s25 + $0xa8] sm:$0xff] }
 0x14b   : > { %3957 = vst.msk [vmem:[%s5531_s30 + $0x4c] sm:$0xf] %vm3937_vm3, %v3858_v39  ;;  %v3561_v43 = vmax.f32 %v2719_v40, %v3346_v38  ;;  %v5264_v40 = vld [vmem:[%s5441_s22 + $0xa8] sm:$0xff] }
 0x14d   : > { %v3663_v44 = vadd.f32 %v5524_v53, %v3561_v43 }
 0x14f   : > { %v3761_v45 = vmax.f32 %v3663_v44, 0.0 }
 0x150   : > { %v2506_v47 = vpop.f32.mrf.mxu2  ;;  %v3348_v48 = vpop.f32.mrf.mxu3 }
 0x151   : > { %v3859_v51 = vpack.c.bf16 %v3761_v45, %v3761_v45  ;;  %v2720_v52 = vmax.f32 %v1878_v46, %v2506_v47  ;;  %v923_v54 = vpop.f32.mrf.mxu0  ;;  %v1667_v55 = vpop.f32.mrf.mxu1 }
 0x152   : > { %v1879_v60 = vmax.f32 %v923_v54, %v1667_v55 }
 0x153   : > { %3958 = vst.msk [vmem:[%s5531_s30 + $0x50] sm:$0xf] %vm3937_vm3, %v3859_v51  ;;  %v3562_v58 = vmax.f32 %v2720_v52, %v3348_v48 }
 0x154   : > { %4373 = vmatmul.msk.bf16.gmra.mxu0 %vm704_vm2, %v5164_v49  ;;  %4618 = vmatmul.msk.bf16.gmra.mxu1 %vm704_vm2, %v5213_v50 }
 0x155   : > { %v3664_v59 = vadd.f32 %v5524_v53, %v3562_v58  ;;  %4863 = vmatmul.msk.bf16.gmra.mxu2 %vm704_vm2, %v5262_v56  ;;  %5108 = vmatmul.msk.bf16.gmra.mxu3 %vm704_vm2, %v5311_v57 }
 0x157   : > { %v3762_v61 = vmax.f32 %v3664_v59, 0.0  ;;  %v5167_v59 = vld [vmem:[%s5429_s15 + $0xb0] sm:$0xff] }
 0x158   : > { %v2509_v62 = vpop.f32.mrf.mxu2  ;;  %v3351_v63 = vpop.f32.mrf.mxu3 }
 0x159   : > { %v3860_v0 = vpack.c.bf16 %v3762_v61, %v3762_v61  ;;  %v2721_v1 = vmax.f32 %v1879_v60, %v2509_v62  ;;  %v925_v2 = vpop.f32.mrf.mxu0  ;;  %v1669_v3 = vpop.f32.mrf.mxu1  ;;  %v5216_v60 = vld [vmem:[%s5435_s18 + $0xb0] sm:$0xff] }
 0x15a   : > { %v1880_v7 = vmax.f32 %v925_v2, %v1669_v3  ;;  %v5314_v2 = vld [vmem:[%s5447_s25 + $0xb0] sm:$0xff] }
 0x15b   : > { %3959 = vst.msk [vmem:[%s5531_s30 + $0x54] sm:$0xf] %vm3937_vm3, %v3860_v0  ;;  %v3563_v4 = vmax.f32 %v2721_v1, %v3351_v63  ;;  %v5265_v1 = vld [vmem:[%s5441_s22 + $0xb0] sm:$0xff] }
 0x15d   : > { %v3665_v5 = vadd.f32 %v5524_v53, %v3563_v4 }
 0x15f   : > { %v3763_v6 = vmax.f32 %v3665_v5, 0.0 }
 0x160   : > { %v2511_v8 = vpop.f32.mrf.mxu2  ;;  %v3353_v9 = vpop.f32.mrf.mxu3 }
 0x161   : > { %v3861_v12 = vpack.c.bf16 %v3763_v6, %v3763_v6  ;;  %v2722_v13 = vmax.f32 %v1880_v7, %v2511_v8  ;;  %v928_v14 = vpop.f32.mrf.mxu0  ;;  %v1672_v15 = vpop.f32.mrf.mxu1 }
 0x162   : > { %v1881_v20 = vmax.f32 %v928_v14, %v1672_v15 }
 0x163   : > { %3960 = vst.msk [vmem:[%s5531_s30 + $0x58] sm:$0xf] %vm3937_vm3, %v3861_v12  ;;  %v3564_v18 = vmax.f32 %v2722_v13, %v3353_v9 }
 0x164   : > { %4374 = vmatmul.msk.bf16.gmra.mxu0 %vm704_vm2, %v5165_v10  ;;  %4619 = vmatmul.msk.bf16.gmra.mxu1 %vm704_vm2, %v5214_v11 }
 0x165   : > { %v3666_v19 = vadd.f32 %v5524_v53, %v3564_v18  ;;  %4864 = vmatmul.msk.bf16.gmra.mxu2 %vm704_vm2, %v5263_v16  ;;  %5109 = vmatmul.msk.bf16.gmra.mxu3 %vm704_vm2, %v5312_v17 }
 0x167   : > { %v3764_v21 = vmax.f32 %v3666_v19, 0.0  ;;  %v5168_v19 = vld [vmem:[%s5429_s15 + $0xb8] sm:$0xff] }
 0x168   : > { %v2514_v22 = vpop.f32.mrf.mxu2  ;;  %v3356_v23 = vpop.f32.mrf.mxu3 }
 0x169   : > { %v3862_v24 = vpack.c.bf16 %v3764_v21, %v3764_v21  ;;  %v2723_v25 = vmax.f32 %v1881_v20, %v2514_v22  ;;  %v930_v26 = vpop.f32.mrf.mxu0  ;;  %v1674_v27 = vpop.f32.mrf.mxu1  ;;  %v5217_v20 = vld [vmem:[%s5435_s18 + $0xb8] sm:$0xff] }
 0x16a   : > { %v1882_v31 = vmax.f32 %v930_v26, %v1674_v27  ;;  %v5315_v26 = vld [vmem:[%s5447_s25 + $0xb8] sm:$0xff] }
 0x16b   : > { %3961 = vst.msk [vmem:[%s5531_s30 + $0x5c] sm:$0xf] %vm3937_vm3, %v3862_v24  ;;  %v3565_v28 = vmax.f32 %v2723_v25, %v3356_v23  ;;  %v5266_v25 = vld [vmem:[%s5441_s22 + $0xb8] sm:$0xff] }
 0x16d   : > { %v3667_v29 = vadd.f32 %v5524_v53, %v3565_v28 }
 0x16f   : > { %v3765_v30 = vmax.f32 %v3667_v29, 0.0 }
 0x170   : > { %v2516_v32 = vpop.f32.mrf.mxu2  ;;  %v3358_v33 = vpop.f32.mrf.mxu3 }
 0x171   : > { %v3863_v36 = vpack.c.bf16 %v3765_v30, %v3765_v30  ;;  %v2724_v37 = vmax.f32 %v1882_v31, %v2516_v32  ;;  %v933_v38 = vpop.f32.mrf.mxu0  ;;  %v1677_v39 = vpop.f32.mrf.mxu1 }
 0x172   : > { %v1883_v44 = vmax.f32 %v933_v38, %v1677_v39 }
 0x173   : > { %3962 = vst.msk [vmem:[%s5531_s30 + $0x60] sm:$0xf] %vm3937_vm3, %v3863_v36  ;;  %v3566_v42 = vmax.f32 %v2724_v37, %v3358_v33 }
 0x174   : > { %4375 = vmatmul.msk.bf16.gmra.mxu0 %vm704_vm2, %v5166_v34  ;;  %4620 = vmatmul.msk.bf16.gmra.mxu1 %vm704_vm2, %v5215_v35 }
 0x175   : > { %v3668_v43 = vadd.f32 %v5524_v53, %v3566_v42  ;;  %4865 = vmatmul.msk.bf16.gmra.mxu2 %vm704_vm2, %v5264_v40  ;;  %5110 = vmatmul.msk.bf16.gmra.mxu3 %vm704_vm2, %v5313_v41 }
 0x177   : > { %v3766_v45 = vmax.f32 %v3668_v43, 0.0  ;;  %v5169_v43 = vld [vmem:[%s5429_s15 + $0xc0] sm:$0xff] }
 0x178   : > { %v2519_v46 = vpop.f32.mrf.mxu2  ;;  %v3361_v47 = vpop.f32.mrf.mxu3 }
 0x179   : > { %v3864_v48 = vpack.c.bf16 %v3766_v45, %v3766_v45  ;;  %v2725_v49 = vmax.f32 %v1883_v44, %v2519_v46  ;;  %v935_v50 = vpop.f32.mrf.mxu0  ;;  %v1679_v51 = vpop.f32.mrf.mxu1  ;;  %v5218_v44 = vld [vmem:[%s5435_s18 + $0xc0] sm:$0xff] }
 0x17a   : > { %v1884_v56 = vmax.f32 %v935_v50, %v1679_v51  ;;  %v5316_v50 = vld [vmem:[%s5447_s25 + $0xc0] sm:$0xff] }
 0x17b   : > { %3963 = vst.msk [vmem:[%s5531_s30 + $0x64] sm:$0xf] %vm3937_vm3, %v3864_v48  ;;  %v3567_v52 = vmax.f32 %v2725_v49, %v3361_v47  ;;  %v5267_v49 = vld [vmem:[%s5441_s22 + $0xc0] sm:$0xff] }
 0x17d   : > { %v3669_v54 = vadd.f32 %v5524_v53, %v3567_v52 }
 0x17f   : > { %v3767_v55 = vmax.f32 %v3669_v54, 0.0 }
 0x180   : > { %v2521_v57 = vpop.f32.mrf.mxu2  ;;  %v3363_v58 = vpop.f32.mrf.mxu3 }
 0x181   : > { %v3865_v61 = vpack.c.bf16 %v3767_v55, %v3767_v55  ;;  %v2726_v62 = vmax.f32 %v1884_v56, %v2521_v57  ;;  %v938_v63 = vpop.f32.mrf.mxu0  ;;  %v1682_v0 = vpop.f32.mrf.mxu1 }
 0x182   : > { %v1885_v5 = vmax.f32 %v938_v63, %v1682_v0 }
 0x183   : > { %3964 = vst.msk [vmem:[%s5531_s30 + $0x68] sm:$0xf] %vm3937_vm3, %v3865_v61  ;;  %v3568_v3 = vmax.f32 %v2726_v62, %v3363_v58 }
 0x184   : > { %4376 = vmatmul.msk.bf16.gmra.mxu0 %vm704_vm2, %v5167_v59  ;;  %4621 = vmatmul.msk.bf16.gmra.mxu1 %vm704_vm2, %v5216_v60 }
 0x185   : > { %v3670_v4 = vadd.f32 %v5524_v53, %v3568_v3  ;;  %4866 = vmatmul.msk.bf16.gmra.mxu2 %vm704_vm2, %v5265_v1  ;;  %5111 = vmatmul.msk.bf16.gmra.mxu3 %vm704_vm2, %v5314_v2 }
 0x187   : > { %v3768_v6 = vmax.f32 %v3670_v4, 0.0  ;;  %v5170_v4 = vld [vmem:[%s5429_s15 + $0xc8] sm:$0xff] }
 0x188   : > { %v2524_v7 = vpop.f32.mrf.mxu2  ;;  %v3366_v8 = vpop.f32.mrf.mxu3 }
 0x189   : > { %v3866_v9 = vpack.c.bf16 %v3768_v6, %v3768_v6  ;;  %v2727_v10 = vmax.f32 %v1885_v5, %v2524_v7  ;;  %v940_v11 = vpop.f32.mrf.mxu0  ;;  %v1684_v12 = vpop.f32.mrf.mxu1  ;;  %v5219_v5 = vld [vmem:[%s5435_s18 + $0xc8] sm:$0xff] }
 0x18a   : > { %v1886_v16 = vmax.f32 %v940_v11, %v1684_v12  ;;  %v5317_v11 = vld [vmem:[%s5447_s25 + $0xc8] sm:$0xff] }
 0x18b   : > { %3965 = vst.msk [vmem:[%s5531_s30 + $0x6c] sm:$0xf] %vm3937_vm3, %v3866_v9  ;;  %v3569_v13 = vmax.f32 %v2727_v10, %v3366_v8  ;;  %v5268_v10 = vld [vmem:[%s5441_s22 + $0xc8] sm:$0xff] }
 0x18d   : > { %v3671_v14 = vadd.f32 %v5524_v53, %v3569_v13 }
 0x18f   : > { %v3769_v15 = vmax.f32 %v3671_v14, 0.0 }
 0x190   : > { %v2526_v17 = vpop.f32.mrf.mxu2  ;;  %v3368_v18 = vpop.f32.mrf.mxu3 }
 0x191   : > { %v3867_v21 = vpack.c.bf16 %v3769_v15, %v3769_v15  ;;  %v2728_v22 = vmax.f32 %v1886_v16, %v2526_v17  ;;  %v943_v23 = vpop.f32.mrf.mxu0  ;;  %v1687_v24 = vpop.f32.mrf.mxu1 }
 0x192   : > { %v1887_v29 = vmax.f32 %v943_v23, %v1687_v24 }
 0x193   : > { %3966 = vst.msk [vmem:[%s5531_s30 + $0x70] sm:$0xf] %vm3937_vm3, %v3867_v21  ;;  %v3570_v27 = vmax.f32 %v2728_v22, %v3368_v18  ;;  %v5773_v22 = vld [vmem:[%s6164_s5] ss:$0 sm:$0xff] }
 0x194   : > { %4377 = vmatmul.msk.bf16.gmra.mxu0 %vm704_vm2, %v5168_v19  ;;  %4622 = vmatmul.msk.bf16.gmra.mxu1 %vm704_vm2, %v5217_v20 }
 0x195   : > { %v3672_v28 = vadd.f32 %v5524_v53, %v3570_v27  ;;  %4867 = vmatmul.msk.bf16.gmra.mxu2 %vm704_vm2, %v5266_v25  ;;  %5112 = vmatmul.msk.bf16.gmra.mxu3 %vm704_vm2, %v5315_v26 }
 0x197   : > { %v3770_v30 = vmax.f32 %v3672_v28, 0.0  ;;  %v5171_v28 = vld [vmem:[%s5429_s15 + $0xd0] sm:$0xff] }
 0x198   : > { %v2529_v31 = vpop.f32.mrf.mxu2  ;;  %v3371_v32 = vpop.f32.mrf.mxu3 }
 0x199   : > { %v3868_v33 = vpack.c.bf16 %v3770_v30, %v3770_v30  ;;  %v2729_v34 = vmax.f32 %v1887_v29, %v2529_v31  ;;  %v945_v35 = vpop.f32.mrf.mxu0  ;;  %v1689_v36 = vpop.f32.mrf.mxu1  ;;  %v5220_v29 = vld [vmem:[%s5435_s18 + $0xd0] sm:$0xff] }
 0x19a   : > { %v1888_v40 = vmax.f32 %v945_v35, %v1689_v36  ;;  %v5318_v35 = vld [vmem:[%s5447_s25 + $0xd0] sm:$0xff] }
 0x19b   : > { %3967 = vst.msk [vmem:[%s5531_s30 + $0x74] sm:$0xf] %vm3937_vm3, %v3868_v33  ;;  %v3571_v37 = vmax.f32 %v2729_v34, %v3371_v32  ;;  %v5269_v34 = vld [vmem:[%s5441_s22 + $0xd0] sm:$0xff] }
 0x19d   : > { %v3673_v38 = vadd.f32 %v5524_v53, %v3571_v37 }
 0x19f   : > { %v3771_v39 = vmax.f32 %v3673_v38, 0.0 }
 0x1a0   : > { %v2531_v41 = vpop.f32.mrf.mxu2  ;;  %v3373_v42 = vpop.f32.mrf.mxu3 }
 0x1a1   : > { %v3869_v45 = vpack.c.bf16 %v3771_v39, %v3771_v39  ;;  %v2730_v46 = vmax.f32 %v1888_v40, %v2531_v41  ;;  %v948_v47 = vpop.f32.mrf.mxu0  ;;  %v1692_v48 = vpop.f32.mrf.mxu1 }
 0x1a2   : > { %v1889_v54 = vmax.f32 %v948_v47, %v1692_v48 }
 0x1a3   : > { %3968 = vst.msk [vmem:[%s5531_s30 + $0x78] sm:$0xf] %vm3937_vm3, %v3869_v45  ;;  %v3572_v51 = vmax.f32 %v2730_v46, %v3373_v42 }
 0x1a4   : > { %4378 = vmatmul.msk.bf16.gmra.mxu0 %vm704_vm2, %v5169_v43  ;;  %4623 = vmatmul.msk.bf16.gmra.mxu1 %vm704_vm2, %v5218_v44 }
 0x1a5   : > { %v3674_v52 = vadd.f32 %v5524_v53, %v3572_v51  ;;  %4868 = vmatmul.msk.bf16.gmra.mxu2 %vm704_vm2, %v5267_v49  ;;  %5113 = vmatmul.msk.bf16.gmra.mxu3 %vm704_vm2, %v5316_v50 }
 0x1a7   : > { %v3772_v55 = vmax.f32 %v3674_v52, 0.0  ;;  %v5172_v52 = vld [vmem:[%s5429_s15 + $0xd8] sm:$0xff] }
 0x1a8   : > { %v2534_v56 = vpop.f32.mrf.mxu2  ;;  %v3376_v57 = vpop.f32.mrf.mxu3 }
 0x1a9   : > { %v3870_v58 = vpack.c.bf16 %v3772_v55, %v3772_v55  ;;  %v2731_v59 = vmax.f32 %v1889_v54, %v2534_v56  ;;  %v950_v60 = vpop.f32.mrf.mxu0  ;;  %v1694_v61 = vpop.f32.mrf.mxu1  ;;  %v5221_v54 = vld [vmem:[%s5435_s18 + $0xd8] sm:$0xff] }
 0x1aa   : > { %v1890_v1 = vmax.f32 %v950_v60, %v1694_v61  ;;  %v5319_v60 = vld [vmem:[%s5447_s25 + $0xd8] sm:$0xff] }
 0x1ab   : > { %3969 = vst.msk [vmem:[%s5531_s30 + $0x7c] sm:$0xf] %vm3937_vm3, %v3870_v58  ;;  %v3573_v62 = vmax.f32 %v2731_v59, %v3376_v57  ;;  %v5270_v59 = vld [vmem:[%s5441_s22 + $0xd8] sm:$0xff] }
 0x1ad   : > { %v3675_v63 = vadd.f32 %v5524_v53, %v3573_v62 }
 0x1af   : > { %v3773_v0 = vmax.f32 %v3675_v63, 0.0 }
 0x1b0   : > { %v2536_v2 = vpop.f32.mrf.mxu2  ;;  %v3378_v3 = vpop.f32.mrf.mxu3 }
 0x1b1   : > { %v3871_v6 = vpack.c.bf16 %v3773_v0, %v3773_v0  ;;  %v2732_v7 = vmax.f32 %v1890_v1, %v2536_v2  ;;  %v953_v8 = vpop.f32.mrf.mxu0  ;;  %v1697_v9 = vpop.f32.mrf.mxu1 }
 0x1b2   : > { %v1891_v14 = vmax.f32 %v953_v8, %v1697_v9 }
 0x1b3   : > { %3970 = vst.msk [vmem:[%s5531_s30 + $0x80] sm:$0xf] %vm3937_vm3, %v3871_v6  ;;  %v3574_v12 = vmax.f32 %v2732_v7, %v3378_v3 }
 0x1b4   : > { %4379 = vmatmul.msk.bf16.gmra.mxu0 %vm704_vm2, %v5170_v4  ;;  %4624 = vmatmul.msk.bf16.gmra.mxu1 %vm704_vm2, %v5219_v5 }
 0x1b5   : > { %v3676_v13 = vadd.f32 %v5524_v53, %v3574_v12  ;;  %4869 = vmatmul.msk.bf16.gmra.mxu2 %vm704_vm2, %v5268_v10  ;;  %5114 = vmatmul.msk.bf16.gmra.mxu3 %vm704_vm2, %v5317_v11 }
 0x1b7   : > { %v3774_v15 = vmax.f32 %v3676_v13, 0.0  ;;  %v5173_v13 = vld [vmem:[%s5429_s15 + $0xe0] sm:$0xff] }
 0x1b8   : > { %v2539_v16 = vpop.f32.mrf.mxu2  ;;  %v3381_v17 = vpop.f32.mrf.mxu3 }
 0x1b9   : > { %v3872_v18 = vpack.c.bf16 %v3774_v15, %v3774_v15  ;;  %v2733_v19 = vmax.f32 %v1891_v14, %v2539_v16  ;;  %v955_v20 = vpop.f32.mrf.mxu0  ;;  %v1699_v21 = vpop.f32.mrf.mxu1  ;;  %v5222_v14 = vld [vmem:[%s5435_s18 + $0xe0] sm:$0xff] }
 0x1ba   : > { %v1892_v25 = vmax.f32 %v955_v20, %v1699_v21  ;;  %v5320_v20 = vld [vmem:[%s5447_s25 + $0xe0] sm:$0xff] }
 0x1bb   : > { %3971 = vst.msk [vmem:[%s5531_s30 + $0x84] sm:$0xf] %vm3937_vm3, %v3872_v18  ;;  %v3575_v53 = vmax.f32 %v2733_v19, %v3381_v17  ;;  %v5271_v19 = vld [vmem:[%s5441_s22 + $0xe0] sm:$0xff] }
 0x1bd   : > { %v3677_v23 = vadd.f32 %v5773_v22, %v3575_v53 }
 0x1bf   : > { %v3775_v24 = vmax.f32 %v3677_v23, 0.0 }
 0x1c0   : > { %v2541_v26 = vpop.f32.mrf.mxu2  ;;  %v3383_v27 = vpop.f32.mrf.mxu3 }
 0x1c1   : > { %v3873_v30 = vpack.c.bf16 %v3775_v24, %v3775_v24  ;;  %v2734_v31 = vmax.f32 %v1892_v25, %v2541_v26  ;;  %v958_v32 = vpop.f32.mrf.mxu0  ;;  %v1702_v33 = vpop.f32.mrf.mxu1 }
 0x1c2   : > { %v1893_v38 = vmax.f32 %v958_v32, %v1702_v33 }
 0x1c3   : > { %3972 = vst.msk [vmem:[%s5531_s30 + $0x88] sm:$0xf] %vm3937_vm3, %v3873_v30  ;;  %v3576_v36 = vmax.f32 %v2734_v31, %v3383_v27 }
 0x1c4   : > { %4380 = vmatmul.msk.bf16.gmra.mxu0 %vm704_vm2, %v5171_v28  ;;  %4625 = vmatmul.msk.bf16.gmra.mxu1 %vm704_vm2, %v5220_v29 }
 0x1c5   : > { %v3678_v37 = vadd.f32 %v5773_v22, %v3576_v36  ;;  %4870 = vmatmul.msk.bf16.gmra.mxu2 %vm704_vm2, %v5269_v34  ;;  %5115 = vmatmul.msk.bf16.gmra.mxu3 %vm704_vm2, %v5318_v35 }
 0x1c7   : > { %v3776_v39 = vmax.f32 %v3678_v37, 0.0  ;;  %v5174_v37 = vld [vmem:[%s5429_s15 + $0xe8] sm:$0xff] }
 0x1c8   : > { %v2544_v40 = vpop.f32.mrf.mxu2  ;;  %v3386_v41 = vpop.f32.mrf.mxu3 }
 0x1c9   : > { %v3874_v42 = vpack.c.bf16 %v3776_v39, %v3776_v39  ;;  %v2735_v43 = vmax.f32 %v1893_v38, %v2544_v40  ;;  %v960_v44 = vpop.f32.mrf.mxu0  ;;  %v1704_v45 = vpop.f32.mrf.mxu1  ;;  %v5223_v38 = vld [vmem:[%s5435_s18 + $0xe8] sm:$0xff] }
 0x1ca   : > { %v1894_v49 = vmax.f32 %v960_v44, %v1704_v45  ;;  %v5321_v44 = vld [vmem:[%s5447_s25 + $0xe8] sm:$0xff] }
 0x1cb   : > { %3973 = vst.msk [vmem:[%s5531_s30 + $0x8c] sm:$0xf] %vm3937_vm3, %v3874_v42  ;;  %v3577_v46 = vmax.f32 %v2735_v43, %v3386_v41  ;;  %v5272_v43 = vld [vmem:[%s5441_s22 + $0xe8] sm:$0xff] }
 0x1cd   : > { %v3679_v47 = vadd.f32 %v5773_v22, %v3577_v46 }
 0x1cf   : > { %v3777_v48 = vmax.f32 %v3679_v47, 0.0 }
 0x1d0   : > { %v2546_v50 = vpop.f32.mrf.mxu2  ;;  %v3388_v51 = vpop.f32.mrf.mxu3 }
 0x1d1   : > { %v3875_v55 = vpack.c.bf16 %v3777_v48, %v3777_v48  ;;  %v2736_v56 = vmax.f32 %v1894_v49, %v2546_v50  ;;  %v963_v57 = vpop.f32.mrf.mxu0  ;;  %v1707_v58 = vpop.f32.mrf.mxu1 }
 0x1d2   : > { %v1895_v63 = vmax.f32 %v963_v57, %v1707_v58 }
 0x1d3   : > { %3974 = vst.msk [vmem:[%s5531_s30 + $0x90] sm:$0xf] %vm3937_vm3, %v3875_v55  ;;  %v3578_v61 = vmax.f32 %v2736_v56, %v3388_v51 }
 0x1d4   : > { %4381 = vmatmul.msk.bf16.gmra.mxu0 %vm704_vm2, %v5172_v52  ;;  %4626 = vmatmul.msk.bf16.gmra.mxu1 %vm704_vm2, %v5221_v54 }
 0x1d5   : > { %v3680_v62 = vadd.f32 %v5773_v22, %v3578_v61  ;;  %4871 = vmatmul.msk.bf16.gmra.mxu2 %vm704_vm2, %v5270_v59  ;;  %5116 = vmatmul.msk.bf16.gmra.mxu3 %vm704_vm2, %v5319_v60 }
 0x1d7   : > { %v3778_v0 = vmax.f32 %v3680_v62, 0.0  ;;  %v5175_v62 = vld [vmem:[%s5429_s15 + $0xf0] sm:$0xff] }
 0x1d8   : > { %v2549_v1 = vpop.f32.mrf.mxu2  ;;  %v3391_v2 = vpop.f32.mrf.mxu3 }
 0x1d9   : > { %v3876_v3 = vpack.c.bf16 %v3778_v0, %v3778_v0  ;;  %v2737_v4 = vmax.f32 %v1895_v63, %v2549_v1  ;;  %v965_v5 = vpop.f32.mrf.mxu0  ;;  %v1709_v6 = vpop.f32.mrf.mxu1  ;;  %v5224_v63 = vld [vmem:[%s5435_s18 + $0xf0] sm:$0xff] }
 0x1da   : > { %v1896_v10 = vmax.f32 %v965_v5, %v1709_v6  ;;  %v5322_v5 = vld [vmem:[%s5447_s25 + $0xf0] sm:$0xff] }
 0x1db   : > { %3975 = vst.msk [vmem:[%s5531_s30 + $0x94] sm:$0xf] %vm3937_vm3, %v3876_v3  ;;  %v3579_v7 = vmax.f32 %v2737_v4, %v3391_v2  ;;  %v5273_v4 = vld [vmem:[%s5441_s22 + $0xf0] sm:$0xff] }
 0x1dd   : > { %v3681_v8 = vadd.f32 %v5773_v22, %v3579_v7 }
 0x1df   : > { %v3779_v9 = vmax.f32 %v3681_v8, 0.0 }
 0x1e0   : > { %v2551_v11 = vpop.f32.mrf.mxu2  ;;  %v3393_v12 = vpop.f32.mrf.mxu3 }
 0x1e1   : > { %v3877_v15 = vpack.c.bf16 %v3779_v9, %v3779_v9  ;;  %v2738_v16 = vmax.f32 %v1896_v10, %v2551_v11  ;;  %v968_v17 = vpop.f32.mrf.mxu0  ;;  %v1712_v18 = vpop.f32.mrf.mxu1 }
 0x1e2   : > { %v1897_v23 = vmax.f32 %v968_v17, %v1712_v18 }
 0x1e3   : > { %3976 = vst.msk [vmem:[%s5531_s30 + $0x98] sm:$0xf] %vm3937_vm3, %v3877_v15  ;;  %v3580_v21 = vmax.f32 %v2738_v16, %v3393_v12 }
 0x1e4   : > { %4382 = vmatmul.msk.bf16.gmra.mxu0 %vm704_vm2, %v5173_v13  ;;  %4627 = vmatmul.msk.bf16.gmra.mxu1 %vm704_vm2, %v5222_v14 }
 0x1e5   : > { %v3682_v53 = vadd.f32 %v5773_v22, %v3580_v21  ;;  %4872 = vmatmul.msk.bf16.gmra.mxu2 %vm704_vm2, %v5271_v19  ;;  %5117 = vmatmul.msk.bf16.gmra.mxu3 %vm704_vm2, %v5320_v20 }
 0x1e7   : > { %v3780_v24 = vmax.f32 %v3682_v53, 0.0  ;;  %v5176_v53 = vld [vmem:[%s5429_s15 + $0xf8] sm:$0xff] }
 0x1e8   : > { %v2554_v25 = vpop.f32.mrf.mxu2  ;;  %v3396_v26 = vpop.f32.mrf.mxu3 }
 0x1e9   : > { %v3878_v27 = vpack.c.bf16 %v3780_v24, %v3780_v24  ;;  %v2739_v28 = vmax.f32 %v1897_v23, %v2554_v25  ;;  %v970_v29 = vpop.f32.mrf.mxu0  ;;  %v1714_v30 = vpop.f32.mrf.mxu1  ;;  %v5225_v23 = vld [vmem:[%s5435_s18 + $0xf8] sm:$0xff] }
 0x1ea   : > { %v1898_v34 = vmax.f32 %v970_v29, %v1714_v30  ;;  %v5323_v29 = vld [vmem:[%s5447_s25 + $0xf8] sm:$0xff] }
 0x1eb   : > { %3977 = vst.msk [vmem:[%s5531_s30 + $0x9c] sm:$0xf] %vm3937_vm3, %v3878_v27  ;;  %v3581_v31 = vmax.f32 %v2739_v28, %v3396_v26  ;;  %v5274_v28 = vld [vmem:[%s5441_s22 + $0xf8] sm:$0xff] }
 0x1ed   : > { %v3683_v32 = vadd.f32 %v5773_v22, %v3581_v31 }
 0x1ef   : > { %v3781_v33 = vmax.f32 %v3683_v32, 0.0 }
 0x1f0   : > { %v2556_v35 = vpop.f32.mrf.mxu2  ;;  %v3398_v36 = vpop.f32.mrf.mxu3 }
 0x1f1   : > { %v3879_v39 = vpack.c.bf16 %v3781_v33, %v3781_v33  ;;  %v2740_v40 = vmax.f32 %v1898_v34, %v2556_v35  ;;  %v973_v41 = vpop.f32.mrf.mxu0  ;;  %v1717_v42 = vpop.f32.mrf.mxu1 }
 0x1f2   : > { %v1899_v47 = vmax.f32 %v973_v41, %v1717_v42 }
 0x1f3   : > { %3978 = vst.msk [vmem:[%s5531_s30 + $0xa0] sm:$0xf] %vm3937_vm3, %v3879_v39  ;;  %v3582_v45 = vmax.f32 %v2740_v40, %v3398_v36 }
 0x1f4   : > { %4383 = vmatmul.msk.bf16.gmra.mxu0 %vm704_vm2, %v5174_v37  ;;  %4628 = vmatmul.msk.bf16.gmra.mxu1 %vm704_vm2, %v5223_v38 }
 0x1f5   : > { %v3684_v46 = vadd.f32 %v5773_v22, %v3582_v45  ;;  %4873 = vmatmul.msk.bf16.gmra.mxu2 %vm704_vm2, %v5272_v43  ;;  %5118 = vmatmul.msk.bf16.gmra.mxu3 %vm704_vm2, %v5321_v44 }
 0x1f7   : > { %v3782_v48 = vmax.f32 %v3684_v46, 0.0  ;;  %v5177_v46 = vld [vmem:[%s5429_s15 + $0x100] sm:$0xff] }
 0x1f8   : > { %v2559_v49 = vpop.f32.mrf.mxu2  ;;  %v3401_v50 = vpop.f32.mrf.mxu3 }
 0x1f9   : > { %v3880_v51 = vpack.c.bf16 %v3782_v48, %v3782_v48  ;;  %v2741_v52 = vmax.f32 %v1899_v47, %v2559_v49  ;;  %v975_v54 = vpop.f32.mrf.mxu0  ;;  %v1719_v55 = vpop.f32.mrf.mxu1  ;;  %v5226_v47 = vld [vmem:[%s5435_s18 + $0x100] sm:$0xff] }
 0x1fa   : > { %v1900_v59 = vmax.f32 %v975_v54, %v1719_v55  ;;  %v5324_v54 = vld [vmem:[%s5447_s25 + $0x100] sm:$0xff] }
 0x1fb   : > { %3979 = vst.msk [vmem:[%s5531_s30 + $0xa4] sm:$0xf] %vm3937_vm3, %v3880_v51  ;;  %v3583_v56 = vmax.f32 %v2741_v52, %v3401_v50  ;;  %v5275_v52 = vld [vmem:[%s5441_s22 + $0x100] sm:$0xff] }
 0x1fd   : > { %v3685_v57 = vadd.f32 %v5773_v22, %v3583_v56 }
 0x1ff   : > { %v3783_v58 = vmax.f32 %v3685_v57, 0.0 }
 0x200   : > { %v2561_v60 = vpop.f32.mrf.mxu2  ;;  %v3403_v61 = vpop.f32.mrf.mxu3 }
 0x201   : > { %v3881_v0 = vpack.c.bf16 %v3783_v58, %v3783_v58  ;;  %v2742_v1 = vmax.f32 %v1900_v59, %v2561_v60  ;;  %v978_v2 = vpop.f32.mrf.mxu0  ;;  %v1722_v3 = vpop.f32.mrf.mxu1 }
 0x202   : > { %v1901_v8 = vmax.f32 %v978_v2, %v1722_v3 }
 0x203   : > { %3980 = vst.msk [vmem:[%s5531_s30 + $0xa8] sm:$0xf] %vm3937_vm3, %v3881_v0  ;;  %v3584_v6 = vmax.f32 %v2742_v1, %v3403_v61 }
 0x204   : > { %4384 = vmatmul.msk.bf16.gmra.mxu0 %vm704_vm2, %v5175_v62  ;;  %4629 = vmatmul.msk.bf16.gmra.mxu1 %vm704_vm2, %v5224_v63 }
 0x205   : > { %v3686_v7 = vadd.f32 %v5773_v22, %v3584_v6  ;;  %4874 = vmatmul.msk.bf16.gmra.mxu2 %vm704_vm2, %v5273_v4  ;;  %5119 = vmatmul.msk.bf16.gmra.mxu3 %vm704_vm2, %v5322_v5 }
 0x207   : > { %v3784_v9 = vmax.f32 %v3686_v7, 0.0  ;;  %v5178_v7 = vld [vmem:[%s5429_s15 + $0x108] sm:$0xff] }
 0x208   : > { %v2564_v10 = vpop.f32.mrf.mxu2  ;;  %v3406_v11 = vpop.f32.mrf.mxu3 }
 0x209   : > { %v3882_v12 = vpack.c.bf16 %v3784_v9, %v3784_v9  ;;  %v2743_v13 = vmax.f32 %v1901_v8, %v2564_v10  ;;  %v980_v14 = vpop.f32.mrf.mxu0  ;;  %v1724_v15 = vpop.f32.mrf.mxu1  ;;  %v5227_v8 = vld [vmem:[%s5435_s18 + $0x108] sm:$0xff] }
 0x20a   : > { %v1902_v19 = vmax.f32 %v980_v14, %v1724_v15  ;;  %v5325_v14 = vld [vmem:[%s5447_s25 + $0x108] sm:$0xff] }
 0x20b   : > { %3981 = vst.msk [vmem:[%s5531_s30 + $0xac] sm:$0xf] %vm3937_vm3, %v3882_v12  ;;  %v3585_v16 = vmax.f32 %v2743_v13, %v3406_v11  ;;  %v5276_v13 = vld [vmem:[%s5441_s22 + $0x108] sm:$0xff] }
 0x20d   : > { %v3687_v17 = vadd.f32 %v5773_v22, %v3585_v16 }
 0x20f   : > { %v3785_v18 = vmax.f32 %v3687_v17, 0.0 }
 0x210   : > { %v2566_v20 = vpop.f32.mrf.mxu2  ;;  %v3408_v21 = vpop.f32.mrf.mxu3 }
 0x211   : > { %v3883_v24 = vpack.c.bf16 %v3785_v18, %v3785_v18  ;;  %v2744_v25 = vmax.f32 %v1902_v19, %v2566_v20  ;;  %v983_v26 = vpop.f32.mrf.mxu0  ;;  %v1727_v27 = vpop.f32.mrf.mxu1 }
 0x212   : > { %v1903_v32 = vmax.f32 %v983_v26, %v1727_v27 }
 0x213   : > { %3982 = vst.msk [vmem:[%s5531_s30 + $0xb0] sm:$0xf] %vm3937_vm3, %v3883_v24  ;;  %v3586_v30 = vmax.f32 %v2744_v25, %v3408_v21 }
 0x214   : > { %4385 = vmatmul.msk.bf16.gmra.mxu0 %vm704_vm2, %v5176_v53  ;;  %4630 = vmatmul.msk.bf16.gmra.mxu1 %vm704_vm2, %v5225_v23 }
 0x215   : > { %v3688_v31 = vadd.f32 %v5773_v22, %v3586_v30  ;;  %4875 = vmatmul.msk.bf16.gmra.mxu2 %vm704_vm2, %v5274_v28  ;;  %5120 = vmatmul.msk.bf16.gmra.mxu3 %vm704_vm2, %v5323_v29 }
 0x217   : > { %v3786_v33 = vmax.f32 %v3688_v31, 0.0  ;;  %v5179_v31 = vld [vmem:[%s5429_s15 + $0x110] sm:$0xff] }
 0x218   : > { %v2569_v34 = vpop.f32.mrf.mxu2  ;;  %v3411_v35 = vpop.f32.mrf.mxu3 }
 0x219   : > { %v3884_v36 = vpack.c.bf16 %v3786_v33, %v3786_v33  ;;  %v2745_v37 = vmax.f32 %v1903_v32, %v2569_v34  ;;  %v985_v38 = vpop.f32.mrf.mxu0  ;;  %v1729_v39 = vpop.f32.mrf.mxu1  ;;  %v5228_v32 = vld [vmem:[%s5435_s18 + $0x110] sm:$0xff] }
 0x21a   : > { %v1904_v43 = vmax.f32 %v985_v38, %v1729_v39  ;;  %v5326_v38 = vld [vmem:[%s5447_s25 + $0x110] sm:$0xff] }
 0x21b   : > { %3983 = vst.msk [vmem:[%s5531_s30 + $0xb4] sm:$0xf] %vm3937_vm3, %v3884_v36  ;;  %v3587_v40 = vmax.f32 %v2745_v37, %v3411_v35  ;;  %v5277_v37 = vld [vmem:[%s5441_s22 + $0x110] sm:$0xff] }
 0x21d   : > { %v3689_v41 = vadd.f32 %v5773_v22, %v3587_v40 }
 0x21f   : > { %v3787_v42 = vmax.f32 %v3689_v41, 0.0 }
 0x220   : > { %v2571_v44 = vpop.f32.mrf.mxu2  ;;  %v3413_v45 = vpop.f32.mrf.mxu3 }
 0x221   : > { %v3885_v48 = vpack.c.bf16 %v3787_v42, %v3787_v42  ;;  %v2746_v49 = vmax.f32 %v1904_v43, %v2571_v44  ;;  %v988_v50 = vpop.f32.mrf.mxu0  ;;  %v1732_v51 = vpop.f32.mrf.mxu1 }
 0x222   : > { %v1905_v57 = vmax.f32 %v988_v50, %v1732_v51 }
 0x223   : > { %3984 = vst.msk [vmem:[%s5531_s30 + $0xb8] sm:$0xf] %vm3937_vm3, %v3885_v48  ;;  %v3588_v55 = vmax.f32 %v2746_v49, %v3413_v45 }
 0x224   : > { %4386 = vmatmul.msk.bf16.gmra.mxu0 %vm704_vm2, %v5177_v46  ;;  %4631 = vmatmul.msk.bf16.gmra.mxu1 %vm704_vm2, %v5226_v47 }
 0x225   : > { %v3690_v56 = vadd.f32 %v5773_v22, %v3588_v55  ;;  %4876 = vmatmul.msk.bf16.gmra.mxu2 %vm704_vm2, %v5275_v52  ;;  %5121 = vmatmul.msk.bf16.gmra.mxu3 %vm704_vm2, %v5324_v54 }
 0x227   : > { %v3788_v58 = vmax.f32 %v3690_v56, 0.0  ;;  %v5180_v56 = vld [vmem:[%s5429_s15 + $0x118] sm:$0xff] }
 0x228   : > { %v2574_v59 = vpop.f32.mrf.mxu2  ;;  %v3416_v60 = vpop.f32.mrf.mxu3 }
 0x229   : > { %v3886_v61 = vpack.c.bf16 %v3788_v58, %v3788_v58  ;;  %v2747_v62 = vmax.f32 %v1905_v57, %v2574_v59  ;;  %v990_v63 = vpop.f32.mrf.mxu0  ;;  %v1734_v0 = vpop.f32.mrf.mxu1  ;;  %v5229_v57 = vld [vmem:[%s5435_s18 + $0x118] sm:$0xff] }
 0x22a   : > { %v1906_v4 = vmax.f32 %v990_v63, %v1734_v0  ;;  %v5327_v63 = vld [vmem:[%s5447_s25 + $0x118] sm:$0xff] }
 0x22b   : > { %3985 = vst.msk [vmem:[%s5531_s30 + $0xbc] sm:$0xf] %vm3937_vm3, %v3886_v61  ;;  %v3589_v1 = vmax.f32 %v2747_v62, %v3416_v60  ;;  %v5278_v62 = vld [vmem:[%s5441_s22 + $0x118] sm:$0xff] }
 0x22d   : > { %v3691_v2 = vadd.f32 %v5773_v22, %v3589_v1 }
 0x22f   : > { %v3789_v3 = vmax.f32 %v3691_v2, 0.0 }
 0x230   : > { %v2576_v5 = vpop.f32.mrf.mxu2  ;;  %v3418_v6 = vpop.f32.mrf.mxu3 }
 0x231   : > { %v3887_v9 = vpack.c.bf16 %v3789_v3, %v3789_v3  ;;  %v2748_v10 = vmax.f32 %v1906_v4, %v2576_v5  ;;  %v993_v11 = vpop.f32.mrf.mxu0  ;;  %v1737_v12 = vpop.f32.mrf.mxu1 }
 0x232   : > { %v1907_v17 = vmax.f32 %v993_v11, %v1737_v12 }
 0x233   : > { %3986 = vst.msk [vmem:[%s5531_s30 + $0xc0] sm:$0xf] %vm3937_vm3, %v3887_v9  ;;  %v3590_v15 = vmax.f32 %v2748_v10, %v3418_v6 }
 0x234   : > { %4387 = vmatmul.msk.bf16.gmra.mxu0 %vm704_vm2, %v5178_v7  ;;  %4632 = vmatmul.msk.bf16.gmra.mxu1 %vm704_vm2, %v5227_v8 }
 0x235   : > { %v3692_v16 = vadd.f32 %v5773_v22, %v3590_v15  ;;  %4877 = vmatmul.msk.bf16.gmra.mxu2 %vm704_vm2, %v5276_v13  ;;  %5122 = vmatmul.msk.bf16.gmra.mxu3 %vm704_vm2, %v5325_v14 }
 0x237   : > { %v3790_v18 = vmax.f32 %v3692_v16, 0.0  ;;  %v5181_v16 = vld [vmem:[%s5429_s15 + $0x120] sm:$0xff] }
 0x238   : > { %v2579_v19 = vpop.f32.mrf.mxu2  ;;  %v3421_v20 = vpop.f32.mrf.mxu3 }
 0x239   : > { %v3888_v21 = vpack.c.bf16 %v3790_v18, %v3790_v18  ;;  %v2749_v53 = vmax.f32 %v1907_v17, %v2579_v19  ;;  %v995_v23 = vpop.f32.mrf.mxu0  ;;  %v1739_v24 = vpop.f32.mrf.mxu1  ;;  %v5230_v17 = vld [vmem:[%s5435_s18 + $0x120] sm:$0xff] }
 0x23a   : > { %v1908_v28 = vmax.f32 %v995_v23, %v1739_v24  ;;  %v5328_v23 = vld [vmem:[%s5447_s25 + $0x120] sm:$0xff] }
 0x23b   : > { %3987 = vst.msk [vmem:[%s5531_s30 + $0xc4] sm:$0xf] %vm3937_vm3, %v3888_v21  ;;  %v3591_v25 = vmax.f32 %v2749_v53, %v3421_v20  ;;  %v5279_v53 = vld [vmem:[%s5441_s22 + $0x120] sm:$0xff] }
 0x23d   : > { %v3693_v26 = vadd.f32 %v5773_v22, %v3591_v25 }
 0x23f   : > { %v3791_v27 = vmax.f32 %v3693_v26, 0.0 }
 0x240   : > { %v2581_v29 = vpop.f32.mrf.mxu2  ;;  %v3423_v30 = vpop.f32.mrf.mxu3 }
 0x241   : > { %v3889_v33 = vpack.c.bf16 %v3791_v27, %v3791_v27  ;;  %v2750_v34 = vmax.f32 %v1908_v28, %v2581_v29  ;;  %v998_v35 = vpop.f32.mrf.mxu0  ;;  %v1742_v36 = vpop.f32.mrf.mxu1 }
 0x242   : > { %v1909_v41 = vmax.f32 %v998_v35, %v1742_v36 }
 0x243   : > { %3988 = vst.msk [vmem:[%s5531_s30 + $0xc8] sm:$0xf] %vm3937_vm3, %v3889_v33  ;;  %v3592_v39 = vmax.f32 %v2750_v34, %v3423_v30 }
 0x244   : > { %4388 = vmatmul.msk.bf16.gmra.mxu0 %vm704_vm2, %v5179_v31  ;;  %4633 = vmatmul.msk.bf16.gmra.mxu1 %vm704_vm2, %v5228_v32 }
 0x245   : > { %v3694_v40 = vadd.f32 %v5773_v22, %v3592_v39  ;;  %4878 = vmatmul.msk.bf16.gmra.mxu2 %vm704_vm2, %v5277_v37  ;;  %5123 = vmatmul.msk.bf16.gmra.mxu3 %vm704_vm2, %v5326_v38 }
 0x247   : > { %v3792_v42 = vmax.f32 %v3694_v40, 0.0  ;;  %v5182_v40 = vld [vmem:[%s5429_s15 + $0x128] sm:$0xff] }
 0x248   : > { %v2584_v43 = vpop.f32.mrf.mxu2  ;;  %v3426_v44 = vpop.f32.mrf.mxu3 }
 0x249   : > { %v3890_v45 = vpack.c.bf16 %v3792_v42, %v3792_v42  ;;  %v2751_v46 = vmax.f32 %v1909_v41, %v2584_v43  ;;  %v1000_v47 = vpop.f32.mrf.mxu0  ;;  %v1744_v48 = vpop.f32.mrf.mxu1  ;;  %v5231_v41 = vld [vmem:[%s5435_s18 + $0x128] sm:$0xff] }
 0x24a   : > { %v1910_v52 = vmax.f32 %v1000_v47, %v1744_v48  ;;  %v5329_v47 = vld [vmem:[%s5447_s25 + $0x128] sm:$0xff] }
 0x24b   : > { %3989 = vst.msk [vmem:[%s5531_s30 + $0xcc] sm:$0xf] %vm3937_vm3, %v3890_v45  ;;  %v3593_v49 = vmax.f32 %v2751_v46, %v3426_v44  ;;  %v5280_v46 = vld [vmem:[%s5441_s22 + $0x128] sm:$0xff] }
 0x24d   : > { %v3695_v50 = vadd.f32 %v5773_v22, %v3593_v49 }
 0x24f   : > { %v3793_v51 = vmax.f32 %v3695_v50, 0.0 }
 0x250   : > { %v2586_v54 = vpop.f32.mrf.mxu2  ;;  %v3428_v55 = vpop.f32.mrf.mxu3 }
 0x251   : > { %v3891_v58 = vpack.c.bf16 %v3793_v51, %v3793_v51  ;;  %v2752_v59 = vmax.f32 %v1910_v52, %v2586_v54  ;;  %v1003_v60 = vpop.f32.mrf.mxu0  ;;  %v1747_v61 = vpop.f32.mrf.mxu1 }
 0x252   : > { %v1911_v2 = vmax.f32 %v1003_v60, %v1747_v61 }
 0x253   : > { %3990 = vst.msk [vmem:[%s5531_s30 + $0xd0] sm:$0xf] %vm3937_vm3, %v3891_v58  ;;  %v3594_v0 = vmax.f32 %v2752_v59, %v3428_v55 }
 0x254   : > { %4389 = vmatmul.msk.bf16.gmra.mxu0 %vm704_vm2, %v5180_v56  ;;  %4634 = vmatmul.msk.bf16.gmra.mxu1 %vm704_vm2, %v5229_v57 }
 0x255   : > { %v3696_v1 = vadd.f32 %v5773_v22, %v3594_v0  ;;  %4879 = vmatmul.msk.bf16.gmra.mxu2 %vm704_vm2, %v5278_v62  ;;  %5124 = vmatmul.msk.bf16.gmra.mxu3 %vm704_vm2, %v5327_v63 }
 0x257   : > { %v3794_v3 = vmax.f32 %v3696_v1, 0.0  ;;  %v5183_v1 = vld [vmem:[%s5429_s15 + $0x130] sm:$0xff] }
 0x258   : > { %v2589_v4 = vpop.f32.mrf.mxu2  ;;  %v3431_v5 = vpop.f32.mrf.mxu3 }
 0x259   : > { %v3892_v6 = vpack.c.bf16 %v3794_v3, %v3794_v3  ;;  %v2753_v7 = vmax.f32 %v1911_v2, %v2589_v4  ;;  %v1005_v8 = vpop.f32.mrf.mxu0  ;;  %v1749_v9 = vpop.f32.mrf.mxu1  ;;  %v5232_v2 = vld [vmem:[%s5435_s18 + $0x130] sm:$0xff] }
 0x25a   : > { %v1912_v13 = vmax.f32 %v1005_v8, %v1749_v9  ;;  %v5330_v8 = vld [vmem:[%s5447_s25 + $0x130] sm:$0xff] }
 0x25b   : > { %3991 = vst.msk [vmem:[%s5531_s30 + $0xd4] sm:$0xf] %vm3937_vm3, %v3892_v6  ;;  %v3595_v10 = vmax.f32 %v2753_v7, %v3431_v5  ;;  %v5281_v7 = vld [vmem:[%s5441_s22 + $0x130] sm:$0xff] }
 0x25d   : > { %v3697_v11 = vadd.f32 %v5773_v22, %v3595_v10 }
 0x25f   : > { %v3795_v12 = vmax.f32 %v3697_v11, 0.0 }
 0x260   : > { %v2591_v14 = vpop.f32.mrf.mxu2  ;;  %v3433_v15 = vpop.f32.mrf.mxu3 }
 0x261   : > { %v3893_v18 = vpack.c.bf16 %v3795_v12, %v3795_v12  ;;  %v2754_v19 = vmax.f32 %v1912_v13, %v2591_v14  ;;  %v1008_v20 = vpop.f32.mrf.mxu0  ;;  %v1752_v21 = vpop.f32.mrf.mxu1 }
 0x262   : > { %v1913_v26 = vmax.f32 %v1008_v20, %v1752_v21 }
 0x263   : > { %3992 = vst.msk [vmem:[%s5531_s30 + $0xd8] sm:$0xf] %vm3937_vm3, %v3893_v18  ;;  %v3596_v24 = vmax.f32 %v2754_v19, %v3433_v15 }
 0x264   : > { %4390 = vmatmul.msk.bf16.gmra.mxu0 %vm704_vm2, %v5181_v16  ;;  %4635 = vmatmul.msk.bf16.gmra.mxu1 %vm704_vm2, %v5230_v17 }
 0x265   : > { %v3698_v25 = vadd.f32 %v5773_v22, %v3596_v24  ;;  %4880 = vmatmul.msk.bf16.gmra.mxu2 %vm704_vm2, %v5279_v53  ;;  %5125 = vmatmul.msk.bf16.gmra.mxu3 %vm704_vm2, %v5328_v23 }
 0x267   : > { %v3796_v27 = vmax.f32 %v3698_v25, 0.0  ;;  %v5184_v25 = vld [vmem:[%s5429_s15 + $0x138] sm:$0xff] }
 0x268   : > { %v2594_v28 = vpop.f32.mrf.mxu2  ;;  %v3436_v29 = vpop.f32.mrf.mxu3 }
 0x269   : > { %v3894_v30 = vpack.c.bf16 %v3796_v27, %v3796_v27  ;;  %v2755_v31 = vmax.f32 %v1913_v26, %v2594_v28  ;;  %v1010_v32 = vpop.f32.mrf.mxu0  ;;  %v1754_v33 = vpop.f32.mrf.mxu1  ;;  %v5233_v26 = vld [vmem:[%s5435_s18 + $0x138] sm:$0xff] }
 0x26a   : > { %v1914_v37 = vmax.f32 %v1010_v32, %v1754_v33  ;;  %v5331_v32 = vld [vmem:[%s5447_s25 + $0x138] sm:$0xff] }
 0x26b   : > { %3993 = vst.msk [vmem:[%s5531_s30 + $0xdc] sm:$0xf] %vm3937_vm3, %v3894_v30  ;;  %v3597_v34 = vmax.f32 %v2755_v31, %v3436_v29  ;;  %v5282_v31 = vld [vmem:[%s5441_s22 + $0x138] sm:$0xff] }
 0x26d   : > { %v3699_v35 = vadd.f32 %v5773_v22, %v3597_v34 }
 0x26f   : > { %v3797_v36 = vmax.f32 %v3699_v35, 0.0 }
 0x270   : > { %v2596_v38 = vpop.f32.mrf.mxu2  ;;  %v3438_v39 = vpop.f32.mrf.mxu3 }
 0x271   : > { %v3895_v42 = vpack.c.bf16 %v3797_v36, %v3797_v36  ;;  %v2756_v43 = vmax.f32 %v1914_v37, %v2596_v38  ;;  %v1013_v44 = vpop.f32.mrf.mxu0  ;;  %v1757_v45 = vpop.f32.mrf.mxu1 }
 0x272   : > { %v1915_v50 = vmax.f32 %v1013_v44, %v1757_v45 }
 0x273   : > { %3994 = vst.msk [vmem:[%s5531_s30 + $0xe0] sm:$0xf] %vm3937_vm3, %v3895_v42  ;;  %v3598_v48 = vmax.f32 %v2756_v43, %v3438_v39 }
 0x274   : > { %4391 = vmatmul.msk.bf16.gmra.mxu0 %vm704_vm2, %v5182_v40  ;;  %4636 = vmatmul.msk.bf16.gmra.mxu1 %vm704_vm2, %v5231_v41 }
 0x275   : > { %v3700_v49 = vadd.f32 %v5773_v22, %v3598_v48  ;;  %4881 = vmatmul.msk.bf16.gmra.mxu2 %vm704_vm2, %v5280_v46  ;;  %5126 = vmatmul.msk.bf16.gmra.mxu3 %vm704_vm2, %v5329_v47 }
 0x277   : > { %v3798_v51 = vmax.f32 %v3700_v49, 0.0  ;;  %v5185_v49 = vld [vmem:[%s5429_s15 + $0x140] sm:$0xff] }
 0x278   : > { %v2599_v52 = vpop.f32.mrf.mxu2  ;;  %v3441_v54 = vpop.f32.mrf.mxu3 }
 0x279   : > { %v3896_v55 = vpack.c.bf16 %v3798_v51, %v3798_v51  ;;  %v2757_v56 = vmax.f32 %v1915_v50, %v2599_v52  ;;  %v1015_v57 = vpop.f32.mrf.mxu0  ;;  %v1759_v58 = vpop.f32.mrf.mxu1  ;;  %v5234_v50 = vld [vmem:[%s5435_s18 + $0x140] sm:$0xff] }
 0x27a   : > { %v1916_v62 = vmax.f32 %v1015_v57, %v1759_v58  ;;  %v5332_v57 = vld [vmem:[%s5447_s25 + $0x140] sm:$0xff] }
 0x27b   : > { %3995 = vst.msk [vmem:[%s5531_s30 + $0xe4] sm:$0xf] %vm3937_vm3, %v3896_v55  ;;  %v3599_v59 = vmax.f32 %v2757_v56, %v3441_v54  ;;  %v5283_v56 = vld [vmem:[%s5441_s22 + $0x140] sm:$0xff] }
 0x27d   : > { %v3701_v60 = vadd.f32 %v5773_v22, %v3599_v59 }
 0x27f   : > { %v3799_v61 = vmax.f32 %v3701_v60, 0.0 }
 0x280   : > { %v2601_v63 = vpop.f32.mrf.mxu2  ;;  %v3443_v0 = vpop.f32.mrf.mxu3 }
 0x281   : > { %v3897_v3 = vpack.c.bf16 %v3799_v61, %v3799_v61  ;;  %v2758_v4 = vmax.f32 %v1916_v62, %v2601_v63  ;;  %v1018_v5 = vpop.f32.mrf.mxu0  ;;  %v1762_v6 = vpop.f32.mrf.mxu1 }
 0x282   : > { %v1917_v11 = vmax.f32 %v1018_v5, %v1762_v6 }
 0x283   : > { %3996 = vst.msk [vmem:[%s5531_s30 + $0xe8] sm:$0xf] %vm3937_vm3, %v3897_v3  ;;  %v3600_v9 = vmax.f32 %v2758_v4, %v3443_v0 }
 0x284   : > { %4392 = vmatmul.msk.bf16.gmra.mxu0 %vm704_vm2, %v5183_v1  ;;  %4637 = vmatmul.msk.bf16.gmra.mxu1 %vm704_vm2, %v5232_v2 }
 0x285   : > { %v3702_v10 = vadd.f32 %v5773_v22, %v3600_v9  ;;  %4882 = vmatmul.msk.bf16.gmra.mxu2 %vm704_vm2, %v5281_v7  ;;  %5127 = vmatmul.msk.bf16.gmra.mxu3 %vm704_vm2, %v5330_v8 }
 0x287   : > { %v3800_v12 = vmax.f32 %v3702_v10, 0.0  ;;  %v5186_v10 = vld [vmem:[%s5429_s15 + $0x148] sm:$0xff] }
 0x288   : > { %v2604_v13 = vpop.f32.mrf.mxu2  ;;  %v3446_v14 = vpop.f32.mrf.mxu3 }
 0x289   : > { %v3898_v15 = vpack.c.bf16 %v3800_v12, %v3800_v12  ;;  %v2759_v16 = vmax.f32 %v1917_v11, %v2604_v13  ;;  %v1020_v17 = vpop.f32.mrf.mxu0  ;;  %v1764_v18 = vpop.f32.mrf.mxu1  ;;  %v5235_v11 = vld [vmem:[%s5435_s18 + $0x148] sm:$0xff] }
 0x28a   : > { %v1918_v53 = vmax.f32 %v1020_v17, %v1764_v18  ;;  %v5333_v17 = vld [vmem:[%s5447_s25 + $0x148] sm:$0xff] }
 0x28b   : > { %3997 = vst.msk [vmem:[%s5531_s30 + $0xec] sm:$0xf] %vm3937_vm3, %v3898_v15  ;;  %v3601_v19 = vmax.f32 %v2759_v16, %v3446_v14  ;;  %v5284_v16 = vld [vmem:[%s5441_s22 + $0x148] sm:$0xff] }
 0x28d   : > { %v3703_v20 = vadd.f32 %v5773_v22, %v3601_v19 }
 0x28f   : > { %v3801_v21 = vmax.f32 %v3703_v20, 0.0 }
 0x290   : > { %v2606_v23 = vpop.f32.mrf.mxu2  ;;  %v3448_v24 = vpop.f32.mrf.mxu3 }
 0x291   : > { %v3899_v27 = vpack.c.bf16 %v3801_v21, %v3801_v21  ;;  %v2760_v28 = vmax.f32 %v1918_v53, %v2606_v23  ;;  %v1023_v29 = vpop.f32.mrf.mxu0  ;;  %v1767_v30 = vpop.f32.mrf.mxu1 }
 0x292   : > { %v1919_v35 = vmax.f32 %v1023_v29, %v1767_v30 }
 0x293   : > { %3998 = vst.msk [vmem:[%s5531_s30 + $0xf0] sm:$0xf] %vm3937_vm3, %v3899_v27  ;;  %v3602_v33 = vmax.f32 %v2760_v28, %v3448_v24 }
 0x294   : > { %4393 = vmatmul.msk.bf16.gmra.mxu0 %vm704_vm2, %v5184_v25  ;;  %4638 = vmatmul.msk.bf16.gmra.mxu1 %vm704_vm2, %v5233_v26 }
 0x295   : > { %v3704_v34 = vadd.f32 %v5773_v22, %v3602_v33  ;;  %4883 = vmatmul.msk.bf16.gmra.mxu2 %vm704_vm2, %v5282_v31  ;;  %5128 = vmatmul.msk.bf16.gmra.mxu3 %vm704_vm2, %v5331_v32 }
 0x297   : > { %v3802_v36 = vmax.f32 %v3704_v34, 0.0  ;;  %v5187_v34 = vld [vmem:[%s5429_s15 + $0x150] sm:$0xff] }
 0x298   : > { %v2609_v37 = vpop.f32.mrf.mxu2  ;;  %v3451_v38 = vpop.f32.mrf.mxu3 }
 0x299   : > { %v3900_v39 = vpack.c.bf16 %v3802_v36, %v3802_v36  ;;  %v2761_v40 = vmax.f32 %v1919_v35, %v2609_v37  ;;  %v1025_v41 = vpop.f32.mrf.mxu0  ;;  %v1769_v42 = vpop.f32.mrf.mxu1  ;;  %v5236_v35 = vld [vmem:[%s5435_s18 + $0x150] sm:$0xff] }
 0x29a   : > { %v1920_v46 = vmax.f32 %v1025_v41, %v1769_v42  ;;  %v5334_v41 = vld [vmem:[%s5447_s25 + $0x150] sm:$0xff] }
 0x29b   : > { %3999 = vst.msk [vmem:[%s5531_s30 + $0xf4] sm:$0xf] %vm3937_vm3, %v3900_v39  ;;  %v3603_v43 = vmax.f32 %v2761_v40, %v3451_v38  ;;  %v5285_v40 = vld [vmem:[%s5441_s22 + $0x150] sm:$0xff] }
 0x29d   : > { %v3705_v44 = vadd.f32 %v5773_v22, %v3603_v43 }
 0x29f   : > { %v3803_v45 = vmax.f32 %v3705_v44, 0.0 }
 0x2a0   : > { %v2611_v47 = vpop.f32.mrf.mxu2  ;;  %v3453_v48 = vpop.f32.mrf.mxu3 }
 0x2a1   : > { %v3901_v51 = vpack.c.bf16 %v3803_v45, %v3803_v45  ;;  %v2762_v52 = vmax.f32 %v1920_v46, %v2611_v47  ;;  %v1028_v54 = vpop.f32.mrf.mxu0  ;;  %v1772_v55 = vpop.f32.mrf.mxu1 }
 0x2a2   : > { %v1921_v60 = vmax.f32 %v1028_v54, %v1772_v55 }
 0x2a3   : > { %4000 = vst.msk [vmem:[%s5531_s30 + $0xf8] sm:$0xf] %vm3937_vm3, %v3901_v51  ;;  %v3604_v58 = vmax.f32 %v2762_v52, %v3453_v48 }
 0x2a4   : > { %4394 = vmatmul.msk.bf16.gmra.mxu0 %vm704_vm2, %v5185_v49  ;;  %4639 = vmatmul.msk.bf16.gmra.mxu1 %vm704_vm2, %v5234_v50 }
 0x2a5   : > { %v3706_v59 = vadd.f32 %v5773_v22, %v3604_v58  ;;  %4884 = vmatmul.msk.bf16.gmra.mxu2 %vm704_vm2, %v5283_v56  ;;  %5129 = vmatmul.msk.bf16.gmra.mxu3 %vm704_vm2, %v5332_v57 }
 0x2a7   : > { %v3804_v61 = vmax.f32 %v3706_v59, 0.0  ;;  %v5188_v59 = vld [vmem:[%s5429_s15 + $0x158] sm:$0xff] }
 0x2a8   : > { %v2614_v62 = vpop.f32.mrf.mxu2  ;;  %v3456_v63 = vpop.f32.mrf.mxu3 }
 0x2a9   : > { %v3902_v0 = vpack.c.bf16 %v3804_v61, %v3804_v61  ;;  %v2763_v1 = vmax.f32 %v1921_v60, %v2614_v62  ;;  %v1030_v2 = vpop.f32.mrf.mxu0  ;;  %v1774_v3 = vpop.f32.mrf.mxu1  ;;  %v5237_v60 = vld [vmem:[%s5435_s18 + $0x158] sm:$0xff] }
 0x2aa   : > { %v1922_v7 = vmax.f32 %v1030_v2, %v1774_v3  ;;  %v5335_v2 = vld [vmem:[%s5447_s25 + $0x158] sm:$0xff] }
 0x2ab   : > { %4001 = vst.msk [vmem:[%s5531_s30 + $0xfc] sm:$0xf] %vm3937_vm3, %v3902_v0  ;;  %v3605_v4 = vmax.f32 %v2763_v1, %v3456_v63  ;;  %v5286_v1 = vld [vmem:[%s5441_s22 + $0x158] sm:$0xff] }
 0x2ad   : > { %v3707_v5 = vadd.f32 %v5773_v22, %v3605_v4 }
 0x2af   : > { %v3805_v6 = vmax.f32 %v3707_v5, 0.0 }
 0x2b0   : > { %v2616_v8 = vpop.f32.mrf.mxu2  ;;  %v3458_v9 = vpop.f32.mrf.mxu3 }
 0x2b1   : > { %v3903_v12 = vpack.c.bf16 %v3805_v6, %v3805_v6  ;;  %v2764_v13 = vmax.f32 %v1922_v7, %v2616_v8  ;;  %v1033_v14 = vpop.f32.mrf.mxu0  ;;  %v1777_v15 = vpop.f32.mrf.mxu1 }
 0x2b2   : > { %v1923_v20 = vmax.f32 %v1033_v14, %v1777_v15 }
 0x2b3   : > { %4002 = vst.msk [vmem:[%s5531_s30 + $0x100] sm:$0xf] %vm3937_vm3, %v3903_v12  ;;  %v3606_v18 = vmax.f32 %v2764_v13, %v3458_v9 }
 0x2b4   : > { %4395 = vmatmul.msk.bf16.gmra.mxu0 %vm704_vm2, %v5186_v10  ;;  %4640 = vmatmul.msk.bf16.gmra.mxu1 %vm704_vm2, %v5235_v11 }
 0x2b5   : > { %v3708_v19 = vadd.f32 %v5773_v22, %v3606_v18  ;;  %4885 = vmatmul.msk.bf16.gmra.mxu2 %vm704_vm2, %v5284_v16  ;;  %5130 = vmatmul.msk.bf16.gmra.mxu3 %vm704_vm2, %v5333_v17 }
 0x2b7   : > { %v3806_v21 = vmax.f32 %v3708_v19, 0.0  ;;  %v5189_v19 = vld [vmem:[%s5429_s15 + $0x160] sm:$0xff] }
 0x2b8   : > { %v2619_v53 = vpop.f32.mrf.mxu2  ;;  %v3461_v23 = vpop.f32.mrf.mxu3 }
 0x2b9   : > { %v3904_v24 = vpack.c.bf16 %v3806_v21, %v3806_v21  ;;  %v2765_v25 = vmax.f32 %v1923_v20, %v2619_v53  ;;  %v1035_v26 = vpop.f32.mrf.mxu0  ;;  %v1779_v27 = vpop.f32.mrf.mxu1  ;;  %v5238_v20 = vld [vmem:[%s5435_s18 + $0x160] sm:$0xff] }
 0x2ba   : > { %v1924_v31 = vmax.f32 %v1035_v26, %v1779_v27  ;;  %v5336_v26 = vld [vmem:[%s5447_s25 + $0x160] sm:$0xff] }
 0x2bb   : > { %4003 = vst.msk [vmem:[%s5531_s30 + $0x104] sm:$0xf] %vm3937_vm3, %v3904_v24  ;;  %v3607_v28 = vmax.f32 %v2765_v25, %v3461_v23  ;;  %v5287_v25 = vld [vmem:[%s5441_s22 + $0x160] sm:$0xff] }
 0x2bd   : > { %v3709_v29 = vadd.f32 %v5773_v22, %v3607_v28 }
 0x2bf   : > { %v3807_v30 = vmax.f32 %v3709_v29, 0.0 }
 0x2c0   : > { %v2621_v32 = vpop.f32.mrf.mxu2  ;;  %v3463_v33 = vpop.f32.mrf.mxu3 }
 0x2c1   : > { %v3905_v36 = vpack.c.bf16 %v3807_v30, %v3807_v30  ;;  %v2766_v37 = vmax.f32 %v1924_v31, %v2621_v32  ;;  %v1038_v38 = vpop.f32.mrf.mxu0  ;;  %v1782_v39 = vpop.f32.mrf.mxu1 }
 0x2c2   : > { %v1925_v44 = vmax.f32 %v1038_v38, %v1782_v39 }
 0x2c3   : > { %4004 = vst.msk [vmem:[%s5531_s30 + $0x108] sm:$0xf] %vm3937_vm3, %v3905_v36  ;;  %v3608_v42 = vmax.f32 %v2766_v37, %v3463_v33 }
 0x2c4   : > { %4396 = vmatmul.msk.bf16.gmra.mxu0 %vm704_vm2, %v5187_v34  ;;  %4641 = vmatmul.msk.bf16.gmra.mxu1 %vm704_vm2, %v5236_v35 }
 0x2c5   : > { %v3710_v43 = vadd.f32 %v5773_v22, %v3608_v42  ;;  %4886 = vmatmul.msk.bf16.gmra.mxu2 %vm704_vm2, %v5285_v40  ;;  %5131 = vmatmul.msk.bf16.gmra.mxu3 %vm704_vm2, %v5334_v41 }
 0x2c7   : > { %v3808_v45 = vmax.f32 %v3710_v43, 0.0  ;;  %v5190_v43 = vld [vmem:[%s5429_s15 + $0x168] sm:$0xff] }
 0x2c8   : > { %v2624_v46 = vpop.f32.mrf.mxu2  ;;  %v3466_v47 = vpop.f32.mrf.mxu3 }
 0x2c9   : > { %v3906_v48 = vpack.c.bf16 %v3808_v45, %v3808_v45  ;;  %v2767_v49 = vmax.f32 %v1925_v44, %v2624_v46  ;;  %v1040_v50 = vpop.f32.mrf.mxu0  ;;  %v1784_v51 = vpop.f32.mrf.mxu1  ;;  %v5239_v44 = vld [vmem:[%s5435_s18 + $0x168] sm:$0xff] }
 0x2ca   : > { %v1926_v56 = vmax.f32 %v1040_v50, %v1784_v51  ;;  %v5337_v50 = vld [vmem:[%s5447_s25 + $0x168] sm:$0xff] }
 0x2cb   : > { %4005 = vst.msk [vmem:[%s5531_s30 + $0x10c] sm:$0xf] %vm3937_vm3, %v3906_v48  ;;  %v3609_v52 = vmax.f32 %v2767_v49, %v3466_v47  ;;  %v5288_v49 = vld [vmem:[%s5441_s22 + $0x168] sm:$0xff] }
 0x2cd   : > { %v3711_v54 = vadd.f32 %v5773_v22, %v3609_v52  ;;  %v6025_v22 = vld [vmem:[%s6164_s5] ss:$0 sm:$0xff] }
 0x2cf   : > { %v3809_v55 = vmax.f32 %v3711_v54, 0.0 }
 0x2d0   : > { %v2626_v57 = vpop.f32.mrf.mxu2  ;;  %v3468_v58 = vpop.f32.mrf.mxu3 }
 0x2d1   : > { %v3907_v61 = vpack.c.bf16 %v3809_v55, %v3809_v55  ;;  %v2768_v62 = vmax.f32 %v1926_v56, %v2626_v57  ;;  %v1043_v63 = vpop.f32.mrf.mxu0  ;;  %v1787_v0 = vpop.f32.mrf.mxu1 }
 0x2d2   : > { %v1927_v5 = vmax.f32 %v1043_v63, %v1787_v0 }
 0x2d3   : > { %4006 = vst.msk [vmem:[%s5531_s30 + $0x110] sm:$0xf] %vm3937_vm3, %v3907_v61  ;;  %v3610_v3 = vmax.f32 %v2768_v62, %v3468_v58 }
 0x2d4   : > { %4397 = vmatmul.msk.bf16.gmra.mxu0 %vm704_vm2, %v5188_v59  ;;  %4642 = vmatmul.msk.bf16.gmra.mxu1 %vm704_vm2, %v5237_v60 }
 0x2d5   : > { %v3712_v4 = vadd.f32 %v6025_v22, %v3610_v3  ;;  %4887 = vmatmul.msk.bf16.gmra.mxu2 %vm704_vm2, %v5286_v1  ;;  %5132 = vmatmul.msk.bf16.gmra.mxu3 %vm704_vm2, %v5335_v2 }
 0x2d7   : > { %v3810_v6 = vmax.f32 %v3712_v4, 0.0  ;;  %v5191_v4 = vld [vmem:[%s5429_s15 + $0x170] sm:$0xff] }
 0x2d8   : > { %v2629_v7 = vpop.f32.mrf.mxu2  ;;  %v3471_v8 = vpop.f32.mrf.mxu3 }
 0x2d9   : > { %v3908_v9 = vpack.c.bf16 %v3810_v6, %v3810_v6  ;;  %v2769_v10 = vmax.f32 %v1927_v5, %v2629_v7  ;;  %v1045_v11 = vpop.f32.mrf.mxu0  ;;  %v1789_v12 = vpop.f32.mrf.mxu1  ;;  %v5240_v5 = vld [vmem:[%s5435_s18 + $0x170] sm:$0xff] }
 0x2da   : > { %v1928_v16 = vmax.f32 %v1045_v11, %v1789_v12  ;;  %v5338_v11 = vld [vmem:[%s5447_s25 + $0x170] sm:$0xff] }
 0x2db   : > { %4007 = vst.msk [vmem:[%s5531_s30 + $0x114] sm:$0xf] %vm3937_vm3, %v3908_v9  ;;  %v3611_v13 = vmax.f32 %v2769_v10, %v3471_v8  ;;  %v5289_v10 = vld [vmem:[%s5441_s22 + $0x170] sm:$0xff] }
 0x2dd   : > { %v3713_v14 = vadd.f32 %v6025_v22, %v3611_v13 }
 0x2df   : > { %v3811_v15 = vmax.f32 %v3713_v14, 0.0 }
 0x2e0   : > { %v2631_v17 = vpop.f32.mrf.mxu2  ;;  %v3473_v18 = vpop.f32.mrf.mxu3 }
 0x2e1   : > { %v3909_v21 = vpack.c.bf16 %v3811_v15, %v3811_v15  ;;  %v2770_v53 = vmax.f32 %v1928_v16, %v2631_v17  ;;  %v1048_v23 = vpop.f32.mrf.mxu0  ;;  %v1792_v24 = vpop.f32.mrf.mxu1 }
 0x2e2   : > { %v1929_v29 = vmax.f32 %v1048_v23, %v1792_v24 }
 0x2e3   : > { %4008 = vst.msk [vmem:[%s5531_s30 + $0x118] sm:$0xf] %vm3937_vm3, %v3909_v21  ;;  %v3612_v27 = vmax.f32 %v2770_v53, %v3473_v18 }
 0x2e4   : > { %4398 = vmatmul.msk.bf16.gmra.mxu0 %vm704_vm2, %v5189_v19  ;;  %4643 = vmatmul.msk.bf16.gmra.mxu1 %vm704_vm2, %v5238_v20 }
 0x2e5   : > { %v3714_v28 = vadd.f32 %v6025_v22, %v3612_v27  ;;  %4888 = vmatmul.msk.bf16.gmra.mxu2 %vm704_vm2, %v5287_v25  ;;  %5133 = vmatmul.msk.bf16.gmra.mxu3 %vm704_vm2, %v5336_v26 }
 0x2e7   : > { %v3812_v30 = vmax.f32 %v3714_v28, 0.0  ;;  %v5192_v28 = vld [vmem:[%s5429_s15 + $0x178] sm:$0xff] }
 0x2e8   : > { %v2634_v31 = vpop.f32.mrf.mxu2  ;;  %v3476_v32 = vpop.f32.mrf.mxu3 }
 0x2e9   : > { %v3910_v33 = vpack.c.bf16 %v3812_v30, %v3812_v30  ;;  %v2771_v34 = vmax.f32 %v1929_v29, %v2634_v31  ;;  %v1050_v35 = vpop.f32.mrf.mxu0  ;;  %v1794_v36 = vpop.f32.mrf.mxu1  ;;  %v5241_v29 = vld [vmem:[%s5435_s18 + $0x178] sm:$0xff] }
 0x2ea   : > { %v1930_v40 = vmax.f32 %v1050_v35, %v1794_v36  ;;  %v5339_v35 = vld [vmem:[%s5447_s25 + $0x178] sm:$0xff] }
 0x2eb   : > { %4009 = vst.msk [vmem:[%s5531_s30 + $0x11c] sm:$0xf] %vm3937_vm3, %v3910_v33  ;;  %v3613_v37 = vmax.f32 %v2771_v34, %v3476_v32  ;;  %v5290_v34 = vld [vmem:[%s5441_s22 + $0x178] sm:$0xff] }
 0x2ed   : > { %v3715_v38 = vadd.f32 %v6025_v22, %v3613_v37 }
 0x2ef   : > { %v3813_v39 = vmax.f32 %v3715_v38, 0.0 }
 0x2f0   : > { %v2636_v41 = vpop.f32.mrf.mxu2  ;;  %v3478_v42 = vpop.f32.mrf.mxu3 }
 0x2f1   : > { %v3911_v45 = vpack.c.bf16 %v3813_v39, %v3813_v39  ;;  %v2772_v46 = vmax.f32 %v1930_v40, %v2636_v41  ;;  %v1053_v47 = vpop.f32.mrf.mxu0  ;;  %v1797_v48 = vpop.f32.mrf.mxu1 }
 0x2f2   : > { %v1931_v54 = vmax.f32 %v1053_v47, %v1797_v48 }
 0x2f3   : > { %4010 = vst.msk [vmem:[%s5531_s30 + $0x120] sm:$0xf] %vm3937_vm3, %v3911_v45  ;;  %v3614_v51 = vmax.f32 %v2772_v46, %v3478_v42 }
 0x2f4   : > { %4399 = vmatmul.msk.bf16.gmra.mxu0 %vm704_vm2, %v5190_v43  ;;  %4644 = vmatmul.msk.bf16.gmra.mxu1 %vm704_vm2, %v5239_v44 }
 0x2f5   : > { %v3716_v52 = vadd.f32 %v6025_v22, %v3614_v51  ;;  %4889 = vmatmul.msk.bf16.gmra.mxu2 %vm704_vm2, %v5288_v49  ;;  %5134 = vmatmul.msk.bf16.gmra.mxu3 %vm704_vm2, %v5337_v50 }
 0x2f7   : > { %v3814_v55 = vmax.f32 %v3716_v52, 0.0  ;;  %v5193_v52 = vld [vmem:[%s5429_s15 + $0x180] sm:$0xff] }
 0x2f8   : > { %v2639_v56 = vpop.f32.mrf.mxu2  ;;  %v3481_v57 = vpop.f32.mrf.mxu3 }
 0x2f9   : > { %v3912_v58 = vpack.c.bf16 %v3814_v55, %v3814_v55  ;;  %v2773_v59 = vmax.f32 %v1931_v54, %v2639_v56  ;;  %v1055_v60 = vpop.f32.mrf.mxu0  ;;  %v1799_v61 = vpop.f32.mrf.mxu1  ;;  %v5242_v54 = vld [vmem:[%s5435_s18 + $0x180] sm:$0xff] }
 0x2fa   : > { %v1932_v1 = vmax.f32 %v1055_v60, %v1799_v61  ;;  %v5340_v60 = vld [vmem:[%s5447_s25 + $0x180] sm:$0xff] }
 0x2fb   : > { %4011 = vst.msk [vmem:[%s5531_s30 + $0x124] sm:$0xf] %vm3937_vm3, %v3912_v58  ;;  %v3615_v62 = vmax.f32 %v2773_v59, %v3481_v57  ;;  %v5291_v59 = vld [vmem:[%s5441_s22 + $0x180] sm:$0xff] }
 0x2fd   : > { %v3717_v63 = vadd.f32 %v6025_v22, %v3615_v62 }
 0x2ff   : > { %v3815_v0 = vmax.f32 %v3717_v63, 0.0 }
 0x300   : > { %v2641_v2 = vpop.f32.mrf.mxu2  ;;  %v3483_v3 = vpop.f32.mrf.mxu3 }
 0x301   : > { %v3913_v6 = vpack.c.bf16 %v3815_v0, %v3815_v0  ;;  %v2774_v7 = vmax.f32 %v1932_v1, %v2641_v2  ;;  %v1058_v8 = vpop.f32.mrf.mxu0  ;;  %v1802_v9 = vpop.f32.mrf.mxu1 }
 0x302   : > { %v1933_v14 = vmax.f32 %v1058_v8, %v1802_v9 }
 0x303   : > { %4012 = vst.msk [vmem:[%s5531_s30 + $0x128] sm:$0xf] %vm3937_vm3, %v3913_v6  ;;  %v3616_v12 = vmax.f32 %v2774_v7, %v3483_v3 }
 0x304   : > { %4400 = vmatmul.msk.bf16.gmra.mxu0 %vm704_vm2, %v5191_v4  ;;  %4645 = vmatmul.msk.bf16.gmra.mxu1 %vm704_vm2, %v5240_v5 }
 0x305   : > { %v3718_v13 = vadd.f32 %v6025_v22, %v3616_v12  ;;  %4890 = vmatmul.msk.bf16.gmra.mxu2 %vm704_vm2, %v5289_v10  ;;  %5135 = vmatmul.msk.bf16.gmra.mxu3 %vm704_vm2, %v5338_v11 }
 0x307   : > { %v3816_v15 = vmax.f32 %v3718_v13, 0.0 }
 0x308   : > { %v2644_v16 = vpop.f32.mrf.mxu2  ;;  %v3486_v17 = vpop.f32.mrf.mxu3 }
 0x309   : > { %v3914_v18 = vpack.c.bf16 %v3816_v15, %v3816_v15  ;;  %v2775_v19 = vmax.f32 %v1933_v14, %v2644_v16  ;;  %v1060_v20 = vpop.f32.mrf.mxu0  ;;  %v1804_v21 = vpop.f32.mrf.mxu1 }
 0x30a   : > { %v1934_v25 = vmax.f32 %v1060_v20, %v1804_v21 }
 0x30b   : > { %4013 = vst.msk [vmem:[%s5531_s30 + $0x12c] sm:$0xf] %vm3937_vm3, %v3914_v18  ;;  %v3617_v53 = vmax.f32 %v2775_v19, %v3486_v17 }
 0x30d   : > { %v3719_v23 = vadd.f32 %v6025_v22, %v3617_v53 }
 0x30f   : > { %v3817_v24 = vmax.f32 %v3719_v23, 0.0 }
 0x310   : > { %v2646_v26 = vpop.f32.mrf.mxu2  ;;  %v3488_v27 = vpop.f32.mrf.mxu3 }
 0x311   : > { %v3915_v30 = vpack.c.bf16 %v3817_v24, %v3817_v24  ;;  %v2776_v31 = vmax.f32 %v1934_v25, %v2646_v26  ;;  %v1063_v32 = vpop.f32.mrf.mxu0  ;;  %v1807_v33 = vpop.f32.mrf.mxu1 }
 0x312   : > { %v1935_v38 = vmax.f32 %v1063_v32, %v1807_v33 }
 0x313   : > { %4014 = vst.msk [vmem:[%s5531_s30 + $0x130] sm:$0xf] %vm3937_vm3, %v3915_v30  ;;  %v3618_v36 = vmax.f32 %v2776_v31, %v3488_v27 }
 0x314   : > { %4401 = vmatmul.msk.bf16.gmra.mxu0 %vm704_vm2, %v5192_v28  ;;  %4646 = vmatmul.msk.bf16.gmra.mxu1 %vm704_vm2, %v5241_v29 }
 0x315   : > { %v3720_v37 = vadd.f32 %v6025_v22, %v3618_v36  ;;  %4891 = vmatmul.msk.bf16.gmra.mxu2 %vm704_vm2, %v5290_v34  ;;  %5136 = vmatmul.msk.bf16.gmra.mxu3 %vm704_vm2, %v5339_v35 }
 0x317   : > { %v3818_v39 = vmax.f32 %v3720_v37, 0.0 }
 0x318   : > { %v2649_v40 = vpop.f32.mrf.mxu2  ;;  %v3491_v41 = vpop.f32.mrf.mxu3 }
 0x319   : > { %v3916_v42 = vpack.c.bf16 %v3818_v39, %v3818_v39  ;;  %v2777_v43 = vmax.f32 %v1935_v38, %v2649_v40  ;;  %v1065_v44 = vpop.f32.mrf.mxu0  ;;  %v1809_v45 = vpop.f32.mrf.mxu1 }
 0x31a   : > { %v1936_v49 = vmax.f32 %v1065_v44, %v1809_v45 }
 0x31b   : > { %4015 = vst.msk [vmem:[%s5531_s30 + $0x134] sm:$0xf] %vm3937_vm3, %v3916_v42  ;;  %v3619_v46 = vmax.f32 %v2777_v43, %v3491_v41 }
 0x31d   : > { %v3721_v47 = vadd.f32 %v6025_v22, %v3619_v46 }
 0x31f   : > { %v3819_v48 = vmax.f32 %v3721_v47, 0.0 }
 0x320   : > { %v2651_v50 = vpop.f32.mrf.mxu2  ;;  %v3493_v51 = vpop.f32.mrf.mxu3 }
 0x321   : > { %v3917_v55 = vpack.c.bf16 %v3819_v48, %v3819_v48  ;;  %v2778_v56 = vmax.f32 %v1936_v49, %v2651_v50  ;;  %v1068_v57 = vpop.f32.mrf.mxu0  ;;  %v1812_v58 = vpop.f32.mrf.mxu1 }
 0x322   : > { %v1937_v63 = vmax.f32 %v1068_v57, %v1812_v58 }
 0x323   : > { %4016 = vst.msk [vmem:[%s5531_s30 + $0x138] sm:$0xf] %vm3937_vm3, %v3917_v55  ;;  %v3620_v61 = vmax.f32 %v2778_v56, %v3493_v51 }
 0x324   : > { %4402 = vmatmul.msk.bf16.gmra.mxu0 %vm704_vm2, %v5193_v52  ;;  %4647 = vmatmul.msk.bf16.gmra.mxu1 %vm704_vm2, %v5242_v54 }
 0x325   : > { %v3722_v62 = vadd.f32 %v6025_v22, %v3620_v61  ;;  %4892 = vmatmul.msk.bf16.gmra.mxu2 %vm704_vm2, %v5291_v59  ;;  %5137 = vmatmul.msk.bf16.gmra.mxu3 %vm704_vm2, %v5340_v60 }
 0x327   : > { %v3820_v0 = vmax.f32 %v3722_v62, 0.0 }
 0x328   : > { %v2654_v1 = vpop.f32.mrf.mxu2  ;;  %v3496_v2 = vpop.f32.mrf.mxu3 }
 0x329   : > { %v3918_v3 = vpack.c.bf16 %v3820_v0, %v3820_v0  ;;  %v2779_v4 = vmax.f32 %v1937_v63, %v2654_v1  ;;  %v1070_v5 = vpop.f32.mrf.mxu0  ;;  %v1814_v6 = vpop.f32.mrf.mxu1 }
 0x32a   : > { %v1938_v10 = vmax.f32 %v1070_v5, %v1814_v6 }
 0x32b   : > { %4017 = vst.msk [vmem:[%s5531_s30 + $0x13c] sm:$0xf] %vm3937_vm3, %v3918_v3  ;;  %v3621_v7 = vmax.f32 %v2779_v4, %v3496_v2 }
 0x32d   : > { %v3723_v8 = vadd.f32 %v6025_v22, %v3621_v7 }
 0x32f   : > { %v3821_v9 = vmax.f32 %v3723_v8, 0.0 }
 0x330   : > { %v2656_v11 = vpop.f32.mrf.mxu2  ;;  %v3498_v12 = vpop.f32.mrf.mxu3 }
 0x331   : > { %v3919_v13 = vpack.c.bf16 %v3821_v9, %v3821_v9  ;;  %v2780_v14 = vmax.f32 %v1938_v10, %v2656_v11  ;;  %v1073_v15 = vpop.f32.mrf.mxu0  ;;  %v1817_v16 = vpop.f32.mrf.mxu1 }
 0x332   : > { %v1939_v19 = vmax.f32 %v1073_v15, %v1817_v16 }
 0x333   : > { %4018 = vst.msk [vmem:[%s5531_s30 + $0x140] sm:$0xf] %vm3937_vm3, %v3919_v13  ;;  %v3622_v17 = vmax.f32 %v2780_v14, %v3498_v12 }
 0x335   : > { %v3724_v18 = vadd.f32 %v6025_v22, %v3622_v17 }
 0x337   : > { %v3822_v20 = vmax.f32 %v3724_v18, 0.0 }
 0x338   : > { %v2659_v21 = vpop.f32.mrf.mxu2  ;;  %v3501_v53 = vpop.f32.mrf.mxu3 }
 0x339   : > { %v3920_v23 = vpack.c.bf16 %v3822_v20, %v3822_v20  ;;  %v2781_v24 = vmax.f32 %v1939_v19, %v2659_v21  ;;  %v1075_v25 = vpop.f32.mrf.mxu0  ;;  %v1819_v26 = vpop.f32.mrf.mxu1 }
 0x33a   : > { %v1940_v30 = vmax.f32 %v1075_v25, %v1819_v26 }
 0x33b   : > { %4019 = vst.msk [vmem:[%s5531_s30 + $0x144] sm:$0xf] %vm3937_vm3, %v3920_v23  ;;  %v3623_v27 = vmax.f32 %v2781_v24, %v3501_v53 }
 0x33d   : > { %v3725_v28 = vadd.f32 %v6025_v22, %v3623_v27 }
 0x33f   : > { %v3823_v29 = vmax.f32 %v3725_v28, 0.0 }
 0x340   : > { %v2661_v31 = vpop.f32.mrf.mxu2  ;;  %v3503_v32 = vpop.f32.mrf.mxu3 }
 0x341   : > { %v3921_v33 = vpack.c.bf16 %v3823_v29, %v3823_v29  ;;  %v2782_v34 = vmax.f32 %v1940_v30, %v2661_v31  ;;  %v1078_v35 = vpop.f32.mrf.mxu0  ;;  %v1822_v36 = vpop.f32.mrf.mxu1 }
 0x342   : > { %v1941_v39 = vmax.f32 %v1078_v35, %v1822_v36 }
 0x343   : > { %4020 = vst.msk [vmem:[%s5531_s30 + $0x148] sm:$0xf] %vm3937_vm3, %v3921_v33  ;;  %v3624_v37 = vmax.f32 %v2782_v34, %v3503_v32 }
 0x345   : > { %v3726_v38 = vadd.f32 %v6025_v22, %v3624_v37 }
 0x347   : > { %v3824_v40 = vmax.f32 %v3726_v38, 0.0 }
 0x348   : > { %v2664_v41 = vpop.f32.mrf.mxu2  ;;  %v3506_v42 = vpop.f32.mrf.mxu3 }
 0x349   : > { %v3922_v43 = vpack.c.bf16 %v3824_v40, %v3824_v40  ;;  %v2783_v44 = vmax.f32 %v1941_v39, %v2664_v41  ;;  %v1080_v45 = vpop.f32.mrf.mxu0  ;;  %v1824_v46 = vpop.f32.mrf.mxu1 }
 0x34a   : > { %v1942_v50 = vmax.f32 %v1080_v45, %v1824_v46 }
 0x34b   : > { %4021 = vst.msk [vmem:[%s5531_s30 + $0x14c] sm:$0xf] %vm3937_vm3, %v3922_v43  ;;  %v3625_v47 = vmax.f32 %v2783_v44, %v3506_v42 }
 0x34d   : > { %v3727_v48 = vadd.f32 %v6025_v22, %v3625_v47 }
 0x34f   : > { %v3825_v49 = vmax.f32 %v3727_v48, 0.0 }
 0x350   : > { %v2666_v51 = vpop.f32.mrf.mxu2  ;;  %v3508_v52 = vpop.f32.mrf.mxu3 }
 0x351   : > { %v3923_v54 = vpack.c.bf16 %v3825_v49, %v3825_v49  ;;  %v2784_v55 = vmax.f32 %v1942_v50, %v2666_v51  ;;  %v1083_v56 = vpop.f32.mrf.mxu0  ;;  %v1827_v57 = vpop.f32.mrf.mxu1 }
 0x352   : > { %v1943_v60 = vmax.f32 %v1083_v56, %v1827_v57 }
 0x353   : > { %4022 = vst.msk [vmem:[%s5531_s30 + $0x150] sm:$0xf] %vm3937_vm3, %v3923_v54  ;;  %v3626_v58 = vmax.f32 %v2784_v55, %v3508_v52 }
 0x355   : > { %v3728_v59 = vadd.f32 %v6025_v22, %v3626_v58 }
 0x357   : > { %v3826_v61 = vmax.f32 %v3728_v59, 0.0 }
 0x358   : > { %v2669_v62 = vpop.f32.mrf.mxu2  ;;  %v3511_v63 = vpop.f32.mrf.mxu3 }
 0x359   : > { %v3924_v0 = vpack.c.bf16 %v3826_v61, %v3826_v61  ;;  %v2785_v1 = vmax.f32 %v1943_v60, %v2669_v62  ;;  %v1085_v2 = vpop.f32.mrf.mxu0  ;;  %v1829_v3 = vpop.f32.mrf.mxu1 }
 0x35a   : > { %v1944_v7 = vmax.f32 %v1085_v2, %v1829_v3 }
 0x35b   : > { %4023 = vst.msk [vmem:[%s5531_s30 + $0x154] sm:$0xf] %vm3937_vm3, %v3924_v0  ;;  %v3627_v4 = vmax.f32 %v2785_v1, %v3511_v63 }
 0x35d   : > { %v3729_v5 = vadd.f32 %v6025_v22, %v3627_v4 }
 0x35f   : > { %v3827_v6 = vmax.f32 %v3729_v5, 0.0 }
 0x360   : > { %v2671_v8 = vpop.f32.mrf.mxu2  ;;  %v3513_v9 = vpop.f32.mrf.mxu3 }
 0x361   : > { %v3925_v10 = vpack.c.bf16 %v3827_v6, %v3827_v6  ;;  %v2786_v11 = vmax.f32 %v1944_v7, %v2671_v8  ;;  %v1088_v12 = vpop.f32.mrf.mxu0  ;;  %v1832_v13 = vpop.f32.mrf.mxu1 }
 0x362   : > { %v1945_v16 = vmax.f32 %v1088_v12, %v1832_v13 }
 0x363   : > { %4024 = vst.msk [vmem:[%s5531_s30 + $0x158] sm:$0xf] %vm3937_vm3, %v3925_v10  ;;  %v3628_v14 = vmax.f32 %v2786_v11, %v3513_v9 }
 0x365   : > { %v3730_v15 = vadd.f32 %v6025_v22, %v3628_v14 }
 0x367   : > { %v3828_v17 = vmax.f32 %v3730_v15, 0.0 }
 0x368   : > { %v2674_v18 = vpop.f32.mrf.mxu2  ;;  %v3516_v19 = vpop.f32.mrf.mxu3 }
 0x369   : > { %v3926_v20 = vpack.c.bf16 %v3828_v17, %v3828_v17  ;;  %v2787_v21 = vmax.f32 %v1945_v16, %v2674_v18  ;;  %v1090_v53 = vpop.f32.mrf.mxu0  ;;  %v1834_v23 = vpop.f32.mrf.mxu1 }
 0x36a   : > { %v1946_v27 = vmax.f32 %v1090_v53, %v1834_v23 }
 0x36b   : > { %4025 = vst.msk [vmem:[%s5531_s30 + $0x15c] sm:$0xf] %vm3937_vm3, %v3926_v20  ;;  %v3629_v24 = vmax.f32 %v2787_v21, %v3516_v19 }
 0x36d   : > { %v3731_v25 = vadd.f32 %v6025_v22, %v3629_v24 }
 0x36f   : > { %v3829_v26 = vmax.f32 %v3731_v25, 0.0 }
 0x370   : > { %v2676_v28 = vpop.f32.mrf.mxu2  ;;  %v3518_v29 = vpop.f32.mrf.mxu3 }
 0x371   : > { %v3927_v30 = vpack.c.bf16 %v3829_v26, %v3829_v26  ;;  %v2788_v31 = vmax.f32 %v1946_v27, %v2676_v28  ;;  %v1093_v32 = vpop.f32.mrf.mxu0  ;;  %v1837_v33 = vpop.f32.mrf.mxu1 }
 0x372   : > { %v1947_v36 = vmax.f32 %v1093_v32, %v1837_v33 }
 0x373   : > { %4026 = vst.msk [vmem:[%s5531_s30 + $0x160] sm:$0xf] %vm3937_vm3, %v3927_v30  ;;  %v3630_v34 = vmax.f32 %v2788_v31, %v3518_v29 }
 0x375   : > { %v3732_v35 = vadd.f32 %v6025_v22, %v3630_v34 }
 0x377   : > { %v3830_v37 = vmax.f32 %v3732_v35, 0.0 }
 0x378   : > { %v2679_v38 = vpop.f32.mrf.mxu2  ;;  %v3521_v39 = vpop.f32.mrf.mxu3 }
 0x379   : > { %v3928_v40 = vpack.c.bf16 %v3830_v37, %v3830_v37  ;;  %v2789_v41 = vmax.f32 %v1947_v36, %v2679_v38  ;;  %v1095_v42 = vpop.f32.mrf.mxu0  ;;  %v1839_v43 = vpop.f32.mrf.mxu1 }
 0x37a   : > { %v1948_v47 = vmax.f32 %v1095_v42, %v1839_v43 }
 0x37b   : > { %4027 = vst.msk [vmem:[%s5531_s30 + $0x164] sm:$0xf] %vm3937_vm3, %v3928_v40  ;;  %v3631_v44 = vmax.f32 %v2789_v41, %v3521_v39 }
 0x37d   : > { %v3733_v45 = vadd.f32 %v6025_v22, %v3631_v44 }
 0x37f   : > { %v3831_v46 = vmax.f32 %v3733_v45, 0.0 }
 0x380   : > { %v2681_v48 = vpop.f32.mrf.mxu2  ;;  %v3523_v49 = vpop.f32.mrf.mxu3 }
 0x381   : > { %v3929_v50 = vpack.c.bf16 %v3831_v46, %v3831_v46  ;;  %v2790_v51 = vmax.f32 %v1948_v47, %v2681_v48  ;;  %v1098_v52 = vpop.f32.mrf.mxu0  ;;  %v1842_v54 = vpop.f32.mrf.mxu1 }
 0x382   : > { %v1949_v57 = vmax.f32 %v1098_v52, %v1842_v54 }
 0x383   : > { %4028 = vst.msk [vmem:[%s5531_s30 + $0x168] sm:$0xf] %vm3937_vm3, %v3929_v50  ;;  %v3632_v55 = vmax.f32 %v2790_v51, %v3523_v49 }
 0x385   : > { %v3734_v56 = vadd.f32 %v6025_v22, %v3632_v55 }
 0x387   : > { %v3832_v58 = vmax.f32 %v3734_v56, 0.0 }
 0x388   : > { %v2684_v59 = vpop.f32.mrf.mxu2  ;;  %v3526_v60 = vpop.f32.mrf.mxu3 }
 0x389   : > { %v3930_v61 = vpack.c.bf16 %v3832_v58, %v3832_v58  ;;  %v2791_v62 = vmax.f32 %v1949_v57, %v2684_v59  ;;  %v1100_v63 = vpop.f32.mrf.mxu0  ;;  %v1844_v0 = vpop.f32.mrf.mxu1 }
 0x38a   : > { %v1950_v4 = vmax.f32 %v1100_v63, %v1844_v0 }
 0x38b   : > { %4029 = vst.msk [vmem:[%s5531_s30 + $0x16c] sm:$0xf] %vm3937_vm3, %v3930_v61  ;;  %v3633_v1 = vmax.f32 %v2791_v62, %v3526_v60 }
 0x38d   : > { %v3735_v2 = vadd.f32 %v6025_v22, %v3633_v1 }
 0x38f   : > { %v3833_v3 = vmax.f32 %v3735_v2, 0.0 }
 0x390   : > { %v2686_v5 = vpop.f32.mrf.mxu2  ;;  %v3528_v6 = vpop.f32.mrf.mxu3 }
 0x391   : > { %v3931_v7 = vpack.c.bf16 %v3833_v3, %v3833_v3  ;;  %v2792_v8 = vmax.f32 %v1950_v4, %v2686_v5  ;;  %v1103_v9 = vpop.f32.mrf.mxu0  ;;  %v1847_v10 = vpop.f32.mrf.mxu1 }
 0x392   : > { %v1951_v13 = vmax.f32 %v1103_v9, %v1847_v10 }
 0x393   : > { %4030 = vst.msk [vmem:[%s5531_s30 + $0x170] sm:$0xf] %vm3937_vm3, %v3931_v7  ;;  %v3634_v11 = vmax.f32 %v2792_v8, %v3528_v6 }
 0x395   : > { %v3736_v12 = vadd.f32 %v6025_v22, %v3634_v11 }
 0x397   : > { %v3834_v14 = vmax.f32 %v3736_v12, 0.0 }
 0x398   : > { %v2689_v15 = vpop.f32.mrf.mxu2  ;;  %v3531_v16 = vpop.f32.mrf.mxu3 }
 0x399   : > { %v3932_v17 = vpack.c.bf16 %v3834_v14, %v3834_v14  ;;  %v2793_v18 = vmax.f32 %v1951_v13, %v2689_v15  ;;  %v1105_v19 = vpop.f32.mrf.mxu0  ;;  %v1849_v20 = vpop.f32.mrf.mxu1 }
 0x39a   : > { %v1952_v24 = vmax.f32 %v1105_v19, %v1849_v20 }
 0x39b   : > { %4031 = vst.msk [vmem:[%s5531_s30 + $0x174] sm:$0xf] %vm3937_vm3, %v3932_v17  ;;  %v3635_v21 = vmax.f32 %v2793_v18, %v3531_v16 }
 0x39d   : > { %v3737_v53 = vadd.f32 %v6025_v22, %v3635_v21 }
 0x39f   : > { %v3835_v23 = vmax.f32 %v3737_v53, 0.0 }
 0x3a0   : > { %v2691_v25 = vpop.f32.mrf.mxu2  ;;  %v3533_v26 = vpop.f32.mrf.mxu3 }
 0x3a1   : > { %v3933_v27 = vpack.c.bf16 %v3835_v23, %v3835_v23  ;;  %v2794_v28 = vmax.f32 %v1952_v24, %v2691_v25  ;;  %v1108_v29 = vpop.f32.mrf.mxu0  ;;  %v1852_v30 = vpop.f32.mrf.mxu1 }
 0x3a2   : > { %v1953_v33 = vmax.f32 %v1108_v29, %v1852_v30 }
 0x3a3   : > { %4032 = vst.msk [vmem:[%s5531_s30 + $0x178] sm:$0xf] %vm3937_vm3, %v3933_v27  ;;  %v3636_v31 = vmax.f32 %v2794_v28, %v3533_v26 }
 0x3a5   : > { %v3738_v32 = vadd.f32 %v6025_v22, %v3636_v31 }
 0x3a7   : > { %v3836_v34 = vmax.f32 %v3738_v32, 0.0 }
 0x3a8   : > { %v2694_v35 = vpop.f32.mrf.mxu2  ;;  %v3536_v36 = vpop.f32.mrf.mxu3 }
 0x3a9   : > { %v3934_v37 = vpack.c.bf16 %v3836_v34, %v3836_v34  ;;  %v2795_v38 = vmax.f32 %v1953_v33, %v2694_v35  ;;  %v1110_v40 = vpop.f32.mrf.mxu0  ;;  %v1854_v41 = vpop.f32.mrf.mxu1 }
 0x3aa   : > { %v1954_v44 = vmax.f32 %v1110_v40, %v1854_v41 }
 0x3ab   : > { %4033 = vst.msk [vmem:[%s5531_s30 + $0x17c] sm:$0xf] %vm3937_vm3, %v3934_v37  ;;  %v3637_v39 = vmax.f32 %v2795_v38, %v3536_v36 }
 0x3ad   : > { %v3739_v42 = vadd.f32 %v6025_v22, %v3637_v39 }
 0x3af   : > { %v3837_v43 = vmax.f32 %v3739_v42, 0.0 }
 0x3b0   : > { %v2696_v45 = vpop.f32.mrf.mxu2  ;;  %v3538_v48 = vpop.f32.mrf.mxu3 }
 0x3b1   : > { %v3935_v46 = vpack.c.bf16 %v3837_v43, %v3837_v43  ;;  %v2796_v47 = vmax.f32 %v1954_v44, %v2696_v45 }
 0x3b3   : > { %4034 = vst.msk [vmem:[%s5531_s30 + $0x180] sm:$0xf] %vm3937_vm3, %v3935_v46  ;;  %v3638_v49 = vmax.f32 %v2796_v47, %v3538_v48 }
 0x3b5   : > { %v3740_v50 = vadd.f32 %v6025_v22, %v3638_v49 }
 0x3b7   : > { %v3838_v51 = vmax.f32 %v3740_v50, 0.0 }
 0x3b9   : > { %v3936_v52 = vpack.c.bf16 %v3838_v51, %v3838_v51 }
 0x3bb   : > { %4035 = vst.msk [vmem:[%s5531_s30 + $0x184] sm:$0xf] %vm3937_vm3, %v3936_v52 }
 0x3bc PF: > { %s16_s21 = sadd.s32 1, %s5359_s21  }
 0x3bd   : > { %p13_p4 = scmp.ge.s32.totalorder %s16_s21, 4  }
 0x3bf   :  { %15 = sbr.rel (!%p13_p4) target bundleno = 1 (0x1), region = 83 }

// kernel: net_forward.3
= control target key start
LH: loop header
LB: loop body
LE: loop exit
PB: predicated region body
PF: predicated region fallthrough
CT: control target
= control target key end

     0   :  { %vm1841_vm0 = vcmask 1043456   ;;  %vm1837_vm1 = vcmask 195584   ;;  %s24385_s0 = inlined_call_operand.vmem [shape: bf16[8,1176], index: 0, kind: input, shape index: {}]   ;;  %s24386_s1 = inlined_call_operand.vmem [shape: bf16[4,1176,400], index: 1, kind: input, shape index: {}]   ;;  %s24387_s2 = inlined_call_operand.vmem [shape: f32[1,400], index: 2, kind: input, shape index: {}]   ;;  %s24388_s3 = inlined_call_operand.vmem [shape: bf16[400,120], index: 3, kind: input, shape index: {}]   ;;  %s24389_s4 = inlined_call_operand.vmem [shape: f32[1,120], index: 4, kind: input, shape index: {}]   ;;  %s24390_s5 = inlined_call_operand.vmem [shape: bf16[120,84], index: 5, kind: input, shape index: {}]   ;;  %s24391_s6 = inlined_call_operand.vmem [shape: f32[1,84], index: 6, kind: input, shape index: {}]   ;;  %s24392_s7 = inlined_call_operand.vmem [shape: bf16[84,10], index: 7, kind: input, shape index: {}]   ;;  %s24393_s8 = inlined_call_operand.vmem [shape: f32[1,10], index: 8, kind: input, shape index: {}]   ;;  %s24394_s9 = inlined_call_operand.hbm [shape: f32[8,10], index: 9, kind: output, shape index: {}]  }
   0x1   :  { %v9848_v0 = vld [vmem:[%s24386_s1 + $0xe0] sm:$0xf]  ;;  %v15485_v1 = vld [vmem:[%s24386_s1 + $0xec] sm:$0xf0] }
   0x2   :  { %v9976_v2 = vld [vmem:[%s24386_s1 + $0x1e0] sm:$0xf]  ;;  %v9849_v3 = vor.u32 %v15485_v1, %v9848_v0  ;;  %v15517_v4 = vld [vmem:[%s24386_s1 + $0x1ec] sm:$0xf0] }
   0x3   :  { %v10104_v5 = vld [vmem:[%s24386_s1 + $0x2e0] sm:$0xf]  ;;  %v15549_v6 = vld [vmem:[%s24386_s1 + $0x2ec] sm:$0xf0]  ;;  %v9977_v7 = vor.u32 %v15517_v4, %v9976_v2 }
   0x4   :  { %v10105_v8 = vor.u32 %v15549_v6, %v10104_v5  ;;  %v10232_v9 = vld [vmem:[%s24386_s1 + $0x3e0] sm:$0xf]  ;;  %v15581_v10 = vld [vmem:[%s24386_s1 + $0x3ec] sm:$0xf0]  ;;  %1854 = vmatpush.bf16.msra.mxu0 %v9849_v3 }
   0x5   :  { %v9832_v11 = vld [vmem:[%s24386_s1 + $0xc0] sm:$0xf]  ;;  %v10233_v12 = vor.u32 %v15581_v10, %v10232_v9  ;;  %v15481_v13 = vld [vmem:[%s24386_s1 + $0xcc] sm:$0xf0]  ;;  %1867 = vmatpush.bf16.msra.mxu1 %v9977_v7 }
   0x6   :  { %v9960_v14 = vld [vmem:[%s24386_s1 + $0x1c0] sm:$0xf]  ;;  %v15513_v15 = vld [vmem:[%s24386_s1 + $0x1cc] sm:$0xf0]  ;;  %1880 = vmatpush.bf16.msra.mxu2 %v10105_v8  ;;  %v9833_v16 = vor.u32 %v15481_v13, %v9832_v11 }
   0x7   :  { %v9961_v17 = vor.u32 %v15513_v15, %v9960_v14  ;;  %v10088_v18 = vld [vmem:[%s24386_s1 + $0x2c0] sm:$0xf]  ;;  %v15545_v19 = vld [vmem:[%s24386_s1 + $0x2cc] sm:$0xf0]  ;;  %1893 = vmatpush.bf16.msra.mxu3 %v10233_v12 }
   0x8   :  { %v10216_v20 = vld [vmem:[%s24386_s1 + $0x3c0] sm:$0xf]  ;;  %v10089_v21 = vor.u32 %v15545_v19, %v10088_v18  ;;  %v15577_v22 = vld [vmem:[%s24386_s1 + $0x3cc] sm:$0xf0]  ;;  %1855 = vmatpush.bf16.msra.mxu0 %v9833_v16 }
   0x9   :  { %v9816_v23 = vld [vmem:[%s24386_s1 + $0xa0] sm:$0xf]  ;;  %v15477_v24 = vld [vmem:[%s24386_s1 + $0xac] sm:$0xf0]  ;;  %v10217_v25 = vor.u32 %v15577_v22, %v10216_v20  ;;  %1868 = vmatpush.bf16.msra.mxu1 %v9961_v17 }
   0xa   :  { %v9944_v26 = vld [vmem:[%s24386_s1 + $0x1a0] sm:$0xf]  ;;  %v15509_v27 = vld [vmem:[%s24386_s1 + $0x1ac] sm:$0xf0]  ;;  %v9817_v29 = vor.u32 %v15477_v24, %v9816_v23  ;;  %1881 = vmatpush.bf16.msra.mxu2 %v10089_v21 }
   0xb   :  { %v10072_v28 = vld [vmem:[%s24386_s1 + $0x2a0] sm:$0xf]  ;;  %v15541_v30 = vld [vmem:[%s24386_s1 + $0x2ac] sm:$0xf0]  ;;  %v9945_v33 = vor.u32 %v15509_v27, %v9944_v26  ;;  %1894 = vmatpush.bf16.msra.mxu3 %v10217_v25 }
   0xc   :  { %v10200_v31 = vld [vmem:[%s24386_s1 + $0x3a0] sm:$0xf]  ;;  %v15573_v32 = vld [vmem:[%s24386_s1 + $0x3ac] sm:$0xf0]  ;;  %v10073_v34 = vor.u32 %v15541_v30, %v10072_v28  ;;  %1856 = vmatpush.bf16.msra.mxu0 %v9817_v29 }
   0xd   :  { %v9800_v35 = vld [vmem:[%s24386_s1 + $0x80] sm:$0xf]  ;;  %v15473_v36 = vld [vmem:[%s24386_s1 + $0x8c] sm:$0xf0]  ;;  %v10201_v38 = vor.u32 %v15573_v32, %v10200_v31  ;;  %1869 = vmatpush.bf16.msra.mxu1 %v9945_v33 }
   0xe   :  { %v9928_v37 = vld [vmem:[%s24386_s1 + $0x180] sm:$0xf]  ;;  %v15505_v39 = vld [vmem:[%s24386_s1 + $0x18c] sm:$0xf0]  ;;  %v9801_v44 = vor.u32 %v15473_v36, %v9800_v35  ;;  %1882 = vmatpush.bf16.msra.mxu2 %v10073_v34 }
   0xf   :  { %v10056_v40 = vld [vmem:[%s24386_s1 + $0x280] sm:$0xf]  ;;  %v15537_v41 = vld [vmem:[%s24386_s1 + $0x28c] sm:$0xf0]  ;;  %v9929_v45 = vor.u32 %v15505_v39, %v9928_v37  ;;  %1895 = vmatpush.bf16.msra.mxu3 %v10201_v38 }
  0x10   :  { %v10184_v42 = vld [vmem:[%s24386_s1 + $0x380] sm:$0xf]  ;;  %v15569_v43 = vld [vmem:[%s24386_s1 + $0x38c] sm:$0xf0]  ;;  %v10057_v46 = vor.u32 %v15537_v41, %v10056_v40  ;;  %1857 = vmatpush.bf16.msra.mxu0 %v9801_v44 }
  0x11   :  { %v9784_v47 = vld [vmem:[%s24386_s1 + $0x60] sm:$0xf]  ;;  %v15469_v48 = vld [vmem:[%s24386_s1 + $0x6c] sm:$0xf0]  ;;  %v10185_v50 = vor.u32 %v15569_v43, %v10184_v42  ;;  %1870 = vmatpush.bf16.msra.mxu1 %v9929_v45 }
  0x12   :  { %v9912_v49 = vld [vmem:[%s24386_s1 + $0x160] sm:$0xf]  ;;  %v15501_v51 = vld [vmem:[%s24386_s1 + $0x16c] sm:$0xf0]  ;;  %v9785_v56 = vor.u32 %v15469_v48, %v9784_v47  ;;  %1883 = vmatpush.bf16.msra.mxu2 %v10057_v46 }
  0x13   :  { %v10040_v52 = vld [vmem:[%s24386_s1 + $0x260] sm:$0xf]  ;;  %v15533_v53 = vld [vmem:[%s24386_s1 + $0x26c] sm:$0xf0]  ;;  %v9913_v57 = vor.u32 %v15501_v51, %v9912_v49  ;;  %1896 = vmatpush.bf16.msra.mxu3 %v10185_v50 }
  0x14   :  { %v10168_v54 = vld [vmem:[%s24386_s1 + $0x360] sm:$0xf]  ;;  %v15565_v55 = vld [vmem:[%s24386_s1 + $0x36c] sm:$0xf0]  ;;  %v10041_v58 = vor.u32 %v15533_v53, %v10040_v52  ;;  %1858 = vmatpush.bf16.msra.mxu0 %v9785_v56 }
  0x15   :  { %v9768_v59 = vld [vmem:[%s24386_s1 + $0x40] sm:$0xf]  ;;  %v15465_v60 = vld [vmem:[%s24386_s1 + $0x4c] sm:$0xf0]  ;;  %v10169_v62 = vor.u32 %v15565_v55, %v10168_v54  ;;  %1871 = vmatpush.bf16.msra.mxu1 %v9913_v57 }
  0x16   :  { %v9896_v61 = vld [vmem:[%s24386_s1 + $0x140] sm:$0xf]  ;;  %v15497_v63 = vld [vmem:[%s24386_s1 + $0x14c] sm:$0xf0]  ;;  %v9769_v4 = vor.u32 %v15465_v60, %v9768_v59  ;;  %1884 = vmatpush.bf16.msra.mxu2 %v10041_v58  ;;  %v35_v59 = vld [vmem:[%s24385_s0 + $0x8] sm:$0xff] }
  0x17   :  { %v10024_v0 = vld [vmem:[%s24386_s1 + $0x240] sm:$0xf]  ;;  %v15529_v1 = vld [vmem:[%s24386_s1 + $0x24c] sm:$0xf0]  ;;  %v9897_v5 = vor.u32 %v15497_v63, %v9896_v61  ;;  %1897 = vmatpush.bf16.msra.mxu3 %v10169_v62  ;;  %v340_v63 = vunpack.c.l.b16 %v35_v59 }
  0x18   :  { %v10152_v2 = vld [vmem:[%s24386_s1 + $0x340] sm:$0xf]  ;;  %v15561_v3 = vld [vmem:[%s24386_s1 + $0x34c] sm:$0xf0]  ;;  %v10025_v6 = vor.u32 %v15529_v1, %v10024_v0  ;;  %1859 = vmatpush.bf16.msra.mxu0 %v9769_v4  ;;  %v341_v1 = vunpack.c.h.b16 %v35_v59 }
  0x19   :  { %v9752_v7 = vld [vmem:[%s24386_s1 + $0x20] sm:$0xf]  ;;  %v15461_v8 = vld [vmem:[%s24386_s1 + $0x2c] sm:$0xf0]  ;;  %v10153_v10 = vor.u32 %v15561_v3, %v10152_v2  ;;  %1872 = vmatpush.bf16.msra.mxu1 %v9897_v5 }
  0x1a   :  { %v9880_v9 = vld [vmem:[%s24386_s1 + $0x120] sm:$0xf]  ;;  %v15493_v11 = vld [vmem:[%s24386_s1 + $0x12c] sm:$0xf0]  ;;  %v9753_v16 = vor.u32 %v15461_v8, %v9752_v7  ;;  %1885 = vmatpush.bf16.msra.mxu2 %v10025_v6  ;;  %v17011_v8 = vpack.c.b16 %v340_v63, %v340_v63 }
  0x1b   :  { %v10008_v12 = vld [vmem:[%s24386_s1 + $0x220] sm:$0xf]  ;;  %v15525_v13 = vld [vmem:[%s24386_s1 + $0x22c] sm:$0xf0]  ;;  %v9881_v19 = vor.u32 %v15493_v11, %v9880_v9  ;;  %1898 = vmatpush.bf16.msra.mxu3 %v10153_v10  ;;  %v17013_v9 = vpack.c.b16 %v341_v1, %v341_v1 }
  0x1c   :  { %v10136_v14 = vld [vmem:[%s24386_s1 + $0x320] sm:$0xf]  ;;  %v15557_v15 = vld [vmem:[%s24386_s1 + $0x32c] sm:$0xf0]  ;;  %v10009_v20 = vor.u32 %v15525_v13, %v10008_v12  ;;  %1860 = vmatpush.bf16.msra.mxu0 %v9753_v16 }
  0x1d   :  { %v9736_v17 = vld [vmem:[%s24386_s1] sm:$0xf]  ;;  %v15457_v18 = vld [vmem:[%s24386_s1 + $0xc] sm:$0xf0]  ;;  %v10137_v24 = vor.u32 %v15557_v15, %v10136_v14  ;;  %1873 = vmatpush.bf16.msra.mxu1 %v9881_v19 }
  0x1e   :  { %v9864_v21 = vld [vmem:[%s24386_s1 + $0x100] sm:$0xf]  ;;  %v15489_v22 = vld [vmem:[%s24386_s1 + $0x10c] sm:$0xf0]  ;;  %v9737_v31 = vor.u32 %v15457_v18, %v9736_v17  ;;  %1886 = vmatpush.bf16.msra.mxu2 %v10009_v20 }
  0x1f   :  { %v9992_v23 = vld [vmem:[%s24386_s1 + $0x200] sm:$0xf]  ;;  %v15521_v25 = vld [vmem:[%s24386_s1 + $0x20c] sm:$0xf0]  ;;  %v9865_v35 = vor.u32 %v15489_v22, %v9864_v21  ;;  %1899 = vmatpush.bf16.msra.mxu3 %v10137_v24 }
  0x20   :  { %v10120_v26 = vld [vmem:[%s24386_s1 + $0x300] sm:$0xf]  ;;  %v15553_v27 = vld [vmem:[%s24386_s1 + $0x30c] sm:$0xf0]  ;;  %v9993_v36 = vor.u32 %v15521_v25, %v9992_v23  ;;  %1861 = vmatpush.bf16.msra.mxu0 %v9737_v31 }
  0x21   :  { %v10360_v28 = vld [vmem:[%s24386_s1 + $0x4e0] sm:$0xf]  ;;  %v15613_v29 = vld [vmem:[%s24386_s1 + $0x4ec] sm:$0xf0]  ;;  %v10121_v39 = vor.u32 %v15553_v27, %v10120_v26  ;;  %1874 = vmatpush.bf16.msra.mxu1 %v9865_v35 }
  0x22   :  { %v10488_v30 = vld [vmem:[%s24386_s1 + $0x5e0] sm:$0xf]  ;;  %v15645_v32 = vld [vmem:[%s24386_s1 + $0x5ec] sm:$0xf0]  ;;  %v10361_v40 = vor.u32 %v15613_v29, %v10360_v28  ;;  %1887 = vmatpush.bf16.msra.mxu2 %v9993_v36 }
  0x23   :  { %v10616_v33 = vld [vmem:[%s24386_s1 + $0x6e0] sm:$0xf]  ;;  %v15677_v34 = vld [vmem:[%s24386_s1 + $0x6ec] sm:$0xf0]  ;;  %v10489_v41 = vor.u32 %v15645_v32, %v10488_v30  ;;  %1900 = vmatpush.bf16.msra.mxu3 %v10121_v39 }
  0x24   :  { %v10744_v37 = vld [vmem:[%s24386_s1 + $0x7e0] sm:$0xf]  ;;  %v15709_v38 = vld [vmem:[%s24386_s1 + $0x7ec] sm:$0xf0]  ;;  %v10617_v42 = vor.u32 %v15677_v34, %v10616_v33  ;;  %1906 = vmatpush.bf16.msrb.mxu0 %v10361_v40 }
  0x25   :  { %v10344_v43 = vld [vmem:[%s24386_s1 + $0x4c0] sm:$0xf]  ;;  %v15609_v44 = vld [vmem:[%s24386_s1 + $0x4cc] sm:$0xf0]  ;;  %v10745_v46 = vor.u32 %v15709_v38, %v10744_v37  ;;  %1919 = vmatpush.bf16.msrb.mxu1 %v10489_v41  ;;  %1888 = vmatmul.bf16.vlgmr.msra.gmra.mxu2 %v17011_v8 }
  0x26   :  { %v10472_v45 = vld [vmem:[%s24386_s1 + $0x5c0] sm:$0xf]  ;;  %v15641_v47 = vld [vmem:[%s24386_s1 + $0x5cc] sm:$0xf0]  ;;  %v10345_v52 = vor.u32 %v15609_v44, %v10344_v43  ;;  %1932 = vmatpush.bf16.msrb.mxu2 %v10617_v42  ;;  %1901 = vmatmul.bf16.vlgmr.msra.gmra.mxu3 %v17013_v9 }
  0x27   :  { %v10600_v48 = vld [vmem:[%s24386_s1 + $0x6c0] sm:$0xf]  ;;  %v15673_v49 = vld [vmem:[%s24386_s1 + $0x6cc] sm:$0xf0]  ;;  %v10473_v55 = vor.u32 %v15641_v47, %v10472_v45  ;;  %1945 = vmatpush.bf16.msrb.mxu3 %v10745_v46 }
  0x28   :  { %v10728_v50 = vld [vmem:[%s24386_s1 + $0x7c0] sm:$0xf]  ;;  %v15705_v51 = vld [vmem:[%s24386_s1 + $0x7cc] sm:$0xf0]  ;;  %v10601_v56 = vor.u32 %v15673_v49, %v10600_v48  ;;  %1907 = vmatpush.bf16.msrb.mxu0 %v10345_v52 }
  0x29   :  { %v10328_v53 = vld [vmem:[%s24386_s1 + $0x4a0] sm:$0xf]  ;;  %v15605_v54 = vld [vmem:[%s24386_s1 + $0x4ac] sm:$0xf0]  ;;  %v10729_v60 = vor.u32 %v15705_v51, %v10728_v50  ;;  %1920 = vmatpush.bf16.msrb.mxu1 %v10473_v55 }
  0x2a   :  { %v10456_v57 = vld [vmem:[%s24386_s1 + $0x5a0] sm:$0xf]  ;;  %v15637_v58 = vld [vmem:[%s24386_s1 + $0x5ac] sm:$0xf0]  ;;  %v10329_v6 = vor.u32 %v15605_v54, %v10328_v53  ;;  %1933 = vmatpush.bf16.msrb.mxu2 %v10601_v56 }
  0x2b   :  { %v10584_v61 = vld [vmem:[%s24386_s1 + $0x6a0] sm:$0xf]  ;;  %v15669_v62 = vld [vmem:[%s24386_s1 + $0x6ac] sm:$0xf0]  ;;  %v10457_v7 = vor.u32 %v15637_v58, %v10456_v57  ;;  %1946 = vmatpush.bf16.msrb.mxu3 %v10729_v60 }
  0x2c   :  { %v34_v0 = vld [vmem:[%s24385_s0] sm:$0xff]  ;;  %v15701_v3 = vld [vmem:[%s24386_s1 + $0x7ac] sm:$0xf0]  ;;  %v10585_v10 = vor.u32 %v15669_v62, %v10584_v61  ;;  %1908 = vmatpush.bf16.msrb.mxu0 %v10329_v6 }
  0x2d   :  { %v10712_v2 = vld [vmem:[%s24386_s1 + $0x7a0] sm:$0xf]  ;;  %v339_v4 = vunpack.c.h.b16 %v34_v0  ;;  %v338_v5 = vunpack.c.l.b16 %v34_v0  ;;  %v15601_v12 = vld [vmem:[%s24386_s1 + $0x48c] sm:$0xf0]  ;;  %1921 = vmatpush.bf16.msrb.mxu1 %v10457_v7 }
  0x2e   :  { %v10312_v11 = vld [vmem:[%s24386_s1 + $0x480] sm:$0xf]  ;;  %v10713_v16 = vor.u32 %v15701_v3, %v10712_v2  ;;  %v15633_v17 = vld [vmem:[%s24386_s1 + $0x58c] sm:$0xf0]  ;;  %1934 = vmatpush.bf16.msrb.mxu2 %v10585_v10 }
  0x2f   :  { %v10440_v13 = vld [vmem:[%s24386_s1 + $0x580] sm:$0xf]  ;;  %v17024_v14 = vpack.c.b16 %v339_v4, %v339_v4  ;;  %v17026_v15 = vpack.c.b16 %v338_v5, %v338_v5  ;;  %v15665_v19 = vld [vmem:[%s24386_s1 + $0x68c] sm:$0xf0]  ;;  %v10313_v22 = vor.u32 %v15601_v12, %v10312_v11  ;;  %v37_v4 = vld [vmem:[%s24385_s0 + $0x18] sm:$0xff] }
  0x30   :  { %v10568_v18 = vld [vmem:[%s24386_s1 + $0x680] sm:$0xf]  ;;  %v15697_v21 = vld [vmem:[%s24386_s1 + $0x78c] sm:$0xf0]  ;;  %v10441_v23 = vor.u32 %v15633_v17, %v10440_v13  ;;  %1947 = vmatpush.bf16.msrb.mxu3 %v10713_v16 }
  0x31   :  { %v10696_v20 = vld [vmem:[%s24386_s1 + $0x780] sm:$0xf]  ;;  %1875 = vmatmul.bf16.vlgmr.msra.gmra.mxu1 %v17024_v14  ;;  %1862 = vmatmul.bf16.vlgmr.msra.gmra.mxu0 %v17026_v15  ;;  %v10569_v24 = vor.u32 %v15665_v19, %v10568_v18  ;;  %v15597_v26 = vld [vmem:[%s24386_s1 + $0x46c] sm:$0xf0]  ;;  %v15483_v18 = vld [vmem:[%s24386_s1 + $0xe4] sm:$0xf] }
  0x32   :  { %v10296_v25 = vld [vmem:[%s24386_s1 + $0x460] sm:$0xf]  ;;  %v10697_v28 = vor.u32 %v15697_v21, %v10696_v20  ;;  %v15629_v29 = vld [vmem:[%s24386_s1 + $0x56c] sm:$0xf0]  ;;  %1909 = vmatpush.bf16.msrb.mxu0 %v10313_v22  ;;  %1922 = vmatpush.bf16.msrb.mxu1 %v10441_v23  ;;  %v9850_v19 = vld [vmem:[%s24386_s1 + $0xf0] sm:$0xf0]  ;;  %v344_v20 = vunpack.c.l.b16 %v37_v4 }
  0x33   :  { %v10424_v27 = vld [vmem:[%s24386_s1 + $0x560] sm:$0xf]  ;;  %v15661_v31 = vld [vmem:[%s24386_s1 + $0x66c] sm:$0xf0]  ;;  %v10297_v34 = vor.u32 %v15597_v26, %v10296_v25  ;;  %1935 = vmatpush.bf16.msrb.mxu2 %v10569_v24  ;;  %v15515_v23 = vld [vmem:[%s24386_s1 + $0x1e4] sm:$0xf] }
  0x34   :  { %v10552_v30 = vld [vmem:[%s24386_s1 + $0x660] sm:$0xf]  ;;  %v15693_v33 = vld [vmem:[%s24386_s1 + $0x76c] sm:$0xf0]  ;;  %v10425_v35 = vor.u32 %v15629_v29, %v10424_v27  ;;  %1948 = vmatpush.bf16.msrb.mxu3 %v10697_v28  ;;  %v9978_v24 = vld [vmem:[%s24386_s1 + $0x1f0] sm:$0xf0] }
  0x35   :  { %v10680_v32 = vld [vmem:[%s24386_s1 + $0x760] sm:$0xf]  ;;  %v10553_v36 = vor.u32 %v15661_v31, %v10552_v30  ;;  %v15593_v38 = vld [vmem:[%s24386_s1 + $0x44c] sm:$0xf0]  ;;  %v345_v31 = vunpack.c.h.b16 %v37_v4  ;;  %v9802_v4 = vld [vmem:[%s24386_s1 + $0x90] sm:$0xf0] }
  0x36   :  { %v10280_v37 = vld [vmem:[%s24386_s1 + $0x440] sm:$0xf]  ;;  %v10681_v40 = vor.u32 %v15693_v33, %v10680_v32  ;;  %v15625_v41 = vld [vmem:[%s24386_s1 + $0x54c] sm:$0xf0]  ;;  %1910 = vmatpush.bf16.msrb.mxu0 %v10297_v34  ;;  %1923 = vmatpush.bf16.msrb.mxu1 %v10425_v35  ;;  %v9853_v32 = vor.u32 %v15483_v18, %v9850_v19  ;;  %v15479_v35 = vld [vmem:[%s24386_s1 + $0xc4] sm:$0xf] }
  0x37   :  { %v10408_v39 = vld [vmem:[%s24386_s1 + $0x540] sm:$0xf]  ;;  %v15657_v43 = vld [vmem:[%s24386_s1 + $0x64c] sm:$0xf0]  ;;  %v10281_v46 = vor.u32 %v15593_v38, %v10280_v37  ;;  %1936 = vmatpush.bf16.msrb.mxu2 %v10553_v36  ;;  %v9981_v37 = vor.u32 %v15515_v23, %v9978_v24  ;;  %v17189_v38 = vpack.c.b16 %v344_v20, %v344_v20  ;;  %v9786_v20 = vld [vmem:[%s24386_s1 + $0x70] sm:$0xf0] }
  0x38   :  { %v10536_v42 = vld [vmem:[%s24386_s1 + $0x640] sm:$0xf]  ;;  %v15689_v45 = vld [vmem:[%s24386_s1 + $0x74c] sm:$0xf0]  ;;  %v10409_v48 = vor.u32 %v15625_v41, %v10408_v39  ;;  %1949 = vmatpush.bf16.msrb.mxu3 %v10681_v40  ;;  %v9834_v39 = vld [vmem:[%s24386_s1 + $0xd0] sm:$0xf0] }
  0x39   :  { %v10664_v44 = vld [vmem:[%s24386_s1 + $0x740] sm:$0xf]  ;;  %v10537_v49 = vor.u32 %v15657_v43, %v10536_v42  ;;  %v15589_v50 = vld [vmem:[%s24386_s1 + $0x42c] sm:$0xf0]  ;;  %v15511_v40 = vld [vmem:[%s24386_s1 + $0x1c4] sm:$0xf] }
  0x3a   :  { %v10264_v47 = vld [vmem:[%s24386_s1 + $0x420] sm:$0xf]  ;;  %v10665_v53 = vor.u32 %v15689_v45, %v10664_v44  ;;  %v15621_v54 = vld [vmem:[%s24386_s1 + $0x52c] sm:$0xf0]  ;;  %1911 = vmatpush.bf16.msrb.mxu0 %v10281_v46  ;;  %1924 = vmatpush.bf16.msrb.mxu1 %v10409_v48  ;;  %v9962_v41 = vld [vmem:[%s24386_s1 + $0x1d0] sm:$0xf0] }
  0x3b   :  { %v10392_v51 = vld [vmem:[%s24386_s1 + $0x520] sm:$0xf]  ;;  %v15653_v56 = vld [vmem:[%s24386_s1 + $0x62c] sm:$0xf0]  ;;  %v10265_v59 = vor.u32 %v15589_v50, %v10264_v47  ;;  %1937 = vmatpush.bf16.msrb.mxu2 %v10537_v49  ;;  %v15547_v43 = vld [vmem:[%s24386_s1 + $0x2e4] sm:$0xf]  ;;  %v17210_v47 = vpack.c.b16 %v345_v31, %v345_v31  ;;  %v9837_v49 = vor.u32 %v15479_v35, %v9834_v39 }
  0x3c   :  { %v17107_v52 = vld [vmem:[%s24386_s1 + $0x920] sm:$0xff]  ;;  %v15685_v58 = vld [vmem:[%s24386_s1 + $0x72c] sm:$0xf0]  ;;  %v10393_v0 = vor.u32 %v15621_v54, %v10392_v51  ;;  %1950 = vmatpush.bf16.msrb.mxu3 %v10665_v53  ;;  %v10106_v44 = vld [vmem:[%s24386_s1 + $0x2f0] sm:$0xf0]  ;;  %v9965_v53 = vor.u32 %v15511_v40, %v9962_v41 }
  0x3d   :  { %v10520_v55 = vld [vmem:[%s24386_s1 + $0x620] sm:$0xf]  ;;  %v15585_v61 = vld [vmem:[%s24386_s1 + $0x40c] sm:$0xf0]  ;;  %v1245_v63 = vunpack.c.l.b16 %v17107_v52  ;;  %v10109_v54 = vor.u32 %v15547_v43, %v10106_v44  ;;  %v9914_v23 = vld [vmem:[%s24386_s1 + $0x170] sm:$0xf0] }
  0x3e   :  { %v10648_v57 = vld [vmem:[%s24386_s1 + $0x720] sm:$0xf]  ;;  %v10521_v1 = vor.u32 %v15653_v56, %v10520_v55  ;;  %v15617_v2 = vld [vmem:[%s24386_s1 + $0x50c] sm:$0xf0]  ;;  %1912 = vmatpush.bf16.msrb.mxu0 %v10265_v59  ;;  %1925 = vmatpush.bf16.msrb.mxu1 %v10393_v0  ;;  %v15475_v55 = vld [vmem:[%s24386_s1 + $0xa4] sm:$0xf] }
  0x3f   :  { %v10248_v60 = vld [vmem:[%s24386_s1 + $0x400] sm:$0xf]  ;;  %v10649_v5 = vor.u32 %v15685_v58, %v10648_v57  ;;  %v15649_v6 = vld [vmem:[%s24386_s1 + $0x60c] sm:$0xf0]  ;;  %v1541_v17 = vpack.c.b16 %v1245_v63, %v1245_v63  ;;  %v9818_v56 = vld [vmem:[%s24386_s1 + $0xb0] sm:$0xf0] }
  0x40   :  { %v10376_v62 = vld [vmem:[%s24386_s1 + $0x500] sm:$0xf]  ;;  %v36_v10 = vld [vmem:[%s24385_s0 + $0x10] sm:$0xff]  ;;  %v10249_v16 = vor.u32 %v15585_v61, %v10248_v60  ;;  %1938 = vmatpush.bf16.msrb.mxu2 %v10521_v1  ;;  %v15507_v57 = vld [vmem:[%s24386_s1 + $0x1a4] sm:$0xf] }
  0x41   :  { %v10504_v3 = vld [vmem:[%s24386_s1 + $0x600] sm:$0xf]  ;;  %v15681_v11 = vld [vmem:[%s24386_s1 + $0x70c] sm:$0xf0]  ;;  %v10377_v21 = vor.u32 %v15617_v2, %v10376_v62  ;;  %v343_v25 = vunpack.c.h.b16 %v36_v10  ;;  %v342_v26 = vunpack.c.l.b16 %v36_v10  ;;  %1951 = vmatpush.bf16.msrb.mxu3 %v10649_v5  ;;  %v1843_v36 = vsel %vm1841_vm0, %v1541_v17, 0 }
  0x42   :  { %v10632_v7 = vld [vmem:[%s24386_s1 + $0x700] sm:$0xf]  ;;  %v15741_v13 = vld [vmem:[%s24386_s1 + $0x8ec] sm:$0xf0]  ;;  %v10505_v22 = vor.u32 %v15649_v6, %v10504_v3  ;;  %1913 = vmatpush.bf16.msrb.mxu0 %v10249_v16  ;;  %v9946_v58 = vld [vmem:[%s24386_s1 + $0x1b0] sm:$0xf0]  ;;  %v9821_v62 = vor.u32 %v15475_v55, %v9818_v56 }
  0x43   :  { %v10872_v12 = vld [vmem:[%s24386_s1 + $0x8e0] sm:$0xf]  ;;  %v10633_v27 = vor.u32 %v15681_v11, %v10632_v7  ;;  %v15737_v30 = vld [vmem:[%s24386_s1 + $0x8cc] sm:$0xf0]  ;;  %1926 = vmatpush.bf16.msrb.mxu1 %v10377_v21  ;;  %v17200_v42 = vpack.c.b16 %v343_v25, %v343_v25  ;;  %v17208_v45 = vpack.c.b16 %v342_v26, %v342_v26  ;;  %v15543_v59 = vld [vmem:[%s24386_s1 + $0x2c4] sm:$0xf]  ;;  %v9949_v1 = vor.u32 %v15507_v57, %v9946_v58 }
  0x44   :  { %v10873_v28 = vor.u32 %v15741_v13, %v10872_v12  ;;  %v10856_v29 = vld [vmem:[%s24386_s1 + $0x8c0] sm:$0xf]  ;;  %v15745_v34 = vld [vmem:[%s24386_s1 + $0x90c] sm:$0xf0]  ;;  %1939 = vmatpush.bf16.msrb.mxu2 %v10505_v22  ;;  %v10090_v60 = vld [vmem:[%s24386_s1 + $0x2d0] sm:$0xf0] }
  0x45   :  { %v10888_v33 = vld [vmem:[%s24386_s1 + $0x900] sm:$0xf]  ;;  %1952 = vmatpush.bf16.msrb.mxu3 %v10633_v27  ;;  %v10857_v46 = vor.u32 %v15737_v30, %v10856_v29  ;;  %v15733_v51 = vld [vmem:[%s24386_s1 + $0x8ac] sm:$0xf0]  ;;  %1914 = vmatmul.bf16.vlgmr.msrb.gmra.mxu0 %v17208_v45  ;;  %v10093_v2 = vor.u32 %v15543_v59, %v10090_v60  ;;  %v15471_v3 = vld [vmem:[%s24386_s1 + $0x84] sm:$0xf] }
  0x46   :  { %1958 = vmatpush.bf16.msra.mxu0 %v10873_v28  ;;  %v10889_v48 = vor.u32 %v15745_v34, %v10888_v33  ;;  %v10840_v50 = vld [vmem:[%s24386_s1 + $0x8a0] sm:$0xf]  ;;  %1927 = vmatmul.bf16.vlgmr.msrb.gmra.mxu1 %v17200_v42  ;;  %v15729_v0 = vld [vmem:[%s24386_s1 + $0x88c] sm:$0xf0]  ;;  %v15503_v5 = vld [vmem:[%s24386_s1 + $0x184] sm:$0xf]  ;;  %v9805_v12 = vor.u32 %v15471_v3, %v9802_v4 }
  0x47   :  { %1977 = vmatpush.bf16.msra.mxu1 %v1843_v36  ;;  %1940 = vmatmul.bf16.vlgmr.msrb.gmra.mxu2 %v17189_v38  ;;  %v10841_v61 = vor.u32 %v15733_v51, %v10840_v50  ;;  %v10824_v63 = vld [vmem:[%s24386_s1 + $0x880] sm:$0xf]  ;;  %v9930_v6 = vld [vmem:[%s24386_s1 + $0x190] sm:$0xf0]  ;;  %v15539_v7 = vld [vmem:[%s24386_s1 + $0x2a4] sm:$0xf] }
  0x48   :  { %1984 = vmatpush.bf16.msra.mxu2 %v9853_v32  ;;  %1953 = vmatmul.bf16.vlgmr.msrb.gmra.mxu3 %v17210_v47  ;;  %v10074_v10 = vld [vmem:[%s24386_s1 + $0x2b0] sm:$0xf0]  ;;  %v10825_v11 = vor.u32 %v15729_v0, %v10824_v63  ;;  %v10808_v13 = vld [vmem:[%s24386_s1 + $0x860] sm:$0xf]  ;;  %v15725_v16 = vld [vmem:[%s24386_s1 + $0x86c] sm:$0xf0]  ;;  %v9933_v18 = vor.u32 %v15503_v5, %v9930_v6 }
  0x49   :  { %1997 = vmatpush.bf16.msra.mxu3 %v9981_v37  ;;  %v15467_v17 = vld [vmem:[%s24386_s1 + $0x64] sm:$0xf]  ;;  %v10077_v19 = vor.u32 %v15539_v7, %v10074_v10  ;;  %v10058_v25 = vld [vmem:[%s24386_s1 + $0x290] sm:$0xf0]  ;;  %v10809_v27 = vor.u32 %v15725_v16, %v10808_v13  ;;  %v10792_v29 = vld [vmem:[%s24386_s1 + $0x840] sm:$0xf] }
  0x4a   :  { %1959 = vmatpush.bf16.msra.mxu0 %v10857_v46  ;;  %v15499_v21 = vld [vmem:[%s24386_s1 + $0x164] sm:$0xf]  ;;  %v9789_v28 = vor.u32 %v15467_v17, %v9786_v20  ;;  %v15721_v30 = vld [vmem:[%s24386_s1 + $0x84c] sm:$0xf0]  ;;  %v9770_v34 = vld [vmem:[%s24386_s1 + $0x50] sm:$0xf0] }
  0x4b   :  { %1978 = vmatpush.bf16.msra.mxu1 %v10889_v48  ;;  %v17282_v22 = vld [vmem:[%s24385_s0 + $0x20] sm:$0xff]  ;;  %v9917_v31 = vor.u32 %v15499_v21, %v9914_v23  ;;  %v9898_v36 = vld [vmem:[%s24386_s1 + $0x150] sm:$0xf0]  ;;  %v10793_v41 = vor.u32 %v15721_v30, %v10792_v29  ;;  %v15717_v44 = vld [vmem:[%s24386_s1 + $0x82c] sm:$0xf0] }
  0x4c   :  { %1985 = vmatpush.bf16.msra.mxu2 %v9837_v49  ;;  %v15535_v24 = vld [vmem:[%s24386_s1 + $0x284] sm:$0xf]  ;;  %v347_v26 = vunpack.c.h.b16 %v17282_v22  ;;  %v10042_v39 = vld [vmem:[%s24386_s1 + $0x270] sm:$0xf0]  ;;  %v10776_v43 = vld [vmem:[%s24386_s1 + $0x820] sm:$0xf] }
  0x4d   :  { %1998 = vmatpush.bf16.msra.mxu3 %v9965_v53  ;;  %v10061_v32 = vor.u32 %v15535_v24, %v10058_v25  ;;  %v15463_v33 = vld [vmem:[%s24386_s1 + $0x44] sm:$0xf]  ;;  %v9754_v49 = vld [vmem:[%s24386_s1 + $0x30] sm:$0xf0]  ;;  %v10760_v57 = vld [vmem:[%s24386_s1 + $0x800] sm:$0xf]  ;;  %v10777_v58 = vor.u32 %v15717_v44, %v10776_v43 }
  0x4e   :  { %1960 = vmatpush.bf16.msra.mxu0 %v10841_v61  ;;  %v15495_v35 = vld [vmem:[%s24386_s1 + $0x144] sm:$0xf]  ;;  %v17318_v40 = vpack.c.b16 %v347_v26, %v347_v26  ;;  %v9773_v46 = vor.u32 %v15463_v33, %v9770_v34  ;;  %v10026_v56 = vld [vmem:[%s24386_s1 + $0x250] sm:$0xf0]  ;;  %v15713_v59 = vld [vmem:[%s24386_s1 + $0x80c] sm:$0xf0] }
  0x4f   :  { %2010 = vmatpush.bf16.msrb.mxu1 %v10109_v54  ;;  %v15531_v37 = vld [vmem:[%s24386_s1 + $0x264] sm:$0xf]  ;;  %v9901_v51 = vor.u32 %v15495_v35, %v9898_v36  ;;  %v9882_v54 = vld [vmem:[%s24386_s1 + $0x130] sm:$0xf0] }
  0x50   :  { %1986 = vmatpush.bf16.msra.mxu2 %v9821_v62  ;;  %v15459_v48 = vld [vmem:[%s24386_s1 + $0x24] sm:$0xf]  ;;  %v10045_v53 = vor.u32 %v15531_v37, %v10042_v39  ;;  %v9738_v61 = vld [vmem:[%s24386_s1 + $0x10] sm:$0xf0] }
  0x51   :  { %1999 = vmatpush.bf16.msra.mxu3 %v9949_v1  ;;  %v15491_v50 = vld [vmem:[%s24386_s1 + $0x124] sm:$0xf]  ;;  %v9757_v62 = vor.u32 %v15459_v48, %v9754_v49  ;;  %v9866_v0 = vld [vmem:[%s24386_s1 + $0x110] sm:$0xf0] }
  0x52   :  { %1961 = vmatpush.bf16.msra.mxu0 %v10825_v11  ;;  %v15527_v55 = vld [vmem:[%s24386_s1 + $0x244] sm:$0xf]  ;;  %v10234_v5 = vld [vmem:[%s24386_s1 + $0x3f0] sm:$0xf0] }
  0x53   :  { %2011 = vmatpush.bf16.msrb.mxu1 %v10093_v2  ;;  %v15455_v60 = vld [vmem:[%s24386_s1 + $0x4] sm:$0xf]  ;;  %v9885_v2 = vor.u32 %v15491_v50, %v9882_v54  ;;  %v10029_v3 = vor.u32 %v15527_v55, %v10026_v56  ;;  %v10010_v6 = vld [vmem:[%s24386_s1 + $0x230] sm:$0xf0] }
  0x54   :  { %1987 = vmatpush.bf16.msra.mxu2 %v9805_v12  ;;  %v15487_v63 = vld [vmem:[%s24386_s1 + $0x104] sm:$0xf] }
  0x55   :  { %2000 = vmatpush.bf16.msra.mxu3 %v9933_v18  ;;  %v15523_v1 = vld [vmem:[%s24386_s1 + $0x224] sm:$0xf] }
  0x56   :  { %1962 = vmatpush.bf16.msra.mxu0 %v10809_v27  ;;  %10902 = vmatmul.msk.bf16.vlgmr.msra.gmra.mxu1 %vm1837_vm1, %v17318_v40  ;;  %v15579_v4 = vld [vmem:[%s24386_s1 + $0x3e4] sm:$0xf] }
  0x57   :  { %2012 = vmatpush.bf16.msrb.mxu1 %v10077_v19  ;;  %v15611_v7 = vld [vmem:[%s24386_s1 + $0x4e4] sm:$0xf] }
  0x58   :  { %1988 = vmatpush.bf16.msra.mxu2 %v9789_v28 }
  0x59   :  { %2001 = vmatpush.bf16.msra.mxu3 %v9917_v31 }
  0x5a   :  { %1963 = vmatpush.bf16.msra.mxu0 %v10793_v41 }
  0x5b   :  { %2013 = vmatpush.bf16.msrb.mxu1 %v10061_v32 }
  0x5c   :  { %1989 = vmatpush.bf16.msra.mxu2 %v9773_v46 }
  0x5d   :  { %2002 = vmatpush.bf16.msra.mxu3 %v9901_v51 }
  0x5f   :  { %2014 = vmatpush.bf16.msrb.mxu1 %v10045_v53 }
  0x60   :  { %14 = vsyncpa [#allocation3], 0  ;;  %1964 = vmatpush.bf16.msra.mxu0 %v10777_v58  ;;  %v10761_v10 = vor.u32 %v15713_v59, %v10760_v57  ;;  %v10362_v11 = vld [vmem:[%s24386_s1 + $0x4f0] sm:$0xf0]  ;;  %v15643_v12 = vld [vmem:[%s24386_s1 + $0x5e4] sm:$0xf]  ;;  %v346_v16 = vunpack.c.l.b16 %v17282_v22  ;;  %1990 = vmatpush.bf16.msra.mxu2 %v9757_v62  ;;  %v9741_v17 = vor.u32 %v15455_v60, %v9738_v61  ;;  %v10237_v18 = vor.u32 %v15579_v4, %v10234_v5 }
  0x61   :  { %v10490_v13 = vld [vmem:[%s24386_s1 + $0x5f0] sm:$0xf0]  ;;  %2003 = vmatpush.bf16.msra.mxu3 %v9885_v2  ;;  %v9869_v19 = vor.u32 %v15487_v63, %v9866_v0  ;;  %v10013_v20 = vor.u32 %v15523_v1, %v10010_v6  ;;  %v15575_v21 = vld [vmem:[%s24386_s1 + $0x3c4] sm:$0xf]  ;;  %v10365_v24 = vor.u32 %v15611_v7, %v10362_v11  ;;  %vm9503_vm2 = vcmask 130048   ;;  %s16690_s21 = smov [#allocation2]  }
  0x62   :  { %v10218_v23 = vld [vmem:[%s24386_s1 + $0x3d0] sm:$0xf0]  ;;  %v10493_v25 = vor.u32 %v15643_v12, %v10490_v13  ;;  %v15519_v22 = vld [vmem:[%s24386_s1 + $0x204] sm:$0xf]  ;;  %v17404_v28 = vpack.c.b16 %v346_v16, %v346_v16  ;;  %vm9699_vm3 = vcmask 1041408   ;;  %vm9625_vm4 = vcmask 982016  }
  0x63   :  { %2015 = vmatpush.bf16.msrb.mxu1 %v10029_v3  ;;  %v9994_v26 = vld [vmem:[%s24386_s1 + $0x210] sm:$0xf0]  ;;  %v15607_v27 = vld [vmem:[%s24386_s1 + $0x4c4] sm:$0xf]  ;;  %v10221_v32 = vor.u32 %v15575_v21, %v10218_v23  ;;  %vm9695_vm5 = vcmask 687104   ;;  %s9723_s22 = sshll.u32 %s16690_s21, 4  ;;  %s9724_s22 = int_to_ptr.vmem [resolvable:$true] %s9723_s22 }
  0x64   :  { %1965 = vmatpush.bf16.msra.mxu0 %v10761_v10  ;;  %v10346_v29 = vld [vmem:[%s24386_s1 + $0x4d0] sm:$0xf0]  ;;  %v15639_v30 = vld [vmem:[%s24386_s1 + $0x5c4] sm:$0xf]  ;;  %1991 = vmatpush.bf16.msra.mxu2 %v9741_v17  ;;  %v9997_v35 = vor.u32 %v15519_v22, %v9994_v26  ;;  %s9725_s24 = sshll.u32 %s24394_s9, 4  ;;  %vm9716_vm6 = vcmask 80896   ;;  %s9726_s24 = int_to_ptr.hbm [resolvable:$true] %s9725_s24 }
  0x65   :  { %v10474_v31 = vld [vmem:[%s24386_s1 + $0x5d0] sm:$0xf0]  ;;  %v15675_v33 = vld [vmem:[%s24386_s1 + $0x6e4] sm:$0xf]  ;;  %2004 = vmatpush.bf16.msra.mxu3 %v9869_v19  ;;  %v10349_v39 = vor.u32 %v15607_v27, %v10346_v29 }
  0x66   :  { %v10618_v34 = vld [vmem:[%s24386_s1 + $0x6f0] sm:$0xf0]  ;;  %v15571_v36 = vld [vmem:[%s24386_s1 + $0x3a4] sm:$0xf]  ;;  %v10477_v41 = vor.u32 %v15639_v30, %v10474_v31 }
  0x67   :  { %2016 = vmatpush.bf16.msrb.mxu1 %v10013_v20  ;;  %v10202_v37 = vld [vmem:[%s24386_s1 + $0x3b0] sm:$0xf0]  ;;  %v15603_v43 = vld [vmem:[%s24386_s1 + $0x4a4] sm:$0xf]  ;;  %1966 = vmatmul.bf16.vlgmr.msra.gmra.mxu0 %v17404_v28  ;;  %v10621_v44 = vor.u32 %v15675_v33, %v10618_v34 }
  0x68   :  { %2023 = vmatpush.bf16.msrb.mxu0 %v10237_v18  ;;  %2036 = vmatpush.bf16.msrb.mxu2 %v10365_v24  ;;  %v10330_v46 = vld [vmem:[%s24386_s1 + $0x4b0] sm:$0xf0]  ;;  %v15635_v48 = vld [vmem:[%s24386_s1 + $0x5a4] sm:$0xf]  ;;  %v10205_v50 = vor.u32 %v15571_v36, %v10202_v37  ;;  %v1246_v36 = vunpack.c.h.b16 %v17107_v52 }
  0x69   :  { %2049 = vmatpush.bf16.msrb.mxu3 %v10493_v25  ;;  %v10458_v49 = vld [vmem:[%s24386_s1 + $0x5b0] sm:$0xf0]  ;;  %1992 = vmatmul.bf16.vlgmr.msra.gmra.mxu2 %v17026_v15  ;;  %v15671_v51 = vld [vmem:[%s24386_s1 + $0x6c4] sm:$0xf]  ;;  %v10333_v56 = vor.u32 %v15603_v43, %v10330_v46 }
  0x6a   :  { %v10602_v53 = vld [vmem:[%s24386_s1 + $0x6d0] sm:$0xf0]  ;;  %2005 = vmatmul.bf16.vlgmr.msra.gmra.mxu3 %v17024_v14  ;;  %v15567_v54 = vld [vmem:[%s24386_s1 + $0x384] sm:$0xf]  ;;  %v10461_v57 = vor.u32 %v15635_v48, %v10458_v49 }
  0x6b   :  { %2017 = vmatpush.bf16.msrb.mxu1 %v9997_v35  ;;  %v10186_v55 = vld [vmem:[%s24386_s1 + $0x390] sm:$0xf0]  ;;  %v15599_v58 = vld [vmem:[%s24386_s1 + $0x484] sm:$0xf]  ;;  %v10605_v59 = vor.u32 %v15671_v51, %v10602_v53 }
  0x6c   :  { %2024 = vmatpush.bf16.msrb.mxu0 %v10221_v32  ;;  %2037 = vmatpush.bf16.msrb.mxu2 %v10349_v39  ;;  %v10314_v60 = vld [vmem:[%s24386_s1 + $0x490] sm:$0xf0]  ;;  %v15631_v61 = vld [vmem:[%s24386_s1 + $0x584] sm:$0xf]  ;;  %v10189_v63 = vor.u32 %v15567_v54, %v10186_v55 }
  0x6d   :  { %2050 = vmatpush.bf16.msrb.mxu3 %v10477_v41  ;;  %v10442_v62 = vld [vmem:[%s24386_s1 + $0x590] sm:$0xf0]  ;;  %v15667_v0 = vld [vmem:[%s24386_s1 + $0x6a4] sm:$0xf]  ;;  %v10317_v4 = vor.u32 %v15599_v58, %v10314_v60 }
  0x6e   :  { %v10586_v1 = vld [vmem:[%s24386_s1 + $0x6b0] sm:$0xf0]  ;;  %2018 = vmatmul.bf16.vlgmr.msrb.gmra.mxu1 %v17011_v8  ;;  %v15563_v2 = vld [vmem:[%s24386_s1 + $0x364] sm:$0xf]  ;;  %v10445_v5 = vor.u32 %v15631_v61, %v10442_v62 }
  0x6f   :  { %2062 = vmatpush.bf16.msra.mxu1 %v10621_v44  ;;  %v10170_v3 = vld [vmem:[%s24386_s1 + $0x370] sm:$0xf0]  ;;  %v15595_v6 = vld [vmem:[%s24386_s1 + $0x464] sm:$0xf]  ;;  %v10589_v7 = vor.u32 %v15667_v0, %v10586_v1 }
  0x70   :  { %2025 = vmatpush.bf16.msrb.mxu0 %v10205_v50  ;;  %2038 = vmatpush.bf16.msrb.mxu2 %v10333_v56  ;;  %v10298_v10 = vld [vmem:[%s24386_s1 + $0x470] sm:$0xf0]  ;;  %v15627_v11 = vld [vmem:[%s24386_s1 + $0x564] sm:$0xf]  ;;  %v10173_v13 = vor.u32 %v15563_v2, %v10170_v3 }
  0x71   :  { %2051 = vmatpush.bf16.msrb.mxu3 %v10461_v57  ;;  %v10426_v12 = vld [vmem:[%s24386_s1 + $0x570] sm:$0xf0]  ;;  %v15663_v16 = vld [vmem:[%s24386_s1 + $0x684] sm:$0xf]  ;;  %v10301_v20 = vor.u32 %v15595_v6, %v10298_v10  ;;  %v1542_v57 = vpack.c.b16 %v1246_v36, %v1246_v36  ;;  %v9840_v36 = vld [vmem:[%s24386_s1 + $0xc8] sm:$0xf] }
  0x72   :  { %v10570_v17 = vld [vmem:[%s24386_s1 + $0x690] sm:$0xf0]  ;;  %v15559_v18 = vld [vmem:[%s24386_s1 + $0x344] sm:$0xf]  ;;  %v10429_v21 = vor.u32 %v15627_v11, %v10426_v12 }
  0x73   :  { %2063 = vmatpush.bf16.msra.mxu1 %v10605_v59  ;;  %v10154_v19 = vld [vmem:[%s24386_s1 + $0x350] sm:$0xf0]  ;;  %v15591_v23 = vld [vmem:[%s24386_s1 + $0x444] sm:$0xf]  ;;  %v10573_v24 = vor.u32 %v15663_v16, %v10570_v17 }
  0x74   :  { %2026 = vmatpush.bf16.msrb.mxu0 %v10189_v63  ;;  %2039 = vmatpush.bf16.msrb.mxu2 %v10317_v4  ;;  %v10282_v25 = vld [vmem:[%s24386_s1 + $0x450] sm:$0xf0]  ;;  %v15623_v22 = vld [vmem:[%s24386_s1 + $0x544] sm:$0xf]  ;;  %v10157_v27 = vor.u32 %v15559_v18, %v10154_v19 }
  0x75   :  { %2052 = vmatpush.bf16.msrb.mxu3 %v10445_v5  ;;  %v10410_v26 = vld [vmem:[%s24386_s1 + $0x550] sm:$0xf0]  ;;  %v15659_v29 = vld [vmem:[%s24386_s1 + $0x664] sm:$0xf]  ;;  %v10285_v33 = vor.u32 %v15591_v23, %v10282_v25  ;;  %v1846_v5 = vsel %vm1841_vm0, %v1542_v57, 0 }
  0x76   :  { %v10554_v30 = vld [vmem:[%s24386_s1 + $0x670] sm:$0xf0]  ;;  %v15555_v31 = vld [vmem:[%s24386_s1 + $0x324] sm:$0xf]  ;;  %v10413_v34 = vor.u32 %v15623_v22, %v10410_v26  ;;  %v15486_v23 = vld [vmem:[%s24386_s1 + $0xf4] sm:$0xf0] }
  0x77   :  { %2064 = vmatpush.bf16.msra.mxu1 %v10589_v7  ;;  %v10138_v32 = vld [vmem:[%s24386_s1 + $0x330] sm:$0xf0]  ;;  %v15587_v35 = vld [vmem:[%s24386_s1 + $0x424] sm:$0xf]  ;;  %v10557_v37 = vor.u32 %v15659_v29, %v10554_v30  ;;  %v15518_v25 = vld [vmem:[%s24386_s1 + $0x1f4] sm:$0xf0] }
  0x78   :  { %2027 = vmatpush.bf16.msrb.mxu0 %v10173_v13  ;;  %2040 = vmatpush.bf16.msrb.mxu2 %v10301_v20  ;;  %v10266_v39 = vld [vmem:[%s24386_s1 + $0x430] sm:$0xf0]  ;;  %v15619_v41 = vld [vmem:[%s24386_s1 + $0x524] sm:$0xf]  ;;  %v10141_v44 = vor.u32 %v15555_v31, %v10138_v32 }
  0x79   :  { %2053 = vmatpush.bf16.msrb.mxu3 %v10429_v21  ;;  %v10394_v43 = vld [vmem:[%s24386_s1 + $0x530] sm:$0xf0]  ;;  %v15655_v52 = vld [vmem:[%s24386_s1 + $0x644] sm:$0xf]  ;;  %v10269_v51 = vor.u32 %v15587_v35, %v10266_v39  ;;  %v9856_v21 = vld [vmem:[%s24386_s1 + $0xe8] sm:$0xf] }
  0x7a   :  { %v10538_v46 = vld [vmem:[%s24386_s1 + $0x650] sm:$0xf0]  ;;  %v15551_v48 = vld [vmem:[%s24386_s1 + $0x304] sm:$0xf]  ;;  %v10397_v53 = vor.u32 %v15619_v41, %v10394_v43  ;;  %v9857_v31 = vor.u32 %v15486_v23, %v9856_v21  ;;  %v9968_v39 = vld [vmem:[%s24386_s1 + $0x1c8] sm:$0xf] }
  0x7b   :  { %2065 = vmatpush.bf16.msra.mxu1 %v10573_v24  ;;  %v10122_v49 = vld [vmem:[%s24386_s1 + $0x310] sm:$0xf0]  ;;  %v15583_v50 = vld [vmem:[%s24386_s1 + $0x404] sm:$0xf]  ;;  %v10541_v58 = vor.u32 %v15655_v52, %v10538_v46  ;;  %v9984_v24 = vld [vmem:[%s24386_s1 + $0x1e8] sm:$0xf] }
  0x7c   :  { %2028 = vmatpush.bf16.msrb.mxu0 %v10157_v27  ;;  %2041 = vmatpush.bf16.msrb.mxu2 %v10285_v33  ;;  %v10250_v54 = vld [vmem:[%s24386_s1 + $0x410] sm:$0xf0]  ;;  %v15707_v55 = vld [vmem:[%s24386_s1 + $0x7e4] sm:$0xf]  ;;  %v10125_v62 = vor.u32 %v15551_v48, %v10122_v49  ;;  %v15514_v41 = vld [vmem:[%s24386_s1 + $0x1d4] sm:$0xf0] }
  0x7d   :  { %2054 = vmatpush.bf16.msrb.mxu3 %v10413_v34  ;;  %v10746_v56 = vld [vmem:[%s24386_s1 + $0x7f0] sm:$0xf0]  ;;  %v15615_v59 = vld [vmem:[%s24386_s1 + $0x504] sm:$0xf]  ;;  %v10253_v3 = vor.u32 %v15583_v50, %v10250_v54  ;;  %v9985_v34 = vor.u32 %v15518_v25, %v9984_v24  ;;  %v9969_v50 = vor.u32 %v15514_v41, %v9968_v39  ;;  %v15478_v54 = vld [vmem:[%s24386_s1 + $0xb4] sm:$0xf0] }
  0x7e   :  { %v10378_v60 = vld [vmem:[%s24386_s1 + $0x510] sm:$0xf0]  ;;  %v15651_v61 = vld [vmem:[%s24386_s1 + $0x624] sm:$0xf]  ;;  %v10749_v2 = vor.u32 %v15707_v55, %v10746_v56  ;;  %v9952_v55 = vld [vmem:[%s24386_s1 + $0x1a8] sm:$0xf] }
  0x7f   :  { %2066 = vmatpush.bf16.msra.mxu1 %v10557_v37  ;;  %v10522_v63 = vld [vmem:[%s24386_s1 + $0x630] sm:$0xf0]  ;;  %v15739_v0 = vld [vmem:[%s24386_s1 + $0x8e4] sm:$0xf]  ;;  %v10381_v4 = vor.u32 %v15615_v59, %v10378_v60  ;;  %v15482_v37 = vld [vmem:[%s24386_s1 + $0xd4] sm:$0xf0] }
  0x80   :  { %2029 = vmatpush.bf16.msrb.mxu0 %v10141_v44  ;;  %v10874_v1 = vld [vmem:[%s24386_s1 + $0x8f0] sm:$0xf0]  ;;  %2042 = vmatpush.bf16.msrb.mxu2 %v10269_v51  ;;  %v15703_v6 = vld [vmem:[%s24386_s1 + $0x7c4] sm:$0xf]  ;;  %v10525_v10 = vor.u32 %v15651_v61, %v10522_v63  ;;  %v9841_v46 = vor.u32 %v15482_v37, %v9840_v36  ;;  %v15510_v56 = vld [vmem:[%s24386_s1 + $0x1b4] sm:$0xf0] }
  0x81   :  { %2055 = vmatpush.bf16.msrb.mxu3 %v10397_v53  ;;  %v10730_v7 = vld [vmem:[%s24386_s1 + $0x7d0] sm:$0xf0]  ;;  %v10877_v11 = vor.u32 %v15739_v0, %v10874_v1  ;;  %v15647_v12 = vld [vmem:[%s24386_s1 + $0x604] sm:$0xf]  ;;  %v9824_v53 = vld [vmem:[%s24386_s1 + $0xa8] sm:$0xf]  ;;  %v9953_v63 = vor.u32 %v15510_v56, %v9952_v55 }
  0x82   :  { %v10506_v13 = vld [vmem:[%s24386_s1 + $0x610] sm:$0xf0]  ;;  %v15735_v16 = vld [vmem:[%s24386_s1 + $0x8c4] sm:$0xf]  ;;  %v10733_v20 = vor.u32 %v15703_v6, %v10730_v7  ;;  %v9825_v60 = vor.u32 %v15478_v54, %v9824_v53  ;;  %v9808_v1 = vld [vmem:[%s24386_s1 + $0x88] sm:$0xf] }
  0x83   :  { %2067 = vmatpush.bf16.msra.mxu1 %v10541_v58  ;;  %v10858_v17 = vld [vmem:[%s24386_s1 + $0x8d0] sm:$0xf0]  ;;  %v15743_v18 = vld [vmem:[%s24386_s1 + $0x904] sm:$0xf]  ;;  %v10509_v27 = vor.u32 %v15647_v12, %v10506_v13  ;;  %v10112_v37 = vld [vmem:[%s24386_s1 + $0x2e8] sm:$0xf] }
  0x84   :  { %2030 = vmatpush.bf16.msrb.mxu0 %v10125_v62  ;;  %v10890_v19 = vld [vmem:[%s24386_s1 + $0x910] sm:$0xf0]  ;;  %2043 = vmatpush.bf16.msrb.mxu2 %v10253_v3  ;;  %v15699_v22 = vld [vmem:[%s24386_s1 + $0x7a4] sm:$0xf]  ;;  %v10861_v29 = vor.u32 %v15735_v16, %v10858_v17  ;;  %v9936_v3 = vld [vmem:[%s24386_s1 + $0x188] sm:$0xf] }
  0x85   :  { %2056 = vmatpush.bf16.msrb.mxu3 %v10381_v4  ;;  %v10714_v26 = vld [vmem:[%s24386_s1 + $0x7b0] sm:$0xf0]  ;;  %v10893_v30 = vor.u32 %v15743_v18, %v10890_v19  ;;  %v15731_v32 = vld [vmem:[%s24386_s1 + $0x8a4] sm:$0xf]  ;;  %v15506_v4 = vld [vmem:[%s24386_s1 + $0x194] sm:$0xf0] }
  0x86   :  { %v10842_v33 = vld [vmem:[%s24386_s1 + $0x8b0] sm:$0xf0]  ;;  %v10717_v35 = vor.u32 %v15699_v22, %v10714_v26  ;;  %v15695_v43 = vld [vmem:[%s24386_s1 + $0x784] sm:$0xf]  ;;  %v9937_v13 = vor.u32 %v15506_v4, %v9936_v3  ;;  %v9792_v17 = vld [vmem:[%s24386_s1 + $0x68] sm:$0xf] }
  0x87   :  { %2068 = vmatpush.bf16.msra.mxu1 %v10525_v10  ;;  %2031 = vmatmul.bf16.vlgmr.msrb.gmra.mxu0 %v17013_v9  ;;  %v10698_v44 = vld [vmem:[%s24386_s1 + $0x790] sm:$0xf0]  ;;  %v10845_v52 = vor.u32 %v15731_v32, %v10842_v33  ;;  %v15727_v48 = vld [vmem:[%s24386_s1 + $0x884] sm:$0xf]  ;;  %v15470_v18 = vld [vmem:[%s24386_s1 + $0x74] sm:$0xf0] }
  0x88   :  { %2075 = vmatpush.bf16.msra.mxu0 %v10749_v2  ;;  %2088 = vmatpush.bf16.msra.mxu2 %v10877_v11  ;;  %v10826_v49 = vld [vmem:[%s24386_s1 + $0x890] sm:$0xf0]  ;;  %v10701_v51 = vor.u32 %v15695_v43, %v10698_v44  ;;  %v15691_v57 = vld [vmem:[%s24386_s1 + $0x764] sm:$0xf]  ;;  %v15474_v2 = vld [vmem:[%s24386_s1 + $0x94] sm:$0xf0]  ;;  %v9793_v25 = vor.u32 %v15470_v18, %v9792_v17 }
  0x89   :  { %2107 = vmatpush.bf16.msra.mxu3 %v1846_v5  ;;  %2044 = vmatmul.bf16.vlgmr.msrb.gmra.mxu2 %v17208_v45  ;;  %v10682_v58 = vld [vmem:[%s24386_s1 + $0x770] sm:$0xf0]  ;;  %v10829_v59 = vor.u32 %v15727_v48, %v10826_v49  ;;  %v15723_v61 = vld [vmem:[%s24386_s1 + $0x864] sm:$0xf]  ;;  %v9809_v10 = vor.u32 %v15474_v2, %v9808_v1  ;;  %v9920_v19 = vld [vmem:[%s24386_s1 + $0x168] sm:$0xf] }
  0x8a   :  { %2057 = vmatmul.bf16.vlgmr.msrb.gmra.mxu3 %v17200_v42  ;;  %v10810_v62 = vld [vmem:[%s24386_s1 + $0x870] sm:$0xf0]  ;;  %v10685_v0 = vor.u32 %v15691_v57, %v10682_v58  ;;  %v15687_v5 = vld [vmem:[%s24386_s1 + $0x744] sm:$0xf]  ;;  %v9904_v32 = vld [vmem:[%s24386_s1 + $0x148] sm:$0xf] }
  0x8b   :  { %2069 = vmatpush.bf16.msra.mxu1 %v10509_v27  ;;  %v10666_v6 = vld [vmem:[%s24386_s1 + $0x750] sm:$0xf0]  ;;  %v10813_v7 = vor.u32 %v15723_v61, %v10810_v62  ;;  %v15719_v11 = vld [vmem:[%s24386_s1 + $0x844] sm:$0xf]  ;;  %v15498_v33 = vld [vmem:[%s24386_s1 + $0x154] sm:$0xf0] }
  0x8c   :  { %2076 = vmatpush.bf16.msra.mxu0 %v10733_v20  ;;  %2089 = vmatpush.bf16.msra.mxu2 %v10861_v29  ;;  %v10794_v12 = vld [vmem:[%s24386_s1 + $0x850] sm:$0xf0]  ;;  %v10669_v16 = vor.u32 %v15687_v5, %v10666_v6  ;;  %v15502_v20 = vld [vmem:[%s24386_s1 + $0x174] sm:$0xf0]  ;;  %v15683_v21 = vld [vmem:[%s24386_s1 + $0x724] sm:$0xf] }
  0x8d   :  { %2108 = vmatpush.bf16.msra.mxu3 %v10893_v30  ;;  %v10650_v23 = vld [vmem:[%s24386_s1 + $0x730] sm:$0xf0]  ;;  %v10797_v24 = vor.u32 %v15719_v11, %v10794_v12  ;;  %v15715_v22 = vld [vmem:[%s24386_s1 + $0x824] sm:$0xf]  ;;  %v9921_v27 = vor.u32 %v15502_v20, %v9920_v19  ;;  %v9776_v30 = vld [vmem:[%s24386_s1 + $0x48] sm:$0xf] }
  0x8e   :  { %2070 = vmatmul.bf16.vlgmr.msra.gmra.mxu1 %v17189_v38  ;;  %v10778_v26 = vld [vmem:[%s24386_s1 + $0x830] sm:$0xf0]  ;;  %v10653_v29 = vor.u32 %v15683_v21, %v10650_v23  ;;  %v15550_v39 = vld [vmem:[%s24386_s1 + $0x2f4] sm:$0xf0]  ;;  %v15711_v43 = vld [vmem:[%s24386_s1 + $0x804] sm:$0xf] }
  0x8f   :  { %2114 = vmatpush.bf16.msrb.mxu1 %v9857_v31  ;;  %v15466_v31 = vld [vmem:[%s24386_s1 + $0x54] sm:$0xf0]  ;;  %v10781_v36 = vor.u32 %v15715_v22, %v10778_v26  ;;  %v10762_v44 = vld [vmem:[%s24386_s1 + $0x810] sm:$0xf0]  ;;  %v9888_v53 = vld [vmem:[%s24386_s1 + $0x128] sm:$0xf]  ;;  %v10113_v55 = vor.u32 %v15550_v39, %v10112_v37 }
  0x90   :  { %2077 = vmatpush.bf16.msra.mxu0 %v10717_v35  ;;  %2090 = vmatpush.bf16.msra.mxu2 %v10845_v52  ;;  %v10634_v35 = vld [vmem:[%s24386_s1 + $0x710] sm:$0xf0]  ;;  %v9777_v41 = vor.u32 %v15466_v31, %v9776_v30  ;;  %v9760_v52 = vld [vmem:[%s24386_s1 + $0x28] sm:$0xf]  ;;  %v15462_v49 = vld [vmem:[%s24386_s1 + $0x34] sm:$0xf0]  ;;  %v10765_v56 = vor.u32 %v15711_v43, %v10762_v44 }
  0x91   :  { %2127 = vmatpush.bf16.msrb.mxu3 %v9985_v34  ;;  %v15679_v34 = vld [vmem:[%s24386_s1 + $0x704] sm:$0xf]  ;;  %v15494_v54 = vld [vmem:[%s24386_s1 + $0x134] sm:$0xf0]  ;;  %v10096_v57 = vld [vmem:[%s24386_s1 + $0x2c8] sm:$0xf] }
  0x92   :  { %v10637_v48 = vor.u32 %v15679_v34, %v10634_v35  ;;  %v15546_v58 = vld [vmem:[%s24386_s1 + $0x2d4] sm:$0xf0]  ;;  %v9744_v61 = vld [vmem:[%s24386_s1 + $0x8] sm:$0xf] }
  0x93   :  { %2115 = vmatpush.bf16.msrb.mxu1 %v9841_v46  ;;  %v9905_v46 = vor.u32 %v15498_v33, %v9904_v32  ;;  %v15458_v62 = vld [vmem:[%s24386_s1 + $0x14] sm:$0xf0]  ;;  %v10224_v2 = vld [vmem:[%s24386_s1 + $0x3c8] sm:$0xf]  ;;  %v10097_v4 = vor.u32 %v15546_v58, %v10096_v57 }
  0x94   :  { %2078 = vmatpush.bf16.msra.mxu0 %v10701_v51  ;;  %2091 = vmatpush.bf16.msra.mxu2 %v10829_v59  ;;  %v15582_v51 = vld [vmem:[%s24386_s1 + $0x3f4] sm:$0xf0]  ;;  %v9761_v59 = vor.u32 %v15462_v49, %v9760_v52  ;;  %v10368_v5 = vld [vmem:[%s24386_s1 + $0x4e8] sm:$0xf] }
  0x95   :  { %2128 = vmatpush.bf16.msrb.mxu3 %v9969_v50  ;;  %v10240_v50 = vld [vmem:[%s24386_s1 + $0x3e8] sm:$0xf]  ;;  %v15490_v1 = vld [vmem:[%s24386_s1 + $0x114] sm:$0xf0] }
  0x96   :  { %v15578_v3 = vld [vmem:[%s24386_s1 + $0x3d4] sm:$0xf0]  ;;  %v10080_v11 = vld [vmem:[%s24386_s1 + $0x2a8] sm:$0xf] }
  0x97   :  { %2116 = vmatpush.bf16.msrb.mxu1 %v9825_v60  ;;  %v10241_v60 = vor.u32 %v15582_v51, %v10240_v50  ;;  %v15614_v6 = vld [vmem:[%s24386_s1 + $0x4f4] sm:$0xf0]  ;;  %v10208_v19 = vld [vmem:[%s24386_s1 + $0x3a8] sm:$0xf] }
  0x98   :  { %2079 = vmatpush.bf16.msra.mxu0 %v10685_v0  ;;  %2092 = vmatpush.bf16.msra.mxu2 %v10813_v7  ;;  %v9889_v0 = vor.u32 %v15494_v54, %v9888_v53  ;;  %v10496_v7 = vld [vmem:[%s24386_s1 + $0x5e8] sm:$0xf]  ;;  %v15542_v12 = vld [vmem:[%s24386_s1 + $0x2b4] sm:$0xf0]  ;;  %v10369_v18 = vor.u32 %v15614_v6, %v10368_v5 }
  0x99   :  { %2129 = vmatpush.bf16.msrb.mxu3 %v9953_v63  ;;  %v9872_v63 = vld [vmem:[%s24386_s1 + $0x108] sm:$0xf]  ;;  %v15574_v20 = vld [vmem:[%s24386_s1 + $0x3b4] sm:$0xf0]  ;;  %v10081_v23 = vor.u32 %v15542_v12, %v10080_v11 }
  0x9a   :  { %10903 = vmatmul.msk.bf16.vlgmr.msra.gmra.mxu3 %vm1837_vm1, %v17318_v40  ;;  %v9873_v17 = vor.u32 %v15490_v1, %v9872_v63  ;;  %v10480_v22 = vld [vmem:[%s24386_s1 + $0x5c8] sm:$0xf]  ;;  %v15642_v26 = vld [vmem:[%s24386_s1 + $0x5d4] sm:$0xf0]  ;;  %v10209_v30 = vor.u32 %v15574_v20, %v10208_v19 }
  0x9b   :  { %2117 = vmatpush.bf16.msrb.mxu1 %v9809_v10  ;;  %v15646_v10 = vld [vmem:[%s24386_s1 + $0x5f4] sm:$0xf0]  ;;  %v10192_v32 = vld [vmem:[%s24386_s1 + $0x388] sm:$0xf]  ;;  %v10481_v34 = vor.u32 %v15642_v26, %v10480_v22 }
  0x9c   :  { %2080 = vmatpush.bf16.msra.mxu0 %v10669_v16  ;;  %2093 = vmatpush.bf16.msra.mxu2 %v10797_v24  ;;  %v10225_v16 = vor.u32 %v15578_v3, %v10224_v2  ;;  %v10497_v21 = vor.u32 %v15646_v10, %v10496_v7  ;;  %v10352_v24 = vld [vmem:[%s24386_s1 + $0x4c8] sm:$0xf]  ;;  %v15570_v33 = vld [vmem:[%s24386_s1 + $0x394] sm:$0xf0] }
  0x9d   :  { %2130 = vmatpush.bf16.msrb.mxu3 %v9937_v13  ;;  %v9745_v13 = vor.u32 %v15458_v62, %v9744_v61  ;;  %v15606_v37 = vld [vmem:[%s24386_s1 + $0x4b4] sm:$0xf0]  ;;  %v10464_v39 = vld [vmem:[%s24386_s1 + $0x5a8] sm:$0xf]  ;;  %v10193_v52 = vor.u32 %v15570_v33, %v10192_v32 }
  0x9e   :  { %v10048_v43 = vld [vmem:[%s24386_s1 + $0x268] sm:$0xf]  ;;  %v15534_v44 = vld [vmem:[%s24386_s1 + $0x274] sm:$0xf0] }
  0x9f   :  { %2118 = vmatpush.bf16.msrb.mxu1 %v9793_v25  ;;  %v15610_v25 = vld [vmem:[%s24386_s1 + $0x4d4] sm:$0xf0]  ;;  %v10049_v51 = vor.u32 %v15534_v44, %v10048_v43  ;;  %v10320_v53 = vld [vmem:[%s24386_s1 + $0x488] sm:$0xf] }
  0xa0   :  { %2081 = vmatpush.bf16.msra.mxu0 %v10653_v29  ;;  %2094 = vmatpush.bf16.msra.mxu2 %v10781_v36  ;;  %v15538_v29 = vld [vmem:[%s24386_s1 + $0x294] sm:$0xf0]  ;;  %v10353_v31 = vor.u32 %v15610_v25, %v10352_v24  ;;  %v10336_v36 = vld [vmem:[%s24386_s1 + $0x4a8] sm:$0xf] }
  0xa1   :  { %2131 = vmatpush.bf16.msrb.mxu3 %v9921_v27  ;;  %v10064_v27 = vld [vmem:[%s24386_s1 + $0x288] sm:$0xf]  ;;  %v15566_v49 = vld [vmem:[%s24386_s1 + $0x374] sm:$0xf0] }
  0xa2   :  { %v10065_v35 = vor.u32 %v15538_v29, %v10064_v27  ;;  %v15602_v54 = vld [vmem:[%s24386_s1 + $0x494] sm:$0xf0]  ;;  %v10032_v57 = vld [vmem:[%s24386_s1 + $0x248] sm:$0xf] }
  0xa3   :  { %2119 = vmatpush.bf16.msrb.mxu1 %v9777_v41  ;;  %v15638_v41 = vld [vmem:[%s24386_s1 + $0x5b4] sm:$0xf0]  ;;  %v10160_v61 = vld [vmem:[%s24386_s1 + $0x348] sm:$0xf] }
  0xa4   :  { %2082 = vmatpush.bf16.msra.mxu0 %v10637_v48  ;;  %2095 = vmatpush.bf16.msra.mxu2 %v10765_v56  ;;  %v10176_v48 = vld [vmem:[%s24386_s1 + $0x368] sm:$0xf]  ;;  %v10465_v50 = vor.u32 %v15638_v41, %v10464_v39  ;;  %v15634_v56 = vld [vmem:[%s24386_s1 + $0x594] sm:$0xf0] }
  0xa5   :  { %2132 = vmatpush.bf16.msrb.mxu3 %v9905_v46  ;;  %v10337_v46 = vor.u32 %v15606_v37, %v10336_v36  ;;  %v15530_v58 = vld [vmem:[%s24386_s1 + $0x254] sm:$0xf0]  ;;  %v10304_v3 = vld [vmem:[%s24386_s1 + $0x468] sm:$0xf] }
  0xa6   :  { %v15562_v62 = vld [vmem:[%s24386_s1 + $0x354] sm:$0xf0]  ;;  %v10033_v2 = vor.u32 %v15530_v58, %v10032_v57  ;;  %v10432_v5 = vld [vmem:[%s24386_s1 + $0x568] sm:$0xf] }
  0xa7   :  { %2120 = vmatpush.bf16.msrb.mxu1 %v9761_v59  ;;  %2083 = vmatmul.bf16.vlgmr.msra.gmra.mxu0 %v17210_v47  ;;  %v10177_v59 = vor.u32 %v15566_v49, %v10176_v48  ;;  %v15630_v7 = vld [vmem:[%s24386_s1 + $0x574] sm:$0xf0]  ;;  %v10016_v10 = vld [vmem:[%s24386_s1 + $0x228] sm:$0xf]  ;;  %v10161_v12 = vor.u32 %v15562_v62, %v10160_v61 }
  0xa8   :  { %2140 = vmatpush.bf16.msrb.mxu0 %v10113_v55  ;;  %2153 = vmatpush.bf16.msrb.mxu2 %v10241_v60  ;;  %v10448_v55 = vld [vmem:[%s24386_s1 + $0x588] sm:$0xf]  ;;  %v10321_v60 = vor.u32 %v15602_v54, %v10320_v53  ;;  %v15526_v11 = vld [vmem:[%s24386_s1 + $0x234] sm:$0xf0]  ;;  %v10433_v19 = vor.u32 %v15630_v7, %v10432_v5  ;;  %v1889_v25 = vpop.f32.mrf.mxu2 }
  0xa9   :  { %2133 = vmatpush.bf16.msrb.mxu3 %v9889_v0  ;;  %2096 = vmatmul.bf16.vlgmr.msra.gmra.mxu2 %v17404_v28  ;;  %v10449_v1 = vor.u32 %v15634_v56, %v10448_v55  ;;  %v10017_v20 = vor.u32 %v15526_v11, %v10016_v10  ;;  %v15626_v24 = vld [vmem:[%s24386_s1 + $0x554] sm:$0xf0]  ;;  %v10000_v22 = vld [vmem:[%s24386_s1 + $0x208] sm:$0xf]  ;;  %v1902_v33 = vpop.f32.mrf.mxu3 }
  0xaa   :  { %v15522_v26 = vld [vmem:[%s24386_s1 + $0x214] sm:$0xf0]  ;;  %v17950_v29 = vld [vmem:[%s24386_s1 + $0x928] sm:$0xff] }
  0xab   :  { %2121 = vmatpush.bf16.msrb.mxu1 %v9745_v13  ;;  %v15678_v32 = vld [vmem:[%s24386_s1 + $0x6f4] sm:$0xf0]  ;;  %v10272_v37 = vld [vmem:[%s24386_s1 + $0x428] sm:$0xf] }
  0xac   :  { %2141 = vmatpush.bf16.msrb.mxu0 %v10097_v4  ;;  %2154 = vmatpush.bf16.msrb.mxu2 %v10225_v16  ;;  %v15598_v4 = vld [vmem:[%s24386_s1 + $0x474] sm:$0xf0]  ;;  %v10144_v16 = vld [vmem:[%s24386_s1 + $0x328] sm:$0xf] }
  0xad   :  { %2134 = vmatpush.bf16.msrb.mxu3 %v9873_v17  ;;  %v10305_v13 = vor.u32 %v15598_v4, %v10304_v3  ;;  %v15558_v17 = vld [vmem:[%s24386_s1 + $0x334] sm:$0xf0]  ;;  %v10752_v48 = vld [vmem:[%s24386_s1 + $0x7e8] sm:$0xf] }
  0xae   :  { %2122 = vmatmul.bf16.vlgmr.msrb.gmra.mxu1 %v17026_v15  ;;  %v1863_v63 = vpop.f32.mrf.mxu0  ;;  %v1876_v0 = vpop.f32.mrf.mxu1  ;;  %v15554_v36 = vld [vmem:[%s24386_s1 + $0x314] sm:$0xf0]  ;;  %v10608_v56 = vld [vmem:[%s24386_s1 + $0x6c8] sm:$0xf] }
  0xaf   :  { %2166 = vmatpush.bf16.msra.mxu1 %v10369_v18  ;;  %v1877_v6 = vadd.f32 %v1876_v0, %v1863_v63  ;;  %v10288_v18 = vld [vmem:[%s24386_s1 + $0x448] sm:$0xf]  ;;  %v15710_v49 = vld [vmem:[%s24386_s1 + $0x7f4] sm:$0xf0] }
  0xb0   :  { %2142 = vmatpush.bf16.msrb.mxu0 %v10081_v23  ;;  %2155 = vmatpush.bf16.msrb.mxu2 %v10209_v30  ;;  %v10416_v23 = vld [vmem:[%s24386_s1 + $0x548] sm:$0xf]  ;;  %v10145_v30 = vor.u32 %v15558_v17, %v10144_v16  ;;  %v15622_v53 = vld [vmem:[%s24386_s1 + $0x534] sm:$0xf0]  ;;  %v1891_v3 = vpop.f32.mrf.mxu2 }
  0xb1   :  { %2179 = vmatpush.bf16.msra.mxu3 %v10497_v21  ;;  %v15594_v21 = vld [vmem:[%s24386_s1 + $0x454] sm:$0xf0]  ;;  %v1890_v27 = vadd.f32 %v1889_v25, %v1877_v6  ;;  %v10417_v44 = vor.u32 %v15626_v24, %v10416_v23  ;;  %v10384_v63 = vld [vmem:[%s24386_s1 + $0x508] sm:$0xf]  ;;  %v10082_v3 = vld [vmem:[%s24386_s1 + $0x2b8] sm:$0xf0] }
  0xb2   :  { %2135 = vmatmul.bf16.vlgmr.msrb.gmra.mxu3 %v17024_v14  ;;  %v15674_v57 = vld [vmem:[%s24386_s1 + $0x6d4] sm:$0xf0]  ;;  %v10736_v0 = vld [vmem:[%s24386_s1 + $0x7c8] sm:$0xf] }
  0xb3   :  { %2167 = vmatpush.bf16.msra.mxu1 %v10353_v31  ;;  %v10624_v31 = vld [vmem:[%s24386_s1 + $0x6e8] sm:$0xf]  ;;  %v17967_v39 = vadd.f32 %v1902_v33, %v1890_v27  ;;  %v15586_v61 = vld [vmem:[%s24386_s1 + $0x414] sm:$0xf0]  ;;  %v10609_v5 = vor.u32 %v15674_v57, %v10608_v56  ;;  %v10114_v33 = vld [vmem:[%s24386_s1 + $0x2f8] sm:$0xf0] }
  0xb4   :  { %2143 = vmatpush.bf16.msrb.mxu0 %v10065_v35  ;;  %2156 = vmatpush.bf16.msrb.mxu2 %v10193_v52  ;;  %v10128_v35 = vld [vmem:[%s24386_s1 + $0x308] sm:$0xf]  ;;  %v10001_v52 = vor.u32 %v15522_v26, %v10000_v22  ;;  %v10625_v54 = vor.u32 %v15678_v32, %v10624_v31  ;;  %v15618_v4 = vld [vmem:[%s24386_s1 + $0x514] sm:$0xf0]  ;;  %v15548_v32 = vld [vmem:[%s24386_s1 + $0x2ec] sm:$0xf] }
  0xb5   :  { %2180 = vmatpush.bf16.msra.mxu3 %v10481_v34  ;;  %v10289_v34 = vor.u32 %v15594_v21, %v10288_v18  ;;  %v10129_v55 = vor.u32 %v15554_v36, %v10128_v35  ;;  %v10880_v6 = vld [vmem:[%s24386_s1 + $0x8e8] sm:$0xf]  ;;  %v15742_v7 = vld [vmem:[%s24386_s1 + $0x8f4] sm:$0xf0]  ;;  %v10385_v17 = vor.u32 %v15618_v4, %v10384_v63 }
  0xb6   :  { %v1865_v41 = vpop.f32.mrf.mxu0  ;;  %v1878_v43 = vpop.f32.mrf.mxu1  ;;  %v10592_v10 = vld [vmem:[%s24386_s1 + $0x6a8] sm:$0xf]  ;;  %v15670_v11 = vld [vmem:[%s24386_s1 + $0x6b4] sm:$0xf0]  ;;  %v10881_v18 = vor.u32 %v15742_v7, %v10880_v6 }
  0xb7   :  { %2168 = vmatpush.bf16.msra.mxu1 %v10337_v46  ;;  %v15590_v46 = vld [vmem:[%s24386_s1 + $0x434] sm:$0xf0]  ;;  %v10593_v23 = vor.u32 %v15670_v11, %v10592_v10  ;;  %v10864_v24 = vld [vmem:[%s24386_s1 + $0x8c8] sm:$0xf] }
  0xb8   :  { %2144 = vmatpush.bf16.msrb.mxu0 %v10049_v51  ;;  %2157 = vmatpush.bf16.msrb.mxu2 %v10177_v59  ;;  %v10400_v51 = vld [vmem:[%s24386_s1 + $0x528] sm:$0xf]  ;;  %v10273_v58 = vor.u32 %v15590_v46, %v10272_v37  ;;  %v10753_v59 = vor.u32 %v15710_v49, %v10752_v48  ;;  %v15702_v21 = vld [vmem:[%s24386_s1 + $0x7b4] sm:$0xf0] }
  0xb9   :  { %2181 = vmatpush.bf16.msra.mxu3 %v10465_v50  ;;  %v1247_v50 = vunpack.c.l.b16 %v17950_v29  ;;  %v10401_v62 = vor.u32 %v15622_v53, %v10400_v51  ;;  %v15738_v25 = vld [vmem:[%s24386_s1 + $0x8d4] sm:$0xf0]  ;;  %v10896_v22 = vld [vmem:[%s24386_s1 + $0x908] sm:$0xf]  ;;  %v10098_v51 = vld [vmem:[%s24386_s1 + $0x2d8] sm:$0xf0] }
  0xba   :  { %v15746_v26 = vld [vmem:[%s24386_s1 + $0x914] sm:$0xf0]  ;;  %v10576_v27 = vld [vmem:[%s24386_s1 + $0x688] sm:$0xf] }
  0xbb   :  { %2169 = vmatpush.bf16.msra.mxu1 %v10321_v60  ;;  %v10256_v60 = vld [vmem:[%s24386_s1 + $0x408] sm:$0xf]  ;;  %v15698_v36 = vld [vmem:[%s24386_s1 + $0x794] sm:$0xf0]  ;;  %v10897_v37 = vor.u32 %v15746_v26, %v10896_v22 }
  0xbc   :  { %2145 = vmatpush.bf16.msrb.mxu0 %v10033_v2  ;;  %2158 = vmatpush.bf16.msrb.mxu2 %v10161_v12  ;;  %v1543_v2 = vpack.c.b16 %v1247_v50, %v1247_v50  ;;  %v1904_v12 = vpop.f32.mrf.mxu3  ;;  %v10704_v35 = vld [vmem:[%s24386_s1 + $0x788] sm:$0xf]  ;;  %v15662_v48 = vld [vmem:[%s24386_s1 + $0x674] sm:$0xf0]  ;;  %v15544_v50 = vld [vmem:[%s24386_s1 + $0x2cc] sm:$0xf] }
  0xbd   :  { %2182 = vmatpush.bf16.msra.mxu3 %v10449_v1  ;;  %v15706_v1 = vld [vmem:[%s24386_s1 + $0x7d4] sm:$0xf0]  ;;  %v10848_v43 = vld [vmem:[%s24386_s1 + $0x8a8] sm:$0xf]  ;;  %v10705_v49 = vor.u32 %v15698_v36, %v10704_v35  ;;  %v15532_v35 = vld [vmem:[%s24386_s1 + $0x26c] sm:$0xf] }
  0xbe   :  { %v10737_v16 = vor.u32 %v15706_v1, %v10736_v0  ;;  %v10560_v46 = vld [vmem:[%s24386_s1 + $0x668] sm:$0xf]  ;;  %v15658_v0 = vld [vmem:[%s24386_s1 + $0x654] sm:$0xf0] }
  0xbf   :  { %2170 = vmatpush.bf16.msra.mxu1 %v10305_v13  ;;  %v10257_v13 = vor.u32 %v15586_v61, %v10256_v60  ;;  %v10561_v57 = vor.u32 %v15662_v48, %v10560_v46  ;;  %v15730_v60 = vld [vmem:[%s24386_s1 + $0x894] sm:$0xf0]  ;;  %v10101_v61 = vor.u32 %v15544_v50, %v10098_v51  ;;  %v10544_v63 = vld [vmem:[%s24386_s1 + $0x648] sm:$0xf] }
  0xc0   :  { %2146 = vmatpush.bf16.msrb.mxu0 %v10017_v20  ;;  %2159 = vmatpush.bf16.msrb.mxu2 %v10145_v30  ;;  %v10720_v20 = vld [vmem:[%s24386_s1 + $0x7a8] sm:$0xf]  ;;  %v15666_v30 = vld [vmem:[%s24386_s1 + $0x694] sm:$0xf0]  ;;  %v10545_v7 = vor.u32 %v15658_v0, %v10544_v63 }
  0xc1   :  { %2183 = vmatpush.bf16.msra.mxu3 %v10433_v19  ;;  %v1849_v19 = vsel %vm1841_vm0, %v1543_v2, 0  ;;  %v10721_v31 = vor.u32 %v15702_v21, %v10720_v20  ;;  %v10577_v41 = vor.u32 %v15666_v30, %v10576_v27  ;;  %v15540_v2 = vld [vmem:[%s24386_s1 + $0x2ac] sm:$0xf]  ;;  %v15690_v6 = vld [vmem:[%s24386_s1 + $0x754] sm:$0xf0] }
  0xc2   :  { %v1915_v56 = vpop.f32.mrf.mxu0  ;;  %v10816_v10 = vld [vmem:[%s24386_s1 + $0x868] sm:$0xf]  ;;  %v15726_v11 = vld [vmem:[%s24386_s1 + $0x874] sm:$0xf0]  ;;  %v10085_v12 = vor.u32 %v15540_v2, %v10082_v3  ;;  %v15536_v20 = vld [vmem:[%s24386_s1 + $0x28c] sm:$0xf] }
  0xc3   :  { %2171 = vmatpush.bf16.msra.mxu1 %v10289_v34  ;;  %v10865_v34 = vor.u32 %v15738_v25, %v10864_v24  ;;  %v10066_v21 = vld [vmem:[%s24386_s1 + $0x298] sm:$0xf0]  ;;  %v10817_v24 = vor.u32 %v15726_v11, %v10816_v10  ;;  %v10656_v25 = vld [vmem:[%s24386_s1 + $0x728] sm:$0xf]  ;;  %v15686_v22 = vld [vmem:[%s24386_s1 + $0x734] sm:$0xf0] }
  0xc4   :  { %2147 = vmatpush.bf16.msrb.mxu0 %v10001_v52  ;;  %2160 = vmatpush.bf16.msrb.mxu2 %v10129_v55  ;;  %v10117_v52 = vor.u32 %v15548_v32, %v10114_v33  ;;  %v15694_v55 = vld [vmem:[%s24386_s1 + $0x774] sm:$0xf0]  ;;  %v10800_v30 = vld [vmem:[%s24386_s1 + $0x848] sm:$0xf]  ;;  %v9842_v2 = vld [vmem:[%s24386_s1 + $0xd8] sm:$0xf0] }
  0xc5   :  { %2184 = vmatpush.bf16.msra.mxu3 %v10417_v44  ;;  %v15734_v44 = vld [vmem:[%s24386_s1 + $0x8b4] sm:$0xf0]  ;;  %v10512_v36 = vld [vmem:[%s24386_s1 + $0x608] sm:$0xf]  ;;  %v15580_v10 = vld [vmem:[%s24386_s1 + $0x3ec] sm:$0xf] }
  0xc6   :  { %v10849_v53 = vor.u32 %v15734_v44, %v10848_v43  ;;  %v10050_v43 = vld [vmem:[%s24386_s1 + $0x278] sm:$0xf0]  ;;  %v15484_v44 = vld [vmem:[%s24386_s1 + $0xec] sm:$0xf]  ;;  %v10640_v48 = vld [vmem:[%s24386_s1 + $0x708] sm:$0xf] }
  0xc7   :  { %2172 = vmatpush.bf16.msra.mxu1 %v10273_v58  ;;  %2148 = vmatmul.bf16.vlgmr.msrb.gmra.mxu0 %v17011_v8  ;;  %v1928_v58 = vpop.f32.mrf.mxu1  ;;  %v10784_v50 = vld [vmem:[%s24386_s1 + $0x828] sm:$0xf]  ;;  %v10242_v11 = vld [vmem:[%s24386_s1 + $0x3f8] sm:$0xf0] }
  0xc8   :  { %2192 = vmatpush.bf16.msra.mxu0 %v10625_v54  ;;  %2205 = vmatpush.bf16.msra.mxu2 %v10753_v59  ;;  %v10688_v54 = vld [vmem:[%s24386_s1 + $0x768] sm:$0xf] }
  0xc9   :  { %2185 = vmatpush.bf16.msra.mxu3 %v10401_v62  ;;  %2161 = vmatmul.bf16.vlgmr.msrb.gmra.mxu2 %v17013_v9  ;;  %v10832_v59 = vld [vmem:[%s24386_s1 + $0x888] sm:$0xf]  ;;  %v1916_v62 = vadd.f32 %v1915_v56, %v17967_v39  ;;  %v10689_v1 = vor.u32 %v15694_v55, %v10688_v54  ;;  %v15516_v54 = vld [vmem:[%s24386_s1 + $0x1ec] sm:$0xf]  ;;  %v9986_v55 = vld [vmem:[%s24386_s1 + $0x1f8] sm:$0xf0]  ;;  %v10053_v56 = vor.u32 %v15532_v35, %v10050_v43 }
  0xca   :  { %v10833_v4 = vor.u32 %v15730_v60, %v10832_v59  ;;  %v1917_v33 = vpop.f32.mrf.mxu0  ;;  %v15528_v60 = vld [vmem:[%s24386_s1 + $0x24c] sm:$0xf]  ;;  %v9989_v63 = vor.u32 %v15516_v54, %v9986_v55  ;;  %v10768_v0 = vld [vmem:[%s24386_s1 + $0x808] sm:$0xf]  ;;  %v10626_v35 = vld [vmem:[%s24386_s1 + $0x6f8] sm:$0xf0] }
  0xcb   :  { %2173 = vmatpush.bf16.msra.mxu1 %v10257_v13  ;;  %v1929_v39 = vadd.f32 %v1928_v58, %v1916_v62  ;;  %v1941_v13 = vpop.f32.mrf.mxu2  ;;  %v15676_v33 = vld [vmem:[%s24386_s1 + $0x6ec] sm:$0xf]  ;;  %v10610_v55 = vld [vmem:[%s24386_s1 + $0x6d8] sm:$0xf0] }
  0xcc   :  { %2193 = vmatpush.bf16.msra.mxu0 %v10609_v5  ;;  %2206 = vmatpush.bf16.msra.mxu2 %v10737_v16  ;;  %v10672_v5 = vld [vmem:[%s24386_s1 + $0x748] sm:$0xf]  ;;  %v15504_v43 = vld [vmem:[%s24386_s1 + $0x18c] sm:$0xf] }
  0xcd   :  { %2186 = vmatpush.bf16.msra.mxu3 %v10385_v17  ;;  %v10528_v16 = vld [vmem:[%s24386_s1 + $0x628] sm:$0xf]  ;;  %v15654_v17 = vld [vmem:[%s24386_s1 + $0x634] sm:$0xf0] }
  0xce   :  { %2174 = vmatmul.bf16.vlgmr.msra.gmra.mxu1 %v17208_v45  ;;  %v10529_v27 = vor.u32 %v15654_v17, %v10528_v16  ;;  %v10018_v16 = vld [vmem:[%s24386_s1 + $0x238] sm:$0xf0] }
  0xcf   :  { %2218 = vmatpush.bf16.msrb.mxu1 %v10881_v18  ;;  %v1942_v18 = vadd.f32 %v1941_v13, %v1929_v39  ;;  %v1930_v32 = vpop.f32.mrf.mxu1  ;;  %v15714_v39 = vld [vmem:[%s24386_s1 + $0x814] sm:$0xf0]  ;;  %v15524_v13 = vld [vmem:[%s24386_s1 + $0x22c] sm:$0xf] }
  0xd0   :  { %2194 = vmatpush.bf16.msra.mxu0 %v10593_v23  ;;  %2207 = vmatpush.bf16.msra.mxu2 %v10721_v31  ;;  %v1954_v23 = vpop.f32.mrf.mxu3  ;;  %v15722_v31 = vld [vmem:[%s24386_s1 + $0x854] sm:$0xf0]  ;;  %v10769_v17 = vor.u32 %v15714_v39, %v10768_v0  ;;  %v10002_v32 = vld [vmem:[%s24386_s1 + $0x218] sm:$0xf0] }
  0xd1   :  { %2237 = vmatpush.bf16.msrb.mxu3 %v1849_v19  ;;  %v10673_v19 = vor.u32 %v15690_v6, %v10672_v5  ;;  %v18135_v26 = vadd.f32 %v1954_v23, %v1942_v18  ;;  %v10801_v46 = vor.u32 %v15722_v31, %v10800_v30  ;;  %v9970_v5 = vld [vmem:[%s24386_s1 + $0x1d8] sm:$0xf0]  ;;  %v15508_v23 = vld [vmem:[%s24386_s1 + $0x1ac] sm:$0xf] }
  0xd2   :  { %2187 = vmatmul.bf16.vlgmr.msra.gmra.mxu3 %v17200_v42  ;;  %v15520_v31 = vld [vmem:[%s24386_s1 + $0x20c] sm:$0xf] }
  0xd3   :  { %2219 = vmatpush.bf16.msrb.mxu1 %v10865_v34  ;;  %v10069_v34 = vor.u32 %v15536_v20, %v10066_v21  ;;  %v1943_v58 = vpop.f32.mrf.mxu2  ;;  %v9826_v20 = vld [vmem:[%s24386_s1 + $0xb8] sm:$0xf0]  ;;  %v10245_v21 = vor.u32 %v15580_v10, %v10242_v11  ;;  %v15496_v11 = vld [vmem:[%s24386_s1 + $0x14c] sm:$0xf] }
  0xd4   :  { %2195 = vmatpush.bf16.msra.mxu0 %v10577_v41  ;;  %2208 = vmatpush.bf16.msra.mxu2 %v10705_v49  ;;  %v10657_v41 = vor.u32 %v15686_v22, %v10656_v25  ;;  %v15682_v49 = vld [vmem:[%s24386_s1 + $0x714] sm:$0xf0]  ;;  %v10021_v25 = vor.u32 %v15524_v13, %v10018_v16  ;;  %v15576_v22 = vld [vmem:[%s24386_s1 + $0x3cc] sm:$0xf] }
  0xd5   :  { %2238 = vmatpush.bf16.msrb.mxu3 %v10897_v37  ;;  %v15650_v37 = vld [vmem:[%s24386_s1 + $0x614] sm:$0xf0]  ;;  %v10641_v59 = vor.u32 %v15682_v49, %v10640_v48  ;;  %v15572_v48 = vld [vmem:[%s24386_s1 + $0x3ac] sm:$0xf]  ;;  %v10210_v49 = vld [vmem:[%s24386_s1 + $0x3b8] sm:$0xf0] }
  0xd6   :  { %v10513_v51 = vor.u32 %v15650_v37, %v10512_v36  ;;  %v15472_v36 = vld [vmem:[%s24386_s1 + $0x8c] sm:$0xf]  ;;  %v9810_v37 = vld [vmem:[%s24386_s1 + $0x98] sm:$0xf0]  ;;  %v10213_v58 = vor.u32 %v15572_v48, %v10210_v49 }
  0xd7   :  { %2220 = vmatpush.bf16.msrb.mxu1 %v10849_v53  ;;  %v15718_v53 = vld [vmem:[%s24386_s1 + $0x834] sm:$0xf0]  ;;  %v18205_v6 = vpop.f32.mrf.mxu1  ;;  %v15564_v13 = vld [vmem:[%s24386_s1 + $0x36c] sm:$0xf]  ;;  %v9874_v49 = vld [vmem:[%s24386_s1 + $0x118] sm:$0xf0] }
  0xd8   :  { %2196 = vmatpush.bf16.msra.mxu0 %v10561_v57  ;;  %2209 = vmatpush.bf16.msra.mxu2 %v10689_v1  ;;  %v10785_v62 = vor.u32 %v15718_v53, %v10784_v50  ;;  %v15480_v1 = vld [vmem:[%s24386_s1 + $0xcc] sm:$0xf]  ;;  %v1956_v3 = vpop.f32.mrf.mxu3  ;;  %v10629_v50 = vor.u32 %v15676_v33, %v10626_v35  ;;  %v10162_v33 = vld [vmem:[%s24386_s1 + $0x358] sm:$0xf0] }
  0xd9   :  { %2270 = vmatpush.bf16.msra.mxu3 %v10117_v52  ;;  %v9858_v52 = vld [vmem:[%s24386_s1 + $0xf8] sm:$0xf0]  ;;  %v15672_v53 = vld [vmem:[%s24386_s1 + $0x6cc] sm:$0xf] }
  0xda   :  { %v9861_v57 = vor.u32 %v15484_v44, %v9858_v52  ;;  %v9938_v44 = vld [vmem:[%s24386_s1 + $0x198] sm:$0xf0]  ;;  %v15668_v3 = vld [vmem:[%s24386_s1 + $0x6ac] sm:$0xf] }
  0xdb   :  { %2221 = vmatpush.bf16.msrb.mxu1 %v10833_v4  ;;  %v15512_v4 = vld [vmem:[%s24386_s1 + $0x1cc] sm:$0xf]  ;;  %v9941_v54 = vor.u32 %v15504_v43, %v9938_v44  ;;  %v10562_v43 = vld [vmem:[%s24386_s1 + $0x678] sm:$0xf0] }
  0xdc   :  { %2197 = vmatpush.bf16.msra.mxu0 %v10545_v7  ;;  %2210 = vmatpush.bf16.msra.mxu2 %v10673_v19  ;;  %v9973_v18 = vor.u32 %v15512_v4, %v9970_v5  ;;  %v15476_v19 = vld [vmem:[%s24386_s1 + $0xac] sm:$0xf]  ;;  %v10594_v4 = vld [vmem:[%s24386_s1 + $0x6b8] sm:$0xf0] }
  0xdd   :  { %2271 = vmatpush.bf16.msra.mxu3 %v10101_v61  ;;  %v10034_v61 = vld [vmem:[%s24386_s1 + $0x258] sm:$0xf0]  ;;  %v9829_v30 = vor.u32 %v15476_v19, %v9826_v20  ;;  %v15464_v5 = vld [vmem:[%s24386_s1 + $0x4c] sm:$0xf]  ;;  %v10597_v16 = vor.u32 %v15668_v3, %v10594_v4 }
  0xde   :  { %v10037_v7 = vor.u32 %v15528_v60, %v10034_v61  ;;  %v9922_v60 = vld [vmem:[%s24386_s1 + $0x178] sm:$0xf0]  ;;  %v15456_v44 = vld [vmem:[%s24386_s1 + $0xc] sm:$0xf] }
  0xdf   :  { %2222 = vmatpush.bf16.msrb.mxu1 %v10817_v24  ;;  %v9954_v24 = vld [vmem:[%s24386_s1 + $0x1b8] sm:$0xf0]  ;;  %v1982_v52 = vpop.f32.mrf.mxu1  ;;  %v15488_v48 = vld [vmem:[%s24386_s1 + $0x10c] sm:$0xf] }
  0xe0   :  { %2198 = vmatpush.bf16.msra.mxu0 %v10529_v27  ;;  %2211 = vmatpush.bf16.msra.mxu2 %v10657_v41  ;;  %v10226_v27 = vld [vmem:[%s24386_s1 + $0x3d8] sm:$0xf0]  ;;  %v15552_v4 = vld [vmem:[%s24386_s1 + $0x30c] sm:$0xf] }
  0xe1   :  { %2272 = vmatpush.bf16.msra.mxu3 %v10085_v12  ;;  %v9845_v12 = vor.u32 %v15480_v1, %v9842_v2  ;;  %v10229_v41 = vor.u32 %v15576_v22, %v10226_v27  ;;  %v10613_v1 = vor.u32 %v15672_v53, %v10610_v55  ;;  %v15492_v27 = vld [vmem:[%s24386_s1 + $0x12c] sm:$0xf]  ;;  %v10370_v55 = vld [vmem:[%s24386_s1 + $0x4f8] sm:$0xf0] }
  0xe2   :  { %10904 = vmatmul.msk.bf16.vlgmr.msrb.gmra.mxu3 %vm1837_vm1, %v17318_v40  ;;  %v15556_v53 = vld [vmem:[%s24386_s1 + $0x32c] sm:$0xf] }
  0xe3   :  { %2223 = vmatpush.bf16.msrb.mxu1 %v10801_v46  ;;  %v10005_v46 = vor.u32 %v15520_v31, %v10002_v32  ;;  %v15560_v32 = vld [vmem:[%s24386_s1 + $0x34c] sm:$0xf] }
  0xe4   :  { %2199 = vmatpush.bf16.msra.mxu0 %v10513_v51  ;;  %2212 = vmatpush.bf16.msra.mxu2 %v10641_v59  ;;  %v9813_v51 = vor.u32 %v15472_v36, %v9810_v37  ;;  %v15500_v59 = vld [vmem:[%s24386_s1 + $0x16c] sm:$0xf]  ;;  %v1967_v61 = vpop.f32.mrf.mxu0 }
  0xe5   :  { %2273 = vmatpush.bf16.msra.mxu3 %v10069_v34  ;;  %v9957_v34 = vor.u32 %v15508_v23, %v9954_v24  ;;  %v1968_v0 = vadd.f32 %v1967_v61, %v18135_v26  ;;  %v9925_v39 = vor.u32 %v15500_v59, %v9922_v60  ;;  %v9778_v26 = vld [vmem:[%s24386_s1 + $0x58] sm:$0xf0]  ;;  %v15460_v23 = vld [vmem:[%s24386_s1 + $0x2c] sm:$0xf] }
  0xe6   :  { %v9762_v24 = vld [vmem:[%s24386_s1 + $0x38] sm:$0xf0] }
  0xe7   :  { %2224 = vmatpush.bf16.msrb.mxu1 %v10785_v62  ;;  %2200 = vmatmul.bf16.vlgmr.msra.gmra.mxu0 %v17189_v38  ;;  %v15568_v62 = vld [vmem:[%s24386_s1 + $0x38c] sm:$0xf]  ;;  %v9765_v37 = vor.u32 %v15460_v23, %v9762_v24 }
  0xe8   :  { %2244 = vmatpush.bf16.msrb.mxu0 %v9861_v57  ;;  %2257 = vmatpush.bf16.msrb.mxu2 %v9989_v63  ;;  %v9794_v57 = vld [vmem:[%s24386_s1 + $0x78] sm:$0xf0]  ;;  %v15604_v24 = vld [vmem:[%s24386_s1 + $0x4ac] sm:$0xf] }
  0xe9   :  { %2274 = vmatpush.bf16.msra.mxu3 %v10053_v56  ;;  %2213 = vmatmul.bf16.vlgmr.msra.gmra.mxu2 %v17210_v47  ;;  %v15468_v56 = vld [vmem:[%s24386_s1 + $0x6c] sm:$0xf]  ;;  %v10194_v63 = vld [vmem:[%s24386_s1 + $0x398] sm:$0xf0] }
  0xea   :  { %v9797_v2 = vor.u32 %v15468_v56, %v9794_v57  ;;  %v10197_v10 = vor.u32 %v15568_v62, %v10194_v63  ;;  %v10146_v56 = vld [vmem:[%s24386_s1 + $0x338] sm:$0xf0]  ;;  %v15644_v57 = vld [vmem:[%s24386_s1 + $0x5ec] sm:$0xf]  ;;  %v9877_v62 = vor.u32 %v15488_v48, %v9874_v49 }
  0xeb   :  { %2225 = vmatpush.bf16.msrb.mxu1 %v10769_v17  ;;  %v9781_v17 = vor.u32 %v15464_v5, %v9778_v26  ;;  %v2019_v19 = vpop.f32.mrf.mxu1  ;;  %v10149_v3 = vor.u32 %v15556_v53, %v10146_v56  ;;  %v15608_v5 = vld [vmem:[%s24386_s1 + $0x4cc] sm:$0xf]  ;;  %v10354_v26 = vld [vmem:[%s24386_s1 + $0x4d8] sm:$0xf0] }
  0xec   :  { %2245 = vmatpush.bf16.msrb.mxu0 %v9845_v12  ;;  %2258 = vmatpush.bf16.msrb.mxu2 %v9973_v18  ;;  %v9906_v12 = vld [vmem:[%s24386_s1 + $0x158] sm:$0xf0]  ;;  %v15664_v18 = vld [vmem:[%s24386_s1 + $0x68c] sm:$0xf] }
  0xed   :  { %2275 = vmatpush.bf16.msra.mxu3 %v10037_v7  ;;  %v18308_v7 = vadd.f32 %v18205_v6, %v1968_v0  ;;  %v10178_v6 = vld [vmem:[%s24386_s1 + $0x378] sm:$0xf0]  ;;  %v9909_v20 = vor.u32 %v15496_v11, %v9906_v12  ;;  %v2006_v31 = vpop.f32.mrf.mxu3  ;;  %v15656_v0 = vld [vmem:[%s24386_s1 + $0x64c] sm:$0xf] }
  0xee   :  { %2226 = vmatmul.bf16.vlgmr.msrb.gmra.mxu1 %v17404_v28  ;;  %v10181_v22 = vor.u32 %v15564_v13, %v10178_v6  ;;  %v10130_v11 = vld [vmem:[%s24386_s1 + $0x318] sm:$0xf0]  ;;  %v15640_v12 = vld [vmem:[%s24386_s1 + $0x5cc] sm:$0xf] }
  0xef   :  { %2283 = vmatpush.bf16.msra.mxu1 %v10245_v21  ;;  %v10578_v21 = vld [vmem:[%s24386_s1 + $0x698] sm:$0xf0]  ;;  %v15632_v48 = vld [vmem:[%s24386_s1 + $0x58c] sm:$0xf] }
  0xf0   :  { %2246 = vmatpush.bf16.msrb.mxu0 %v9829_v30  ;;  %2259 = vmatpush.bf16.msrb.mxu2 %v9957_v34  ;;  %v9890_v30 = vld [vmem:[%s24386_s1 + $0x138] sm:$0xf0]  ;;  %v1969_v34 = vpop.f32.mrf.mxu0  ;;  %v10581_v36 = vor.u32 %v15664_v18, %v10578_v21  ;;  %v10357_v18 = vor.u32 %v15608_v5, %v10354_v26  ;;  %v10133_v21 = vor.u32 %v15552_v4, %v10130_v11  ;;  %v15700_v53 = vld [vmem:[%s24386_s1 + $0x7ac] sm:$0xf]  ;;  %v11282_v5 = vld [vmem:[%s24386_s1 + $0x9d0] sm:$0xf] }
  0xf1   :  { %2276 = vmatpush.bf16.msra.mxu3 %v10021_v25  ;;  %v1993_v25 = vpop.f32.mrf.mxu2  ;;  %v9893_v52 = vor.u32 %v15492_v27, %v9890_v30  ;;  %v10482_v13 = vld [vmem:[%s24386_s1 + $0x5d8] sm:$0xf0]  ;;  %v15636_v27 = vld [vmem:[%s24386_s1 + $0x5ac] sm:$0xf]  ;;  %v15769_v11 = vld [vmem:[%s24386_s1 + $0x9dc] sm:$0xf0] }
  0xf2   :  { %v2007_v35 = vadd.f32 %v2006_v31, %v1993_v25  ;;  %v10485_v23 = vor.u32 %v15640_v12, %v10482_v13  ;;  %v10338_v25 = vld [vmem:[%s24386_s1 + $0x4b8] sm:$0xf0]  ;;  %v15592_v12 = vld [vmem:[%s24386_s1 + $0x44c] sm:$0xf] }
  0xf3   :  { %2284 = vmatpush.bf16.msra.mxu1 %v10229_v41  ;;  %v15660_v41 = vld [vmem:[%s24386_s1 + $0x66c] sm:$0xf]  ;;  %v2021_v61 = vpop.f32.mrf.mxu1  ;;  %v10466_v30 = vld [vmem:[%s24386_s1 + $0x5b8] sm:$0xf0]  ;;  %v10341_v34 = vor.u32 %v15604_v24, %v10338_v25  ;;  %v15765_v24 = vld [vmem:[%s24386_s1 + $0x9bc] sm:$0xf0] }
  0xf4   :  { %2247 = vmatpush.bf16.msrb.mxu0 %v9813_v51  ;;  %2260 = vmatpush.bf16.msrb.mxu2 %v9941_v54  ;;  %v10165_v51 = vor.u32 %v15560_v32, %v10162_v33  ;;  %v15612_v54 = vld [vmem:[%s24386_s1 + $0x4ec] sm:$0xf]  ;;  %v10565_v59 = vor.u32 %v15660_v41, %v10562_v43  ;;  %v10738_v33 = vld [vmem:[%s24386_s1 + $0x7d8] sm:$0xf0]  ;;  %v10469_v41 = vor.u32 %v15636_v27, %v10466_v30  ;;  %v15777_v43 = vld [vmem:[%s24386_s1 + $0xa1c] sm:$0xf0]  ;;  %v1248_v30 = vunpack.c.h.b16 %v17950_v29 }
  0xf5   :  { %2277 = vmatpush.bf16.msra.mxu3 %v10005_v46  ;;  %v9746_v46 = vld [vmem:[%s24386_s1 + $0x18] sm:$0xf0]  ;;  %v10373_v63 = vor.u32 %v15612_v54, %v10370_v55  ;;  %v15704_v32 = vld [vmem:[%s24386_s1 + $0x7cc] sm:$0xf] }
  0xf6   :  { %v9749_v60 = vor.u32 %v15456_v44, %v9746_v46  ;;  %v15600_v44 = vld [vmem:[%s24386_s1 + $0x48c] sm:$0xf]  ;;  %v10741_v46 = vor.u32 %v15704_v32, %v10738_v33  ;;  %v10450_v49 = vld [vmem:[%s24386_s1 + $0x598] sm:$0xf0] }
  0xf7   :  { %2285 = vmatpush.bf16.msra.mxu1 %v10213_v58  ;;  %v10498_v58 = vld [vmem:[%s24386_s1 + $0x5f8] sm:$0xf0]  ;;  %v15588_v25 = vld [vmem:[%s24386_s1 + $0x42c] sm:$0xf] }
  0xf8   :  { %2278 = vmatmul.bf16.vlgmr.msra.gmra.mxu3 %v17011_v8  ;;  %2248 = vmatpush.bf16.msrb.mxu0 %v9797_v2  ;;  %v10722_v54 = vld [vmem:[%s24386_s1 + $0x7b8] sm:$0xf0]  ;;  %v15620_v32 = vld [vmem:[%s24386_s1 + $0x52c] sm:$0xf] }
  0xf9   :  { %2322 = vmatpush.bf16.msrb.mxu3 %v10629_v50  ;;  %2261 = vmatpush.bf16.msrb.mxu2 %v9925_v39  ;;  %v18365_v50 = vadd.f32 %v2019_v19, %v2007_v35  ;;  %v1995_v2 = vpop.f32.mrf.mxu2  ;;  %v10501_v39 = vor.u32 %v15644_v57, %v10498_v58  ;;  %v15652_v19 = vld [vmem:[%s24386_s1 + $0x62c] sm:$0xf]  ;;  %v11298_v57 = vld [vmem:[%s24386_s1 + $0x9f0] sm:$0xf]  ;;  %v10453_v58 = vor.u32 %v15632_v48, %v10450_v49  ;;  %v10306_v61 = vld [vmem:[%s24386_s1 + $0x478] sm:$0xf0] }
  0xfa   :  { %v15648_v35 = vld [vmem:[%s24386_s1 + $0x60c] sm:$0xf]  ;;  %v10706_v2 = vld [vmem:[%s24386_s1 + $0x798] sm:$0xf0] }
  0xfb   :  { %2286 = vmatpush.bf16.msra.mxu1 %v10197_v10  ;;  %v2008_v10 = vpop.f32.mrf.mxu3  ;;  %v10290_v13 = vld [vmem:[%s24386_s1 + $0x458] sm:$0xf0]  ;;  %v15584_v49 = vld [vmem:[%s24386_s1 + $0x40c] sm:$0xf] }
  0xfc   :  { %2249 = vmatpush.bf16.msrb.mxu0 %v9781_v17  ;;  %v10754_v17 = vld [vmem:[%s24386_s1 + $0x7f8] sm:$0xf0] }
  0xfd   :  { %2323 = vmatpush.bf16.msrb.mxu3 %v10613_v1  ;;  %2262 = vmatpush.bf16.msrb.mxu2 %v9909_v20  ;;  %v10546_v1 = vld [vmem:[%s24386_s1 + $0x658] sm:$0xf0] }
  0xfe   :  { %v10549_v6 = vor.u32 %v15656_v0, %v10546_v1  ;;  %v10530_v20 = vld [vmem:[%s24386_s1 + $0x638] sm:$0xf0]  ;;  %v15696_v1 = vld [vmem:[%s24386_s1 + $0x78c] sm:$0xf] }
  0xff   :  { %2287 = vmatpush.bf16.msra.mxu1 %v10181_v22  ;;  %v10533_v31 = vor.u32 %v15652_v19, %v10530_v20  ;;  %v10434_v0 = vld [vmem:[%s24386_s1 + $0x578] sm:$0xf0]  ;;  %v11283_v19 = vor.u32 %v15769_v11, %v11282_v5  ;;  %v10293_v20 = vor.u32 %v15592_v12, %v10290_v13  ;;  %v15680_v5 = vld [vmem:[%s24386_s1 + $0x70c] sm:$0xf] }
 0x100   :  { %2250 = vmatpush.bf16.msrb.mxu0 %v9765_v37  ;;  %v11314_v37 = vld [vmem:[%s24386_s1 + $0xa10] sm:$0xf]  ;;  %v10402_v33 = vld [vmem:[%s24386_s1 + $0x538] sm:$0xf0]  ;;  %v15736_v12 = vld [vmem:[%s24386_s1 + $0x8cc] sm:$0xf] }
 0x101   :  { %2324 = vmatpush.bf16.msrb.mxu3 %v10597_v16  ;;  %2263 = vmatpush.bf16.msrb.mxu2 %v9893_v52  ;;  %v15708_v16 = vld [vmem:[%s24386_s1 + $0x7ec] sm:$0xf]  ;;  %v10322_v52 = vld [vmem:[%s24386_s1 + $0x498] sm:$0xf0]  ;;  %v11315_v55 = vor.u32 %v15777_v43, %v11314_v37  ;;  %v10405_v48 = vor.u32 %v15620_v32, %v10402_v33 }
 0x102   :  { %v10757_v22 = vor.u32 %v15708_v16, %v10754_v17  ;;  %v10325_v56 = vor.u32 %v15600_v44, %v10322_v52  ;;  %v10418_v16 = vld [vmem:[%s24386_s1 + $0x558] sm:$0xf0]  ;;  %v15692_v17 = vld [vmem:[%s24386_s1 + $0x76c] sm:$0xf]  ;;  %v11250_v52 = vld [vmem:[%s24386_s1 + $0x990] sm:$0xf] }
 0x103   :  { %2288 = vmatpush.bf16.msra.mxu1 %v10165_v51  ;;  %v10674_v29 = vld [vmem:[%s24386_s1 + $0x758] sm:$0xf0] }
 0x104   :  { %2251 = vmatpush.bf16.msrb.mxu0 %v9749_v60  ;;  %v15596_v60 = vld [vmem:[%s24386_s1 + $0x46c] sm:$0xf]  ;;  %v10642_v11 = vld [vmem:[%s24386_s1 + $0x718] sm:$0xf0] }
 0x105   :  { %2325 = vmatpush.bf16.msrb.mxu3 %v10581_v36  ;;  %2264 = vmatpush.bf16.msrb.mxu2 %v9877_v62  ;;  %v10514_v36 = vld [vmem:[%s24386_s1 + $0x618] sm:$0xf0]  ;;  %v10725_v62 = vor.u32 %v15700_v53, %v10722_v54  ;;  %v10309_v4 = vor.u32 %v15596_v60, %v10306_v61  ;;  %v15616_v53 = vld [vmem:[%s24386_s1 + $0x50c] sm:$0xf]  ;;  %v1544_v54 = vpack.c.b16 %v1248_v30, %v1248_v30 }
 0x106   :  { %v10517_v51 = vor.u32 %v15648_v35, %v10514_v36  ;;  %v15688_v36 = vld [vmem:[%s24386_s1 + $0x74c] sm:$0xf]  ;;  %v10658_v61 = vld [vmem:[%s24386_s1 + $0x738] sm:$0xf0] }
 0x107   :  { %2289 = vmatpush.bf16.msra.mxu1 %v10149_v3  ;;  %2252 = vmatmul.bf16.vlgmr.msrb.gmra.mxu0 %v17026_v15  ;;  %v2032_v3 = vpop.f32.mrf.mxu0  ;;  %v15684_v60 = vld [vmem:[%s24386_s1 + $0x72c] sm:$0xf]  ;;  %v10866_v13 = vld [vmem:[%s24386_s1 + $0x8d8] sm:$0xf0] }
 0x108   :  { %2296 = vmatpush.bf16.msra.mxu0 %v10373_v63  ;;  %2265 = vmatmul.bf16.vlgmr.msrb.gmra.mxu2 %v17024_v14  ;;  %v15628_v63 = vld [vmem:[%s24386_s1 + $0x56c] sm:$0xf]  ;;  %v2033_v26 = vadd.f32 %v2032_v3, %v18365_v50  ;;  %v10850_v32 = vld [vmem:[%s24386_s1 + $0x8b8] sm:$0xf0] }
 0x109   :  { %2326 = vmatpush.bf16.msrb.mxu3 %v10565_v59  ;;  %2309 = vmatpush.bf16.msra.mxu2 %v10501_v39  ;;  %v15773_v59 = vld [vmem:[%s24386_s1 + $0x9fc] sm:$0xf0]  ;;  %v10437_v10 = vor.u32 %v15628_v63, %v10434_v0  ;;  %v15624_v50 = vld [vmem:[%s24386_s1 + $0x54c] sm:$0xf] }
 0x10a   :  { %v11299_v39 = vor.u32 %v15773_v59, %v11298_v57  ;;  %v10386_v57 = vld [vmem:[%s24386_s1 + $0x518] sm:$0xf0] }
 0x10b   :  { %2290 = vmatpush.bf16.msra.mxu1 %v10133_v21  ;;  %v11266_v21 = vld [vmem:[%s24386_s1 + $0x9b0] sm:$0xf]  ;;  %v2071_v27 = vpop.f32.mrf.mxu1  ;;  %v10882_v59 = vld [vmem:[%s24386_s1 + $0x8f8] sm:$0xf0] }
 0x10c   :  { %2297 = vmatpush.bf16.msra.mxu0 %v10357_v18  ;;  %v10690_v18 = vld [vmem:[%s24386_s1 + $0x778] sm:$0xf0]  ;;  %v2045_v35 = vpop.f32.mrf.mxu2 }
 0x10d   :  { %2327 = vmatpush.bf16.msrb.mxu3 %v10549_v6  ;;  %2310 = vmatpush.bf16.msra.mxu2 %v10485_v23  ;;  %v10709_v6 = vor.u32 %v15696_v1, %v10706_v2  ;;  %v10421_v23 = vor.u32 %v15624_v50, %v10418_v16  ;;  %v2046_v44 = vadd.f32 %v2045_v35, %v2033_v26  ;;  %v11234_v1 = vld [vmem:[%s24386_s1 + $0x970] sm:$0xf]  ;;  %v15744_v50 = vld [vmem:[%s24386_s1 + $0x90c] sm:$0xf]  ;;  %v10898_v16 = vld [vmem:[%s24386_s1 + $0x918] sm:$0xf0] }
 0x10e   :  { %2291 = vmatmul.bf16.vlgmr.msra.gmra.mxu1 %v17013_v9  ;;  %v10389_v2 = vor.u32 %v15616_v53, %v10386_v57  ;;  %v10901_v30 = vor.u32 %v15744_v50, %v10898_v16  ;;  %v11426_v35 = vld [vmem:[%s24386_s1 + $0xaf0] sm:$0xf] }
 0x10f   :  { %2335 = vmatpush.bf16.msrb.mxu1 %v10757_v22  ;;  %v10274_v22 = vld [vmem:[%s24386_s1 + $0x438] sm:$0xf0]  ;;  %v2034_v37 = vpop.f32.mrf.mxu0  ;;  %v11794_v16 = vld [vmem:[%s24386_s1 + $0xdd0] sm:$0xf] }
 0x110   :  { %2298 = vmatpush.bf16.msra.mxu0 %v10341_v34  ;;  %v2058_v34 = vpop.f32.mrf.mxu3  ;;  %v10277_v43 = vor.u32 %v15588_v25, %v10274_v22  ;;  %v11218_v25 = vld [vmem:[%s24386_s1 + $0x950] sm:$0xf]  ;;  %v15753_v22 = vld [vmem:[%s24386_s1 + $0x95c] sm:$0xf0] }
 0x111   :  { %2328 = vmatpush.bf16.msrb.mxu3 %v10533_v31  ;;  %2311 = vmatpush.bf16.msra.mxu2 %v10469_v41  ;;  %v10693_v31 = vor.u32 %v15692_v17, %v10690_v18  ;;  %v11267_v41 = vor.u32 %v15765_v24, %v11266_v21  ;;  %v11442_v17 = vld [vmem:[%s24386_s1 + $0xb10] sm:$0xf]  ;;  %v10869_v24 = vor.u32 %v15736_v12, %v10866_v13  ;;  %v15829_v12 = vld [vmem:[%s24386_s1 + $0xbbc] sm:$0xf0] }
 0x112   :  { %v11570_v21 = vld [vmem:[%s24386_s1 + $0xc10] sm:$0xf] }
 0x113   :  { %2336 = vmatpush.bf16.msrb.mxu1 %v10741_v46  ;;  %v15761_v46 = vld [vmem:[%s24386_s1 + $0x99c] sm:$0xf0]  ;;  %v2073_v26 = vpop.f32.mrf.mxu1  ;;  %v11554_v37 = vld [vmem:[%s24386_s1 + $0xbf0] sm:$0xf] }
 0x114   :  { %2299 = vmatpush.bf16.msra.mxu0 %v10325_v56  ;;  %v2059_v56 = vadd.f32 %v2058_v34, %v2046_v44  ;;  %v2047_v18 = vpop.f32.mrf.mxu2  ;;  %v11202_v44 = vld [vmem:[%s24386_s1 + $0x930] sm:$0xf] }
 0x115   :  { %2329 = vmatpush.bf16.msrb.mxu3 %v10517_v51  ;;  %2312 = vmatpush.bf16.msra.mxu2 %v10453_v58  ;;  %v10258_v51 = vld [vmem:[%s24386_s1 + $0x418] sm:$0xf0]  ;;  %v15740_v58 = vld [vmem:[%s24386_s1 + $0x8ec] sm:$0xf] }
 0x116   :  { %v10261_v63 = vor.u32 %v15584_v49, %v10258_v51  ;;  %v18577_v0 = vadd.f32 %v2071_v27, %v2059_v56  ;;  %v10885_v3 = vor.u32 %v15740_v58, %v10882_v59  ;;  %v10645_v27 = vor.u32 %v15680_v5, %v10642_v11  ;;  %v15728_v49 = vld [vmem:[%s24386_s1 + $0x88c] sm:$0xf]  ;;  %v10834_v51 = vld [vmem:[%s24386_s1 + $0x898] sm:$0xf0]  ;;  %v15801_v58 = vld [vmem:[%s24386_s1 + $0xadc] sm:$0xf0] }
 0x117   :  { %2337 = vmatpush.bf16.msrb.mxu1 %v10725_v62  ;;  %v11251_v62 = vor.u32 %v15761_v46, %v11250_v52  ;;  %v15749_v52 = vld [vmem:[%s24386_s1 + $0x93c] sm:$0xf0]  ;;  %v11826_v46 = vld [vmem:[%s24386_s1 + $0xe10] sm:$0xf]  ;;  %v15720_v18 = vld [vmem:[%s24386_s1 + $0x84c] sm:$0xf] }
 0x118   :  { %2330 = vmatmul.bf16.vlgmr.msrb.gmra.mxu3 %v17189_v38  ;;  %2300 = vmatpush.bf16.msra.mxu0 %v10309_v4  ;;  %v15757_v4 = vld [vmem:[%s24386_s1 + $0x97c] sm:$0xf0]  ;;  %v11203_v57 = vor.u32 %v15749_v52, %v11202_v44  ;;  %v11538_v59 = vld [vmem:[%s24386_s1 + $0xbd0] sm:$0xf] }
 0x119   :  { %4151 = vmatpush.bf16.msra.mxu3 %v11315_v55  ;;  %2313 = vmatpush.bf16.msra.mxu2 %v10437_v10  ;;  %v10677_v55 = vor.u32 %v15688_v36, %v10674_v29  ;;  %v10661_v10 = vor.u32 %v15684_v60, %v10658_v61  ;;  %v11219_v36 = vor.u32 %v15753_v22, %v11218_v25  ;;  %v15805_v29 = vld [vmem:[%s24386_s1 + $0xafc] sm:$0xf0]  ;;  %v11394_v5 = vld [vmem:[%s24386_s1 + $0xab0] sm:$0xf] }
 0x11a   :  { %v11427_v53 = vor.u32 %v15805_v29, %v11426_v35  ;;  %v15833_v60 = vld [vmem:[%s24386_s1 + $0xbdc] sm:$0xf0]  ;;  %v11522_v11 = vld [vmem:[%s24386_s1 + $0xbb0] sm:$0xf] }
 0x11b   :  { %2338 = vmatpush.bf16.msrb.mxu1 %v10709_v6  ;;  %v2060_v6 = vpop.f32.mrf.mxu3  ;;  %v11506_v25 = vld [vmem:[%s24386_s1 + $0xb90] sm:$0xf]  ;;  %v15825_v22 = vld [vmem:[%s24386_s1 + $0xb9c] sm:$0xf0] }
 0x11c   :  { %2301 = vmatpush.bf16.msra.mxu0 %v10293_v20  ;;  %v15809_v20 = vld [vmem:[%s24386_s1 + $0xb1c] sm:$0xf0]  ;;  %v11490_v52 = vld [vmem:[%s24386_s1 + $0xb70] sm:$0xf] }
 0x11d   :  { %4152 = vmatpush.bf16.msra.mxu3 %v11299_v39  ;;  %2314 = vmatpush.bf16.msra.mxu2 %v10421_v23  ;;  %v1852_v39 = vsel %vm1841_vm0, %v1544_v54, 0  ;;  %v15841_v23 = vld [vmem:[%s24386_s1 + $0xc1c] sm:$0xf0]  ;;  %v11443_v33 = vor.u32 %v15809_v20, %v11442_v17  ;;  %v11523_v20 = vor.u32 %v15829_v12, %v11522_v11  ;;  %v11330_v11 = vld [vmem:[%s24386_s1 + $0xa30] sm:$0xf] }
 0x11e   :  { %v11571_v34 = vor.u32 %v15841_v23, %v11570_v21  ;;  %v15897_v17 = vld [vmem:[%s24386_s1 + $0xddc] sm:$0xf0]  ;;  %v11378_v21 = vld [vmem:[%s24386_s1 + $0xa90] sm:$0xf] }
 0x11f   :  { %2339 = vmatpush.bf16.msrb.mxu1 %v10693_v31  ;;  %v15732_v31 = vld [vmem:[%s24386_s1 + $0x8ac] sm:$0xf]  ;;  %v15789_v44 = vld [vmem:[%s24386_s1 + $0xa7c] sm:$0xf0] }
 0x120   :  { %2302 = vmatpush.bf16.msra.mxu0 %v10277_v43  ;;  %v10853_v43 = vor.u32 %v15732_v31, %v10850_v32  ;;  %v11778_v31 = vld [vmem:[%s24386_s1 + $0xdb0] sm:$0xf]  ;;  %v15893_v32 = vld [vmem:[%s24386_s1 + $0xdbc] sm:$0xf0] }
 0x121   :  { %4153 = vmatpush.bf16.msra.mxu3 %v11283_v19  ;;  %2315 = vmatpush.bf16.msra.mxu2 %v10405_v48  ;;  %v11235_v19 = vor.u32 %v15757_v4, %v11234_v1  ;;  %v15905_v48 = vld [vmem:[%s24386_s1 + $0xe1c] sm:$0xf0]  ;;  %v11539_v4 = vor.u32 %v15833_v60, %v11538_v59 }
 0x122   :  { %v11827_v61 = vor.u32 %v15905_v48, %v11826_v46  ;;  %v15901_v1 = vld [vmem:[%s24386_s1 + $0xdfc] sm:$0xf0] }
 0x123   :  { %2340 = vmatpush.bf16.msrb.mxu1 %v10677_v55  ;;  %v11410_v55 = vld [vmem:[%s24386_s1 + $0xad0] sm:$0xf]  ;;  %v18663_v56 = vpop.f32.mrf.mxu3  ;;  %v15821_v46 = vld [vmem:[%s24386_s1 + $0xb7c] sm:$0xf0] }
 0x124   :  { %2303 = vmatpush.bf16.msra.mxu0 %v10261_v63  ;;  %v11810_v63 = vld [vmem:[%s24386_s1 + $0xdf0] sm:$0xf]  ;;  %v2084_v26 = vpop.f32.mrf.mxu0  ;;  %v11491_v60 = vor.u32 %v15821_v46, %v11490_v52  ;;  %v15965_v52 = vld [vmem:[%s24386_s1 + $0xffc] sm:$0xf0] }
 0x125   :  { %4154 = vmatpush.bf16.msra.mxu3 %v11267_v41  ;;  %2316 = vmatpush.bf16.msra.mxu2 %v10389_v2  ;;  %v15837_v41 = vld [vmem:[%s24386_s1 + $0xbfc] sm:$0xf0]  ;;  %v15724_v2 = vld [vmem:[%s24386_s1 + $0x86c] sm:$0xf]  ;;  %v2085_v13 = vadd.f32 %v2084_v26, %v18577_v0  ;;  %v11811_v6 = vor.u32 %v15901_v1, %v11810_v63  ;;  %v11474_v1 = vld [vmem:[%s24386_s1 + $0xb50] sm:$0xf] }
 0x126   :  { %v11555_v54 = vor.u32 %v15837_v41, %v11554_v37  ;;  %v11507_v37 = vor.u32 %v15825_v22, %v11506_v25  ;;  %v11362_v41 = vld [vmem:[%s24386_s1 + $0xa70] sm:$0xf]  ;;  %v15785_v63 = vld [vmem:[%s24386_s1 + $0xa5c] sm:$0xf0] }
 0x127   :  { %2341 = vmatpush.bf16.msrb.mxu1 %v10661_v10  ;;  %2304 = vmatmul.bf16.vlgmr.msra.gmra.mxu0 %v17208_v45  ;;  %v15797_v10 = vld [vmem:[%s24386_s1 + $0xabc] sm:$0xf0]  ;;  %v11363_v59 = vor.u32 %v15789_v44, %v11362_v41  ;;  %v11746_v26 = vld [vmem:[%s24386_s1 + $0xd70] sm:$0xf] }
 0x128   :  { %2348 = vmatpush.bf16.msrb.mxu0 %v10885_v3  ;;  %2317 = vmatmul.bf16.vlgmr.msra.gmra.mxu2 %v17200_v42  ;;  %v10818_v3 = vld [vmem:[%s24386_s1 + $0x878] sm:$0xf0]  ;;  %v11395_v0 = vor.u32 %v15797_v10, %v11394_v5  ;;  %v15885_v10 = vld [vmem:[%s24386_s1 + $0xd7c] sm:$0xf0]  ;;  %v12082_v25 = vld [vmem:[%s24386_s1 + $0x1010] sm:$0xf] }
 0x129   :  { %4155 = vmatpush.bf16.msra.mxu3 %v11251_v62  ;;  %2367 = vmatpush.bf16.msrb.mxu2 %v1852_v39  ;;  %v10837_v62 = vor.u32 %v15728_v49, %v10834_v51  ;;  %v11411_v39 = vor.u32 %v15801_v58, %v11410_v55  ;;  %v10821_v50 = vor.u32 %v15724_v2, %v10818_v3  ;;  %v15889_v55 = vld [vmem:[%s24386_s1 + $0xd9c] sm:$0xf0]  ;;  %v10770_v58 = vld [vmem:[%s24386_s1 + $0x818] sm:$0xf0]  ;;  %v12066_v44 = vld [vmem:[%s24386_s1 + $0xff0] sm:$0xf] }
 0x12a   :  { %v11779_v49 = vor.u32 %v15893_v32, %v11778_v31  ;;  %v15817_v2 = vld [vmem:[%s24386_s1 + $0xb5c] sm:$0xf0] }
 0x12b   :  { %2342 = vmatpush.bf16.msrb.mxu1 %v10645_v27  ;;  %v2112_v23 = vpop.f32.mrf.mxu3  ;;  %v11795_v27 = vor.u32 %v15897_v17, %v11794_v16  ;;  %v2123_v35 = vpop.f32.mrf.mxu1  ;;  %v15781_v16 = vld [vmem:[%s24386_s1 + $0xa3c] sm:$0xf0]  ;;  %v11682_v17 = vld [vmem:[%s24386_s1 + $0xcf0] sm:$0xf] }
 0x12c   :  { %2349 = vmatpush.bf16.msrb.mxu0 %v10869_v24  ;;  %v15793_v24 = vld [vmem:[%s24386_s1 + $0xa9c] sm:$0xf0]  ;;  %v2086_v48 = vpop.f32.mrf.mxu0  ;;  %v11747_v23 = vor.u32 %v15885_v10, %v11746_v26  ;;  %v11331_v32 = vor.u32 %v15781_v16, %v11330_v11 }
 0x12d   :  { %4156 = vmatpush.bf16.msra.mxu3 %v11235_v19  ;;  %2368 = vmatpush.bf16.msrb.mxu2 %v10901_v30  ;;  %v10802_v19 = vld [vmem:[%s24386_s1 + $0x858] sm:$0xf0]  ;;  %v11379_v29 = vor.u32 %v15793_v24, %v11378_v21  ;;  %v11954_v21 = vld [vmem:[%s24386_s1 + $0xf10] sm:$0xf]  ;;  %v15937_v24 = vld [vmem:[%s24386_s1 + $0xf1c] sm:$0xf0] }
 0x12e   :  { %2343 = vmatmul.bf16.vlgmr.msrb.gmra.mxu1 %v17210_v47  ;;  %v10805_v30 = vor.u32 %v15720_v18, %v10802_v19  ;;  %v15869_v18 = vld [vmem:[%s24386_s1 + $0xcfc] sm:$0xf0] }
 0x12f   :  { %4164 = vmatpush.bf16.msra.mxu1 %v11443_v33  ;;  %v15716_v33 = vld [vmem:[%s24386_s1 + $0x82c] sm:$0xf]  ;;  %v15969_v22 = vld [vmem:[%s24386_s1 + $0x101c] sm:$0xf0] }
 0x130   :  { %2350 = vmatpush.bf16.msrb.mxu0 %v10853_v43  ;;  %v15881_v31 = vld [vmem:[%s24386_s1 + $0xd5c] sm:$0xf0] }
 0x131   :  { %4177 = vmatpush.bf16.msra.mxu2 %v11571_v34  ;;  %4157 = vmatpush.bf16.msra.mxu3 %v11219_v36  ;;  %v10786_v34 = vld [vmem:[%s24386_s1 + $0x838] sm:$0xf0]  ;;  %v2097_v36 = vpop.f32.mrf.mxu2  ;;  %v15857_v26 = vld [vmem:[%s24386_s1 + $0xc9c] sm:$0xf0] }
 0x132   :  { %v2098_v43 = vadd.f32 %v2097_v36, %v2085_v13  ;;  %v10789_v51 = vor.u32 %v15716_v33, %v10786_v34  ;;  %v11666_v34 = vld [vmem:[%s24386_s1 + $0xcd0] sm:$0xf]  ;;  %v11955_v36 = vor.u32 %v15937_v24, %v11954_v21  ;;  %v15957_v16 = vld [vmem:[%s24386_s1 + $0xfbc] sm:$0xf0] }
 0x133   :  { %4165 = vmatpush.bf16.msra.mxu1 %v11427_v53  ;;  %v11762_v53 = vld [vmem:[%s24386_s1 + $0xd90] sm:$0xf]  ;;  %v2125_v13 = vpop.f32.mrf.mxu1  ;;  %v16025_v21 = vld [vmem:[%s24386_s1 + $0x11dc] sm:$0xf0] }
 0x134   :  { %2351 = vmatpush.bf16.msrb.mxu0 %v10837_v62  ;;  %v15873_v62 = vld [vmem:[%s24386_s1 + $0xd1c] sm:$0xf0]  ;;  %v11763_v3 = vor.u32 %v15889_v55, %v11762_v53  ;;  %v12338_v53 = vld [vmem:[%s24386_s1 + $0x1210] sm:$0xf] }
 0x135   :  { %4178 = vmatpush.bf16.msra.mxu2 %v11555_v54  ;;  %4158 = vmatpush.bf16.msra.mxu3 %v11203_v57  ;;  %v18755_v54 = vadd.f32 %v18663_v56, %v2098_v43  ;;  %v15712_v57 = vld [vmem:[%s24386_s1 + $0x80c] sm:$0xf]  ;;  %v11346_v56 = vld [vmem:[%s24386_s1 + $0xa50] sm:$0xf]  ;;  %v15933_v43 = vld [vmem:[%s24386_s1 + $0xefc] sm:$0xf0] }
 0x136   :  { %v16033_v55 = vld [vmem:[%s24386_s1 + $0x121c] sm:$0xf0]  ;;  %v11906_v13 = vld [vmem:[%s24386_s1 + $0xeb0] sm:$0xf] }
 0x137   :  { %4166 = vmatpush.bf16.msra.mxu1 %v11411_v39  ;;  %v10773_v39 = vor.u32 %v15712_v57, %v10770_v58  ;;  %v11650_v57 = vld [vmem:[%s24386_s1 + $0xcb0] sm:$0xf]  ;;  %v15861_v58 = vld [vmem:[%s24386_s1 + $0xcbc] sm:$0xf0] }
 0x138   :  { %4159 = vmatmul.bf16.vlgmr.msra.gmra.mxu3 %v17026_v15  ;;  %2352 = vmatpush.bf16.msrb.mxu0 %v10821_v50  ;;  %v11475_v50 = vor.u32 %v15817_v2, %v11474_v1  ;;  %v15961_v1 = vld [vmem:[%s24386_s1 + $0xfdc] sm:$0xf0]  ;;  %v12339_v2 = vor.u32 %v16033_v55, %v12338_v53  ;;  %v18956_v55 = vld [vmem:[%s24386_s1 + $0x1250] sm:$0xff] }
 0x139   :  { %4203 = vmatpush.bf16.msrb.mxu3 %v11827_v61  ;;  %4179 = vmatpush.bf16.msra.mxu2 %v11539_v4  ;;  %v11698_v61 = vld [vmem:[%s24386_s1 + $0xd10] sm:$0xf]  ;;  %v2136_v4 = vpop.f32.mrf.mxu3  ;;  %v2099_v19 = vpop.f32.mrf.mxu2  ;;  %v15853_v24 = vld [vmem:[%s24386_s1 + $0xc7c] sm:$0xf0] }
 0x13a   :  { %10905 = vmatmul.msk.bf16.vlgmr.msrb.gmra.mxu2 %vm1837_vm1, %v17318_v40  ;;  %v11699_v5 = vor.u32 %v15873_v62, %v11698_v61  ;;  %v18793_v12 = vadd.f32 %v2136_v4, %v2123_v35  ;;  %v15865_v35 = vld [vmem:[%s24386_s1 + $0xcdc] sm:$0xf0] }
 0x13b   :  { %4167 = vmatpush.bf16.msra.mxu1 %v11395_v0  ;;  %v11458_v0 = vld [vmem:[%s24386_s1 + $0xb30] sm:$0xf]  ;;  %v11667_v48 = vor.u32 %v15865_v35, %v11666_v34  ;;  %v15929_v62 = vld [vmem:[%s24386_s1 + $0xedc] sm:$0xf0] }
 0x13c   :  { %2353 = vmatpush.bf16.msrb.mxu0 %v10805_v30  ;;  %v11730_v30 = vld [vmem:[%s24386_s1 + $0xd50] sm:$0xf]  ;;  %v16029_v4 = vld [vmem:[%s24386_s1 + $0x11fc] sm:$0xf0] }
 0x13d   :  { %4204 = vmatpush.bf16.msrb.mxu3 %v11811_v6  ;;  %4180 = vmatpush.bf16.msra.mxu2 %v11523_v20  ;;  %v11347_v6 = vor.u32 %v15785_v63, %v11346_v56  ;;  %v15813_v20 = vld [vmem:[%s24386_s1 + $0xb3c] sm:$0xf0]  ;;  %v11731_v41 = vor.u32 %v15881_v31, %v11730_v30  ;;  %v11922_v56 = vld [vmem:[%s24386_s1 + $0xed0] sm:$0xf] }
 0x13e   :  { %v11459_v33 = vor.u32 %v15813_v20, %v11458_v0  ;;  %v12050_v63 = vld [vmem:[%s24386_s1 + $0xfd0] sm:$0xf]  ;;  %v11923_v10 = vor.u32 %v15929_v62, %v11922_v56  ;;  %v15953_v31 = vld [vmem:[%s24386_s1 + $0xf9c] sm:$0xf0] }
 0x13f   :  { %4168 = vmatpush.bf16.msra.mxu1 %v11379_v29  ;;  %v12083_v29 = vor.u32 %v15969_v22, %v12082_v25  ;;  %v12051_v11 = vor.u32 %v15961_v1, %v12050_v63  ;;  %v12306_v0 = vld [vmem:[%s24386_s1 + $0x11d0] sm:$0xf]  ;;  %v16021_v35 = vld [vmem:[%s24386_s1 + $0x11bc] sm:$0xf0] }
 0x140   :  { %2354 = vmatpush.bf16.msrb.mxu0 %v10789_v51  ;;  %v15877_v51 = vld [vmem:[%s24386_s1 + $0xd3c] sm:$0xf0]  ;;  %v12018_v30 = vld [vmem:[%s24386_s1 + $0xf90] sm:$0xf] }
 0x141   :  { %4205 = vmatpush.bf16.msrb.mxu3 %v11795_v27  ;;  %4181 = vmatpush.bf16.msra.mxu2 %v11507_v37  ;;  %v11683_v27 = vor.u32 %v15869_v18, %v11682_v17  ;;  %v11938_v37 = vld [vmem:[%s24386_s1 + $0xef0] sm:$0xf]  ;;  %v2138_v46 = vpop.f32.mrf.mxu3 }
 0x142   :  { %v12290_v34 = vld [vmem:[%s24386_s1 + $0x11b0] sm:$0xf] }
 0x143   :  { %4169 = vmatpush.bf16.msra.mxu1 %v11363_v59  ;;  %v11939_v59 = vor.u32 %v15933_v43, %v11938_v37  ;;  %v12019_v43 = vor.u32 %v15953_v31, %v12018_v30  ;;  %v11586_v56 = vld [vmem:[%s24386_s1 + $0xc30] sm:$0xf]  ;;  %v15941_v30 = vld [vmem:[%s24386_s1 + $0xf3c] sm:$0xf0] }
 0x144   :  { %2355 = vmatpush.bf16.msrb.mxu0 %v10773_v39  ;;  %v12322_v39 = vld [vmem:[%s24386_s1 + $0x11f0] sm:$0xf]  ;;  %v2149_v17 = vpop.f32.mrf.mxu0 }
 0x145   :  { %4206 = vmatpush.bf16.msrb.mxu3 %v11779_v49  ;;  %4182 = vmatpush.bf16.msra.mxu2 %v11491_v60  ;;  %v11714_v49 = vld [vmem:[%s24386_s1 + $0xd30] sm:$0xf]  ;;  %v12067_v60 = vor.u32 %v15965_v52, %v12066_v44  ;;  %v12323_v18 = vor.u32 %v16029_v4, %v12322_v39  ;;  %v2150_v20 = vadd.f32 %v2149_v17, %v18793_v12  ;;  %v15917_v52 = vld [vmem:[%s24386_s1 + $0xe7c] sm:$0xf0]  ;;  %v3547_v4 = vunpack.c.l.b16 %v18956_v55 }
 0x146   :  { %v11715_v61 = vor.u32 %v15877_v51, %v11714_v49  ;;  %v11890_v12 = vld [vmem:[%s24386_s1 + $0xe90] sm:$0xf]  ;;  %v15949_v49 = vld [vmem:[%s24386_s1 + $0xf7c] sm:$0xf0] }
 0x147   :  { %4170 = vmatpush.bf16.msra.mxu1 %v11347_v6  ;;  %2356 = vmatmul.bf16.vlgmr.msrb.gmra.mxu0 %v17404_v28  ;;  %v15925_v6 = vld [vmem:[%s24386_s1 + $0xebc] sm:$0xf0]  ;;  %v11874_v44 = vld [vmem:[%s24386_s1 + $0xe70] sm:$0xf] }
 0x148   :  { %4190 = vmatpush.bf16.msra.mxu0 %v11699_v5  ;;  %v11634_v5 = vld [vmem:[%s24386_s1 + $0xc90] sm:$0xf]  ;;  %v11907_v25 = vor.u32 %v15925_v6, %v11906_v13  ;;  %v11875_v63 = vor.u32 %v15917_v52, %v11874_v44  ;;  %v16001_v39 = vld [vmem:[%s24386_s1 + $0x111c] sm:$0xf0] }
 0x149   :  { %4207 = vmatpush.bf16.msrb.mxu3 %v11763_v3  ;;  %4183 = vmatpush.bf16.msra.mxu2 %v11475_v50  ;;  %v11651_v3 = vor.u32 %v15861_v58, %v11650_v57  ;;  %v12034_v50 = vld [vmem:[%s24386_s1 + $0xfb0] sm:$0xf]  ;;  %v11635_v19 = vor.u32 %v15857_v26, %v11634_v5  ;;  %v12291_v57 = vor.u32 %v16021_v35, %v12290_v34  ;;  %v15913_v5 = vld [vmem:[%s24386_s1 + $0xe5c] sm:$0xf0] }
 0x14a   :  { %v12035_v22 = vor.u32 %v15957_v16, %v12034_v50  ;;  %v11986_v26 = vld [vmem:[%s24386_s1 + $0xf50] sm:$0xf]  ;;  %v16013_v17 = vld [vmem:[%s24386_s1 + $0x117c] sm:$0xf0] }
 0x14b   :  { %4171 = vmatpush.bf16.msra.mxu1 %v11331_v32  ;;  %v12307_v32 = vor.u32 %v16025_v21, %v12306_v0  ;;  %v2175_v37 = vpop.f32.mrf.mxu1  ;;  %v12258_v16 = vld [vmem:[%s24386_s1 + $0x1170] sm:$0xf]  ;;  %v15993_v44 = vld [vmem:[%s24386_s1 + $0x10dc] sm:$0xf0] }
 0x14c   :  { %4191 = vmatpush.bf16.msra.mxu0 %v11683_v27  ;;  %v15921_v27 = vld [vmem:[%s24386_s1 + $0xe9c] sm:$0xf0]  ;;  %v2162_v46 = vpop.f32.mrf.mxu2  ;;  %v2151_v53 = vpop.f32.mrf.mxu0  ;;  %v11842_v21 = vld [vmem:[%s24386_s1 + $0xe30] sm:$0xf]  ;;  %v12259_v31 = vor.u32 %v16013_v17, %v12258_v16  ;;  %v15867_v16 = vld [vmem:[%s24386_s1 + $0xcf4] sm:$0xf] }
 0x14d   :  { %4208 = vmatpush.bf16.msrb.mxu3 %v11747_v23  ;;  %4184 = vmatpush.bf16.msra.mxu2 %v11459_v33  ;;  %v11618_v23 = vld [vmem:[%s24386_s1 + $0xc70] sm:$0xf]  ;;  %v2163_v51 = vadd.f32 %v2162_v46, %v2150_v20  ;;  %v16037_v53 = vld [vmem:[%s24386_s1 + $0x123c] sm:$0xf0]  ;;  %v11684_v17 = vld [vmem:[%s24386_s1 + $0xd00] sm:$0xf0] }
 0x14e   :  { %4172 = vmatmul.bf16.vlgmr.msra.gmra.mxu1 %v17024_v14  ;;  %v11619_v33 = vor.u32 %v15853_v24, %v11618_v23  ;;  %v12194_v23 = vld [vmem:[%s24386_s1 + $0x10f0] sm:$0xf]  ;;  %v15997_v24 = vld [vmem:[%s24386_s1 + $0x10fc] sm:$0xf0] }
 0x14f   :  { %4216 = vmatpush.bf16.msrb.mxu1 %v11955_v36  ;;  %v11602_v36 = vld [vmem:[%s24386_s1 + $0xc50] sm:$0xf]  ;;  %v2176_v62 = vadd.f32 %v2175_v37, %v2163_v51  ;;  %v12195_v34 = vor.u32 %v15997_v24, %v12194_v23  ;;  %v15763_v24 = vld [vmem:[%s24386_s1 + $0x9b4] sm:$0xf] }
 0x150   :  { %4192 = vmatpush.bf16.msra.mxu0 %v11667_v48  ;;  %4185 = vmatmul.bf16.vlgmr.msra.gmra.mxu2 %v17011_v8  ;;  %v12002_v48 = vld [vmem:[%s24386_s1 + $0xf70] sm:$0xf] }
 0x151   :  { %4229 = vmatpush.bf16.msrb.mxu2 %v12083_v29  ;;  %4209 = vmatpush.bf16.msrb.mxu3 %v11731_v41  ;;  %v15849_v29 = vld [vmem:[%s24386_s1 + $0xc5c] sm:$0xf0]  ;;  %v11891_v41 = vor.u32 %v15921_v27, %v11890_v12  ;;  %v12003_v1 = vor.u32 %v15949_v49, %v12002_v48  ;;  %v11970_v27 = vld [vmem:[%s24386_s1 + $0xf30] sm:$0xf] }
 0x152   :  { %v11603_v58 = vor.u32 %v15849_v29, %v11602_v36  ;;  %v15909_v12 = vld [vmem:[%s24386_s1 + $0xe3c] sm:$0xf0]  ;;  %v12242_v35 = vld [vmem:[%s24386_s1 + $0x1150] sm:$0xf]  ;;  %v11971_v37 = vor.u32 %v15941_v30, %v11970_v27  ;;  %v11687_v27 = vor.u32 %v15867_v16, %v11684_v17  ;;  %v11444_v16 = vld [vmem:[%s24386_s1 + $0xb20] sm:$0xf0] }
 0x153   :  { %4217 = vmatpush.bf16.msrb.mxu1 %v11939_v59  ;;  %v12274_v59 = vld [vmem:[%s24386_s1 + $0x1190] sm:$0xf]  ;;  %v16009_v36 = vld [vmem:[%s24386_s1 + $0x115c] sm:$0xf0]  ;;  %v11843_v29 = vor.u32 %v15909_v12, %v11842_v21 }
 0x154   :  { %4193 = vmatpush.bf16.msra.mxu0 %v11651_v3  ;;  %v12210_v3 = vld [vmem:[%s24386_s1 + $0x1110] sm:$0xf]  ;;  %v16005_v48 = vld [vmem:[%s24386_s1 + $0x113c] sm:$0xf0]  ;;  %v12243_v51 = vor.u32 %v16009_v36, %v12242_v35 }
 0x155   :  { %4230 = vmatpush.bf16.msrb.mxu2 %v12067_v60  ;;  %4210 = vmatpush.bf16.msrb.mxu3 %v11715_v61  ;;  %v16017_v60 = vld [vmem:[%s24386_s1 + $0x119c] sm:$0xf0]  ;;  %v2188_v6 = vpop.f32.mrf.mxu3  ;;  %v12211_v50 = vor.u32 %v16001_v39, %v12210_v3  ;;  %v12226_v46 = vld [vmem:[%s24386_s1 + $0x1130] sm:$0xf] }
 0x156   :  { %v15845_v61 = vld [vmem:[%s24386_s1 + $0xc3c] sm:$0xf0]  ;;  %v12354_v49 = vld [vmem:[%s24386_s1 + $0x1230] sm:$0xf] }
 0x157   :  { %4218 = vmatpush.bf16.msrb.mxu1 %v11923_v10  ;;  %v15945_v10 = vld [vmem:[%s24386_s1 + $0xf5c] sm:$0xf0]  ;;  %v11587_v13 = vor.u32 %v15845_v61, %v11586_v56  ;;  %v15839_v56 = vld [vmem:[%s24386_s1 + $0xc14] sm:$0xf]  ;;  %v11572_v61 = vld [vmem:[%s24386_s1 + $0xc20] sm:$0xf0]  ;;  %v12355_v3 = vor.u32 %v16037_v53, %v12354_v49 }
 0x158   :  { %4211 = vmatmul.bf16.vlgmr.msrb.gmra.mxu3 %v17208_v45  ;;  %4194 = vmatpush.bf16.msra.mxu0 %v11635_v19  ;;  %v2177_v19 = vpop.f32.mrf.mxu1  ;;  %v11987_v20 = vor.u32 %v15945_v10, %v11986_v26  ;;  %v15767_v26 = vld [vmem:[%s24386_s1 + $0x9d4] sm:$0xf]  ;;  %v11284_v10 = vld [vmem:[%s24386_s1 + $0x9e0] sm:$0xf0]  ;;  %v15981_v35 = vld [vmem:[%s24386_s1 + $0x107c] sm:$0xf0] }
 0x159   :  { %4255 = vmatpush.bf16.msra.mxu3 %v12339_v2  ;;  %4231 = vmatpush.bf16.msrb.mxu2 %v12051_v11  ;;  %v11858_v2 = vld [vmem:[%s24386_s1 + $0xe50] sm:$0xf]  ;;  %v12275_v11 = vor.u32 %v16017_v60, %v12274_v59 }
 0x15a   :  { %v11859_v0 = vor.u32 %v15913_v5, %v11858_v2  ;;  %v15989_v2 = vld [vmem:[%s24386_s1 + $0x10bc] sm:$0xf0]  ;;  %v11575_v5 = vor.u32 %v15839_v56, %v11572_v61  ;;  %v12146_v19 = vld [vmem:[%s24386_s1 + $0x1090] sm:$0xf]  ;;  %v15755_v61 = vld [vmem:[%s24386_s1 + $0x974] sm:$0xf] }
 0x15b   :  { %4219 = vmatpush.bf16.msrb.mxu1 %v11907_v25  ;;  %v3843_v25 = vpack.c.b16 %v3547_v4, %v3547_v4  ;;  %v12227_v4 = vor.u32 %v16005_v48, %v12226_v46  ;;  %v11524_v46 = vld [vmem:[%s24386_s1 + $0xbc0] sm:$0xf0]  ;;  %v15859_v48 = vld [vmem:[%s24386_s1 + $0xcb4] sm:$0xf]  ;;  %v12114_v53 = vld [vmem:[%s24386_s1 + $0x1050] sm:$0xf] }
 0x15c   :  { %4195 = vmatpush.bf16.msra.mxu0 %v11619_v33  ;;  %v11316_v33 = vld [vmem:[%s24386_s1 + $0xa20] sm:$0xf0] }
 0x15d   :  { %4256 = vmatpush.bf16.msra.mxu3 %v12323_v18  ;;  %4232 = vmatpush.bf16.msrb.mxu2 %v12035_v22  ;;  %v18995_v18 = vadd.f32 %v2188_v6, %v2176_v62  ;;  %v2164_v22 = vpop.f32.mrf.mxu2  ;;  %v2190_v59 = vpop.f32.mrf.mxu3  ;;  %v15871_v62 = vld [vmem:[%s24386_s1 + $0xd14] sm:$0xf] }
 0x15e   :  { %v15835_v6 = vld [vmem:[%s24386_s1 + $0xbf4] sm:$0xf] }
 0x15f   :  { %4220 = vmatpush.bf16.msrb.mxu1 %v11891_v41  ;;  %v4140_v41 = vsel %vm1841_vm0, %v3843_v25, 0  ;;  %v11268_v25 = vld [vmem:[%s24386_s1 + $0x9c0] sm:$0xf0] }
 0x160   :  { %4196 = vmatpush.bf16.msra.mxu0 %v11603_v58  ;;  %v11300_v58 = vld [vmem:[%s24386_s1 + $0xa00] sm:$0xf0]  ;;  %v11271_v36 = vor.u32 %v15763_v24, %v11268_v25  ;;  %v15819_v24 = vld [vmem:[%s24386_s1 + $0xb74] sm:$0xf] }
 0x161   :  { %4257 = vmatpush.bf16.msra.mxu3 %v12307_v32  ;;  %4233 = vmatpush.bf16.msrb.mxu2 %v12019_v43  ;;  %v15775_v32 = vld [vmem:[%s24386_s1 + $0xa14] sm:$0xf]  ;;  %v12178_v43 = vld [vmem:[%s24386_s1 + $0x10d0] sm:$0xf]  ;;  %v11492_v25 = vld [vmem:[%s24386_s1 + $0xb80] sm:$0xf0] }
 0x162   :  { %v11319_v52 = vor.u32 %v15775_v32, %v11316_v33  ;;  %v12179_v60 = vor.u32 %v15993_v44, %v12178_v43  ;;  %v11540_v32 = vld [vmem:[%s24386_s1 + $0xbe0] sm:$0xf0]  ;;  %v15863_v33 = vld [vmem:[%s24386_s1 + $0xcd4] sm:$0xf] }
 0x163   :  { %4221 = vmatpush.bf16.msrb.mxu1 %v11875_v63  ;;  %v11700_v63 = vld [vmem:[%s24386_s1 + $0xd20] sm:$0xf0] }
 0x164   :  { %4197 = vmatpush.bf16.msra.mxu0 %v11587_v13  ;;  %v2201_v21 = vpop.f32.mrf.mxu0 }
 0x165   :  { %4258 = vmatpush.bf16.msra.mxu3 %v12291_v57  ;;  %4234 = vmatpush.bf16.msrb.mxu2 %v12003_v1  ;;  %v15771_v57 = vld [vmem:[%s24386_s1 + $0x9f4] sm:$0xf]  ;;  %v12162_v1 = vld [vmem:[%s24386_s1 + $0x10b0] sm:$0xf]  ;;  %v2240_v22 = vpop.f32.mrf.mxu3  ;;  %v2202_v12 = vadd.f32 %v2201_v21, %v18995_v18 }
 0x166   :  { %v11303_v39 = vor.u32 %v15771_v57, %v11300_v58  ;;  %v12163_v13 = vor.u32 %v15989_v2, %v12162_v1  ;;  %v12130_v18 = vld [vmem:[%s24386_s1 + $0x1070] sm:$0xf]  ;;  %v15977_v57 = vld [vmem:[%s24386_s1 + $0x105c] sm:$0xf0] }
 0x167   :  { %4222 = vmatpush.bf16.msrb.mxu1 %v11859_v0  ;;  %4198 = vmatmul.bf16.vlgmr.msra.gmra.mxu0 %v17013_v9  ;;  %v15985_v0 = vld [vmem:[%s24386_s1 + $0x109c] sm:$0xf0]  ;;  %v12131_v44 = vor.u32 %v15981_v35, %v12130_v18  ;;  %v11495_v18 = vor.u32 %v15819_v24, %v11492_v25  ;;  %v15747_v35 = vld [vmem:[%s24386_s1 + $0x934] sm:$0xf]  ;;  %v12068_v24 = vld [vmem:[%s24386_s1 + $0x1000] sm:$0xf0] }
 0x168   :  { %4242 = vmatpush.bf16.msrb.mxu0 %v12211_v50  ;;  %v11556_v50 = vld [vmem:[%s24386_s1 + $0xc00] sm:$0xf0]  ;;  %v12147_v30 = vor.u32 %v15985_v0, %v12146_v19  ;;  %v15751_v0 = vld [vmem:[%s24386_s1 + $0x954] sm:$0xf] }
 0x169   :  { %4259 = vmatpush.bf16.msra.mxu3 %v12275_v11  ;;  %4235 = vmatpush.bf16.msrb.mxu2 %v11987_v20  ;;  %v11703_v11 = vor.u32 %v15871_v62, %v11700_v63  ;;  %v11287_v20 = vor.u32 %v15767_v26, %v11284_v10  ;;  %v11559_v23 = vor.u32 %v15835_v6, %v11556_v50  ;;  %v11236_v62 = vld [vmem:[%s24386_s1 + $0x980] sm:$0xf0]  ;;  %v15807_v50 = vld [vmem:[%s24386_s1 + $0xb14] sm:$0xf] }
 0x16a   :  { %v11636_v10 = vld [vmem:[%s24386_s1 + $0xca0] sm:$0xf0]  ;;  %v11239_v6 = vor.u32 %v15755_v61, %v11236_v62  ;;  %v15843_v61 = vld [vmem:[%s24386_s1 + $0xc34] sm:$0xf] }
 0x16b   :  { %4223 = vmatpush.bf16.msrb.mxu1 %v11843_v29  ;;  %v2227_v49 = vpop.f32.mrf.mxu1  ;;  %v15995_v25 = vld [vmem:[%s24386_s1 + $0x10f4] sm:$0xf] }
 0x16c   :  { %4243 = vmatpush.bf16.msrb.mxu0 %v12195_v34  ;;  %v11668_v34 = vld [vmem:[%s24386_s1 + $0xce0] sm:$0xf0]  ;;  %v2214_v58 = vpop.f32.mrf.mxu2  ;;  %v2203_v63 = vpop.f32.mrf.mxu0 }
 0x16d   :  { %4260 = vmatpush.bf16.msra.mxu3 %v12259_v31  ;;  %4236 = vmatpush.bf16.msrb.mxu2 %v11971_v37  ;;  %v15831_v31 = vld [vmem:[%s24386_s1 + $0xbd4] sm:$0xf]  ;;  %v11671_v43 = vor.u32 %v15863_v33, %v11668_v34  ;;  %v2242_v1 = vpop.f32.mrf.mxu3  ;;  %v11428_v33 = vld [vmem:[%s24386_s1 + $0xb00] sm:$0xf0] }
 0x16e   :  { %4224 = vmatmul.bf16.vlgmr.msrb.gmra.mxu1 %v17200_v42  ;;  %v11543_v29 = vor.u32 %v15831_v31, %v11540_v32  ;;  %v15759_v37 = vld [vmem:[%s24386_s1 + $0x994] sm:$0xf]  ;;  %v11588_v63 = vld [vmem:[%s24386_s1 + $0xc40] sm:$0xf0] }
 0x16f   :  { %4274 = vmatpush.bf16.msra.mxu1 %v4140_v41  ;;  %v11252_v41 = vld [vmem:[%s24386_s1 + $0x9a0] sm:$0xf0]  ;;  %v15803_v32 = vld [vmem:[%s24386_s1 + $0xaf4] sm:$0xf] }
 0x170   :  { %4244 = vmatpush.bf16.msrb.mxu0 %v12179_v60  ;;  %4237 = vmatmul.bf16.vlgmr.msrb.gmra.mxu2 %v17189_v38  ;;  %v11255_v59 = vor.u32 %v15759_v37, %v11252_v41  ;;  %v2215_v60 = vadd.f32 %v2214_v58, %v2202_v12  ;;  %v15851_v12 = vld [vmem:[%s24386_s1 + $0xc74] sm:$0xf]  ;;  %v11476_v41 = vld [vmem:[%s24386_s1 + $0xb60] sm:$0xf0] }
 0x171   :  { %4281 = vmatpush.bf16.msra.mxu2 %v11319_v52  ;;  %4261 = vmatpush.bf16.msra.mxu3 %v12243_v51  ;;  %v15827_v52 = vld [vmem:[%s24386_s1 + $0xbb4] sm:$0xf]  ;;  %v11652_v51 = vld [vmem:[%s24386_s1 + $0xcc0] sm:$0xf0] }
 0x172   :  { %v11527_v56 = vor.u32 %v15827_v52, %v11524_v46  ;;  %v11655_v2 = vor.u32 %v15859_v48, %v11652_v51  ;;  %v2228_v26 = vadd.f32 %v2227_v49, %v2215_v60  ;;  %v11431_v52 = vor.u32 %v15803_v32, %v11428_v33  ;;  %v15847_v46 = vld [vmem:[%s24386_s1 + $0xc54] sm:$0xf]  ;;  %v11604_v48 = vld [vmem:[%s24386_s1 + $0xc60] sm:$0xf0] }
 0x173   :  { %4275 = vmatpush.bf16.msra.mxu1 %v12355_v3  ;;  %v12115_v3 = vor.u32 %v15977_v57, %v12114_v53  ;;  %v15799_v53 = vld [vmem:[%s24386_s1 + $0xad4] sm:$0xf]  ;;  %v11412_v57 = vld [vmem:[%s24386_s1 + $0xae0] sm:$0xf0]  ;;  %v11607_v62 = vor.u32 %v15847_v46, %v11604_v48 }
 0x174   :  { %4245 = vmatpush.bf16.msrb.mxu0 %v12163_v13  ;;  %v15973_v13 = vld [vmem:[%s24386_s1 + $0x103c] sm:$0xf0]  ;;  %v19177_v17 = vadd.f32 %v2240_v22, %v2228_v26  ;;  %v11447_v22 = vor.u32 %v15807_v50, %v11444_v16  ;;  %v2216_v34 = vpop.f32.mrf.mxu2  ;;  %v15811_v60 = vld [vmem:[%s24386_s1 + $0xb34] sm:$0xf]  ;;  %v12212_v26 = vld [vmem:[%s24386_s1 + $0x1120] sm:$0xf0]  ;;  %v11591_v50 = vor.u32 %v15843_v61, %v11588_v63 }
 0x175   :  { %4282 = vmatpush.bf16.msra.mxu2 %v11303_v39  ;;  %4262 = vmatpush.bf16.msra.mxu3 %v12227_v4  ;;  %v15823_v39 = vld [vmem:[%s24386_s1 + $0xb94] sm:$0xf]  ;;  %v11508_v4 = vld [vmem:[%s24386_s1 + $0xba0] sm:$0xf0] }
 0x176   :  { %v11511_v19 = vor.u32 %v15823_v39, %v11508_v4  ;;  %v15899_v1 = vld [vmem:[%s24386_s1 + $0xdf4] sm:$0xf]  ;;  %v12084_v4 = vld [vmem:[%s24386_s1 + $0x1020] sm:$0xf0] }
 0x177   :  { %4307 = vmatpush.bf16.msrb.mxu1 %v11575_v5  ;;  %v15855_v5 = vld [vmem:[%s24386_s1 + $0xc94] sm:$0xf]  ;;  %v11780_v34 = vld [vmem:[%s24386_s1 + $0xdc0] sm:$0xf0] }
 0x178   :  { %4263 = vmatmul.bf16.vlgmr.msra.gmra.mxu3 %v17404_v28  ;;  %4246 = vmatpush.bf16.msrb.mxu0 %v12147_v30  ;;  %v11639_v21 = vor.u32 %v15855_v5, %v11636_v10  ;;  %v2229_v30 = vpop.f32.mrf.mxu1  ;;  %v15967_v39 = vld [vmem:[%s24386_s1 + $0x1014] sm:$0xf]  ;;  %v12164_v61 = vld [vmem:[%s24386_s1 + $0x10c0] sm:$0xf0] }
 0x179   :  { %4320 = vmatpush.bf16.msrb.mxu3 %v11703_v11  ;;  %4283 = vmatpush.bf16.msra.mxu2 %v11287_v20  ;;  %v12098_v11 = vld [vmem:[%s24386_s1 + $0x1030] sm:$0xf]  ;;  %v11220_v20 = vld [vmem:[%s24386_s1 + $0x960] sm:$0xf0]  ;;  %v15999_v5 = vld [vmem:[%s24386_s1 + $0x1114] sm:$0xf]  ;;  %v12087_v16 = vor.u32 %v15967_v39, %v12084_v4 }
 0x17a   :  { %v11223_v31 = vor.u32 %v15751_v0, %v11220_v20  ;;  %v15795_v10 = vld [vmem:[%s24386_s1 + $0xab4] sm:$0xf]  ;;  %v11796_v0 = vld [vmem:[%s24386_s1 + $0xde0] sm:$0xf0]  ;;  %v12215_v20 = vor.u32 %v15999_v5, %v12212_v26 }
 0x17b   :  { %4308 = vmatpush.bf16.msrb.mxu1 %v11559_v23  ;;  %v12099_v23 = vor.u32 %v15973_v13, %v12098_v11  ;;  %v19229_v49 = vpop.f32.mrf.mxu3  ;;  %v11396_v11 = vld [vmem:[%s24386_s1 + $0xac0] sm:$0xf0]  ;;  %v15891_v33 = vld [vmem:[%s24386_s1 + $0xdb4] sm:$0xf] }
 0x17c   :  { %4247 = vmatpush.bf16.msrb.mxu0 %v12131_v44  ;;  %v11828_v44 = vld [vmem:[%s24386_s1 + $0xe20] sm:$0xf0]  ;;  %v11783_v46 = vor.u32 %v15891_v33, %v11780_v34  ;;  %v15883_v4 = vld [vmem:[%s24386_s1 + $0xd74] sm:$0xf] }
 0x17d   :  { %4321 = vmatpush.bf16.msrb.mxu3 %v11687_v27  ;;  %4284 = vmatpush.bf16.msra.mxu2 %v11271_v36  ;;  %v11620_v27 = vld [vmem:[%s24386_s1 + $0xc80] sm:$0xf0] }
 0x17e   :  { %12368 = vmatmul.msk.bf16.vlgmr.msra.gmra.mxu1 %vm1837_vm1, %v17318_v40  ;;  %v11204_v36 = vld [vmem:[%s24386_s1 + $0x940] sm:$0xf0]  ;;  %v11623_v37 = vor.u32 %v15851_v12, %v11620_v27  ;;  %v15791_v27 = vld [vmem:[%s24386_s1 + $0xa94] sm:$0xf] }
 0x17f   :  { %4309 = vmatpush.bf16.msrb.mxu1 %v11543_v29  ;;  %v15815_v29 = vld [vmem:[%s24386_s1 + $0xb54] sm:$0xf]  ;;  %v11207_v51 = vor.u32 %v15747_v35, %v11204_v36  ;;  %v12196_v12 = vld [vmem:[%s24386_s1 + $0x1100] sm:$0xf0] }
 0x180   :  { %4248 = vmatpush.bf16.msrb.mxu0 %v12115_v3  ;;  %v11479_v58 = vor.u32 %v15815_v29, %v11476_v41  ;;  %v11415_v3 = vor.u32 %v15799_v53, %v11412_v57  ;;  %v11380_v30 = vld [vmem:[%s24386_s1 + $0xaa0] sm:$0xf0]  ;;  %v12199_v35 = vor.u32 %v15995_v25, %v12196_v12  ;;  %v15959_v29 = vld [vmem:[%s24386_s1 + $0xfd4] sm:$0xf] }
 0x181   :  { %4322 = vmatpush.bf16.msrb.mxu3 %v11671_v43  ;;  %4285 = vmatpush.bf16.msra.mxu2 %v11255_v59  ;;  %v15903_v43 = vld [vmem:[%s24386_s1 + $0xe14] sm:$0xf]  ;;  %v11383_v36 = vor.u32 %v15791_v27, %v11380_v30  ;;  %v11764_v53 = vld [vmem:[%s24386_s1 + $0xda0] sm:$0xf0] }
 0x182   :  { %v11831_v59 = vor.u32 %v15903_v43, %v11828_v44  ;;  %v15991_v41 = vld [vmem:[%s24386_s1 + $0x10d4] sm:$0xf]  ;;  %v12180_v43 = vld [vmem:[%s24386_s1 + $0x10e0] sm:$0xf0] }
 0x183   :  { %4310 = vmatpush.bf16.msrb.mxu1 %v11527_v56  ;;  %v11460_v56 = vld [vmem:[%s24386_s1 + $0xb40] sm:$0xf0]  ;;  %v15787_v44 = vld [vmem:[%s24386_s1 + $0xa74] sm:$0xf]  ;;  %v12183_v57 = vor.u32 %v15991_v41, %v12180_v43 }
 0x184   :  { %4249 = vmatpush.bf16.msrb.mxu0 %v12099_v23  ;;  %v11463_v13 = vor.u32 %v15811_v60, %v11460_v56  ;;  %v15963_v23 = vld [vmem:[%s24386_s1 + $0xff4] sm:$0xf]  ;;  %v12036_v60 = vld [vmem:[%s24386_s1 + $0xfc0] sm:$0xf0] }
 0x185   :  { %4323 = vmatpush.bf16.msrb.mxu3 %v11655_v2  ;;  %4286 = vmatpush.bf16.msra.mxu2 %v11239_v6  ;;  %v11812_v2 = vld [vmem:[%s24386_s1 + $0xe00] sm:$0xf0]  ;;  %v12071_v32 = vor.u32 %v15963_v23, %v12068_v24  ;;  %v15987_v56 = vld [vmem:[%s24386_s1 + $0x10b4] sm:$0xf] }
 0x186   :  { %v11815_v6 = vor.u32 %v15899_v1, %v11812_v2  ;;  %v11348_v63 = vld [vmem:[%s24386_s1 + $0xa60] sm:$0xf0]  ;;  %v15935_v24 = vld [vmem:[%s24386_s1 + $0xf14] sm:$0xf] }
 0x187   :  { %4311 = vmatpush.bf16.msrb.mxu1 %v11511_v19  ;;  %4250 = vmatmul.bf16.vlgmr.msrb.gmra.mxu0 %v17210_v47  ;;  %v15895_v19 = vld [vmem:[%s24386_s1 + $0xdd4] sm:$0xf]  ;;  %v11748_v5 = vld [vmem:[%s24386_s1 + $0xd80] sm:$0xf0] }
 0x188   :  { %4294 = vmatpush.bf16.msra.mxu0 %v11447_v22  ;;  %v2281_v22 = vpop.f32.mrf.mxu3  ;;  %v11751_v23 = vor.u32 %v15883_v4, %v11748_v5  ;;  %v11956_v25 = vld [vmem:[%s24386_s1 + $0xf20] sm:$0xf0]  ;;  %v15879_v12 = vld [vmem:[%s24386_s1 + $0xd54] sm:$0xf] }
 0x189   :  { %4324 = vmatpush.bf16.msrb.mxu3 %v11639_v21  ;;  %4287 = vmatpush.bf16.msra.mxu2 %v11223_v31  ;;  %v11399_v21 = vor.u32 %v15795_v10, %v11396_v11  ;;  %v11799_v31 = vor.u32 %v15895_v19, %v11796_v0  ;;  %v12167_v11 = vor.u32 %v15987_v56, %v12164_v61  ;;  %v12148_v19 = vld [vmem:[%s24386_s1 + $0x10a0] sm:$0xf0]  ;;  %v15779_v0 = vld [vmem:[%s24386_s1 + $0xa34] sm:$0xf] }
 0x18a   :  { %v12004_v33 = vld [vmem:[%s24386_s1 + $0xf80] sm:$0xf0]  ;;  %v11959_v34 = vor.u32 %v15935_v24, %v11956_v25  ;;  %v15975_v56 = vld [vmem:[%s24386_s1 + $0x1054] sm:$0xf] }
 0x18b   :  { %4312 = vmatpush.bf16.msrb.mxu1 %v11495_v18  ;;  %v2253_v18 = vpop.f32.mrf.mxu0  ;;  %v2292_v1 = vpop.f32.mrf.mxu1  ;;  %v11940_v41 = vld [vmem:[%s24386_s1 + $0xf00] sm:$0xf0] }
 0x18c   :  { %4295 = vmatpush.bf16.msra.mxu0 %v11431_v52  ;;  %v11364_v52 = vld [vmem:[%s24386_s1 + $0xa80] sm:$0xf0] }
 0x18d   :  { %4325 = vmatpush.bf16.msrb.mxu3 %v11623_v37  ;;  %4288 = vmatpush.bf16.msra.mxu2 %v11207_v51  ;;  %v12052_v37 = vld [vmem:[%s24386_s1 + $0xfe0] sm:$0xf0]  ;;  %v15887_v51 = vld [vmem:[%s24386_s1 + $0xd94] sm:$0xf] }
 0x18e   :  { %v12055_v48 = vor.u32 %v15959_v29, %v12052_v37  ;;  %v11767_v2 = vor.u32 %v15887_v51, %v11764_v53  ;;  %v15931_v37 = vld [vmem:[%s24386_s1 + $0xef4] sm:$0xf]  ;;  %v11988_v53 = vld [vmem:[%s24386_s1 + $0xf60] sm:$0xf0] }
 0x18f   :  { %4313 = vmatpush.bf16.msrb.mxu1 %v11479_v58  ;;  %v11367_v58 = vor.u32 %v15787_v44, %v11364_v52  ;;  %v15875_v52 = vld [vmem:[%s24386_s1 + $0xd34] sm:$0xf]  ;;  %v12116_v61 = vld [vmem:[%s24386_s1 + $0x1060] sm:$0xf0] }
 0x190   :  { %4296 = vmatpush.bf16.msra.mxu0 %v11415_v3  ;;  %4289 = vmatmul.bf16.vlgmr.msra.gmra.mxu2 %v17026_v15  ;;  %v2266_v3 = vpop.f32.mrf.mxu2  ;;  %v12119_v4 = vor.u32 %v15975_v56, %v12116_v61  ;;  %v11972_v5 = vld [vmem:[%s24386_s1 + $0xf40] sm:$0xf0]  ;;  %v15915_v61 = vld [vmem:[%s24386_s1 + $0xe74] sm:$0xf] }
 0x191   :  { %4333 = vmatpush.bf16.msrb.mxu2 %v11831_v59  ;;  %4326 = vmatpush.bf16.msrb.mxu3 %v11607_v62  ;;  %v15955_v59 = vld [vmem:[%s24386_s1 + $0xfb4] sm:$0xf]  ;;  %v2267_v26 = vadd.f32 %v2266_v3, %v2253_v18 }
 0x192   :  { %v15783_v62 = vld [vmem:[%s24386_s1 + $0xa54] sm:$0xf]  ;;  %v12039_v39 = vor.u32 %v15955_v59, %v12036_v60  ;;  %v3548_v59 = vunpack.c.h.b16 %v18956_v55  ;;  %v11943_v60 = vor.u32 %v15931_v37, %v11940_v41  ;;  %v11924_v55 = vld [vmem:[%s24386_s1 + $0xee0] sm:$0xf0] }
 0x193   :  { %4314 = vmatpush.bf16.msrb.mxu1 %v11463_v13  ;;  %v2255_v10 = vpop.f32.mrf.mxu0  ;;  %v11351_v13 = vor.u32 %v15783_v62, %v11348_v63  ;;  %v15979_v18 = vld [vmem:[%s24386_s1 + $0x1074] sm:$0xf]  ;;  %v11892_v41 = vld [vmem:[%s24386_s1 + $0xea0] sm:$0xf0] }
 0x194   :  { %4297 = vmatpush.bf16.msra.mxu0 %v11399_v21  ;;  %v2280_v21 = vadd.f32 %v19229_v49, %v2267_v26  ;;  %v11732_v49 = vld [vmem:[%s24386_s1 + $0xd60] sm:$0xf0]  ;;  %v16027_v26 = vld [vmem:[%s24386_s1 + $0x11f4] sm:$0xf] }
 0x195   :  { %4334 = vmatpush.bf16.msrb.mxu2 %v11815_v6  ;;  %4327 = vmatpush.bf16.msrb.mxu3 %v11591_v50  ;;  %v15951_v6 = vld [vmem:[%s24386_s1 + $0xf94] sm:$0xf]  ;;  %v12020_v50 = vld [vmem:[%s24386_s1 + $0xfa0] sm:$0xf0]  ;;  %v11735_v29 = vor.u32 %v15879_v12, %v11732_v49 }
 0x196   :  { %4315 = vmatmul.bf16.vlgmr.msrb.gmra.mxu1 %v17011_v8  ;;  %v12023_v22 = vor.u32 %v15951_v6, %v12020_v50  ;;  %v19386_v27 = vadd.f32 %v2292_v1, %v2280_v21  ;;  %v15927_v1 = vld [vmem:[%s24386_s1 + $0xed4] sm:$0xf]  ;;  %v12324_v10 = vld [vmem:[%s24386_s1 + $0x1200] sm:$0xf0] }
 0x197   :  { %4359 = vmatpush.bf16.msra.mxu1 %v12087_v16  ;;  %v15983_v16 = vld [vmem:[%s24386_s1 + $0x1094] sm:$0xf]  ;;  %v12100_v50 = vld [vmem:[%s24386_s1 + $0x1040] sm:$0xf0] }
 0x198   :  { %4328 = vmatmul.bf16.vlgmr.msrb.gmra.mxu3 %v17013_v9  ;;  %4298 = vmatpush.bf16.msra.mxu0 %v11383_v36  ;;  %v12151_v30 = vor.u32 %v15983_v16, %v12148_v19  ;;  %v2294_v36 = vpop.f32.mrf.mxu1  ;;  %v2268_v43 = vpop.f32.mrf.mxu2  ;;  %v15971_v6 = vld [vmem:[%s24386_s1 + $0x1034] sm:$0xf]  ;;  %v11450_v16 = vld [vmem:[%s24386_s1 + $0xb18] sm:$0xf]  ;;  %v15810_v19 = vld [vmem:[%s24386_s1 + $0xb24] sm:$0xf0] }
 0x199   :  { %4372 = vmatpush.bf16.msra.mxu3 %v12215_v20  ;;  %4335 = vmatpush.bf16.msrb.mxu2 %v11799_v31  ;;  %v11332_v20 = vld [vmem:[%s24386_s1 + $0xa40] sm:$0xf0]  ;;  %v12103_v24 = vor.u32 %v15971_v6, %v12100_v50  ;;  %v11451_v49 = vor.u32 %v15810_v19, %v11450_v16  ;;  %v15778_v36 = vld [vmem:[%s24386_s1 + $0xa24] sm:$0xf0]  ;;  %v15919_v37 = vld [vmem:[%s24386_s1 + $0xe94] sm:$0xf] }
 0x19a   :  { %v11335_v31 = vor.u32 %v15779_v0, %v11332_v20  ;;  %v15923_v0 = vld [vmem:[%s24386_s1 + $0xeb4] sm:$0xf]  ;;  %v11908_v20 = vld [vmem:[%s24386_s1 + $0xec0] sm:$0xf0] }
 0x19b   :  { %4360 = vmatpush.bf16.msra.mxu1 %v12071_v32  ;;  %v15947_v32 = vld [vmem:[%s24386_s1 + $0xf74] sm:$0xf]  ;;  %v19431_v62 = vpop.f32.mrf.mxu3  ;;  %v12308_v12 = vld [vmem:[%s24386_s1 + $0x11e0] sm:$0xf0] }
 0x19c   :  { %4299 = vmatpush.bf16.msra.mxu0 %v11367_v58  ;;  %v12007_v44 = vor.u32 %v15947_v32, %v12004_v33  ;;  %v12340_v58 = vld [vmem:[%s24386_s1 + $0x1220] sm:$0xf0]  ;;  %v11434_v33 = vld [vmem:[%s24386_s1 + $0xaf8] sm:$0xf]  ;;  %v15911_v50 = vld [vmem:[%s24386_s1 + $0xe54] sm:$0xf] }
 0x19d   :  { %4373 = vmatpush.bf16.msra.mxu3 %v12199_v35  ;;  %4336 = vmatpush.bf16.msrb.mxu2 %v11783_v46  ;;  %v12132_v35 = vld [vmem:[%s24386_s1 + $0x1080] sm:$0xf0] }
 0x19e   :  { %v11716_v46 = vld [vmem:[%s24386_s1 + $0xd40] sm:$0xf0]  ;;  %v12135_v51 = vor.u32 %v15979_v18, %v12132_v35  ;;  %v15806_v18 = vld [vmem:[%s24386_s1 + $0xb04] sm:$0xf0]  ;;  %v11322_v35 = vld [vmem:[%s24386_s1 + $0xa18] sm:$0xf] }
 0x19f   :  { %4361 = vmatpush.bf16.msra.mxu1 %v12055_v48  ;;  %v15943_v48 = vld [vmem:[%s24386_s1 + $0xf54] sm:$0xf]  ;;  %v11719_v63 = vor.u32 %v15875_v52, %v11716_v46  ;;  %v12356_v32 = vld [vmem:[%s24386_s1 + $0x1240] sm:$0xf0] }
 0x1a0   :  { %4300 = vmatpush.bf16.msra.mxu0 %v11351_v13  ;;  %v11927_v13 = vor.u32 %v15927_v1, %v11924_v55  ;;  %v16019_v52 = vld [vmem:[%s24386_s1 + $0x11b4] sm:$0xf]  ;;  %v12292_v46 = vld [vmem:[%s24386_s1 + $0x11c0] sm:$0xf0] }
 0x1a1   :  { %4374 = vmatpush.bf16.msra.mxu3 %v12183_v57  ;;  %4337 = vmatpush.bf16.msrb.mxu2 %v11767_v2  ;;  %v16031_v57 = vld [vmem:[%s24386_s1 + $0x1214] sm:$0xf]  ;;  %v11991_v2 = vor.u32 %v15943_v48, %v11988_v53  ;;  %v11323_v53 = vor.u32 %v15778_v36, %v11322_v35  ;;  %v12295_v56 = vor.u32 %v16019_v52, %v12292_v46  ;;  %v12276_v55 = vld [vmem:[%s24386_s1 + $0x11a0] sm:$0xf0]  ;;  %v11578_v36 = vld [vmem:[%s24386_s1 + $0xc18] sm:$0xf] }
 0x1a2   :  { %v12343_v3 = vor.u32 %v16031_v57, %v12340_v58  ;;  %v11418_v57 = vld [vmem:[%s24386_s1 + $0xad8] sm:$0xf]  ;;  %v11895_v58 = vor.u32 %v15919_v37, %v11892_v41  ;;  %v16015_v1 = vld [vmem:[%s24386_s1 + $0x1194] sm:$0xf]  ;;  %v11860_v16 = vld [vmem:[%s24386_s1 + $0xe60] sm:$0xf0] }
 0x1a3   :  { %4362 = vmatpush.bf16.msra.mxu1 %v12039_v39  ;;  %v15939_v39 = vld [vmem:[%s24386_s1 + $0xf34] sm:$0xf]  ;;  %v12279_v6 = vor.u32 %v16015_v1, %v12276_v55  ;;  %v12244_v35 = vld [vmem:[%s24386_s1 + $0x1160] sm:$0xf0]  ;;  %v15790_v52 = vld [vmem:[%s24386_s1 + $0xa84] sm:$0xf0] }
 0x1a4   :  { %4301 = vmatpush.bf16.msra.mxu0 %v11335_v31  ;;  %v11975_v21 = vor.u32 %v15939_v39, %v11972_v5  ;;  %v16035_v31 = vld [vmem:[%s24386_s1 + $0x1234] sm:$0xf]  ;;  %v2305_v43 = vpop.f32.mrf.mxu0  ;;  %v11402_v39 = vld [vmem:[%s24386_s1 + $0xab8] sm:$0xf]  ;;  %v15874_v1 = vld [vmem:[%s24386_s1 + $0xd24] sm:$0xf0] }
 0x1a5   :  { %4375 = vmatpush.bf16.msra.mxu3 %v12167_v11  ;;  %4338 = vmatpush.bf16.msrb.mxu2 %v11751_v23  ;;  %v3844_v11 = vpack.c.b16 %v3548_v59, %v3548_v59  ;;  %v12327_v23 = vor.u32 %v16027_v26, %v12324_v10  ;;  %v2306_v48 = vadd.f32 %v2305_v43, %v19386_v27  ;;  %v15802_v59 = vld [vmem:[%s24386_s1 + $0xae4] sm:$0xf0]  ;;  %v11290_v10 = vld [vmem:[%s24386_s1 + $0x9d8] sm:$0xf] }
 0x1a6   :  { %v15774_v27 = vld [vmem:[%s24386_s1 + $0xa04] sm:$0xf0] }
 0x1a7   :  { %4363 = vmatpush.bf16.msra.mxu1 %v12023_v22  ;;  %4302 = vmatmul.bf16.vlgmr.msra.gmra.mxu0 %v17024_v14  ;;  %v4143_v25 = vsel %vm1841_vm0, %v3844_v11, 0  ;;  %v16023_v22 = vld [vmem:[%s24386_s1 + $0x11d4] sm:$0xf]  ;;  %v15798_v26 = vld [vmem:[%s24386_s1 + $0xac4] sm:$0xf0] }
 0x1a8   :  { %4346 = vmatpush.bf16.msrb.mxu0 %v11959_v34  ;;  %v2333_v34 = vpop.f32.mrf.mxu3  ;;  %v15770_v11 = vld [vmem:[%s24386_s1 + $0x9e4] sm:$0xf0] }
 0x1a9   :  { %4376 = vmatpush.bf16.msra.mxu3 %v12151_v30  ;;  %4339 = vmatpush.bf16.msrb.mxu2 %v11735_v29  ;;  %v11911_v30 = vor.u32 %v15923_v0, %v11908_v20  ;;  %v12311_v29 = vor.u32 %v16023_v22, %v12308_v12  ;;  %v16011_v0 = vld [vmem:[%s24386_s1 + $0x1174] sm:$0xf]  ;;  %v12260_v20 = vld [vmem:[%s24386_s1 + $0x1180] sm:$0xf0]  ;;  %v11863_v12 = vor.u32 %v15911_v50, %v11860_v16  ;;  %v11690_v16 = vld [vmem:[%s24386_s1 + $0xcf8] sm:$0xf] }
 0x1aa   :  { %v16007_v34 = vld [vmem:[%s24386_s1 + $0x1154] sm:$0xf] }
 0x1ab   :  { %4364 = vmatpush.bf16.msra.mxu1 %v12007_v44  ;;  %v12359_v44 = vor.u32 %v16035_v31, %v12356_v32  ;;  %v2344_v5 = vpop.f32.mrf.mxu1  ;;  %v15766_v31 = vld [vmem:[%s24386_s1 + $0x9c4] sm:$0xf0]  ;;  %v12263_v32 = vor.u32 %v16011_v0, %v12260_v20  ;;  %v11338_v20 = vld [vmem:[%s24386_s1 + $0xa38] sm:$0xf] }
 0x1ac   :  { %4347 = vmatpush.bf16.msrb.mxu0 %v11943_v60  ;;  %v11306_v60 = vld [vmem:[%s24386_s1 + $0x9f8] sm:$0xf] }
 0x1ad   :  { %4377 = vmatpush.bf16.msra.mxu3 %v12135_v51  ;;  %4340 = vmatpush.bf16.msrb.mxu2 %v11719_v63  ;;  %v11435_v51 = vor.u32 %v15806_v18, %v11434_v33  ;;  %v11876_v63 = vld [vmem:[%s24386_s1 + $0xe80] sm:$0xf0] }
 0x1ae   :  { %v11844_v33 = vld [vmem:[%s24386_s1 + $0xe40] sm:$0xf0] }
 0x1af   :  { %4365 = vmatpush.bf16.msra.mxu1 %v11991_v2  ;;  %v11419_v2 = vor.u32 %v15802_v59, %v11418_v57  ;;  %v11258_v57 = vld [vmem:[%s24386_s1 + $0x998] sm:$0xf]  ;;  %v16003_v59 = vld [vmem:[%s24386_s1 + $0x1134] sm:$0xf] }
 0x1b0   :  { %4348 = vmatpush.bf16.msrb.mxu0 %v11927_v13  ;;  %4341 = vmatmul.bf16.vlgmr.msrb.gmra.mxu2 %v17208_v45  ;;  %v2318_v13 = vpop.f32.mrf.mxu2 }
 0x1b1   :  { %4385 = vmatpush.bf16.msra.mxu2 %v12343_v3  ;;  %4378 = vmatpush.bf16.msra.mxu3 %v12119_v4  ;;  %v11307_v3 = vor.u32 %v15774_v27, %v11306_v60  ;;  %v11879_v4 = vor.u32 %v15915_v61, %v11876_v63  ;;  %v2319_v19 = vadd.f32 %v2318_v13, %v2306_v48  ;;  %v12228_v60 = vld [vmem:[%s24386_s1 + $0x1140] sm:$0xf0]  ;;  %v11562_v27 = vld [vmem:[%s24386_s1 + $0xbf8] sm:$0xf]  ;;  %v15834_v13 = vld [vmem:[%s24386_s1 + $0xbe4] sm:$0xf0] }
 0x1b2   :  { %v11706_v63 = vld [vmem:[%s24386_s1 + $0xd18] sm:$0xf] }
 0x1b3   :  { %4366 = vmatpush.bf16.msra.mxu1 %v11975_v21  ;;  %v2307_v21 = vpop.f32.mrf.mxu0  ;;  %v2332_v22 = vadd.f32 %v19431_v62, %v2319_v19  ;;  %v15907_v62 = vld [vmem:[%s24386_s1 + $0xe34] sm:$0xf]  ;;  %v2346_v46 = vpop.f32.mrf.mxu1  ;;  %v15870_v19 = vld [vmem:[%s24386_s1 + $0xd04] sm:$0xf0] }
 0x1b4   :  { %4349 = vmatpush.bf16.msrb.mxu0 %v11911_v30  ;;  %v11274_v30 = vld [vmem:[%s24386_s1 + $0x9b8] sm:$0xf]  ;;  %v11847_v43 = vor.u32 %v15907_v62, %v11844_v33  ;;  %v15782_v21 = vld [vmem:[%s24386_s1 + $0xa44] sm:$0xf0] }
 0x1b5   :  { %4386 = vmatpush.bf16.msra.mxu2 %v12327_v23  ;;  %4379 = vmatpush.bf16.msra.mxu3 %v12103_v24  ;;  %v11403_v23 = vor.u32 %v15798_v26, %v11402_v39  ;;  %v11291_v24 = vor.u32 %v15770_v11, %v11290_v10  ;;  %v19581_v18 = vadd.f32 %v2344_v5, %v2332_v22  ;;  %v11242_v5 = vld [vmem:[%s24386_s1 + $0x978] sm:$0xf]  ;;  %v15758_v26 = vld [vmem:[%s24386_s1 + $0x984] sm:$0xf0] }
 0x1b6   :  { %4367 = vmatmul.bf16.vlgmr.msra.gmra.mxu1 %v17189_v38  ;;  %v11275_v41 = vor.u32 %v15766_v31, %v11274_v30  ;;  %v12231_v39 = vor.u32 %v16003_v59, %v12228_v60  ;;  %v11707_v10 = vor.u32 %v15874_v1, %v11706_v63  ;;  %v11546_v11 = vld [vmem:[%s24386_s1 + $0xbd8] sm:$0xf]  ;;  %v11243_v0 = vor.u32 %v15758_v26, %v11242_v5  ;;  %v15862_v60 = vld [vmem:[%s24386_s1 + $0xcc4] sm:$0xf0] }
 0x1b7   :  { %4404 = vmatpush.bf16.msrb.mxu1 %v4143_v25  ;;  %v11386_v25 = vld [vmem:[%s24386_s1 + $0xa98] sm:$0xf]  ;;  %v11691_v30 = vor.u32 %v15870_v19, %v11690_v16  ;;  %v11339_v62 = vor.u32 %v15782_v21, %v11338_v20  ;;  %v15902_v5 = vld [vmem:[%s24386_s1 + $0xe04] sm:$0xf0] }
 0x1b8   :  { %4380 = vmatmul.bf16.vlgmr.msra.gmra.mxu3 %v17210_v47  ;;  %4350 = vmatpush.bf16.msrb.mxu0 %v11895_v58  ;;  %v2320_v48 = vpop.f32.mrf.mxu2  ;;  %v15762_v58 = vld [vmem:[%s24386_s1 + $0x9a4] sm:$0xf0]  ;;  %v11962_v22 = vld [vmem:[%s24386_s1 + $0xf18] sm:$0xf] }
 0x1b9   :  { %4424 = vmatpush.bf16.msrb.mxu3 %v11451_v49  ;;  %4387 = vmatpush.bf16.msra.mxu2 %v12311_v29  ;;  %v15794_v49 = vld [vmem:[%s24386_s1 + $0xaa4] sm:$0xf0]  ;;  %v11259_v55 = vor.u32 %v15762_v58, %v11258_v57  ;;  %v11530_v31 = vld [vmem:[%s24386_s1 + $0xbb8] sm:$0xf] }
 0x1ba   :  { %v15842_v29 = vld [vmem:[%s24386_s1 + $0xc24] sm:$0xf0]  ;;  %v11387_v37 = vor.u32 %v15794_v49, %v11386_v25  ;;  %v11674_v33 = vld [vmem:[%s24386_s1 + $0xcd8] sm:$0xf] }
 0x1bb   :  { %4405 = vmatpush.bf16.msrb.mxu1 %v12359_v44  ;;  %v11370_v44 = vld [vmem:[%s24386_s1 + $0xa78] sm:$0xf]  ;;  %v15754_v25 = vld [vmem:[%s24386_s1 + $0x964] sm:$0xf0] }
 0x1bc   :  { %4351 = vmatpush.bf16.msrb.mxu0 %v11879_v4  ;;  %v11371_v61 = vor.u32 %v15790_v52, %v11370_v44  ;;  %v15934_v44 = vld [vmem:[%s24386_s1 + $0xf04] sm:$0xf0]  ;;  %v11834_v52 = vld [vmem:[%s24386_s1 + $0xe18] sm:$0xf] }
 0x1bd   :  { %4425 = vmatpush.bf16.msrb.mxu3 %v11435_v51  ;;  %4388 = vmatpush.bf16.msra.mxu2 %v12295_v56  ;;  %v12247_v51 = vor.u32 %v16007_v34, %v12244_v35  ;;  %v15838_v56 = vld [vmem:[%s24386_s1 + $0xc04] sm:$0xf0]  ;;  %v11658_v59 = vld [vmem:[%s24386_s1 + $0xcb8] sm:$0xf] }
 0x1be   :  { %v11563_v4 = vor.u32 %v15838_v56, %v11562_v27  ;;  %v15866_v34 = vld [vmem:[%s24386_s1 + $0xce4] sm:$0xf0]  ;;  %v11498_v26 = vld [vmem:[%s24386_s1 + $0xb78] sm:$0xf] }
 0x1bf   :  { %4411 = vmatpush.bf16.msra.mxu1 %v11323_v53  ;;  %v11579_v53 = vor.u32 %v15842_v29, %v11578_v36  ;;  %v11210_v29 = vld [vmem:[%s24386_s1 + $0x938] sm:$0xf]  ;;  %v11675_v46 = vor.u32 %v15866_v34, %v11674_v33  ;;  %v15906_v48 = vld [vmem:[%s24386_s1 + $0xe24] sm:$0xf0] }
 0x1c0   :  { %4352 = vmatpush.bf16.msrb.mxu0 %v11863_v12  ;;  %v15938_v12 = vld [vmem:[%s24386_s1 + $0xf24] sm:$0xf0]  ;;  %v2370_v49 = vpop.f32.mrf.mxu2  ;;  %v11835_v63 = vor.u32 %v15906_v48, %v11834_v52  ;;  %v11802_v21 = vld [vmem:[%s24386_s1 + $0xdd8] sm:$0xf] }
 0x1c1   :  { %4426 = vmatpush.bf16.msrb.mxu3 %v11419_v2  ;;  %4389 = vmatpush.bf16.msra.mxu2 %v12279_v6  ;;  %v11354_v2 = vld [vmem:[%s24386_s1 + $0xa58] sm:$0xf]  ;;  %v19642_v6 = vpop.f32.mrf.mxu3  ;;  %v11963_v36 = vor.u32 %v15938_v12, %v11962_v22  ;;  %v15926_v20 = vld [vmem:[%s24386_s1 + $0xec4] sm:$0xf0] }
 0x1c2   :  { %v11482_v22 = vld [vmem:[%s24386_s1 + $0xb58] sm:$0xf]  ;;  %v15818_v12 = vld [vmem:[%s24386_s1 + $0xb64] sm:$0xf0] }
 0x1c3   :  { %4412 = vmatpush.bf16.msra.mxu1 %v11307_v3  ;;  %v15786_v3 = vld [vmem:[%s24386_s1 + $0xa64] sm:$0xf0]  ;;  %v11898_v33 = vld [vmem:[%s24386_s1 + $0xe98] sm:$0xf]  ;;  %v11483_v34 = vor.u32 %v15818_v12, %v11482_v22 }
 0x1c4   :  { %4353 = vmatpush.bf16.msrb.mxu0 %v11847_v43  ;;  %v11355_v50 = vor.u32 %v15786_v3, %v11354_v2  ;;  %v11946_v43 = vld [vmem:[%s24386_s1 + $0xef8] sm:$0xf]  ;;  %v2357_v58 = vpop.f32.mrf.mxu0  ;;  %v15930_v2 = vld [vmem:[%s24386_s1 + $0xee4] sm:$0xf0] }
 0x1c5   :  { %4427 = vmatpush.bf16.msrb.mxu3 %v11403_v23  ;;  %4390 = vmatpush.bf16.msra.mxu2 %v12263_v32  ;;  %v11226_v23 = vld [vmem:[%s24386_s1 + $0x958] sm:$0xf]  ;;  %v15830_v32 = vld [vmem:[%s24386_s1 + $0xbc4] sm:$0xf0]  ;;  %v2358_v27 = vadd.f32 %v2357_v58, %v19581_v18  ;;  %v11659_v18 = vor.u32 %v15862_v60, %v11658_v59 }
 0x1c6   :  { %12369 = vmatmul.msk.bf16.vlgmr.msrb.gmra.mxu1 %vm1837_vm1, %v17318_v40  ;;  %v11227_v35 = vor.u32 %v15754_v25, %v11226_v23  ;;  %v11818_v3 = vld [vmem:[%s24386_s1 + $0xdf8] sm:$0xf]  ;;  %v15898_v25 = vld [vmem:[%s24386_s1 + $0xde4] sm:$0xf0] }
 0x1c7   :  { %4413 = vmatpush.bf16.msra.mxu1 %v11291_v24  ;;  %4354 = vmatmul.bf16.vlgmr.msrb.gmra.mxu0 %v17200_v42  ;;  %v11547_v24 = vor.u32 %v15834_v13, %v11546_v11  ;;  %v11642_v11 = vld [vmem:[%s24386_s1 + $0xc98] sm:$0xf]  ;;  %v15858_v13 = vld [vmem:[%s24386_s1 + $0xca4] sm:$0xf0]  ;;  %v11819_v16 = vor.u32 %v15902_v5, %v11818_v3 }
 0x1c8   :  { %4437 = vmatpush.bf16.msra.mxu0 %v11579_v53  ;;  %v15826_v53 = vld [vmem:[%s24386_s1 + $0xba4] sm:$0xf0]  ;;  %v11882_v59 = vld [vmem:[%s24386_s1 + $0xe78] sm:$0xf] }
 0x1c9   :  { %4428 = vmatpush.bf16.msrb.mxu3 %v11387_v37  ;;  %4391 = vmatpush.bf16.msra.mxu2 %v12247_v51  ;;  %v15750_v37 = vld [vmem:[%s24386_s1 + $0x944] sm:$0xf0]  ;;  %v11514_v51 = vld [vmem:[%s24386_s1 + $0xb98] sm:$0xf]  ;;  %v4162_v57 = vpop.f32.mrf.mxu3 }
 0x1ca   :  { %v11211_v56 = vor.u32 %v15750_v37, %v11210_v29  ;;  %v11515_v1 = vor.u32 %v15826_v53, %v11514_v51  ;;  %v15894_v29 = vld [vmem:[%s24386_s1 + $0xdc4] sm:$0xf0]  ;;  %v11594_v3 = vld [vmem:[%s24386_s1 + $0xc38] sm:$0xf] }
 0x1cb   :  { %4414 = vmatpush.bf16.msra.mxu1 %v11275_v41  ;;  %v11531_v41 = vor.u32 %v15830_v32, %v11530_v31  ;;  %v4173_v23 = vpop.f32.mrf.mxu1  ;;  %v15854_v31 = vld [vmem:[%s24386_s1 + $0xc84] sm:$0xf0]  ;;  %v12058_v22 = vld [vmem:[%s24386_s1 + $0xfd8] sm:$0xf] }
 0x1cc   :  { %4438 = vmatpush.bf16.msra.mxu0 %v11563_v4  ;;  %v19722_v4 = vadd.f32 %v2370_v49, %v2358_v27  ;;  %v4174_v49 = vadd.f32 %v4173_v23, %v19642_v6  ;;  %v2359_v32 = vpop.f32.mrf.mxu0  ;;  %v11803_v6 = vor.u32 %v15898_v25, %v11802_v21  ;;  %v15850_v52 = vld [vmem:[%s24386_s1 + $0xc64] sm:$0xf0]  ;;  %v11754_v21 = vld [vmem:[%s24386_s1 + $0xd78] sm:$0xf] }
 0x1cd   :  { %4429 = vmatpush.bf16.msrb.mxu3 %v11371_v61  ;;  %4392 = vmatpush.bf16.msra.mxu2 %v12231_v39  ;;  %v11947_v61 = vor.u32 %v15934_v44, %v11946_v43  ;;  %v2372_v39 = vpop.f32.mrf.mxu2  ;;  %v15814_v43 = vld [vmem:[%s24386_s1 + $0xb44] sm:$0xf0]  ;;  %v11610_v44 = vld [vmem:[%s24386_s1 + $0xc58] sm:$0xf] }
 0x1ce   :  { %v15970_v48 = vld [vmem:[%s24386_s1 + $0x1024] sm:$0xf0] }
 0x1cf   :  { %4415 = vmatpush.bf16.msra.mxu1 %v11259_v55  ;;  %v11930_v55 = vld [vmem:[%s24386_s1 + $0xed8] sm:$0xf]  ;;  %v15918_v60 = vld [vmem:[%s24386_s1 + $0xe84] sm:$0xf0] }
 0x1d0   :  { %4393 = vmatmul.bf16.vlgmr.msra.gmra.mxu2 %v17404_v28  ;;  %4439 = vmatpush.bf16.msra.mxu0 %v11547_v24  ;;  %v11643_v24 = vor.u32 %v15858_v13, %v11642_v11  ;;  %v15846_v39 = vld [vmem:[%s24386_s1 + $0xc44] sm:$0xf0] }
 0x1d1   :  { %4450 = vmatpush.bf16.msrb.mxu2 %v11707_v10  ;;  %4430 = vmatpush.bf16.msrb.mxu3 %v11355_v50  ;;  %v15822_v10 = vld [vmem:[%s24386_s1 + $0xb84] sm:$0xf0]  ;;  %v11931_v50 = vor.u32 %v15930_v2, %v11930_v55  ;;  %v11770_v55 = vld [vmem:[%s24386_s1 + $0xd98] sm:$0xf] }
 0x1d2   :  { %v11499_v19 = vor.u32 %v15822_v10, %v11498_v26  ;;  %v15890_v2 = vld [vmem:[%s24386_s1 + $0xda4] sm:$0xf0]  ;;  %v11883_v26 = vor.u32 %v15918_v60, %v11882_v59  ;;  %v12218_v10 = vld [vmem:[%s24386_s1 + $0x1118] sm:$0xf] }
 0x1d3   :  { %4416 = vmatpush.bf16.msra.mxu1 %v11243_v0  ;;  %v11914_v0 = vld [vmem:[%s24386_s1 + $0xeb8] sm:$0xf]  ;;  %v15966_v5 = vld [vmem:[%s24386_s1 + $0x1004] sm:$0xf0] }
 0x1d4   :  { %4440 = vmatpush.bf16.msra.mxu0 %v11531_v41  ;;  %v11466_v41 = vld [vmem:[%s24386_s1 + $0xb38] sm:$0xf]  ;;  %v16002_v11 = vld [vmem:[%s24386_s1 + $0x1124] sm:$0xf0] }
 0x1d5   :  { %4451 = vmatpush.bf16.msrb.mxu2 %v11691_v30  ;;  %4431 = vmatpush.bf16.msrb.mxu3 %v11339_v62  ;;  %v11626_v30 = vld [vmem:[%s24386_s1 + $0xc78] sm:$0xf]  ;;  %v11915_v62 = vor.u32 %v15926_v20, %v11914_v0  ;;  %v4186_v53 = vpop.f32.mrf.mxu2  ;;  %v11467_v58 = vor.u32 %v15814_v43, %v11466_v41  ;;  %v11595_v0 = vor.u32 %v15846_v39, %v11594_v3  ;;  %v15886_v23 = vld [vmem:[%s24386_s1 + $0xd84] sm:$0xf0]  ;;  %v11580_v3 = vld [vmem:[%s24386_s1 + $0xc28] sm:$0xf0] }
 0x1d6   :  { %v11627_v37 = vor.u32 %v15854_v31, %v11626_v30  ;;  %v19802_v27 = vadd.f32 %v4186_v53, %v4174_v49  ;;  %v12219_v25 = vor.u32 %v16002_v11, %v12218_v10  ;;  %v15962_v12 = vld [vmem:[%s24386_s1 + $0xfe4] sm:$0xf0]  ;;  %v12202_v30 = vld [vmem:[%s24386_s1 + $0x10f8] sm:$0xf] }
 0x1d7   :  { %4417 = vmatpush.bf16.msra.mxu1 %v11227_v35  ;;  %v15922_v35 = vld [vmem:[%s24386_s1 + $0xea4] sm:$0xf0]  ;;  %v12042_v41 = vld [vmem:[%s24386_s1 + $0xfb8] sm:$0xf] }
 0x1d8   :  { %4432 = vmatmul.bf16.vlgmr.msrb.gmra.mxu3 %v17024_v14  ;;  %4441 = vmatpush.bf16.msra.mxu0 %v11515_v1  ;;  %v11899_v51 = vor.u32 %v15922_v35, %v11898_v33  ;;  %v15998_v31 = vld [vmem:[%s24386_s1 + $0x1104] sm:$0xf0]  ;;  %v11755_v33 = vor.u32 %v15886_v23, %v11754_v21  ;;  %v12059_v35 = vor.u32 %v15962_v12, %v12058_v22  ;;  %v11722_v53 = vld [vmem:[%s24386_s1 + $0xd38] sm:$0xf] }
 0x1d9   :  { %4476 = vmatpush.bf16.msra.mxu3 %v11963_v36  ;;  %4452 = vmatpush.bf16.msrb.mxu2 %v11675_v46  ;;  %v11786_v36 = vld [vmem:[%s24386_s1 + $0xdb8] sm:$0xf]  ;;  %v15958_v43 = vld [vmem:[%s24386_s1 + $0xfc4] sm:$0xf0] }
 0x1da   :  { %v12090_v46 = vld [vmem:[%s24386_s1 + $0x1018] sm:$0xf]  ;;  %v11787_v57 = vor.u32 %v15894_v29, %v11786_v36  ;;  %v15882_v29 = vld [vmem:[%s24386_s1 + $0xd64] sm:$0xf0]  ;;  %v12043_v59 = vor.u32 %v15958_v43, %v12042_v41 }
 0x1db   :  { %4418 = vmatpush.bf16.msra.mxu1 %v11211_v56  ;;  %v19807_v56 = vld [vmem:[%s24386_s1 + $0x1258] sm:$0xff]  ;;  %v12091_v1 = vor.u32 %v15970_v48, %v12090_v46  ;;  %v15994_v48 = vld [vmem:[%s24386_s1 + $0x10e4] sm:$0xf0] }
 0x1dc   :  { %4442 = vmatpush.bf16.msra.mxu0 %v11499_v19  ;;  %v3549_v13 = vunpack.c.l.b16 %v19807_v56  ;;  %v15914_v19 = vld [vmem:[%s24386_s1 + $0xe64] sm:$0xf0]  ;;  %v11738_v36 = vld [vmem:[%s24386_s1 + $0xd58] sm:$0xf] }
 0x1dd   :  { %4477 = vmatpush.bf16.msra.mxu3 %v11947_v61  ;;  %4453 = vmatpush.bf16.msrb.mxu2 %v11659_v18  ;;  %v4175_v61 = vpop.f32.mrf.mxu1  ;;  %v12074_v18 = vld [vmem:[%s24386_s1 + $0xff8] sm:$0xf]  ;;  %v16038_v60 = vld [vmem:[%s24386_s1 + $0x1244] sm:$0xf0] }
 0x1de   :  { %4419 = vmatmul.bf16.vlgmr.msra.gmra.mxu1 %v17026_v15  ;;  %v12075_v20 = vor.u32 %v15966_v5, %v12074_v18  ;;  %v3845_v32 = vpack.c.b16 %v3549_v13, %v3549_v13  ;;  %v12186_v46 = vld [vmem:[%s24386_s1 + $0x10d8] sm:$0xf]  ;;  %v15954_v18 = vld [vmem:[%s24386_s1 + $0xfa4] sm:$0xf0] }
 0x1df   :  { %4463 = vmatpush.bf16.msrb.mxu1 %v11835_v63  ;;  %v11611_v63 = vor.u32 %v15850_v52, %v11610_v44  ;;  %v12346_v61 = vld [vmem:[%s24386_s1 + $0x1218] sm:$0xf]  ;;  %v15946_v43 = vld [vmem:[%s24386_s1 + $0xf64] sm:$0xf0] }
 0x1e0   :  { %4443 = vmatpush.bf16.msra.mxu0 %v11483_v34  ;;  %v15910_v34 = vld [vmem:[%s24386_s1 + $0xe44] sm:$0xf0]  ;;  %v4146_v52 = vsel %vm1841_vm0, %v3845_v32, 0  ;;  %v12026_v39 = vld [vmem:[%s24386_s1 + $0xf98] sm:$0xf] }
 0x1e1   :  { %4478 = vmatpush.bf16.msra.mxu3 %v11931_v50  ;;  %4454 = vmatpush.bf16.msrb.mxu2 %v11643_v24  ;;  %v11771_v50 = vor.u32 %v15890_v2, %v11770_v55  ;;  %v19846_v24 = vpop.f32.mrf.mxu3  ;;  %v12187_v55 = vor.u32 %v15994_v48, %v12186_v46  ;;  %v15840_v2 = vld [vmem:[%s24386_s1 + $0xc1c] sm:$0xf]  ;;  %v12170_v5 = vld [vmem:[%s24386_s1 + $0x10b8] sm:$0xf]  ;;  %v12027_v21 = vor.u32 %v15954_v18, %v12026_v39  ;;  %v11324_v18 = vld [vmem:[%s24386_s1 + $0xa28] sm:$0xf0] }
 0x1e2   :  { %v12010_v22 = vld [vmem:[%s24386_s1 + $0xf78] sm:$0xf]  ;;  %v15776_v39 = vld [vmem:[%s24386_s1 + $0xa1c] sm:$0xf] }
 0x1e3   :  { %4464 = vmatpush.bf16.msrb.mxu1 %v11819_v16  ;;  %v11866_v16 = vld [vmem:[%s24386_s1 + $0xe58] sm:$0xf] }
 0x1e4   :  { %4444 = vmatpush.bf16.msra.mxu0 %v11467_v58  ;;  %v11867_v49 = vor.u32 %v15914_v19, %v11866_v16  ;;  %v12362_v58 = vld [vmem:[%s24386_s1 + $0x1238] sm:$0xf]  ;;  %v4199_v10 = vpop.f32.mrf.mxu0  ;;  %v11583_v19 = vor.u32 %v15840_v2, %v11580_v3  ;;  %v15978_v2 = vld [vmem:[%s24386_s1 + $0x1064] sm:$0xf0] }
 0x1e5   :  { %4479 = vmatpush.bf16.msra.mxu3 %v11915_v62  ;;  %4455 = vmatpush.bf16.msrb.mxu2 %v11627_v37  ;;  %v4188_v62 = vpop.f32.mrf.mxu2  ;;  %v12203_v37 = vor.u32 %v15998_v31, %v12202_v30  ;;  %v12363_v13 = vor.u32 %v16038_v60, %v12362_v58  ;;  %v12154_v30 = vld [vmem:[%s24386_s1 + $0x1098] sm:$0xf]  ;;  %v15986_v31 = vld [vmem:[%s24386_s1 + $0x10a4] sm:$0xf0]  ;;  %v15828_v60 = vld [vmem:[%s24386_s1 + $0xbbc] sm:$0xf] }
 0x1e6   :  { %v11994_v41 = vld [vmem:[%s24386_s1 + $0xf58] sm:$0xf] }
 0x1e7   :  { %4465 = vmatpush.bf16.msrb.mxu1 %v11803_v6  ;;  %4445 = vmatmul.bf16.vlgmr.msra.gmra.mxu0 %v17011_v8  ;;  %v11850_v6 = vld [vmem:[%s24386_s1 + $0xe38] sm:$0xf]  ;;  %v11995_v58 = vor.u32 %v15946_v43, %v11994_v41  ;;  %v15804_v41 = vld [vmem:[%s24386_s1 + $0xafc] sm:$0xf]  ;;  %v11436_v43 = vld [vmem:[%s24386_s1 + $0xb08] sm:$0xf0] }
 0x1e8   :  { %4489 = vmatpush.bf16.msrb.mxu0 %v12091_v1  ;;  %v11851_v44 = vor.u32 %v15910_v34, %v11850_v6  ;;  %v16026_v6 = vld [vmem:[%s24386_s1 + $0x11e4] sm:$0xf0] }
 0x1e9   :  { %4480 = vmatpush.bf16.msra.mxu3 %v11899_v51  ;;  %4456 = vmatpush.bf16.msrb.mxu2 %v11611_v63  ;;  %v11739_v51 = vor.u32 %v15882_v29, %v11738_v36  ;;  %v16034_v63 = vld [vmem:[%s24386_s1 + $0x1224] sm:$0xf0]  ;;  %v4214_v1 = vpop.f32.mrf.mxu3  ;;  %v15832_v29 = vld [vmem:[%s24386_s1 + $0xbdc] sm:$0xf] }
 0x1ea   :  { %v12347_v16 = vor.u32 %v16034_v63, %v12346_v61  ;;  %v11532_v61 = vld [vmem:[%s24386_s1 + $0xbc8] sm:$0xf0]  ;;  %v11978_v63 = vld [vmem:[%s24386_s1 + $0xf38] sm:$0xf]  ;;  %v15942_v1 = vld [vmem:[%s24386_s1 + $0xf44] sm:$0xf0] }
 0x1eb   :  { %4466 = vmatpush.bf16.msrb.mxu1 %v11787_v57  ;;  %v15878_v57 = vld [vmem:[%s24386_s1 + $0xd44] sm:$0xf0] }
 0x1ec   :  { %4490 = vmatpush.bf16.msrb.mxu0 %v12075_v20  ;;  %v11723_v11 = vor.u32 %v15878_v57, %v11722_v53  ;;  %v16030_v20 = vld [vmem:[%s24386_s1 + $0x1204] sm:$0xf0]  ;;  %v4201_v46 = vpop.f32.mrf.mxu0  ;;  %v12298_v53 = vld [vmem:[%s24386_s1 + $0x11b8] sm:$0xf] }
 0x1ed   :  { %4481 = vmatpush.bf16.msra.mxu3 %v11883_v26  ;;  %4457 = vmatpush.bf16.msrb.mxu2 %v11595_v0  ;;  %v15990_v26 = vld [vmem:[%s24386_s1 + $0x10c4] sm:$0xf0]  ;;  %v12330_v0 = vld [vmem:[%s24386_s1 + $0x11f8] sm:$0xf] }
 0x1ee   :  { %v12171_v23 = vor.u32 %v15990_v26, %v12170_v5  ;;  %v12331_v32 = vor.u32 %v16030_v20, %v12330_v0  ;;  %v16022_v57 = vld [vmem:[%s24386_s1 + $0x11c4] sm:$0xf0]  ;;  %v15824_v0 = vld [vmem:[%s24386_s1 + $0xb9c] sm:$0xf]  ;;  %v11516_v20 = vld [vmem:[%s24386_s1 + $0xba8] sm:$0xf0] }
 0x1ef   :  { %4467 = vmatpush.bf16.msrb.mxu1 %v11771_v50  ;;  %v4200_v50 = vadd.f32 %v4199_v10, %v19802_v27  ;;  %v15836_v27 = vld [vmem:[%s24386_s1 + $0xbfc] sm:$0xf]  ;;  %v12299_v26 = vor.u32 %v16022_v57, %v12298_v53  ;;  %v11535_v10 = vor.u32 %v15828_v60, %v11532_v61  ;;  %v11484_v57 = vld [vmem:[%s24386_s1 + $0xb68] sm:$0xf0]  ;;  %v11439_v60 = vor.u32 %v15804_v41, %v11436_v43 }
 0x1f0   :  { %4458 = vmatmul.bf16.vlgmr.msrb.gmra.mxu2 %v17013_v9  ;;  %4491 = vmatpush.bf16.msrb.mxu0 %v12059_v35  ;;  %v12155_v35 = vor.u32 %v15986_v31, %v12154_v30  ;;  %v11519_v31 = vor.u32 %v15824_v0, %v11516_v20  ;;  %v15816_v53 = vld [vmem:[%s24386_s1 + $0xb5c] sm:$0xf]  ;;  %v12092_v20 = vld [vmem:[%s24386_s1 + $0x1028] sm:$0xf0] }
 0x1f1   :  { %4502 = vmatpush.bf16.msra.mxu2 %v12219_v25  ;;  %4482 = vmatpush.bf16.msra.mxu3 %v11867_v49  ;;  %v11564_v25 = vld [vmem:[%s24386_s1 + $0xc08] sm:$0xf0]  ;;  %v4213_v12 = vadd.f32 %v19846_v24, %v4200_v50  ;;  %v15950_v49 = vld [vmem:[%s24386_s1 + $0xf84] sm:$0xf0]  ;;  %v12314_v24 = vld [vmem:[%s24386_s1 + $0x11d8] sm:$0xf]  ;;  %v11979_v50 = vor.u32 %v15942_v1, %v11978_v63 }
 0x1f2   :  { %v11567_v62 = vor.u32 %v15836_v27, %v11564_v25  ;;  %v12011_v34 = vor.u32 %v15950_v49, %v12010_v22  ;;  %v12315_v48 = vor.u32 %v16026_v6, %v12314_v24  ;;  %v15974_v27 = vld [vmem:[%s24386_s1 + $0x1044] sm:$0xf0]  ;;  %v15772_v25 = vld [vmem:[%s24386_s1 + $0x9fc] sm:$0xf]  ;;  %v11308_v22 = vld [vmem:[%s24386_s1 + $0xa08] sm:$0xf0] }
 0x1f3   :  { %4468 = vmatpush.bf16.msrb.mxu1 %v11755_v33  ;;  %v4225_v33 = vpop.f32.mrf.mxu1  ;;  %v4238_v3 = vpop.f32.mrf.mxu2  ;;  %v11452_v49 = vld [vmem:[%s24386_s1 + $0xb28] sm:$0xf0]  ;;  %v16014_v24 = vld [vmem:[%s24386_s1 + $0x1184] sm:$0xf0]  ;;  %v15820_v6 = vld [vmem:[%s24386_s1 + $0xb7c] sm:$0xf] }
 0x1f4   :  { %4492 = vmatpush.bf16.msrb.mxu0 %v12043_v59  ;;  %v4226_v36 = vadd.f32 %v4225_v33, %v4213_v12  ;;  %v15808_v12 = vld [vmem:[%s24386_s1 + $0xb1c] sm:$0xf]  ;;  %v11276_v63 = vld [vmem:[%s24386_s1 + $0x9c8] sm:$0xf0] }
 0x1f5   :  { %4503 = vmatpush.bf16.msra.mxu2 %v12203_v37  ;;  %4483 = vmatpush.bf16.msra.mxu3 %v11851_v44  ;;  %v11548_v37 = vld [vmem:[%s24386_s1 + $0xbe8] sm:$0xf0]  ;;  %v12138_v44 = vld [vmem:[%s24386_s1 + $0x1078] sm:$0xf]  ;;  %v15764_v61 = vld [vmem:[%s24386_s1 + $0x9bc] sm:$0xf] }
 0x1f6   :  { %v20005_v5 = vadd.f32 %v4238_v3, %v4226_v36  ;;  %v11455_v36 = vor.u32 %v15808_v12, %v11452_v49  ;;  %v15800_v1 = vld [vmem:[%s24386_s1 + $0xadc] sm:$0xf]  ;;  %v11487_v3 = vor.u32 %v15816_v53, %v11484_v57  ;;  %v11244_v41 = vld [vmem:[%s24386_s1 + $0x988] sm:$0xf0] }
 0x1f7   :  { %4469 = vmatpush.bf16.msrb.mxu1 %v11739_v51  ;;  %v11551_v51 = vor.u32 %v15832_v29, %v11548_v37  ;;  %v15768_v29 = vld [vmem:[%s24386_s1 + $0x9dc] sm:$0xf]  ;;  %v11292_v37 = vld [vmem:[%s24386_s1 + $0x9e8] sm:$0xf0] }
 0x1f8   :  { %4484 = vmatmul.bf16.vlgmr.msra.gmra.mxu3 %v17200_v42  ;;  %4493 = vmatpush.bf16.msrb.mxu0 %v12027_v21  ;;  %v11327_v21 = vor.u32 %v15776_v39, %v11324_v18  ;;  %v12234_v39 = vld [vmem:[%s24386_s1 + $0x1138] sm:$0xf]  ;;  %v16006_v18 = vld [vmem:[%s24386_s1 + $0x1144] sm:$0xf0]  ;;  %v15968_v0 = vld [vmem:[%s24386_s1 + $0x101c] sm:$0xf] }
 0x1f9   :  { %4534 = vmatpush.bf16.msrb.mxu3 %v4146_v52  ;;  %4504 = vmatpush.bf16.msra.mxu2 %v12187_v55  ;;  %v15982_v52 = vld [vmem:[%s24386_s1 + $0x1084] sm:$0xf0]  ;;  %v12122_v55 = vld [vmem:[%s24386_s1 + $0x1058] sm:$0xf]  ;;  %v12235_v49 = vor.u32 %v16006_v18, %v12234_v39  ;;  %v11388_v43 = vld [vmem:[%s24386_s1 + $0xaa8] sm:$0xf0] }
 0x1fa   :  { %v12139_v59 = vor.u32 %v15982_v52, %v12138_v44  ;;  %v15860_v18 = vld [vmem:[%s24386_s1 + $0xcbc] sm:$0xf] }
 0x1fb   :  { %4470 = vmatpush.bf16.msrb.mxu1 %v11723_v11  ;;  %v4227_v11 = vpop.f32.mrf.mxu1  ;;  %v4240_v44 = vpop.f32.mrf.mxu2 }
 0x1fc   :  { %4494 = vmatpush.bf16.msrb.mxu0 %v12011_v34  ;;  %v11500_v34 = vld [vmem:[%s24386_s1 + $0xb88] sm:$0xf0] }
 0x1fd   :  { %4535 = vmatpush.bf16.msrb.mxu3 %v12363_v13  ;;  %4505 = vmatpush.bf16.msra.mxu2 %v12171_v23  ;;  %v12282_v13 = vld [vmem:[%s24386_s1 + $0x1198] sm:$0xf]  ;;  %v11503_v46 = vor.u32 %v15820_v6, %v11500_v34  ;;  %v11468_v11 = vld [vmem:[%s24386_s1 + $0xb48] sm:$0xf0] }
 0x1fe   :  { %4471 = vmatmul.bf16.vlgmr.msrb.gmra.mxu1 %v17208_v45  ;;  %v12106_v23 = vld [vmem:[%s24386_s1 + $0x1038] sm:$0xf] }
 0x1ff   :  { %4515 = vmatpush.bf16.msra.mxu1 %v12347_v16  ;;  %v12123_v16 = vor.u32 %v15978_v2, %v12122_v55  ;;  %v12107_v33 = vor.u32 %v15974_v27, %v12106_v23  ;;  %v11420_v55 = vld [vmem:[%s24386_s1 + $0xae8] sm:$0xf0] }
 0x200   :  { %4495 = vmatpush.bf16.msrb.mxu0 %v11995_v58  ;;  %v11260_v27 = vld [vmem:[%s24386_s1 + $0x9a8] sm:$0xf0] }
 0x201   :  { %4567 = vmatpush.bf16.msra.mxu3 %v11583_v19  ;;  %4506 = vmatpush.bf16.msra.mxu2 %v12155_v35  ;;  %v16018_v19 = vld [vmem:[%s24386_s1 + $0x11a4] sm:$0xf0]  ;;  %v11311_v35 = vor.u32 %v15772_v25, %v11308_v22  ;;  %v15796_v25 = vld [vmem:[%s24386_s1 + $0xabc] sm:$0xf]  ;;  %v11404_v22 = vld [vmem:[%s24386_s1 + $0xac8] sm:$0xf0] }
 0x202   :  { %v12283_v30 = vor.u32 %v16018_v19, %v12282_v13  ;;  %v15872_v13 = vld [vmem:[%s24386_s1 + $0xd1c] sm:$0xf]  ;;  %v11423_v19 = vor.u32 %v15800_v1, %v11420_v55  ;;  %v11372_v55 = vld [vmem:[%s24386_s1 + $0xa88] sm:$0xf0] }
 0x203   :  { %4516 = vmatpush.bf16.msra.mxu1 %v12331_v32  ;;  %v12266_v32 = vld [vmem:[%s24386_s1 + $0x1178] sm:$0xf]  ;;  %v4277_v58 = vpop.f32.mrf.mxu1  ;;  %v15788_v1 = vld [vmem:[%s24386_s1 + $0xa7c] sm:$0xf] }
 0x204   :  { %4496 = vmatpush.bf16.msrb.mxu0 %v11979_v50  ;;  %v12267_v52 = vor.u32 %v16014_v24, %v12266_v32  ;;  %v11708_v50 = vld [vmem:[%s24386_s1 + $0xd28] sm:$0xf0]  ;;  %v4251_v23 = vpop.f32.mrf.mxu0  ;;  %v12095_v32 = vor.u32 %v15968_v0, %v12092_v20  ;;  %v15784_v20 = vld [vmem:[%s24386_s1 + $0xa5c] sm:$0xf] }
 0x205   :  { %4568 = vmatpush.bf16.msra.mxu3 %v11567_v62  ;;  %4507 = vmatpush.bf16.msra.mxu2 %v12139_v59  ;;  %v20040_v62 = vpop.f32.mrf.mxu3  ;;  %v11295_v59 = vor.u32 %v15768_v29, %v11292_v37  ;;  %v4252_v12 = vadd.f32 %v4251_v23, %v20005_v5  ;;  %v11692_v24 = vld [vmem:[%s24386_s1 + $0xd08] sm:$0xf0]  ;;  %v15964_v5 = vld [vmem:[%s24386_s1 + $0xffc] sm:$0xf] }
 0x206   :  { %v12076_v29 = vld [vmem:[%s24386_s1 + $0x1008] sm:$0xf0]  ;;  %v15756_v37 = vld [vmem:[%s24386_s1 + $0x97c] sm:$0xf] }
 0x207   :  { %4517 = vmatpush.bf16.msra.mxu1 %v12315_v48  ;;  %v12250_v48 = vld [vmem:[%s24386_s1 + $0x1158] sm:$0xf]  ;;  %4497 = vmatmul.bf16.vlgmr.msrb.gmra.mxu0 %v17189_v38  ;;  %v4265_v34 = vadd.f32 %v20040_v62, %v4252_v12  ;;  %v15792_v62 = vld [vmem:[%s24386_s1 + $0xa9c] sm:$0xf]  ;;  %v11247_v57 = vor.u32 %v15756_v37, %v11244_v41  ;;  %v11212_v0 = vld [vmem:[%s24386_s1 + $0x948] sm:$0xf0] }
 0x208   :  { %4541 = vmatpush.bf16.msra.mxu0 %v11327_v21  ;;  %12370 = vmatmul.msk.bf16.vlgmr.msrb.gmra.mxu3 %vm1837_vm1, %v17318_v40  ;;  %v15760_v21 = vld [vmem:[%s24386_s1 + $0x99c] sm:$0xf]  ;;  %v11964_v37 = vld [vmem:[%s24386_s1 + $0xf28] sm:$0xf0] }
 0x209   :  { %4569 = vmatpush.bf16.msra.mxu3 %v11551_v51  ;;  %4508 = vmatpush.bf16.msra.mxu2 %v12123_v16  ;;  %v16010_v51 = vld [vmem:[%s24386_s1 + $0x1164] sm:$0xf0]  ;;  %v11279_v16 = vor.u32 %v15764_v61, %v11276_v63  ;;  %v20153_v44 = vadd.f32 %v4277_v58, %v4265_v34  ;;  %v11391_v58 = vor.u32 %v15792_v62, %v11388_v43  ;;  %v15752_v61 = vld [vmem:[%s24386_s1 + $0x95c] sm:$0xf]  ;;  %v11228_v63 = vld [vmem:[%s24386_s1 + $0x968] sm:$0xf0] }
 0x20a   :  { %v12251_v2 = vor.u32 %v16010_v51, %v12250_v48  ;;  %v15864_v48 = vld [vmem:[%s24386_s1 + $0xcdc] sm:$0xf]  ;;  %v11676_v51 = vld [vmem:[%s24386_s1 + $0xce8] sm:$0xf0] }
 0x20b   :  { %4518 = vmatpush.bf16.msra.mxu1 %v12299_v26  ;;  %v15812_v26 = vld [vmem:[%s24386_s1 + $0xb3c] sm:$0xf]  ;;  %v4279_v6 = vpop.f32.mrf.mxu1  ;;  %v4671_v53 = vmax.f32 %v18308_v7, %v20153_v44  ;;  %v16084_v44 = vld [vmem:[%s24386_s1 + $0x13cc] sm:$0xf] }
 0x20c   :  { %4542 = vmatpush.bf16.msra.mxu0 %v11311_v35  ;;  %v11263_v35 = vor.u32 %v15760_v21, %v11260_v27  ;;  %v11356_v21 = vld [vmem:[%s24386_s1 + $0xa68] sm:$0xf0]  ;;  %v15904_v27 = vld [vmem:[%s24386_s1 + $0xe1c] sm:$0xf] }
 0x20d   :  { %4570 = vmatpush.bf16.msra.mxu3 %v11535_v10  ;;  %4509 = vmatpush.bf16.msra.mxu2 %v12107_v33  ;;  %v4266_v10 = vpop.f32.mrf.mxu3  ;;  %v15868_v33 = vld [vmem:[%s24386_s1 + $0xcfc] sm:$0xf] }
 0x20e   :  { %v11231_v10 = vor.u32 %v15752_v61, %v11228_v63  ;;  %v15780_v34 = vld [vmem:[%s24386_s1 + $0xa3c] sm:$0xf] }
 0x20f   :  { %4519 = vmatpush.bf16.msra.mxu1 %v12283_v30  ;;  %v11471_v30 = vor.u32 %v15812_v26, %v11468_v11  ;;  %v11660_v26 = vld [vmem:[%s24386_s1 + $0xcc8] sm:$0xf0]  ;;  %v11375_v11 = vor.u32 %v15788_v1, %v11372_v55  ;;  %v15852_v43 = vld [vmem:[%s24386_s1 + $0xc7c] sm:$0xf] }
 0x210   :  { %4510 = vmatmul.bf16.vlgmr.msra.gmra.mxu2 %v17210_v47  ;;  %4543 = vmatpush.bf16.msra.mxu0 %v11295_v59  ;;  %v15960_v59 = vld [vmem:[%s24386_s1 + $0xfdc] sm:$0xf]  ;;  %v11804_v1 = vld [vmem:[%s24386_s1 + $0xde8] sm:$0xf0] }
 0x211   :  { %4571 = vmatpush.bf16.msra.mxu3 %v11519_v31  ;;  %4554 = vmatpush.bf16.msrb.mxu2 %v11455_v36  ;;  %v11711_v31 = vor.u32 %v15872_v13, %v11708_v50  ;;  %v11407_v36 = vor.u32 %v15796_v25, %v11404_v22  ;;  %v15956_v13 = vld [vmem:[%s24386_s1 + $0xfbc] sm:$0xf]  ;;  %v12044_v50 = vld [vmem:[%s24386_s1 + $0xfc8] sm:$0xf0]  ;;  %v11663_v22 = vor.u32 %v15860_v18, %v11660_v26 }
 0x212   :  { %v11836_v25 = vld [vmem:[%s24386_s1 + $0xe28] sm:$0xf0]  ;;  %v12047_v12 = vor.u32 %v15956_v13, %v12044_v50  ;;  %v15896_v61 = vld [vmem:[%s24386_s1 + $0xddc] sm:$0xf] }
 0x213   :  { %4520 = vmatpush.bf16.msra.mxu1 %v12267_v52  ;;  %v11695_v52 = vor.u32 %v15868_v33, %v11692_v24  ;;  %v20209_v23 = vpop.f32.mrf.mxu2  ;;  %v15952_v33 = vld [vmem:[%s24386_s1 + $0xf9c] sm:$0xf]  ;;  %v12028_v24 = vld [vmem:[%s24386_s1 + $0xfa8] sm:$0xf0]  ;;  %v11839_v6 = vor.u32 %v15904_v27, %v11836_v25  ;;  %v11807_v13 = vor.u32 %v15896_v61, %v11804_v1  ;;  %v12764_v61 = vld [vmem:[%s24386_s1 + $0x1320] sm:$0xf] }
 0x214   :  { %4544 = vmatpush.bf16.msra.mxu0 %v11279_v16  ;;  %v15748_v16 = vld [vmem:[%s24386_s1 + $0x93c] sm:$0xf]  ;;  %v12031_v62 = vor.u32 %v15952_v33, %v12028_v24  ;;  %v11612_v26 = vld [vmem:[%s24386_s1 + $0xc68] sm:$0xf0] }
 0x215   :  { %4572 = vmatpush.bf16.msra.mxu3 %v11503_v46  ;;  %4555 = vmatpush.bf16.msrb.mxu2 %v11439_v60  ;;  %v12079_v46 = vor.u32 %v15964_v5, %v12076_v29  ;;  %v12060_v60 = vld [vmem:[%s24386_s1 + $0xfe8] sm:$0xf0]  ;;  %v15936_v29 = vld [vmem:[%s24386_s1 + $0xf1c] sm:$0xf] }
 0x216   :  { %v12063_v39 = vor.u32 %v15960_v59, %v12060_v60  ;;  %v11820_v5 = vld [vmem:[%s24386_s1 + $0xe08] sm:$0xf0]  ;;  %v11967_v60 = vor.u32 %v15936_v29, %v11964_v37  ;;  %v15932_v55 = vld [vmem:[%s24386_s1 + $0xefc] sm:$0xf] }
 0x217   :  { %4521 = vmatpush.bf16.msra.mxu1 %v12251_v2  ;;  %v4253_v2 = vpop.f32.mrf.mxu0  ;;  %v15848_v18 = vld [vmem:[%s24386_s1 + $0xc5c] sm:$0xf]  ;;  %v12220_v33 = vld [vmem:[%s24386_s1 + $0x1128] sm:$0xf0] }
 0x218   :  { %4545 = vmatpush.bf16.msra.mxu0 %v11263_v35  ;;  %v11340_v35 = vld [vmem:[%s24386_s1 + $0xa48] sm:$0xf0]  ;;  %v11615_v27 = vor.u32 %v15848_v18, %v11612_v26  ;;  %v15924_v29 = vld [vmem:[%s24386_s1 + $0xebc] sm:$0xf] }
 0x219   :  { %4573 = vmatpush.bf16.msra.mxu3 %v11487_v3  ;;  %4556 = vmatpush.bf16.msrb.mxu2 %v11423_v19  ;;  %v11679_v3 = vor.u32 %v15864_v48, %v11676_v51  ;;  %v20198_v19 = vpop.f32.mrf.mxu1  ;;  %v11628_v48 = vld [vmem:[%s24386_s1 + $0xc88] sm:$0xf0]  ;;  %v15948_v51 = vld [vmem:[%s24386_s1 + $0xf7c] sm:$0xf] }
 0x21a   :  { %v11948_v2 = vld [vmem:[%s24386_s1 + $0xf08] sm:$0xf0]  ;;  %v15992_v26 = vld [vmem:[%s24386_s1 + $0x10dc] sm:$0xf] }
 0x21b   :  { %4522 = vmatpush.bf16.msra.mxu1 %v12235_v49  ;;  %v15856_v49 = vld [vmem:[%s24386_s1 + $0xc9c] sm:$0xf]  ;;  %v4292_v63 = vpop.f32.mrf.mxu2  ;;  %v11951_v50 = vor.u32 %v15932_v55, %v11948_v2  ;;  %v11916_v37 = vld [vmem:[%s24386_s1 + $0xec8] sm:$0xf0] }
 0x21c   :  { %4546 = vmatpush.bf16.msra.mxu0 %v11247_v57  ;;  %v12012_v57 = vld [vmem:[%s24386_s1 + $0xf88] sm:$0xf0]  ;;  %v15884_v63 = vld [vmem:[%s24386_s1 + $0xd7c] sm:$0xf] }
 0x21d   :  { %4574 = vmatpush.bf16.msra.mxu3 %v11471_v30  ;;  %4557 = vmatpush.bf16.msrb.mxu2 %v11407_v36  ;;  %v11215_v30 = vor.u32 %v15748_v16, %v11212_v0  ;;  %v15900_v36 = vld [vmem:[%s24386_s1 + $0xdfc] sm:$0xf]  ;;  %v11788_v0 = vld [vmem:[%s24386_s1 + $0xdc8] sm:$0xf0] }
 0x21e   :  { %4523 = vmatmul.bf16.vlgmr.msra.gmra.mxu1 %v17404_v28  ;;  %v11823_v59 = vor.u32 %v15900_v36, %v11820_v5  ;;  %v15892_v16 = vld [vmem:[%s24386_s1 + $0xdbc] sm:$0xf]  ;;  %v11772_v5 = vld [vmem:[%s24386_s1 + $0xda8] sm:$0xf0] }
 0x21f   :  { %4580 = vmatpush.bf16.msrb.mxu1 %v11711_v31  ;;  %v11359_v31 = vor.u32 %v15784_v20, %v11356_v21  ;;  %v15928_v20 = vld [vmem:[%s24386_s1 + $0xedc] sm:$0xf]  ;;  %v11932_v21 = vld [vmem:[%s24386_s1 + $0xee8] sm:$0xf0]  ;;  %v11791_v24 = vor.u32 %v15892_v16, %v11788_v0 }
 0x220   :  { %4575 = vmatmul.bf16.vlgmr.msra.gmra.mxu3 %v17011_v8  ;;  %4547 = vmatpush.bf16.msra.mxu0 %v11231_v10  ;;  %v15944_v10 = vld [vmem:[%s24386_s1 + $0xf5c] sm:$0xf]  ;;  %v11756_v55 = vld [vmem:[%s24386_s1 + $0xd88] sm:$0xf0] }
 0x221   :  { %4619 = vmatpush.bf16.msrb.mxu3 %v12095_v32  ;;  %4558 = vmatpush.bf16.msrb.mxu2 %v11391_v58  ;;  %v11644_v32 = vld [vmem:[%s24386_s1 + $0xca8] sm:$0xf0]  ;;  %v4318_v58 = vpop.f32.mrf.mxu1  ;;  %v15888_v36 = vld [vmem:[%s24386_s1 + $0xd9c] sm:$0xf] }
 0x222   :  { %v11647_v41 = vor.u32 %v15856_v49, %v11644_v32  ;;  %v15940_v49 = vld [vmem:[%s24386_s1 + $0xf3c] sm:$0xf]  ;;  %v12204_v58 = vld [vmem:[%s24386_s1 + $0x1108] sm:$0xf0] }
 0x223   :  { %4581 = vmatpush.bf16.msrb.mxu1 %v11695_v52  ;;  %v20250_v52 = vpop.f32.mrf.mxu3  ;;  %v16000_v32 = vld [vmem:[%s24386_s1 + $0x111c] sm:$0xf]  ;;  %v11740_v0 = vld [vmem:[%s24386_s1 + $0xd68] sm:$0xf0] }
 0x224   :  { %4548 = vmatpush.bf16.msra.mxu0 %v11215_v30  ;;  %v15920_v2 = vld [vmem:[%s24386_s1 + $0xe9c] sm:$0xf] }
 0x225   :  { %4620 = vmatpush.bf16.msrb.mxu3 %v12079_v46  ;;  %4559 = vmatpush.bf16.msrb.mxu2 %v11375_v11  ;;  %v11343_v46 = vor.u32 %v15780_v34, %v11340_v35  ;;  %v11996_v11 = vld [vmem:[%s24386_s1 + $0xf68] sm:$0xf0]  ;;  %v12780_v34 = vld [vmem:[%s24386_s1 + $0x1340] sm:$0xf]  ;;  %v16069_v35 = vld [vmem:[%s24386_s1 + $0x134c] sm:$0xf0] }
 0x226   :  { %v11999_v25 = vor.u32 %v15944_v10, %v11996_v11  ;;  %v12188_v10 = vld [vmem:[%s24386_s1 + $0x10e8] sm:$0xf0]  ;;  %v11759_v11 = vor.u32 %v15884_v63, %v11756_v55  ;;  %v15880_v16 = vld [vmem:[%s24386_s1 + $0xd5c] sm:$0xf] }
 0x227   :  { %4582 = vmatpush.bf16.msrb.mxu1 %v11679_v3  ;;  %v11631_v3 = vor.u32 %v15852_v43, %v11628_v48  ;;  %4549 = vmatmul.bf16.vlgmr.msra.gmra.mxu0 %v17026_v15  ;;  %v12223_v48 = vor.u32 %v16000_v32, %v12220_v33  ;;  %v12732_v32 = vld [vmem:[%s24386_s1 + $0x12e0] sm:$0xf]  ;;  %v16057_v33 = vld [vmem:[%s24386_s1 + $0x12ec] sm:$0xf0]  ;;  %v12332_v55 = vld [vmem:[%s24386_s1 + $0x1208] sm:$0xf0] }
 0x228   :  { %4593 = vmatpush.bf16.msrb.mxu0 %v11839_v6  ;;  %v11935_v6 = vor.u32 %v15928_v20, %v11932_v21  ;;  %v15916_v20 = vld [vmem:[%s24386_s1 + $0xe7c] sm:$0xf]  ;;  %v11884_v21 = vld [vmem:[%s24386_s1 + $0xe88] sm:$0xf0] }
 0x229   :  { %4621 = vmatpush.bf16.msrb.mxu3 %v12063_v39  ;;  %4560 = vmatpush.bf16.msrb.mxu2 %v11359_v31  ;;  %v12015_v39 = vor.u32 %v15948_v51, %v12012_v57  ;;  %v11980_v31 = vld [vmem:[%s24386_s1 + $0xf48] sm:$0xf0]  ;;  %v12781_v51 = vor.u32 %v16069_v35, %v12780_v34  ;;  %v15996_v57 = vld [vmem:[%s24386_s1 + $0x10fc] sm:$0xf] }
 0x22a   :  { %v11983_v43 = vor.u32 %v15940_v49, %v11980_v31  ;;  %v12207_v18 = vor.u32 %v15996_v57, %v12204_v58  ;;  %v12172_v49 = vld [vmem:[%s24386_s1 + $0x10c8] sm:$0xf0]  ;;  %v11887_v31 = vor.u32 %v15916_v20, %v11884_v21  ;;  %v12716_v58 = vld [vmem:[%s24386_s1 + $0x12c0] sm:$0xf]  ;;  %v16036_v21 = vld [vmem:[%s24386_s1 + $0x123c] sm:$0xf] }
 0x22b   :  { %4583 = vmatpush.bf16.msrb.mxu1 %v11663_v22  ;;  %v15844_v22 = vld [vmem:[%s24386_s1 + $0xc3c] sm:$0xf]  ;;  %v4331_v30 = vpop.f32.mrf.mxu3  ;;  %v11724_v35 = vld [vmem:[%s24386_s1 + $0xd48] sm:$0xf0] }
 0x22c   :  { %4594 = vmatpush.bf16.msrb.mxu0 %v11823_v59  ;;  %v11775_v59 = vor.u32 %v15888_v36, %v11772_v5  ;;  %v11743_v30 = vor.u32 %v15880_v16, %v11740_v0  ;;  %v15912_v36 = vld [vmem:[%s24386_s1 + $0xe5c] sm:$0xf]  ;;  %v11868_v5 = vld [vmem:[%s24386_s1 + $0xe68] sm:$0xf0] }
 0x22d   :  { %4622 = vmatpush.bf16.msrb.mxu3 %v12047_v12  ;;  %4561 = vmatpush.bf16.msrb.mxu2 %v11343_v46  ;;  %v11596_v12 = vld [vmem:[%s24386_s1 + $0xc48] sm:$0xf0]  ;;  %v16024_v16 = vld [vmem:[%s24386_s1 + $0x11dc] sm:$0xf] }
 0x22e   :  { %v12156_v57 = vld [vmem:[%s24386_s1 + $0x10a8] sm:$0xf0]  ;;  %v12710_v7 = vld [vmem:[%s24386_s1 + $0x12b8] sm:$0xf0] }
 0x22f   :  { %4584 = vmatpush.bf16.msrb.mxu1 %v11647_v41  ;;  %v4303_v41 = vpop.f32.mrf.mxu0  ;;  %v12316_v20 = vld [vmem:[%s24386_s1 + $0x11e8] sm:$0xf0] }
 0x230   :  { %4562 = vmatmul.bf16.vlgmr.msrb.gmra.mxu2 %v17024_v14  ;;  %4595 = vmatpush.bf16.msrb.mxu0 %v11807_v13  ;;  %v4304_v46 = vadd.f32 %v4303_v41, %v20209_v23  ;;  %v16065_v23 = vld [vmem:[%s24386_s1 + $0x132c] sm:$0xf0]  ;;  %v16032_v41 = vld [vmem:[%s24386_s1 + $0x121c] sm:$0xf] }
 0x231   :  { %4623 = vmatpush.bf16.msrb.mxu3 %v12031_v62  ;;  %4606 = vmatpush.bf16.msra.mxu2 %v11967_v60  ;;  %v11599_v62 = vor.u32 %v15844_v22, %v11596_v12  ;;  %v11919_v60 = vor.u32 %v15924_v29, %v11916_v37  ;;  %v15988_v12 = vld [vmem:[%s24386_s1 + $0x10bc] sm:$0xf]  ;;  %v3550_v29 = vunpack.c.h.b16 %v19807_v56 }
 0x232   :  { %v4317_v1 = vadd.f32 %v20198_v19, %v4304_v46  ;;  %v12765_v19 = vor.u32 %v16065_v23, %v12764_v61  ;;  %v12733_v46 = vor.u32 %v16057_v33, %v12732_v32  ;;  %v15908_v61 = vld [vmem:[%s24386_s1 + $0xe3c] sm:$0xf]  ;;  %v11852_v23 = vld [vmem:[%s24386_s1 + $0xe48] sm:$0xf0]  ;;  %v12684_v32 = vld [vmem:[%s24386_s1 + $0x1280] sm:$0xf] }
 0x233   :  { %4585 = vmatpush.bf16.msrb.mxu1 %v11631_v3  ;;  %v11900_v3 = vld [vmem:[%s24386_s1 + $0xea8] sm:$0xf0]  ;;  %v4342_v34 = vpop.f32.mrf.mxu2  ;;  %v3846_v63 = vpack.c.b16 %v3550_v29, %v3550_v29  ;;  %v16045_v33 = vld [vmem:[%s24386_s1 + $0x128c] sm:$0xf0]  ;;  %v15972_v29 = vld [vmem:[%s24386_s1 + $0x103c] sm:$0xf] }
 0x234   :  { %4596 = vmatpush.bf16.msrb.mxu0 %v11791_v24  ;;  %v11903_v13 = vor.u32 %v15920_v2, %v11900_v3  ;;  %v20400_v24 = vpop.f32.mrf.mxu1 }
 0x235   :  { %4624 = vmatpush.bf16.msrb.mxu3 %v12015_v39  ;;  %4607 = vmatpush.bf16.msra.mxu2 %v11951_v50  ;;  %v4330_v39 = vadd.f32 %v20250_v52, %v4317_v1  ;;  %v12748_v52 = vld [vmem:[%s24386_s1 + $0x1300] sm:$0xf]  ;;  %v16061_v50 = vld [vmem:[%s24386_s1 + $0x130c] sm:$0xf0]  ;;  %v16028_v1 = vld [vmem:[%s24386_s1 + $0x11fc] sm:$0xf] }
 0x236   :  { %v12749_v22 = vor.u32 %v16061_v50, %v12748_v52  ;;  %v12335_v52 = vor.u32 %v16028_v1, %v12332_v55  ;;  %v4149_v50 = vsel %vm1841_vm0, %v3846_v63, 0  ;;  %v16197_v63 = vld [vmem:[%s24386_s1 + $0x174c] sm:$0xf0]  ;;  %v16016_v55 = vld [vmem:[%s24386_s1 + $0x119c] sm:$0xf] }
 0x237   :  { %4586 = vmatpush.bf16.msrb.mxu1 %v11615_v27  ;;  %v4305_v27 = vpop.f32.mrf.mxu0  ;;  %v20415_v37 = vadd.f32 %v4342_v34, %v4330_v39  ;;  %v15980_v39 = vld [vmem:[%s24386_s1 + $0x107c] sm:$0xf] }
 0x238   :  { %4597 = vmatpush.bf16.msrb.mxu0 %v11775_v59  ;;  %v16053_v59 = vld [vmem:[%s24386_s1 + $0x12cc] sm:$0xf0]  ;;  %v12364_v27 = vld [vmem:[%s24386_s1 + $0x1248] sm:$0xf0] }
 0x239   :  { %4625 = vmatpush.bf16.msrb.mxu3 %v11999_v25  ;;  %4608 = vmatpush.bf16.msra.mxu2 %v11935_v6  ;;  %v12191_v25 = vor.u32 %v15992_v26, %v12188_v10  ;;  %v15876_v6 = vld [vmem:[%s24386_s1 + $0xd3c] sm:$0xf]  ;;  %v12717_v3 = vor.u32 %v16053_v59, %v12716_v58  ;;  %v12140_v26 = vld [vmem:[%s24386_s1 + $0x1088] sm:$0xf0]  ;;  %v12700_v10 = vld [vmem:[%s24386_s1 + $0x12a0] sm:$0xf]  ;;  %v12367_v34 = vor.u32 %v16036_v21, %v12364_v27 }
 0x23a   :  { %v11727_v56 = vor.u32 %v15876_v6, %v11724_v35  ;;  %v12319_v6 = vor.u32 %v16024_v16, %v12316_v20  ;;  %v12908_v58 = vld [vmem:[%s24386_s1 + $0x1440] sm:$0xf] }
 0x23b   :  { %4587 = vmatpush.bf16.msrb.mxu1 %v11599_v62  ;;  %v12348_v62 = vld [vmem:[%s24386_s1 + $0x1228] sm:$0xf0]  ;;  %v4344_v0 = vpop.f32.mrf.mxu2  ;;  %v13276_v20 = vld [vmem:[%s24386_s1 + $0x1720] sm:$0xf] }
 0x23c   :  { %4598 = vmatpush.bf16.msrb.mxu0 %v11759_v11  ;;  %v16049_v11 = vld [vmem:[%s24386_s1 + $0x12ac] sm:$0xf0] }
 0x23d   :  { %4626 = vmatpush.bf16.msrb.mxu3 %v11983_v43  ;;  %4609 = vmatpush.bf16.msra.mxu2 %v11919_v60  ;;  %v12175_v43 = vor.u32 %v15988_v12, %v12172_v49  ;;  %v12351_v60 = vor.u32 %v16032_v41, %v12348_v62  ;;  %v15976_v12 = vld [vmem:[%s24386_s1 + $0x105c] sm:$0xf]  ;;  %v13036_v49 = vld [vmem:[%s24386_s1 + $0x1540] sm:$0xf]  ;;  %v12685_v62 = vor.u32 %v16045_v33, %v12684_v32  ;;  %v16097_v0 = vld [vmem:[%s24386_s1 + $0x142c] sm:$0xf0] }
 0x23e   :  { %4588 = vmatmul.bf16.vlgmr.msrb.gmra.mxu1 %v17013_v9  ;;  %v12876_v32 = vld [vmem:[%s24386_s1 + $0x1400] sm:$0xf] }
 0x23f   :  { %4632 = vmatpush.bf16.msra.mxu1 %v12223_v48  ;;  %v15984_v48 = vld [vmem:[%s24386_s1 + $0x109c] sm:$0xf] }
 0x240   :  { %4627 = vmatmul.bf16.vlgmr.msrb.gmra.mxu3 %v17189_v38  ;;  %4599 = vmatpush.bf16.msrb.mxu0 %v11743_v30  ;;  %v12159_v2 = vor.u32 %v15984_v48, %v12156_v57  ;;  %v16133_v30 = vld [vmem:[%s24386_s1 + $0x154c] sm:$0xf0] }
 0x241   :  { %6452 = vmatpush.bf16.msra.mxu3 %v12781_v51  ;;  %4610 = vmatpush.bf16.msra.mxu2 %v11903_v13  ;;  %v11871_v51 = vor.u32 %v15912_v36, %v11868_v5  ;;  %v4370_v13 = vpop.f32.mrf.mxu1  ;;  %v13037_v35 = vor.u32 %v16133_v30, %v13036_v49  ;;  %v16020_v36 = vld [vmem:[%s24386_s1 + $0x11bc] sm:$0xf]  ;;  %v12300_v5 = vld [vmem:[%s24386_s1 + $0x11c8] sm:$0xf0]  ;;  %v16129_v48 = vld [vmem:[%s24386_s1 + $0x152c] sm:$0xf0] }
 0x242   :  { %v16041_v57 = vld [vmem:[%s24386_s1 + $0x126c] sm:$0xf0] }
 0x243   :  { %4633 = vmatpush.bf16.msra.mxu1 %v12207_v18  ;;  %v20450_v18 = vpop.f32.mrf.mxu3  ;;  %v16121_v49 = vld [vmem:[%s24386_s1 + $0x14ec] sm:$0xf0] }
 0x244   :  { %4600 = vmatpush.bf16.msrb.mxu0 %v11727_v56 }
 0x245   :  { %6453 = vmatpush.bf16.msra.mxu3 %v12765_v19  ;;  %4611 = vmatpush.bf16.msra.mxu2 %v11887_v31  ;;  %v11855_v19 = vor.u32 %v15908_v61, %v11852_v23  ;;  %v12124_v31 = vld [vmem:[%s24386_s1 + $0x1068] sm:$0xf0]  ;;  %v16101_v61 = vld [vmem:[%s24386_s1 + $0x144c] sm:$0xf0]  ;;  %v13292_v23 = vld [vmem:[%s24386_s1 + $0x1740] sm:$0xf] }
 0x246   :  { %v12127_v41 = vor.u32 %v15976_v12, %v12124_v31  ;;  %v12909_v13 = vor.u32 %v16101_v61, %v12908_v58  ;;  %v12988_v12 = vld [vmem:[%s24386_s1 + $0x14e0] sm:$0xf] }
 0x247   :  { %4634 = vmatpush.bf16.msra.mxu1 %v12191_v25  ;;  %v12143_v25 = vor.u32 %v15980_v39, %v12140_v26  ;;  %4601 = vmatmul.bf16.vlgmr.msrb.gmra.mxu0 %v17208_v45  ;;  %v13004_v26 = vld [vmem:[%s24386_s1 + $0x1500] sm:$0xf] }
 0x248   :  { %4645 = vmatpush.bf16.msra.mxu0 %v12351_v60  ;;  %v12303_v60 = vor.u32 %v16020_v36, %v12300_v5  ;;  %v12989_v36 = vor.u32 %v16121_v49, %v12988_v12  ;;  %v16008_v5 = vld [vmem:[%s24386_s1 + $0x115c] sm:$0xf]  ;;  %v13244_v58 = vld [vmem:[%s24386_s1 + $0x16e0] sm:$0xf] }
 0x249   :  { %6454 = vmatpush.bf16.msra.mxu3 %v12749_v22  ;;  %4612 = vmatpush.bf16.msra.mxu2 %v11871_v51  ;;  %v12701_v22 = vor.u32 %v16049_v11, %v12700_v10  ;;  %v12668_v51 = vld [vmem:[%s24386_s1 + $0x1260] sm:$0xf]  ;;  %v20521_v59 = vpop.f32.mrf.mxu1  ;;  %v16125_v10 = vld [vmem:[%s24386_s1 + $0x150c] sm:$0xf0] }
 0x24a   :  { %v13005_v27 = vor.u32 %v16125_v10, %v13004_v26 }
 0x24b   :  { %4635 = vmatpush.bf16.msra.mxu1 %v12175_v43  ;;  %v12108_v43 = vld [vmem:[%s24386_s1 + $0x1048] sm:$0xf0]  ;;  %v4383_v56 = vpop.f32.mrf.mxu3 }
 0x24c   :  { %4646 = vmatpush.bf16.msra.mxu0 %v12335_v52  ;;  %v12111_v39 = vor.u32 %v15972_v29, %v12108_v43  ;;  %v13293_v52 = vor.u32 %v16197_v63, %v13292_v23  ;;  %v12252_v29 = vld [vmem:[%s24386_s1 + $0x1168] sm:$0xf0]  ;;  %v12860_v56 = vld [vmem:[%s24386_s1 + $0x13e0] sm:$0xf]  ;;  %v16004_v63 = vld [vmem:[%s24386_s1 + $0x113c] sm:$0xf] }
 0x24d   :  { %6455 = vmatpush.bf16.msra.mxu3 %v12733_v46  ;;  %4613 = vmatpush.bf16.msra.mxu2 %v11855_v19  ;;  %v13020_v46 = vld [vmem:[%s24386_s1 + $0x1520] sm:$0xf]  ;;  %v12669_v19 = vor.u32 %v16041_v57, %v12668_v51  ;;  %v12255_v51 = vor.u32 %v16008_v5, %v12252_v29  ;;  %v16089_v57 = vld [vmem:[%s24386_s1 + $0x13ec] sm:$0xf0] }
 0x24e   :  { %v13021_v1 = vor.u32 %v16129_v48, %v13020_v46  ;;  %v12861_v26 = vor.u32 %v16089_v57, %v12860_v56  ;;  %v16157_v29 = vld [vmem:[%s24386_s1 + $0x160c] sm:$0xf0] }
 0x24f   :  { %4636 = vmatpush.bf16.msra.mxu1 %v12159_v2  ;;  %v12284_v2 = vld [vmem:[%s24386_s1 + $0x11a8] sm:$0xf0]  ;;  %v16077_v57 = vld [vmem:[%s24386_s1 + $0x138c] sm:$0xf0] }
 0x250   :  { %4614 = vmatmul.bf16.vlgmr.msra.gmra.mxu2 %v17200_v42  ;;  %4647 = vmatpush.bf16.msra.mxu0 %v12319_v6  ;;  %v12287_v16 = vor.u32 %v16016_v55, %v12284_v2  ;;  %v13164_v55 = vld [vmem:[%s24386_s1 + $0x1640] sm:$0xf] }
 0x251   :  { %6456 = vmatpush.bf16.msra.mxu3 %v12717_v3  ;;  %4664 = vmatpush.bf16.msrb.mxu2 %v4149_v50  ;;  %v4355_v3 = vpop.f32.mrf.mxu0  ;;  %v12892_v50 = vld [vmem:[%s24386_s1 + $0x1420] sm:$0xf]  ;;  %v4409_v33 = vpop.f32.mrf.mxu1 }
 0x252   :  { %v4356_v11 = vadd.f32 %v4355_v3, %v20415_v37  ;;  %v16193_v37 = vld [vmem:[%s24386_s1 + $0x172c] sm:$0xf0]  ;;  %v12893_v30 = vor.u32 %v16097_v0, %v12892_v50 }
 0x253   :  { %4637 = vmatpush.bf16.msra.mxu1 %v12143_v25  ;;  %v16012_v25 = vld [vmem:[%s24386_s1 + $0x117c] sm:$0xf]  ;;  %v13277_v31 = vor.u32 %v16193_v37, %v13276_v20  ;;  %v4394_v61 = vpop.f32.mrf.mxu2  ;;  %v16165_v3 = vld [vmem:[%s24386_s1 + $0x164c] sm:$0xf0]  ;;  %v13148_v37 = vld [vmem:[%s24386_s1 + $0x1620] sm:$0xf] }
 0x254   :  { %4648 = vmatpush.bf16.msra.mxu0 %v12303_v60  ;;  %v4369_v21 = vadd.f32 %v20400_v24, %v4356_v11  ;;  %v16185_v60 = vld [vmem:[%s24386_s1 + $0x16ec] sm:$0xf0] }
 0x255   :  { %6457 = vmatpush.bf16.msra.mxu3 %v12701_v22  ;;  %4665 = vmatpush.bf16.msrb.mxu2 %v12367_v34  ;;  %v12268_v22 = vld [vmem:[%s24386_s1 + $0x1188] sm:$0xf0]  ;;  %v16093_v34 = vld [vmem:[%s24386_s1 + $0x140c] sm:$0xf0]  ;;  %v13245_v10 = vor.u32 %v16185_v60, %v13244_v58 }
 0x256   :  { %v4382_v24 = vadd.f32 %v20450_v18, %v4369_v21  ;;  %v12271_v6 = vor.u32 %v16012_v25, %v12268_v22  ;;  %v16189_v18 = vld [vmem:[%s24386_s1 + $0x170c] sm:$0xf0]  ;;  %v12877_v46 = vor.u32 %v16093_v34, %v12876_v32  ;;  %v12940_v25 = vld [vmem:[%s24386_s1 + $0x1480] sm:$0xf] }
 0x257   :  { %4638 = vmatpush.bf16.msra.mxu1 %v12127_v41  ;;  %v12972_v41 = vld [vmem:[%s24386_s1 + $0x14c0] sm:$0xf]  ;;  %v16085_v50 = vld [vmem:[%s24386_s1 + $0x13cc] sm:$0xf0] }
 0x258   :  { %4649 = vmatpush.bf16.msra.mxu0 %v12287_v16  ;;  %v4395_v2 = vadd.f32 %v4394_v61, %v4382_v24  ;;  %v13165_v16 = vor.u32 %v16165_v3, %v13164_v55  ;;  %v16181_v20 = vld [vmem:[%s24386_s1 + $0x16cc] sm:$0xf0]  ;;  %v13196_v61 = vld [vmem:[%s24386_s1 + $0x1680] sm:$0xf] }
 0x259   :  { %6478 = vmatpush.bf16.msra.mxu2 %v13037_v35  ;;  %6458 = vmatpush.bf16.msra.mxu3 %v12685_v62  ;;  %v13260_v35 = vld [vmem:[%s24386_s1 + $0x1700] sm:$0xf]  ;;  %v16117_v62 = vld [vmem:[%s24386_s1 + $0x14cc] sm:$0xf0]  ;;  %v4357_v43 = vpop.f32.mrf.mxu0 }
 0x25a   :  { %v13261_v48 = vor.u32 %v16189_v18, %v13260_v35  ;;  %v12973_v23 = vor.u32 %v16117_v62, %v12972_v41  ;;  %v20628_v11 = vadd.f32 %v20521_v59, %v4395_v2  ;;  %v13228_v59 = vld [vmem:[%s24386_s1 + $0x16c0] sm:$0xf]  ;;  %v16109_v22 = vld [vmem:[%s24386_s1 + $0x148c] sm:$0xf0] }
 0x25b   :  { %4639 = vmatpush.bf16.msra.mxu1 %v12111_v39  ;;  %v12956_v39 = vld [vmem:[%s24386_s1 + $0x14a0] sm:$0xf]  ;;  %v4420_v12 = vpop.f32.mrf.mxu1  ;;  %v4433_v24 = vpop.f32.mrf.mxu3  ;;  %v16081_v32 = vld [vmem:[%s24386_s1 + $0x13ac] sm:$0xf0]  ;;  %v12941_v34 = vor.u32 %v16109_v22, %v12940_v25 }
 0x25c   :  { %4650 = vmatpush.bf16.msra.mxu0 %v12271_v6  ;;  %v4672_v21 = vmax.f32 %v18755_v54, %v20628_v11  ;;  %v4434_v33 = vadd.f32 %v4433_v24, %v4420_v12  ;;  %v13212_v35 = vld [vmem:[%s24386_s1 + $0x16a0] sm:$0xf]  ;;  %v16177_v18 = vld [vmem:[%s24386_s1 + $0x16ac] sm:$0xf0]  ;;  %v4396_v5 = vpop.f32.mrf.mxu2 }
 0x25d   :  { %6479 = vmatpush.bf16.msra.mxu2 %v13021_v1  ;;  %6459 = vmatpush.bf16.msra.mxu3 %v12669_v19  ;;  %v12236_v1 = vld [vmem:[%s24386_s1 + $0x1148] sm:$0xf0]  ;;  %v16113_v19 = vld [vmem:[%s24386_s1 + $0x14ac] sm:$0xf0]  ;;  %v12924_v41 = vld [vmem:[%s24386_s1 + $0x1460] sm:$0xf]  ;;  %v13213_v56 = vor.u32 %v16177_v18, %v13212_v35 }
 0x25e   :  { %4640 = vmatmul.bf16.vlgmr.msra.gmra.mxu1 %v17210_v47  ;;  %v12957_v0 = vor.u32 %v16113_v19, %v12956_v39  ;;  %v16105_v62 = vld [vmem:[%s24386_s1 + $0x146c] sm:$0xf0]  ;;  %v12796_v39 = vld [vmem:[%s24386_s1 + $0x1360] sm:$0xf] }
 0x25f   :  { %6465 = vmatpush.bf16.msrb.mxu1 %v12909_v13  ;;  %v12239_v13 = vor.u32 %v16004_v63, %v12236_v1  ;;  %v12925_v60 = vor.u32 %v16105_v62, %v12924_v41  ;;  %v13116_v1 = vld [vmem:[%s24386_s1 + $0x15e0] sm:$0xf]  ;;  %v16153_v55 = vld [vmem:[%s24386_s1 + $0x15ec] sm:$0xf0] }
 0x260   :  { %6460 = vmatmul.bf16.vlgmr.msra.gmra.mxu3 %v17026_v15  ;;  %4651 = vmatpush.bf16.msra.mxu0 %v12255_v51  ;;  %v12812_v51 = vld [vmem:[%s24386_s1 + $0x1380] sm:$0xf]  ;;  %v16325_v25 = vld [vmem:[%s24386_s1 + $0x1b4c] sm:$0xf0] }
 0x261   :  { %6504 = vmatpush.bf16.msrb.mxu3 %v13293_v52  ;;  %6480 = vmatpush.bf16.msra.mxu2 %v13005_v27  ;;  %v12844_v52 = vld [vmem:[%s24386_s1 + $0x13c0] sm:$0xf]  ;;  %v16161_v27 = vld [vmem:[%s24386_s1 + $0x162c] sm:$0xf0]  ;;  %v12813_v3 = vor.u32 %v16077_v57, %v12812_v51 }
 0x262   :  { %12371 = vmatmul.msk.bf16.vlgmr.msrb.gmra.mxu2 %vm1837_vm1, %v17318_v40  ;;  %v12845_v49 = vor.u32 %v16085_v50, %v12844_v52  ;;  %v13149_v6 = vor.u32 %v16161_v27, %v13148_v37  ;;  %v13532_v19 = vld [vmem:[%s24386_s1 + $0x1920] sm:$0xf]  ;;  %v16073_v52 = vld [vmem:[%s24386_s1 + $0x136c] sm:$0xf0] }
 0x263   :  { %6466 = vmatpush.bf16.msrb.mxu1 %v12893_v30  ;;  %v13229_v30 = vor.u32 %v16181_v20, %v13228_v59  ;;  %v4422_v2 = vpop.f32.mrf.mxu1  ;;  %v13180_v50 = vld [vmem:[%s24386_s1 + $0x1660] sm:$0xf]  ;;  %v16229_v20 = vld [vmem:[%s24386_s1 + $0x184c] sm:$0xf0] }
 0x264   :  { %4652 = vmatpush.bf16.msra.mxu0 %v12239_v13  ;;  %v13420_v59 = vld [vmem:[%s24386_s1 + $0x1840] sm:$0xf]  ;;  %v16149_v12 = vld [vmem:[%s24386_s1 + $0x15cc] sm:$0xf0] }
 0x265   :  { %6505 = vmatpush.bf16.msrb.mxu3 %v13277_v31  ;;  %6481 = vmatpush.bf16.msra.mxu2 %v12989_v36  ;;  %v12828_v31 = vld [vmem:[%s24386_s1 + $0x13a0] sm:$0xf]  ;;  %v16225_v5 = vld [vmem:[%s24386_s1 + $0x182c] sm:$0xf0] }
 0x266   :  { %v13132_v36 = vld [vmem:[%s24386_s1 + $0x1600] sm:$0xf]  ;;  %v12829_v43 = vor.u32 %v16081_v32, %v12828_v31  ;;  %v4446_v31 = vpop.f32.mrf.mxu0  ;;  %v14294_v11 = vld [vmem:[%s24386_s1 + $0x1cd0] sm:$0xf] }
 0x267   :  { %6467 = vmatpush.bf16.msrb.mxu1 %v12877_v46  ;;  %4653 = vmatmul.bf16.vlgmr.msra.gmra.mxu0 %v17404_v28  ;;  %v13548_v46 = vld [vmem:[%s24386_s1 + $0x1940] sm:$0xf]  ;;  %v13133_v58 = vor.u32 %v16157_v29, %v13132_v36 }
 0x268   :  { %6491 = vmatpush.bf16.msrb.mxu0 %v13165_v16  ;;  %v16169_v16 = vld [vmem:[%s24386_s1 + $0x166c] sm:$0xf0]  ;;  %v13804_v37 = vld [vmem:[%s24386_s1 + $0x1b40] sm:$0xf] }
 0x269   :  { %6506 = vmatpush.bf16.msrb.mxu3 %v13261_v48  ;;  %6482 = vmatpush.bf16.msra.mxu2 %v12973_v23  ;;  %v16261_v48 = vld [vmem:[%s24386_s1 + $0x194c] sm:$0xf0]  ;;  %v13100_v22 = vld [vmem:[%s24386_s1 + $0x15c0] sm:$0xf]  ;;  %v13181_v32 = vor.u32 %v16169_v16, %v13180_v50  ;;  %v13805_v35 = vor.u32 %v16325_v25, %v13804_v37 }
 0x26a   :  { %v16173_v23 = vld [vmem:[%s24386_s1 + $0x168c] sm:$0xf0]  ;;  %v13549_v63 = vor.u32 %v16261_v48, %v13548_v46  ;;  %v13516_v24 = vld [vmem:[%s24386_s1 + $0x1900] sm:$0xf]  ;;  %v13101_v18 = vor.u32 %v16149_v12, %v13100_v22 }
 0x26b   :  { %6468 = vmatpush.bf16.msrb.mxu1 %v12861_v26  ;;  %v16257_v26 = vld [vmem:[%s24386_s1 + $0x192c] sm:$0xf0]  ;;  %v13197_v13 = vor.u32 %v16173_v23, %v13196_v61  ;;  %v13404_v36 = vld [vmem:[%s24386_s1 + $0x1820] sm:$0xf] }
 0x26c   :  { %6492 = vmatpush.bf16.msrb.mxu0 %v13149_v6  ;;  %v13533_v27 = vor.u32 %v16257_v26, %v13532_v19  ;;  %v13421_v6 = vor.u32 %v16229_v20, %v13420_v59  ;;  %v13788_v29 = vld [vmem:[%s24386_s1 + $0x1b20] sm:$0xf]  ;;  %v16249_v48 = vld [vmem:[%s24386_s1 + $0x18ec] sm:$0xf0] }
 0x26d   :  { %6507 = vmatpush.bf16.msrb.mxu3 %v13245_v10  ;;  %6483 = vmatpush.bf16.msra.mxu2 %v12957_v0  ;;  %v4435_v10 = vpop.f32.mrf.mxu3  ;;  %v13117_v0 = vor.u32 %v16153_v55, %v13116_v1  ;;  %v13084_v62 = vld [vmem:[%s24386_s1 + $0x15a0] sm:$0xf]  ;;  %v16141_v55 = vld [vmem:[%s24386_s1 + $0x158c] sm:$0xf0] }
 0x26e   :  { %v13500_v46 = vld [vmem:[%s24386_s1 + $0x18e0] sm:$0xf]  ;;  %v16313_v16 = vld [vmem:[%s24386_s1 + $0x1aec] sm:$0xf0] }
 0x26f   :  { %6469 = vmatpush.bf16.msrb.mxu1 %v12845_v49  ;;  %v12797_v49 = vor.u32 %v16073_v52, %v12796_v39  ;;  %v13772_v61 = vld [vmem:[%s24386_s1 + $0x1b00] sm:$0xf]  ;;  %v13501_v23 = vor.u32 %v16249_v48, %v13500_v46  ;;  %v4448_v39 = vpop.f32.mrf.mxu0  ;;  %v16217_v52 = vld [vmem:[%s24386_s1 + $0x17ec] sm:$0xf0] }
 0x270   :  { %6493 = vmatpush.bf16.msrb.mxu0 %v13133_v58  ;;  %v13388_v58 = vld [vmem:[%s24386_s1 + $0x1800] sm:$0xf]  ;;  %v16137_v20 = vld [vmem:[%s24386_s1 + $0x156c] sm:$0xf0] }
 0x271   :  { %6508 = vmatpush.bf16.msrb.mxu3 %v13229_v30  ;;  %6484 = vmatpush.bf16.msra.mxu2 %v12941_v34  ;;  %v16253_v30 = vld [vmem:[%s24386_s1 + $0x190c] sm:$0xf0]  ;;  %v4447_v34 = vadd.f32 %v4446_v31, %v4434_v33  ;;  %v13068_v1 = vld [vmem:[%s24386_s1 + $0x1580] sm:$0xf] }
 0x272   :  { %v13517_v41 = vor.u32 %v16253_v30, %v13516_v24  ;;  %v16321_v33 = vld [vmem:[%s24386_s1 + $0x1b2c] sm:$0xf0]  ;;  %v13484_v2 = vld [vmem:[%s24386_s1 + $0x18c0] sm:$0xf] }
 0x273   :  { %6470 = vmatpush.bf16.msrb.mxu1 %v12829_v43  ;;  %v16145_v43 = vld [vmem:[%s24386_s1 + $0x15ac] sm:$0xf0]  ;;  %v13789_v51 = vor.u32 %v16321_v33, %v13788_v29  ;;  %v13372_v26 = vld [vmem:[%s24386_s1 + $0x17e0] sm:$0xf] }
 0x274   :  { %6494 = vmatpush.bf16.msrb.mxu0 %v13117_v0  ;;  %v13085_v57 = vor.u32 %v16145_v43, %v13084_v62  ;;  %v13756_v50 = vld [vmem:[%s24386_s1 + $0x1ae0] sm:$0xf]  ;;  %v16293_v25 = vld [vmem:[%s24386_s1 + $0x1a4c] sm:$0xf0]  ;;  %v13373_v24 = vor.u32 %v16217_v52, %v13372_v26 }
 0x275   :  { %6509 = vmatpush.bf16.msrb.mxu3 %v13213_v56  ;;  %6485 = vmatpush.bf16.msra.mxu2 %v12925_v60  ;;  %v13405_v56 = vor.u32 %v16225_v5, %v13404_v36  ;;  %v16221_v60 = vld [vmem:[%s24386_s1 + $0x180c] sm:$0xf0]  ;;  %v13052_v59 = vld [vmem:[%s24386_s1 + $0x1560] sm:$0xf]  ;;  %v13757_v30 = vor.u32 %v16313_v16, %v13756_v50 }
 0x276   :  { %v13389_v19 = vor.u32 %v16221_v60, %v13388_v58  ;;  %v13676_v37 = vld [vmem:[%s24386_s1 + $0x1a40] sm:$0xf]  ;;  %v16241_v12 = vld [vmem:[%s24386_s1 + $0x18ac] sm:$0xf0]  ;;  %v13053_v31 = vor.u32 %v16137_v20, %v13052_v59 }
 0x277   :  { %6471 = vmatpush.bf16.msrb.mxu1 %v12813_v3  ;;  %v16245_v3 = vld [vmem:[%s24386_s1 + $0x18cc] sm:$0xf0]  ;;  %v13468_v22 = vld [vmem:[%s24386_s1 + $0x18a0] sm:$0xf] }
 0x278   :  { %6486 = vmatmul.bf16.vlgmr.msra.gmra.mxu2 %v17011_v8  ;;  %6495 = vmatpush.bf16.msrb.mxu0 %v13101_v18  ;;  %v13485_v0 = vor.u32 %v16245_v3, %v13484_v2  ;;  %v13469_v18 = vor.u32 %v16241_v12, %v13468_v22  ;;  %v16309_v36 = vld [vmem:[%s24386_s1 + $0x1acc] sm:$0xf0]  ;;  %v13660_v5 = vld [vmem:[%s24386_s1 + $0x1a20] sm:$0xf] }
 0x279   :  { %6530 = vmatpush.bf16.msrb.mxu2 %v13549_v63  ;;  %6510 = vmatpush.bf16.msrb.mxu3 %v13197_v13  ;;  %v16317_v63 = vld [vmem:[%s24386_s1 + $0x1b0c] sm:$0xf0]  ;;  %v13069_v13 = vor.u32 %v16141_v55, %v13068_v1  ;;  %v13724_v58 = vld [vmem:[%s24386_s1 + $0x1aa0] sm:$0xf] }
 0x27a   :  { %v13773_v10 = vor.u32 %v16317_v63, %v13772_v61  ;;  %v16289_v29 = vld [vmem:[%s24386_s1 + $0x1a2c] sm:$0xf0]  ;;  %v13644_v63 = vld [vmem:[%s24386_s1 + $0x1a00] sm:$0xf] }
 0x27b   :  { %6472 = vmatpush.bf16.msrb.mxu1 %v12797_v49  ;;  %v16237_v33 = vld [vmem:[%s24386_s1 + $0x188c] sm:$0xf0]  ;;  %v4472_v62 = vpop.f32.mrf.mxu1  ;;  %v4485_v48 = vpop.f32.mrf.mxu3  ;;  %v13661_v60 = vor.u32 %v16289_v29, %v13660_v5  ;;  %v20874_v2 = vld [vmem:[%s24386_s1 + $0x1b80] sm:$0xff] }
 0x27c   :  { %6496 = vmatpush.bf16.msrb.mxu0 %v13085_v57  ;;  %v16209_v57 = vld [vmem:[%s24386_s1 + $0x17ac] sm:$0xf0]  ;;  %v13436_v39 = vld [vmem:[%s24386_s1 + $0x1860] sm:$0xf] }
 0x27d   :  { %6531 = vmatpush.bf16.msrb.mxu2 %v13533_v27  ;;  %6511 = vmatpush.bf16.msrb.mxu3 %v13181_v32  ;;  %v4459_v27 = vpop.f32.mrf.mxu2  ;;  %v13356_v32 = vld [vmem:[%s24386_s1 + $0x17c0] sm:$0xf]  ;;  %v16285_v3 = vld [vmem:[%s24386_s1 + $0x1a0c] sm:$0xf0] }
 0x27e   :  { %6473 = vmatmul.bf16.vlgmr.msrb.gmra.mxu1 %v17024_v14  ;;  %v4460_v49 = vadd.f32 %v4459_v27, %v4447_v34  ;;  %v13740_v34 = vld [vmem:[%s24386_s1 + $0x1ac0] sm:$0xf]  ;;  %v16205_v16 = vld [vmem:[%s24386_s1 + $0x178c] sm:$0xf0]  ;;  %v13645_v59 = vor.u32 %v16285_v3, %v13644_v63  ;;  %v16159_v3 = vld [vmem:[%s24386_s1 + $0x1624] sm:$0xf] }
 0x27f   :  { %6517 = vmatpush.bf16.msra.mxu1 %v13421_v6  ;;  %v16213_v6 = vld [vmem:[%s24386_s1 + $0x17cc] sm:$0xf0]  ;;  %v13324_v50 = vld [vmem:[%s24386_s1 + $0x1780] sm:$0xf] }
 0x280   :  { %6512 = vmatmul.bf16.vlgmr.msrb.gmra.mxu3 %v17208_v45  ;;  %6497 = vmatpush.bf16.msrb.mxu0 %v13069_v13  ;;  %v13357_v43 = vor.u32 %v16213_v6, %v13356_v32  ;;  %v4473_v46 = vadd.f32 %v4472_v62, %v4460_v49  ;;  %v12782_v13 = vld [vmem:[%s24386_s1 + $0x1350] sm:$0xf0]  ;;  %v16301_v27 = vld [vmem:[%s24386_s1 + $0x1a8c] sm:$0xf0]  ;;  %v13628_v22 = vld [vmem:[%s24386_s1 + $0x19e0] sm:$0xf] }
 0x281   :  { %6556 = vmatpush.bf16.msra.mxu3 %v13805_v35  ;;  %6532 = vmatpush.bf16.msrb.mxu2 %v13517_v41  ;;  %v13677_v35 = vor.u32 %v16293_v25, %v13676_v37  ;;  %v13452_v41 = vld [vmem:[%s24386_s1 + $0x1880] sm:$0xf]  ;;  %v16281_v12 = vld [vmem:[%s24386_s1 + $0x19ec] sm:$0xf0]  ;;  %v13166_v62 = vld [vmem:[%s24386_s1 + $0x1650] sm:$0xf0] }
 0x282   :  { %v13453_v61 = vor.u32 %v16237_v33, %v13452_v41  ;;  %v20869_v1 = vadd.f32 %v4485_v48, %v4473_v46  ;;  %v13708_v37 = vld [vmem:[%s24386_s1 + $0x1a80] sm:$0xf]  ;;  %v16297_v29 = vld [vmem:[%s24386_s1 + $0x1a6c] sm:$0xf0]  ;;  %v16163_v41 = vld [vmem:[%s24386_s1 + $0x1644] sm:$0xf] }
 0x283   :  { %6518 = vmatpush.bf16.msra.mxu1 %v13405_v56  ;;  %v13741_v56 = vor.u32 %v16309_v36, %v13740_v34  ;;  %v4474_v49 = vpop.f32.mrf.mxu1  ;;  %v4487_v32 = vpop.f32.mrf.mxu3  ;;  %v13709_v6 = vor.u32 %v16301_v27, %v13708_v37  ;;  %v13629_v36 = vor.u32 %v16281_v12, %v13628_v22  ;;  %v13692_v5 = vld [vmem:[%s24386_s1 + $0x1a60] sm:$0xf]  ;;  %v16277_v46 = vld [vmem:[%s24386_s1 + $0x19cc] sm:$0xf0]  ;;  %v16155_v27 = vld [vmem:[%s24386_s1 + $0x1604] sm:$0xf] }
 0x284   :  { %6498 = vmatpush.bf16.msrb.mxu0 %v13053_v31  ;;  %v12766_v31 = vld [vmem:[%s24386_s1 + $0x1330] sm:$0xf0]  ;;  %v4498_v63 = vpop.f32.mrf.mxu0  ;;  %v13580_v49 = vld [vmem:[%s24386_s1 + $0x1980] sm:$0xf]  ;;  %v16051_v32 = vld [vmem:[%s24386_s1 + $0x12c4] sm:$0xf] }
 0x285   :  { %6557 = vmatpush.bf16.msra.mxu3 %v13789_v51  ;;  %6533 = vmatpush.bf16.msrb.mxu2 %v13501_v23  ;;  %v13340_v51 = vld [vmem:[%s24386_s1 + $0x17a0] sm:$0xf]  ;;  %v16305_v23 = vld [vmem:[%s24386_s1 + $0x1aac] sm:$0xf0]  ;;  %v4461_v55 = vpop.f32.mrf.mxu2 }
 0x286   :  { %v13341_v26 = vor.u32 %v16209_v57, %v13340_v51  ;;  %v13725_v52 = vor.u32 %v16305_v23, %v13724_v58  ;;  %v12750_v51 = vld [vmem:[%s24386_s1 + $0x1310] sm:$0xf0]  ;;  %v13693_v57 = vor.u32 %v16297_v29, %v13692_v5  ;;  %v16329_v55 = vld [vmem:[%s24386_s1 + $0x1b6c] sm:$0xf0] }
 0x287   :  { %6519 = vmatpush.bf16.msra.mxu1 %v13389_v19  ;;  %v16233_v19 = vld [vmem:[%s24386_s1 + $0x186c] sm:$0xf0]  ;;  %6499 = vmatmul.bf16.vlgmr.msrb.gmra.mxu0 %v17013_v9 }
 0x288   :  { %6543 = vmatpush.bf16.msra.mxu0 %v13677_v35  ;;  %v13437_v20 = vor.u32 %v16233_v19, %v13436_v39  ;;  %v13308_v35 = vld [vmem:[%s24386_s1 + $0x1760] sm:$0xf]  ;;  %v13150_v39 = vld [vmem:[%s24386_s1 + $0x1630] sm:$0xf0]  ;;  %v4499_v19 = vadd.f32 %v4498_v63, %v20869_v1  ;;  %v16055_v1 = vld [vmem:[%s24386_s1 + $0x12e4] sm:$0xf] }
 0x289   :  { %6558 = vmatpush.bf16.msra.mxu3 %v13773_v10  ;;  %6534 = vmatpush.bf16.msrb.mxu2 %v13485_v0  ;;  %v16067_v10 = vld [vmem:[%s24386_s1 + $0x1344] sm:$0xf]  ;;  %v5848_v0 = vunpack.c.l.b16 %v20874_v2 }
 0x28a   :  { %v12785_v25 = vor.u32 %v16067_v10, %v12782_v13  ;;  %v13596_v10 = vld [vmem:[%s24386_s1 + $0x19a0] sm:$0xf]  ;;  %v16273_v13 = vld [vmem:[%s24386_s1 + $0x19ac] sm:$0xf0] }
 0x28b   :  { %6520 = vmatpush.bf16.msra.mxu1 %v13373_v24  ;;  %v13325_v24 = vor.u32 %v16205_v16, %v13324_v50  ;;  %v6144_v34 = vpack.c.b16 %v5848_v0, %v5848_v0  ;;  %v13038_v50 = vld [vmem:[%s24386_s1 + $0x1550] sm:$0xf0]  ;;  %v13597_v37 = vor.u32 %v16273_v13, %v13596_v10 }
 0x28c   :  { %6544 = vmatpush.bf16.msra.mxu0 %v13661_v60  ;;  %v13820_v60 = vld [vmem:[%s24386_s1 + $0x1b60] sm:$0xf]  ;;  %v12734_v16 = vld [vmem:[%s24386_s1 + $0x12f0] sm:$0xf0]  ;;  %v4500_v5 = vpop.f32.mrf.mxu0 }
 0x28d   :  { %6559 = vmatpush.bf16.msra.mxu3 %v13757_v30  ;;  %6535 = vmatpush.bf16.msrb.mxu2 %v13469_v18  ;;  %v16063_v30 = vld [vmem:[%s24386_s1 + $0x1324] sm:$0xf]  ;;  %v16201_v18 = vld [vmem:[%s24386_s1 + $0x176c] sm:$0xf0]  ;;  %v6441_v58 = vsel %vm1841_vm0, %v6144_v34, 0  ;;  %v13821_v0 = vor.u32 %v16329_v55, %v13820_v60  ;;  %v12737_v12 = vor.u32 %v16055_v1, %v12734_v16 }
 0x28e   :  { %v12769_v33 = vor.u32 %v16063_v30, %v12766_v31  ;;  %v13309_v48 = vor.u32 %v16201_v18, %v13308_v35  ;;  %v16127_v30 = vld [vmem:[%s24386_s1 + $0x1524] sm:$0xf]  ;;  %v13022_v31 = vld [vmem:[%s24386_s1 + $0x1530] sm:$0xf0] }
 0x28f   :  { %6521 = vmatpush.bf16.msra.mxu1 %v13357_v43  ;;  %v13612_v43 = vld [vmem:[%s24386_s1 + $0x19c0] sm:$0xf]  ;;  %v16151_v34 = vld [vmem:[%s24386_s1 + $0x15e4] sm:$0xf]  ;;  %v13025_v29 = vor.u32 %v16127_v30, %v13022_v31  ;;  %v12702_v60 = vld [vmem:[%s24386_s1 + $0x12b0] sm:$0xf0] }
 0x290   :  { %6545 = vmatpush.bf16.msra.mxu0 %v13645_v59  ;;  %v13613_v23 = vor.u32 %v16277_v46, %v13612_v43  ;;  %v20980_v59 = vpop.f32.mrf.mxu3  ;;  %v16123_v43 = vld [vmem:[%s24386_s1 + $0x1504] sm:$0xf]  ;;  %v12894_v1 = vld [vmem:[%s24386_s1 + $0x1430] sm:$0xf0] }
 0x291   :  { %6560 = vmatpush.bf16.msra.mxu3 %v13741_v56  ;;  %6536 = vmatpush.bf16.msrb.mxu2 %v13453_v61  ;;  %v16059_v56 = vld [vmem:[%s24386_s1 + $0x1304] sm:$0xf]  ;;  %v13169_v61 = vor.u32 %v16163_v41, %v13166_v62  ;;  %v16265_v62 = vld [vmem:[%s24386_s1 + $0x196c] sm:$0xf0] }
 0x292   :  { %v16091_v31 = vld [vmem:[%s24386_s1 + $0x1404] sm:$0xf] }
 0x293   :  { %6522 = vmatpush.bf16.msra.mxu1 %v13341_v26  ;;  %v12753_v26 = vor.u32 %v16059_v56, %v12750_v51  ;;  %v4511_v46 = vpop.f32.mrf.mxu2  ;;  %v16099_v56 = vld [vmem:[%s24386_s1 + $0x1444] sm:$0xf]  ;;  %v12910_v51 = vld [vmem:[%s24386_s1 + $0x1450] sm:$0xf0] }
 0x294   :  { %6546 = vmatpush.bf16.msra.mxu0 %v13629_v36  ;;  %v13118_v36 = vld [vmem:[%s24386_s1 + $0x15f0] sm:$0xf0]  ;;  %v16195_v5 = vld [vmem:[%s24386_s1 + $0x1744] sm:$0xf] }
 0x295   :  { %6561 = vmatpush.bf16.msra.mxu3 %v13725_v52  ;;  %6537 = vmatpush.bf16.msrb.mxu2 %v13437_v20  ;;  %v16131_v52 = vld [vmem:[%s24386_s1 + $0x1544] sm:$0xf]  ;;  %v13153_v20 = vor.u32 %v16159_v3, %v13150_v39  ;;  %v12913_v3 = vor.u32 %v16099_v56, %v12910_v51  ;;  %v12958_v56 = vld [vmem:[%s24386_s1 + $0x14b0] sm:$0xf0] }
 0x296   :  { %v13041_v22 = vor.u32 %v16131_v52, %v13038_v50  ;;  %v16147_v39 = vld [vmem:[%s24386_s1 + $0x15c4] sm:$0xf]  ;;  %v12990_v52 = vld [vmem:[%s24386_s1 + $0x14f0] sm:$0xf0] }
 0x297   :  { %6523 = vmatpush.bf16.msra.mxu1 %v13325_v24  ;;  %v16269_v24 = vld [vmem:[%s24386_s1 + $0x198c] sm:$0xf0]  ;;  %v16095_v50 = vld [vmem:[%s24386_s1 + $0x1424] sm:$0xf] }
 0x298   :  { %6538 = vmatmul.bf16.vlgmr.msrb.gmra.mxu2 %v17189_v38  ;;  %6547 = vmatpush.bf16.msra.mxu0 %v13613_v23  ;;  %v13581_v18 = vor.u32 %v16269_v24, %v13580_v49  ;;  %v13121_v23 = vor.u32 %v16151_v34, %v13118_v36  ;;  %v13086_v49 = vld [vmem:[%s24386_s1 + $0x15b0] sm:$0xf0]  ;;  %v16115_v24 = vld [vmem:[%s24386_s1 + $0x14c4] sm:$0xf] }
 0x299   :  { %6582 = vmatpush.bf16.msra.mxu2 %v12785_v25  ;;  %6562 = vmatpush.bf16.msra.mxu3 %v13709_v6  ;;  %v13134_v25 = vld [vmem:[%s24386_s1 + $0x1610] sm:$0xf0]  ;;  %v16087_v51 = vld [vmem:[%s24386_s1 + $0x13e4] sm:$0xf] }
 0x29a   :  { %v12718_v6 = vld [vmem:[%s24386_s1 + $0x12d0] sm:$0xf0]  ;;  %v13137_v35 = vor.u32 %v16155_v27, %v13134_v25 }
 0x29b   :  { %6524 = vmatpush.bf16.msra.mxu1 %v13309_v48  ;;  %v12721_v41 = vor.u32 %v16051_v32, %v12718_v6  ;;  %v13006_v48 = vld [vmem:[%s24386_s1 + $0x1510] sm:$0xf0]  ;;  %v4524_v10 = vpop.f32.mrf.mxu1  ;;  %v4513_v6 = vpop.f32.mrf.mxu2 }
 0x29c   :  { %6548 = vmatpush.bf16.msra.mxu0 %v13597_v37  ;;  %v13009_v55 = vor.u32 %v16123_v43, %v13006_v48  ;;  %v12878_v32 = vld [vmem:[%s24386_s1 + $0x1410] sm:$0xf0]  ;;  %v16079_v6 = vld [vmem:[%s24386_s1 + $0x13a4] sm:$0xf] }
 0x29d   :  { %6583 = vmatpush.bf16.msra.mxu2 %v12769_v33  ;;  %6563 = vmatpush.bf16.msra.mxu3 %v13693_v57  ;;  %v13564_v33 = vld [vmem:[%s24386_s1 + $0x1960] sm:$0xf]  ;;  %v4512_v57 = vadd.f32 %v4511_v46, %v4499_v19  ;;  %v13102_v19 = vld [vmem:[%s24386_s1 + $0x15d0] sm:$0xf0]  ;;  %v16111_v46 = vld [vmem:[%s24386_s1 + $0x14a4] sm:$0xf] }
 0x29e   :  { %6525 = vmatmul.bf16.vlgmr.msra.gmra.mxu1 %v17200_v42  ;;  %v13565_v63 = vor.u32 %v16265_v62, %v13564_v33  ;;  %v13105_v37 = vor.u32 %v16147_v39, %v13102_v19  ;;  %v12670_v34 = vld [vmem:[%s24386_s1 + $0x1270] sm:$0xf0]  ;;  %v12881_v33 = vor.u32 %v16091_v31, %v12878_v32  ;;  %v16139_v62 = vld [vmem:[%s24386_s1 + $0x1584] sm:$0xf] }
 0x29f   :  { %6575 = vmatpush.bf16.msrb.mxu1 %v6441_v58  ;;  %v16047_v58 = vld [vmem:[%s24386_s1 + $0x12a4] sm:$0xf]  ;;  %v4525_v16 = vadd.f32 %v4524_v10, %v4512_v57  ;;  %v13070_v43 = vld [vmem:[%s24386_s1 + $0x1590] sm:$0xf0] }
 0x2a0   :  { %6564 = vmatmul.bf16.vlgmr.msra.gmra.mxu3 %v17404_v28  ;;  %6549 = vmatpush.bf16.msra.mxu0 %v13581_v18  ;;  %v12705_v13 = vor.u32 %v16047_v58, %v12702_v60  ;;  %v16039_v18 = vld [vmem:[%s24386_s1 + $0x1264] sm:$0xf]  ;;  %v12862_v57 = vld [vmem:[%s24386_s1 + $0x13f0] sm:$0xf0] }
 0x2a1   :  { %6621 = vmatpush.bf16.msrb.mxu3 %v13169_v61  ;;  %6584 = vmatpush.bf16.msra.mxu2 %v12753_v26  ;;  %v4539_v61 = vpop.f32.mrf.mxu3  ;;  %v16119_v26 = vld [vmem:[%s24386_s1 + $0x14e4] sm:$0xf]  ;;  %v21063_v27 = vadd.f32 %v20980_v59, %v4525_v16  ;;  %v12974_v59 = vld [vmem:[%s24386_s1 + $0x14d0] sm:$0xf0]  ;;  %v12673_v48 = vor.u32 %v16039_v18, %v12670_v34  ;;  %v12865_v39 = vor.u32 %v16087_v51, %v12862_v57 }
 0x2a2   :  { %v12993_v25 = vor.u32 %v16119_v26, %v12990_v52  ;;  %v16135_v19 = vld [vmem:[%s24386_s1 + $0x1564] sm:$0xf]  ;;  %v13054_v26 = vld [vmem:[%s24386_s1 + $0x1570] sm:$0xf0] }
 0x2a3   :  { %6576 = vmatpush.bf16.msrb.mxu1 %v13821_v0  ;;  %v16043_v0 = vld [vmem:[%s24386_s1 + $0x1284] sm:$0xf]  ;;  %v4526_v58 = vpop.f32.mrf.mxu1  ;;  %v13662_v32 = vld [vmem:[%s24386_s1 + $0x1a30] sm:$0xf0] }
 0x2a4   :  { %6550 = vmatpush.bf16.msra.mxu0 %v13565_v63  ;;  %v16191_v63 = vld [vmem:[%s24386_s1 + $0x1724] sm:$0xf]  ;;  %v13646_v51 = vld [vmem:[%s24386_s1 + $0x1a10] sm:$0xf0] }
 0x2a5   :  { %6622 = vmatpush.bf16.msrb.mxu3 %v13153_v20  ;;  %6585 = vmatpush.bf16.msra.mxu2 %v12737_v12  ;;  %v12686_v20 = vld [vmem:[%s24386_s1 + $0x1290] sm:$0xf0]  ;;  %v16143_v12 = vld [vmem:[%s24386_s1 + $0x15a4] sm:$0xf] }
 0x2a6   :  { %v12689_v30 = vor.u32 %v16043_v0, %v12686_v20  ;;  %v13089_v36 = vor.u32 %v16143_v12, %v13086_v49  ;;  %v16107_v10 = vld [vmem:[%s24386_s1 + $0x1484] sm:$0xf]  ;;  %v12846_v0 = vld [vmem:[%s24386_s1 + $0x13d0] sm:$0xf0]  ;;  %v13057_v20 = vor.u32 %v16135_v19, %v13054_v26 }
 0x2a7   :  { %6608 = vmatpush.bf16.msra.mxu1 %v13041_v22  ;;  %v12897_v22 = vor.u32 %v16095_v50, %v12894_v1  ;;  %6551 = vmatmul.bf16.vlgmr.msra.gmra.mxu0 %v17210_v47  ;;  %v16291_v52 = vld [vmem:[%s24386_s1 + $0x1a44] sm:$0xf]  ;;  %v13678_v50 = vld [vmem:[%s24386_s1 + $0x1a50] sm:$0xf0] }
 0x2a8   :  { %6595 = vmatpush.bf16.msrb.mxu0 %v12913_v3  ;;  %v12961_v3 = vor.u32 %v16111_v46, %v12958_v56  ;;  %v16083_v16 = vld [vmem:[%s24386_s1 + $0x13c4] sm:$0xf]  ;;  %v13681_v12 = vor.u32 %v16291_v52, %v13678_v50  ;;  %v13630_v52 = vld [vmem:[%s24386_s1 + $0x19f0] sm:$0xf0] }
 0x2a9   :  { %6623 = vmatpush.bf16.msrb.mxu3 %v13137_v35  ;;  %6586 = vmatpush.bf16.msra.mxu2 %v12721_v41  ;;  %v4673_v35 = vmax.f32 %v19177_v17, %v21063_v27  ;;  %v12977_v41 = vor.u32 %v16115_v24, %v12974_v59  ;;  %v21118_v60 = vpop.f32.mrf.mxu3  ;;  %v16103_v49 = vld [vmem:[%s24386_s1 + $0x1464] sm:$0xf]  ;;  %v12926_v24 = vld [vmem:[%s24386_s1 + $0x1470] sm:$0xf0]  ;;  %v12849_v59 = vor.u32 %v16083_v16, %v12846_v0 }
 0x2aa   :  { %v16287_v31 = vld [vmem:[%s24386_s1 + $0x1a24] sm:$0xf] }
 0x2ab   :  { %6609 = vmatpush.bf16.msra.mxu1 %v13025_v29  ;;  %v13294_v29 = vld [vmem:[%s24386_s1 + $0x1750] sm:$0xf0]  ;;  %v16283_v56 = vld [vmem:[%s24386_s1 + $0x1a04] sm:$0xf] }
 0x2ac   :  { %6596 = vmatpush.bf16.msrb.mxu0 %v12897_v22  ;;  %v13297_v61 = vor.u32 %v16195_v5, %v13294_v29  ;;  %v16259_v5 = vld [vmem:[%s24386_s1 + $0x1944] sm:$0xf]  ;;  %v13550_v29 = vld [vmem:[%s24386_s1 + $0x1950] sm:$0xf0] }
 0x2ad   :  { %6624 = vmatpush.bf16.msrb.mxu3 %v13121_v23  ;;  %6587 = vmatpush.bf16.msra.mxu2 %v12705_v13  ;;  %v13073_v23 = vor.u32 %v16139_v62, %v13070_v43  ;;  %v12942_v13 = vld [vmem:[%s24386_s1 + $0x1490] sm:$0xf0]  ;;  %v12929_v62 = vor.u32 %v16103_v49, %v12926_v24  ;;  %v13665_v43 = vor.u32 %v16287_v31, %v13662_v32  ;;  %v16075_v57 = vld [vmem:[%s24386_s1 + $0x1384] sm:$0xf] }
 0x2ae   :  { %13834 = vmatmul.msk.bf16.vlgmr.msrb.gmra.mxu1 %vm1837_vm1, %v17318_v40  ;;  %v12945_v22 = vor.u32 %v16107_v10, %v12942_v13  ;;  %v16279_v19 = vld [vmem:[%s24386_s1 + $0x19e4] sm:$0xf]  ;;  %v13214_v49 = vld [vmem:[%s24386_s1 + $0x16b0] sm:$0xf0] }
 0x2af   :  { %6610 = vmatpush.bf16.msra.mxu1 %v13009_v55  ;;  %v13278_v55 = vld [vmem:[%s24386_s1 + $0x1730] sm:$0xf0]  ;;  %v16071_v50 = vld [vmem:[%s24386_s1 + $0x1364] sm:$0xf] }
 0x2b0   :  { %6597 = vmatpush.bf16.msrb.mxu0 %v12881_v33  ;;  %v13281_v1 = vor.u32 %v16191_v63, %v13278_v55  ;;  %v13246_v33 = vld [vmem:[%s24386_s1 + $0x16f0] sm:$0xf0]  ;;  %v16179_v55 = vld [vmem:[%s24386_s1 + $0x16c4] sm:$0xf] }
 0x2b1   :  { %6625 = vmatpush.bf16.msrb.mxu3 %v13105_v37  ;;  %6588 = vmatpush.bf16.msra.mxu2 %v12689_v30  ;;  %v16187_v37 = vld [vmem:[%s24386_s1 + $0x1704] sm:$0xf]  ;;  %v4550_v30 = vpop.f32.mrf.mxu0  ;;  %v4578_v18 = vpop.f32.mrf.mxu3  ;;  %v13534_v63 = vld [vmem:[%s24386_s1 + $0x1930] sm:$0xf0] }
 0x2b2   :  { %v16251_v0 = vld [vmem:[%s24386_s1 + $0x1904] sm:$0xf]  ;;  %v13614_v18 = vld [vmem:[%s24386_s1 + $0x19d0] sm:$0xf0] }
 0x2b3   :  { %6611 = vmatpush.bf16.msra.mxu1 %v12993_v25  ;;  %v13262_v25 = vld [vmem:[%s24386_s1 + $0x1710] sm:$0xf0]  ;;  %v14760_v17 = vld [vmem:[%s24386_s1 + $0x2080] sm:$0xf0] }
 0x2b4   :  { %6598 = vmatpush.bf16.msrb.mxu0 %v12865_v39  ;;  %v13265_v34 = vor.u32 %v16187_v37, %v13262_v25  ;;  %v13649_v39 = vor.u32 %v16283_v56, %v13646_v51  ;;  %v16227_v37 = vld [vmem:[%s24386_s1 + $0x1844] sm:$0xf]  ;;  %v4563_v25 = vpop.f32.mrf.mxu2 }
 0x2b5   :  { %6626 = vmatpush.bf16.msrb.mxu3 %v13089_v36  ;;  %6589 = vmatpush.bf16.msra.mxu2 %v12673_v48  ;;  %v12830_v36 = vld [vmem:[%s24386_s1 + $0x13b0] sm:$0xf0]  ;;  %v13553_v48 = vor.u32 %v16259_v5, %v13550_v29  ;;  %v4564_v24 = vadd.f32 %v4563_v25, %v4550_v30  ;;  %v16247_v5 = vld [vmem:[%s24386_s1 + $0x18e4] sm:$0xf] }
 0x2b6   :  { %v12833_v46 = vor.u32 %v16079_v6, %v12830_v36  ;;  %v16275_v6 = vld [vmem:[%s24386_s1 + $0x19c4] sm:$0xf]  ;;  %v13502_v29 = vld [vmem:[%s24386_s1 + $0x18f0] sm:$0xf0] }
 0x2b7   :  { %6612 = vmatpush.bf16.msra.mxu1 %v12977_v41  ;;  %v16183_v41 = vld [vmem:[%s24386_s1 + $0x16e4] sm:$0xf]  ;;  %v13505_v56 = vor.u32 %v16247_v5, %v13502_v29  ;;  %v13454_v29 = vld [vmem:[%s24386_s1 + $0x1890] sm:$0xf0] }
 0x2b8   :  { %6590 = vmatmul.bf16.vlgmr.msra.gmra.mxu2 %v17026_v15  ;;  %6599 = vmatpush.bf16.msrb.mxu0 %v12849_v59  ;;  %v13249_v58 = vor.u32 %v16183_v41, %v13246_v33  ;;  %v13633_v59 = vor.u32 %v16279_v19, %v13630_v52  ;;  %v16223_v41 = vld [vmem:[%s24386_s1 + $0x1824] sm:$0xf]  ;;  %v13806_v52 = vld [vmem:[%s24386_s1 + $0x1b50] sm:$0xf0] }
 0x2b9   :  { %6634 = vmatpush.bf16.msrb.mxu2 %v13297_v61  ;;  %6627 = vmatpush.bf16.msrb.mxu3 %v13073_v23  ;;  %v12814_v61 = vld [vmem:[%s24386_s1 + $0x1390] sm:$0xf0]  ;;  %v16255_v23 = vld [vmem:[%s24386_s1 + $0x1924] sm:$0xf]  ;;  %v4552_v26 = vpop.f32.mrf.mxu0 }
 0x2ba   :  { %v12817_v10 = vor.u32 %v16075_v57, %v12814_v61  ;;  %v13537_v13 = vor.u32 %v16255_v23, %v13534_v63  ;;  %v16271_v51 = vld [vmem:[%s24386_s1 + $0x19a4] sm:$0xf]  ;;  %v13598_v57 = vld [vmem:[%s24386_s1 + $0x19b0] sm:$0xf0] }
 0x2bb   :  { %6613 = vmatpush.bf16.msra.mxu1 %v12961_v3  ;;  %v13230_v3 = vld [vmem:[%s24386_s1 + $0x16d0] sm:$0xf0]  ;;  %v4589_v33 = vpop.f32.mrf.mxu1  ;;  %v16243_v23 = vld [vmem:[%s24386_s1 + $0x18c4] sm:$0xf] }
 0x2bc   :  { %6600 = vmatpush.bf16.msrb.mxu0 %v12833_v46  ;;  %v13233_v16 = vor.u32 %v16179_v55, %v13230_v3  ;;  %v13486_v63 = vld [vmem:[%s24386_s1 + $0x18d0] sm:$0xf0]  ;;  %v16219_v55 = vld [vmem:[%s24386_s1 + $0x1804] sm:$0xf]  ;;  %v4565_v3 = vpop.f32.mrf.mxu2 }
 0x2bd   :  { %6635 = vmatpush.bf16.msrb.mxu2 %v13281_v1  ;;  %6628 = vmatpush.bf16.msrb.mxu3 %v13057_v20  ;;  %v12798_v1 = vld [vmem:[%s24386_s1 + $0x1370] sm:$0xf0]  ;;  %v16167_v19 = vld [vmem:[%s24386_s1 + $0x1664] sm:$0xf] }
 0x2be   :  { %v13518_v20 = vld [vmem:[%s24386_s1 + $0x1910] sm:$0xf0]  ;;  %v12801_v31 = vor.u32 %v16071_v50, %v12798_v1  ;;  %v13489_v1 = vor.u32 %v16243_v23, %v13486_v63  ;;  %v16239_v25 = vld [vmem:[%s24386_s1 + $0x18a4] sm:$0xf] }
 0x2bf   :  { %6614 = vmatpush.bf16.msra.mxu1 %v12945_v22  ;;  %v13422_v22 = vld [vmem:[%s24386_s1 + $0x1850] sm:$0xf0]  ;;  %v13521_v32 = vor.u32 %v16251_v0, %v13518_v20  ;;  %v16231_v63 = vld [vmem:[%s24386_s1 + $0x1864] sm:$0xf] }
 0x2c0   :  { %6629 = vmatmul.bf16.vlgmr.msrb.gmra.mxu3 %v17013_v9  ;;  %6601 = vmatpush.bf16.msrb.mxu0 %v12817_v10  ;;  %v13425_v30 = vor.u32 %v16227_v37, %v13422_v22  ;;  %v13182_v26 = vld [vmem:[%s24386_s1 + $0x1670] sm:$0xf0]  ;;  %v13601_v10 = vor.u32 %v16271_v51, %v13598_v57 }
 0x2c1   :  { %6673 = vmatpush.bf16.msra.mxu3 %v13681_v12  ;;  %6636 = vmatpush.bf16.msrb.mxu2 %v13265_v34  ;;  %v16175_v12 = vld [vmem:[%s24386_s1 + $0x16a4] sm:$0xf]  ;;  %v4577_v34 = vadd.f32 %v21118_v60, %v4564_v24  ;;  %v13406_v60 = vld [vmem:[%s24386_s1 + $0x1830] sm:$0xf0]  ;;  %v13185_v37 = vor.u32 %v16167_v19, %v13182_v26  ;;  %v12900_v19 = vld [vmem:[%s24386_s1 + $0x1428] sm:$0xf] }
 0x2c2   :  { %v13217_v36 = vor.u32 %v16175_v12, %v13214_v49  ;;  %v13582_v0 = vld [vmem:[%s24386_s1 + $0x1990] sm:$0xf0]  ;;  %v16215_v24 = vld [vmem:[%s24386_s1 + $0x17e4] sm:$0xf]  ;;  %v16098_v26 = vld [vmem:[%s24386_s1 + $0x1434] sm:$0xf0] }
 0x2c3   :  { %6615 = vmatpush.bf16.msra.mxu1 %v12929_v62  ;;  %v16171_v62 = vld [vmem:[%s24386_s1 + $0x1684] sm:$0xf]  ;;  %v21268_v46 = vadd.f32 %v4589_v33, %v4577_v34  ;;  %v21301_v50 = vpop.f32.mrf.mxu3  ;;  %v13470_v22 = vld [vmem:[%s24386_s1 + $0x18b0] sm:$0xf0]  ;;  %v4591_v12 = vpop.f32.mrf.mxu1  ;;  %v16102_v33 = vld [vmem:[%s24386_s1 + $0x1454] sm:$0xf0] }
 0x2c4   :  { %6602 = vmatpush.bf16.msrb.mxu0 %v12801_v31  ;;  %v16263_v34 = vld [vmem:[%s24386_s1 + $0x1964] sm:$0xf]  ;;  %v13774_v51 = vld [vmem:[%s24386_s1 + $0x1b10] sm:$0xf0]  ;;  %v12884_v12 = vld [vmem:[%s24386_s1 + $0x1408] sm:$0xf] }
 0x2c5   :  { %6674 = vmatpush.bf16.msra.mxu3 %v13665_v43  ;;  %6637 = vmatpush.bf16.msrb.mxu2 %v13249_v58  ;;  %v13198_v43 = vld [vmem:[%s24386_s1 + $0x1690] sm:$0xf0]  ;;  %v13409_v58 = vor.u32 %v16223_v41, %v13406_v60  ;;  %v12916_v41 = vld [vmem:[%s24386_s1 + $0x1448] sm:$0xf] }
 0x2c6   :  { %6616 = vmatmul.bf16.vlgmr.msra.gmra.mxu1 %v17011_v8  ;;  %v13201_v61 = vor.u32 %v16171_v62, %v13198_v43  ;;  %v16211_v62 = vld [vmem:[%s24386_s1 + $0x17c4] sm:$0xf]  ;;  %v13358_v43 = vld [vmem:[%s24386_s1 + $0x17d0] sm:$0xf0]  ;;  %v12917_v23 = vor.u32 %v16102_v33, %v12916_v41  ;;  %v12868_v41 = vld [vmem:[%s24386_s1 + $0x13e8] sm:$0xf] }
 0x2c7   :  { %6660 = vmatpush.bf16.msrb.mxu1 %v13553_v48  ;;  %v13617_v48 = vor.u32 %v16275_v6, %v13614_v18  ;;  %6603 = vmatmul.bf16.vlgmr.msrb.gmra.mxu0 %v17024_v14  ;;  %v13790_v6 = vld [vmem:[%s24386_s1 + $0x1b30] sm:$0xf0]  ;;  %v13473_v18 = vor.u32 %v16239_v25, %v13470_v22  ;;  %v16090_v33 = vld [vmem:[%s24386_s1 + $0x13f4] sm:$0xf0] }
 0x2c8   :  { %6647 = vmatpush.bf16.msra.mxu0 %v13425_v30  ;;  %v13566_v30 = vld [vmem:[%s24386_s1 + $0x1970] sm:$0xf0] }
 0x2c9   :  { %6675 = vmatpush.bf16.msra.mxu3 %v13649_v39  ;;  %6638 = vmatpush.bf16.msrb.mxu2 %v13233_v16  ;;  %v13390_v39 = vld [vmem:[%s24386_s1 + $0x1810] sm:$0xf0]  ;;  %v16267_v16 = vld [vmem:[%s24386_s1 + $0x1984] sm:$0xf] }
 0x2ca   :  { %v13393_v20 = vor.u32 %v16219_v55, %v13390_v39  ;;  %v13585_v31 = vor.u32 %v16267_v16, %v13582_v0  ;;  %v13438_v55 = vld [vmem:[%s24386_s1 + $0x1870] sm:$0xf0]  ;;  %v13361_v39 = vor.u32 %v16211_v62, %v13358_v43  ;;  %v16311_v16 = vld [vmem:[%s24386_s1 + $0x1ae4] sm:$0xf] }
 0x2cb   :  { %6661 = vmatpush.bf16.msrb.mxu1 %v13537_v13  ;;  %v16323_v13 = vld [vmem:[%s24386_s1 + $0x1b44] sm:$0xf]  ;;  %v4630_v57 = vpop.f32.mrf.mxu3  ;;  %v13758_v0 = vld [vmem:[%s24386_s1 + $0x1af0] sm:$0xf0] }
 0x2cc   :  { %6648 = vmatpush.bf16.msra.mxu0 %v13409_v58  ;;  %v13809_v49 = vor.u32 %v16323_v13, %v13806_v52  ;;  %v4602_v58 = vpop.f32.mrf.mxu0  ;;  %v13342_v52 = vld [vmem:[%s24386_s1 + $0x17b0] sm:$0xf0]  ;;  %v16062_v57 = vld [vmem:[%s24386_s1 + $0x1314] sm:$0xf0] }
 0x2cd   :  { %6676 = vmatpush.bf16.msra.mxu3 %v13633_v59  ;;  %6639 = vmatpush.bf16.msrb.mxu2 %v13217_v36  ;;  %v13374_v59 = vld [vmem:[%s24386_s1 + $0x17f0] sm:$0xf0]  ;;  %v16235_v36 = vld [vmem:[%s24386_s1 + $0x1884] sm:$0xf]  ;;  %v4603_v3 = vadd.f32 %v4602_v58, %v21268_v46  ;;  %v12788_v46 = vld [vmem:[%s24386_s1 + $0x1348] sm:$0xf] }
 0x2ce   :  { %v13377_v5 = vor.u32 %v16215_v24, %v13374_v59  ;;  %v16203_v24 = vld [vmem:[%s24386_s1 + $0x1784] sm:$0xf]  ;;  %v5849_v59 = vunpack.c.h.b16 %v20874_v2 }
 0x2cf   :  { %6662 = vmatpush.bf16.msrb.mxu1 %v13521_v32  ;;  %v16319_v32 = vld [vmem:[%s24386_s1 + $0x1b24] sm:$0xf] }
 0x2d0   :  { %6649 = vmatpush.bf16.msra.mxu0 %v13393_v20  ;;  %v13793_v60 = vor.u32 %v16319_v32, %v13790_v6  ;;  %v13441_v20 = vor.u32 %v16231_v63, %v13438_v55  ;;  %v13326_v32 = vld [vmem:[%s24386_s1 + $0x1790] sm:$0xf0]  ;;  %v12772_v6 = vld [vmem:[%s24386_s1 + $0x1328] sm:$0xf]  ;;  %v16307_v2 = vld [vmem:[%s24386_s1 + $0x1ac4] sm:$0xf]  ;;  %v6145_v62 = vpack.c.b16 %v5849_v59, %v5849_v59  ;;  %v12869_v63 = vor.u32 %v16090_v33, %v12868_v41 }
 0x2d1   :  { %6677 = vmatpush.bf16.msra.mxu3 %v13617_v48  ;;  %6640 = vmatpush.bf16.msrb.mxu2 %v13201_v61  ;;  %v13569_v48 = vor.u32 %v16263_v34, %v13566_v30  ;;  %v13457_v61 = vor.u32 %v16235_v36, %v13454_v29  ;;  %v13742_v34 = vld [vmem:[%s24386_s1 + $0x1ad0] sm:$0xf0]  ;;  %v16082_v59 = vld [vmem:[%s24386_s1 + $0x13b4] sm:$0xf0]  ;;  %v13172_v33 = vld [vmem:[%s24386_s1 + $0x1648] sm:$0xf] }
 0x2d2   :  { %v16130_v41 = vld [vmem:[%s24386_s1 + $0x1534] sm:$0xf0] }
 0x2d3   :  { %6663 = vmatpush.bf16.msrb.mxu1 %v13505_v56  ;;  %v16315_v56 = vld [vmem:[%s24386_s1 + $0x1b04] sm:$0xf]  ;;  %v4615_v43 = vpop.f32.mrf.mxu2 }
 0x2d4   :  { %6650 = vmatpush.bf16.msra.mxu0 %v13377_v5  ;;  %v13777_v13 = vor.u32 %v16315_v56, %v13774_v51  ;;  %v4604_v36 = vpop.f32.mrf.mxu0  ;;  %v13329_v5 = vor.u32 %v16203_v24, %v13326_v32  ;;  %v13310_v56 = vld [vmem:[%s24386_s1 + $0x1770] sm:$0xf0]  ;;  %v12756_v51 = vld [vmem:[%s24386_s1 + $0x1308] sm:$0xf]  ;;  %v4616_v58 = vadd.f32 %v4615_v43, %v4603_v3  ;;  %v6444_v3 = vsel %vm1841_vm0, %v6145_v62, 0 }
 0x2d5   :  { %6678 = vmatpush.bf16.msra.mxu3 %v13601_v10  ;;  %6641 = vmatpush.bf16.msrb.mxu2 %v13185_v37  ;;  %v16207_v10 = vld [vmem:[%s24386_s1 + $0x17a4] sm:$0xf]  ;;  %v12901_v37 = vor.u32 %v16098_v26, %v12900_v19  ;;  %v12757_v19 = vor.u32 %v16062_v57, %v12756_v51  ;;  %v12852_v26 = vld [vmem:[%s24386_s1 + $0x13c8] sm:$0xf]  ;;  %v13694_v36 = vld [vmem:[%s24386_s1 + $0x1a70] sm:$0xf0] }
 0x2d6   :  { %v13345_v25 = vor.u32 %v16207_v10, %v13342_v52  ;;  %v4629_v55 = vadd.f32 %v21301_v50, %v4616_v58  ;;  %v16086_v10 = vld [vmem:[%s24386_s1 + $0x13d4] sm:$0xf0]  ;;  %v12740_v50 = vld [vmem:[%s24386_s1 + $0x12e8] sm:$0xf] }
 0x2d7   :  { %6664 = vmatpush.bf16.msrb.mxu1 %v13489_v1  ;;  %v16070_v1 = vld [vmem:[%s24386_s1 + $0x1354] sm:$0xf0]  ;;  %v12836_v24 = vld [vmem:[%s24386_s1 + $0x13a8] sm:$0xf] }
 0x2d8   :  { %6642 = vmatmul.bf16.vlgmr.msrb.gmra.mxu2 %v17208_v45  ;;  %6651 = vmatpush.bf16.msra.mxu0 %v13361_v39  ;;  %v12789_v22 = vor.u32 %v16070_v1, %v12788_v46  ;;  %v16058_v46 = vld [vmem:[%s24386_s1 + $0x12f4] sm:$0xf0]  ;;  %v16327_v1 = vld [vmem:[%s24386_s1 + $0x1b64] sm:$0xf]  ;;  %v12820_v43 = vld [vmem:[%s24386_s1 + $0x1388] sm:$0xf] }
 0x2d9   :  { %6686 = vmatpush.bf16.msra.mxu2 %v13809_v49  ;;  %6679 = vmatpush.bf16.msra.mxu3 %v13585_v31  ;;  %v16094_v49 = vld [vmem:[%s24386_s1 + $0x1414] sm:$0xf0]  ;;  %v13761_v31 = vor.u32 %v16311_v16, %v13758_v0  ;;  %v13822_v0 = vld [vmem:[%s24386_s1 + $0x1b70] sm:$0xf0]  ;;  %v12708_v51 = vld [vmem:[%s24386_s1 + $0x12a8] sm:$0xf] }
 0x2da   :  { %v12885_v30 = vor.u32 %v16094_v49, %v12884_v12  ;;  %v16134_v12 = vld [vmem:[%s24386_s1 + $0x1554] sm:$0xf0]  ;;  %v12741_v49 = vor.u32 %v16058_v46, %v12740_v50  ;;  %v13825_v32 = vor.u32 %v16327_v1, %v13822_v0  ;;  %v12692_v50 = vld [vmem:[%s24386_s1 + $0x1288] sm:$0xf] }
 0x2db   :  { %6665 = vmatpush.bf16.msrb.mxu1 %v13473_v18  ;;  %v16066_v18 = vld [vmem:[%s24386_s1 + $0x1334] sm:$0xf0]  ;;  %v13428_v1 = vld [vmem:[%s24386_s1 + $0x1848] sm:$0xf] }
 0x2dc   :  { %6652 = vmatpush.bf16.msra.mxu0 %v13345_v25  ;;  %v12773_v29 = vor.u32 %v16066_v18, %v12772_v6  ;;  %v12853_v25 = vor.u32 %v16086_v10, %v12852_v26  ;;  %v12724_v18 = vld [vmem:[%s24386_s1 + $0x12c8] sm:$0xf]  ;;  %v16050_v57 = vld [vmem:[%s24386_s1 + $0x12b4] sm:$0xf0] }
 0x2dd   :  { %6687 = vmatpush.bf16.msra.mxu2 %v13793_v60  ;;  %6680 = vmatpush.bf16.msra.mxu3 %v13569_v48  ;;  %v16199_v60 = vld [vmem:[%s24386_s1 + $0x1764] sm:$0xf]  ;;  %v13745_v48 = vor.u32 %v16307_v2, %v13742_v34  ;;  %v16054_v2 = vld [vmem:[%s24386_s1 + $0x12d4] sm:$0xf0]  ;;  %v12709_v10 = vor.u32 %v16050_v57, %v12708_v51 }
 0x2de   :  { %v13313_v39 = vor.u32 %v16199_v60, %v13310_v56  ;;  %v16166_v60 = vld [vmem:[%s24386_s1 + $0x1654] sm:$0xf0]  ;;  %v12725_v62 = vor.u32 %v16054_v2, %v12724_v18  ;;  %v12676_v2 = vld [vmem:[%s24386_s1 + $0x1268] sm:$0xf] }
 0x2df   :  { %6666 = vmatpush.bf16.msrb.mxu1 %v13457_v61  ;;  %v16303_v61 = vld [vmem:[%s24386_s1 + $0x1aa4] sm:$0xf]  ;;  %v16046_v46 = vld [vmem:[%s24386_s1 + $0x1294] sm:$0xf0] }
 0x2e0   :  { %6681 = vmatmul.bf16.vlgmr.msra.gmra.mxu3 %v17210_v47  ;;  %6653 = vmatpush.bf16.msra.mxu0 %v13329_v5  ;;  %v13028_v5 = vld [vmem:[%s24386_s1 + $0x1528] sm:$0xf]  ;;  %v16230_v0 = vld [vmem:[%s24386_s1 + $0x1854] sm:$0xf0] }
 0x2e1   :  { %6725 = vmatpush.bf16.msrb.mxu3 %v12917_v23  ;;  %6688 = vmatpush.bf16.msra.mxu2 %v13777_v13  ;;  %v13726_v23 = vld [vmem:[%s24386_s1 + $0x1ab0] sm:$0xf0]  ;;  %v4641_v13 = vpop.f32.mrf.mxu1  ;;  %v13429_v18 = vor.u32 %v16230_v0, %v13428_v1 }
 0x2e2   :  { %v13729_v52 = vor.u32 %v16303_v61, %v13726_v23  ;;  %v21457_v16 = vadd.f32 %v4641_v13, %v4629_v55  ;;  %v13029_v61 = vor.u32 %v16130_v41, %v13028_v5  ;;  %v13173_v23 = vor.u32 %v16166_v60, %v13172_v33  ;;  %v12804_v13 = vld [vmem:[%s24386_s1 + $0x1368] sm:$0xf]  ;;  %v16198_v33 = vld [vmem:[%s24386_s1 + $0x1754] sm:$0xf0] }
 0x2e3   :  { %6667 = vmatpush.bf16.msrb.mxu1 %v13441_v20  ;;  %v16299_v20 = vld [vmem:[%s24386_s1 + $0x1a84] sm:$0xf]  ;;  %v21529_v26 = vpop.f32.mrf.mxu3  ;;  %v13300_v41 = vld [vmem:[%s24386_s1 + $0x1748] sm:$0xf] }
 0x2e4   :  { %6654 = vmatpush.bf16.msra.mxu0 %v13313_v39  ;;  %v16126_v39 = vld [vmem:[%s24386_s1 + $0x1514] sm:$0xf0]  ;;  %v12980_v60 = vld [vmem:[%s24386_s1 + $0x14c8] sm:$0xf] }
 0x2e5   :  { %6726 = vmatpush.bf16.msrb.mxu3 %v12901_v37  ;;  %6689 = vmatpush.bf16.msra.mxu2 %v13761_v31  ;;  %v13710_v37 = vld [vmem:[%s24386_s1 + $0x1a90] sm:$0xf0]  ;;  %v4617_v31 = vpop.f32.mrf.mxu2 }
 0x2e6   :  { %6668 = vmatmul.bf16.vlgmr.msrb.gmra.mxu1 %v17189_v38  ;;  %v13713_v6 = vor.u32 %v16299_v20, %v13710_v37  ;;  %v16158_v31 = vld [vmem:[%s24386_s1 + $0x1614] sm:$0xf0] }
 0x2e7   :  { %6712 = vmatpush.bf16.msra.mxu1 %v12789_v22  ;;  %v13044_v22 = vld [vmem:[%s24386_s1 + $0x1548] sm:$0xf]  ;;  %6655 = vmatmul.bf16.vlgmr.msra.gmra.mxu0 %v17200_v42 }
 0x2e8   :  { %6705 = vmatpush.bf16.msrb.mxu0 %v6444_v3  ;;  %v13045_v34 = vor.u32 %v16134_v12, %v13044_v22  ;;  %v16162_v3 = vld [vmem:[%s24386_s1 + $0x1634] sm:$0xf0]  ;;  %v12996_v22 = vld [vmem:[%s24386_s1 + $0x14e8] sm:$0xf]  ;;  %v4654_v12 = vpop.f32.mrf.mxu0 }
 0x2e9   :  { %6727 = vmatpush.bf16.msrb.mxu3 %v12885_v30  ;;  %6690 = vmatpush.bf16.msra.mxu2 %v13745_v48  ;;  %v16295_v30 = vld [vmem:[%s24386_s1 + $0x1a64] sm:$0xf]  ;;  %v16078_v48 = vld [vmem:[%s24386_s1 + $0x1394] sm:$0xf0]  ;;  %v4643_v58 = vpop.f32.mrf.mxu1 }
 0x2ea   :  { %v13697_v56 = vor.u32 %v16295_v30, %v13694_v36  ;;  %v12821_v55 = vor.u32 %v16078_v48, %v12820_v43  ;;  %v13412_v30 = vld [vmem:[%s24386_s1 + $0x1828] sm:$0xf]  ;;  %v16154_v48 = vld [vmem:[%s24386_s1 + $0x15f4] sm:$0xf0] }
 0x2eb   :  { %6713 = vmatpush.bf16.msra.mxu1 %v12773_v29  ;;  %v12837_v29 = vor.u32 %v16082_v59, %v12836_v24  ;;  %v16122_v24 = vld [vmem:[%s24386_s1 + $0x14f4] sm:$0xf0]  ;;  %v13140_v59 = vld [vmem:[%s24386_s1 + $0x1608] sm:$0xf] }
 0x2ec   :  { %6706 = vmatpush.bf16.msrb.mxu0 %v13825_v32  ;;  %v4655_v32 = vadd.f32 %v4654_v12, %v21457_v16  ;;  %v16226_v16 = vld [vmem:[%s24386_s1 + $0x1834] sm:$0xf0]  ;;  %v12997_v5 = vor.u32 %v16122_v24, %v12996_v22  ;;  %v13124_v43 = vld [vmem:[%s24386_s1 + $0x15e8] sm:$0xf] }
 0x2ed   :  { %6728 = vmatpush.bf16.msrb.mxu3 %v12869_v63  ;;  %6691 = vmatpush.bf16.msra.mxu2 %v13729_v52  ;;  %v13012_v63 = vld [vmem:[%s24386_s1 + $0x1508] sm:$0xf]  ;;  %v16074_v52 = vld [vmem:[%s24386_s1 + $0x1374] sm:$0xf0]  ;;  %v4667_v20 = vpop.f32.mrf.mxu2  ;;  %v13413_v58 = vor.u32 %v16226_v16, %v13412_v30 }
 0x2ee   :  { %v13013_v37 = vor.u32 %v16126_v39, %v13012_v63  ;;  %v21575_v36 = vadd.f32 %v4667_v20, %v4655_v32  ;;  %v16222_v63 = vld [vmem:[%s24386_s1 + $0x1814] sm:$0xf0]  ;;  %v13125_v39 = vor.u32 %v16154_v48, %v13124_v43  ;;  %v13092_v32 = vld [vmem:[%s24386_s1 + $0x15a8] sm:$0xf] }
 0x2ef   :  { %6714 = vmatpush.bf16.msra.mxu1 %v12757_v19  ;;  %v13156_v19 = vld [vmem:[%s24386_s1 + $0x1628] sm:$0xf]  ;;  %v16190_v24 = vld [vmem:[%s24386_s1 + $0x1714] sm:$0xf0] }
 0x2f0   :  { %6738 = vmatpush.bf16.msra.mxu0 %v13045_v34  ;;  %v16042_v34 = vld [vmem:[%s24386_s1 + $0x1274] sm:$0xf0]  ;;  %v4674_v51 = vmax.f32 %v19722_v4, %v21575_v36  ;;  %v4656_v1 = vpop.f32.mrf.mxu0  ;;  %v13076_v48 = vld [vmem:[%s24386_s1 + $0x1588] sm:$0xf] }
 0x2f1   :  { %6729 = vmatpush.bf16.msrb.mxu3 %v12853_v25  ;;  %6692 = vmatpush.bf16.msra.mxu2 %v13713_v6  ;;  %v13157_v25 = vor.u32 %v16162_v3, %v13156_v19  ;;  %v12693_v6 = vor.u32 %v16046_v46, %v12692_v50  ;;  %v12677_v57 = vor.u32 %v16042_v34, %v12676_v2  ;;  %v13284_v19 = vld [vmem:[%s24386_s1 + $0x1728] sm:$0xf]  ;;  %v16194_v3 = vld [vmem:[%s24386_s1 + $0x1734] sm:$0xf0] }
 0x2f2   :  { %v13108_v50 = vld [vmem:[%s24386_s1 + $0x15c8] sm:$0xf]  ;;  %v16150_v46 = vld [vmem:[%s24386_s1 + $0x15d4] sm:$0xf0]  ;;  %v13285_v20 = vor.u32 %v16194_v3, %v13284_v19 }
 0x2f3   :  { %6715 = vmatpush.bf16.msra.mxu1 %v12741_v49  ;;  %v12805_v49 = vor.u32 %v16074_v52, %v12804_v13  ;;  %v16114_v52 = vld [vmem:[%s24386_s1 + $0x14b4] sm:$0xf0]  ;;  %v13109_v12 = vor.u32 %v16150_v46, %v13108_v50  ;;  %v13364_v34 = vld [vmem:[%s24386_s1 + $0x17c8] sm:$0xf] }
 0x2f4   :  { %6739 = vmatpush.bf16.msra.mxu0 %v13029_v61  ;;  %v13301_v61 = vor.u32 %v16198_v33, %v13300_v41  ;;  %v16214_v30 = vld [vmem:[%s24386_s1 + $0x17d4] sm:$0xf0]  ;;  %v12932_v33 = vld [vmem:[%s24386_s1 + $0x1468] sm:$0xf] }
 0x2f5   :  { %6730 = vmatpush.bf16.msrb.mxu3 %v12837_v29  ;;  %6693 = vmatpush.bf16.msra.mxu2 %v13697_v56  ;;  %v13141_v29 = vor.u32 %v16158_v31, %v13140_v59  ;;  %v6463_v56 = vpop.f32.mrf.mxu3  ;;  %v4669_v13 = vpop.f32.mrf.mxu2  ;;  %v12948_v59 = vld [vmem:[%s24386_s1 + $0x1488] sm:$0xf]  ;;  %v16110_v31 = vld [vmem:[%s24386_s1 + $0x1494] sm:$0xf0] }
 0x2f6   :  { %v12949_v16 = vor.u32 %v16110_v31, %v12948_v59  ;;  %v16186_v41 = vld [vmem:[%s24386_s1 + $0x16f4] sm:$0xf0]  ;;  %v13236_v13 = vld [vmem:[%s24386_s1 + $0x16c8] sm:$0xf] }
 0x2f7   :  { %6716 = vmatpush.bf16.msra.mxu1 %v12725_v62  ;;  %v16118_v62 = vld [vmem:[%s24386_s1 + $0x14d4] sm:$0xf0]  ;;  %13835 = vmatmul.msk.bf16.vlgmr.msrb.gmra.mxu0 %vm1837_vm1, %v17318_v40  ;;  %v13060_v46 = vld [vmem:[%s24386_s1 + $0x1568] sm:$0xf] }
 0x2f8   :  { %6694 = vmatmul.bf16.vlgmr.msra.gmra.mxu2 %v17404_v28  ;;  %6740 = vmatpush.bf16.msra.mxu0 %v13013_v37  ;;  %v13380_v37 = vld [vmem:[%s24386_s1 + $0x17e8] sm:$0xf]  ;;  %v16106_v43 = vld [vmem:[%s24386_s1 + $0x1474] sm:$0xf0] }
 0x2f9   :  { %6751 = vmatpush.bf16.msrb.mxu2 %v13173_v23  ;;  %6731 = vmatpush.bf16.msrb.mxu3 %v12821_v55  ;;  %v13396_v23 = vld [vmem:[%s24386_s1 + $0x1808] sm:$0xf]  ;;  %v12981_v55 = vor.u32 %v16118_v62, %v12980_v60  ;;  %v16142_v56 = vld [vmem:[%s24386_s1 + $0x1594] sm:$0xf0]  ;;  %v12933_v3 = vor.u32 %v16106_v43, %v12932_v33 }
 0x2fa   :  { %v13397_v0 = vor.u32 %v16222_v63, %v13396_v23  ;;  %v16262_v23 = vld [vmem:[%s24386_s1 + $0x1954] sm:$0xf0]  ;;  %v21683_v63 = vld [vmem:[%s24386_s1 + $0x1b88] sm:$0xff] }
 0x2fb   :  { %6717 = vmatpush.bf16.msra.mxu1 %v12709_v10  ;;  %v12964_v10 = vld [vmem:[%s24386_s1 + $0x14a8] sm:$0xf]  ;;  %v6474_v60 = vpop.f32.mrf.mxu1  ;;  %v16138_v1 = vld [vmem:[%s24386_s1 + $0x1574] sm:$0xf0] }
 0x2fc   :  { %6741 = vmatpush.bf16.msra.mxu0 %v12997_v5  ;;  %v12965_v22 = vor.u32 %v16114_v52, %v12964_v10  ;;  %v13077_v10 = vor.u32 %v16142_v56, %v13076_v48  ;;  %v16182_v52 = vld [vmem:[%s24386_s1 + $0x16d4] sm:$0xf0]  ;;  %v13316_v48 = vld [vmem:[%s24386_s1 + $0x1768] sm:$0xf] }
 0x2fd   :  { %6752 = vmatpush.bf16.msrb.mxu2 %v13157_v25  ;;  %6732 = vmatpush.bf16.msrb.mxu3 %v12805_v49  ;;  %v16218_v25 = vld [vmem:[%s24386_s1 + $0x17f4] sm:$0xf0]  ;;  %v13268_v49 = vld [vmem:[%s24386_s1 + $0x1708] sm:$0xf]  ;;  %v6487_v62 = vpop.f32.mrf.mxu2 }
 0x2fe   :  { %v13269_v2 = vor.u32 %v16190_v24, %v13268_v49  ;;  %v13237_v49 = vor.u32 %v16182_v52, %v13236_v13  ;;  %v13332_v24 = vld [vmem:[%s24386_s1 + $0x1788] sm:$0xf]  ;;  %v16206_v59 = vld [vmem:[%s24386_s1 + $0x1794] sm:$0xf0] }
 0x2ff   :  { %6718 = vmatpush.bf16.msra.mxu1 %v12693_v6  ;;  %v16146_v6 = vld [vmem:[%s24386_s1 + $0x15b4] sm:$0xf0]  ;;  %v16486_v36 = vld [vmem:[%s24386_s1 + $0x2064] sm:$0xf0] }
 0x300   :  { %6733 = vmatmul.bf16.vlgmr.msrb.gmra.mxu3 %v17024_v14  ;;  %6742 = vmatpush.bf16.msra.mxu0 %v12981_v55  ;;  %v13093_v5 = vor.u32 %v16146_v6, %v13092_v32  ;;  %v13061_v32 = vor.u32 %v16138_v1, %v13060_v46  ;;  %v13220_v6 = vld [vmem:[%s24386_s1 + $0x16a8] sm:$0xf]  ;;  %v16254_v33 = vld [vmem:[%s24386_s1 + $0x1914] sm:$0xf0] }
 0x301   :  { %6777 = vmatpush.bf16.msra.mxu3 %v13429_v18  ;;  %6753 = vmatpush.bf16.msrb.mxu2 %v13141_v29  ;;  %v13381_v18 = vor.u32 %v16218_v25, %v13380_v37  ;;  %v13252_v29 = vld [vmem:[%s24386_s1 + $0x16e8] sm:$0xf]  ;;  %v16258_v25 = vld [vmem:[%s24386_s1 + $0x1934] sm:$0xf0] }
 0x302   :  { %v13253_v55 = vor.u32 %v16186_v41, %v13252_v29  ;;  %v13333_v41 = vor.u32 %v16206_v59, %v13332_v24  ;;  %v16202_v56 = vld [vmem:[%s24386_s1 + $0x1774] sm:$0xf0]  ;;  %v13188_v46 = vld [vmem:[%s24386_s1 + $0x1668] sm:$0xf]  ;;  %v13046_v59 = vld [vmem:[%s24386_s1 + $0x1558] sm:$0xf0] }
 0x303   :  { %6719 = vmatpush.bf16.msra.mxu1 %v12677_v57  ;;  %v6475_v57 = vadd.f32 %v6474_v60, %v21529_v26  ;;  %v13348_v26 = vld [vmem:[%s24386_s1 + $0x17a8] sm:$0xf]  ;;  %v6513_v31 = vpop.f32.mrf.mxu3  ;;  %v16286_v13 = vld [vmem:[%s24386_s1 + $0x1a14] sm:$0xf0] }
 0x304   :  { %6743 = vmatpush.bf16.msra.mxu0 %v12965_v22  ;;  %v13684_v22 = vld [vmem:[%s24386_s1 + $0x1a48] sm:$0xf]  ;;  %v6500_v52 = vpop.f32.mrf.mxu0  ;;  %v16170_v1 = vld [vmem:[%s24386_s1 + $0x1674] sm:$0xf0] }
 0x305   :  { %6778 = vmatpush.bf16.msra.mxu3 %v13413_v58  ;;  %6754 = vmatpush.bf16.msrb.mxu2 %v13125_v39  ;;  %v13365_v58 = vor.u32 %v16214_v30, %v13364_v34  ;;  %v16210_v39 = vld [vmem:[%s24386_s1 + $0x17b4] sm:$0xf0]  ;;  %v21691_v19 = vadd.f32 %v6487_v62, %v6475_v57  ;;  %v6489_v34 = vpop.f32.mrf.mxu2  ;;  %v13668_v60 = vld [vmem:[%s24386_s1 + $0x1a28] sm:$0xf] }
 0x306   :  { %6720 = vmatmul.bf16.vlgmr.msra.gmra.mxu1 %v17026_v15  ;;  %v13349_v37 = vor.u32 %v16210_v39, %v13348_v26  ;;  %v16290_v62 = vld [vmem:[%s24386_s1 + $0x1a34] sm:$0xf0]  ;;  %v13204_v57 = vld [vmem:[%s24386_s1 + $0x1688] sm:$0xf]  ;;  %v13317_v39 = vor.u32 %v16202_v56, %v13316_v48 }
 0x307   :  { %6764 = vmatpush.bf16.msrb.mxu1 %v13301_v61  ;;  %v13556_v61 = vld [vmem:[%s24386_s1 + $0x1948] sm:$0xf]  ;;  %v16282_v34 = vld [vmem:[%s24386_s1 + $0x19f4] sm:$0xf0] }
 0x308   :  { %6744 = vmatpush.bf16.msra.mxu0 %v12949_v16  ;;  %v13557_v50 = vor.u32 %v16262_v23, %v13556_v61  ;;  %v13669_v23 = vor.u32 %v16290_v62, %v13668_v60  ;;  %v13508_v26 = vld [vmem:[%s24386_s1 + $0x18e8] sm:$0xf]  ;;  %v16128_v62 = vld [vmem:[%s24386_s1 + $0x152c] sm:$0xf]  ;;  %v16242_v56 = vld [vmem:[%s24386_s1 + $0x18b4] sm:$0xf0] }
 0x309   :  { %6779 = vmatpush.bf16.msra.mxu3 %v13397_v0  ;;  %6755 = vmatpush.bf16.msrb.mxu2 %v13109_v12  ;;  %v13540_v0 = vld [vmem:[%s24386_s1 + $0x1928] sm:$0xf]  ;;  %v16294_v12 = vld [vmem:[%s24386_s1 + $0x1a54] sm:$0xf0] }
 0x30a   :  { %v13541_v30 = vor.u32 %v16258_v25, %v13540_v0  ;;  %v13685_v16 = vor.u32 %v16294_v12, %v13684_v22  ;;  %v13828_v0 = vld [vmem:[%s24386_s1 + $0x1b68] sm:$0xf]  ;;  %v16330_v25 = vld [vmem:[%s24386_s1 + $0x1b74] sm:$0xf0] }
 0x30b   :  { %6765 = vmatpush.bf16.msrb.mxu1 %v13285_v20  ;;  %v5850_v20 = vunpack.c.l.b16 %v21683_v63  ;;  %v13812_v22 = vld [vmem:[%s24386_s1 + $0x1b48] sm:$0xf]  ;;  %v16326_v12 = vld [vmem:[%s24386_s1 + $0x1b54] sm:$0xf0] }
 0x30c   :  { %6745 = vmatpush.bf16.msra.mxu0 %v12933_v3  ;;  %v16250_v3 = vld [vmem:[%s24386_s1 + $0x18f4] sm:$0xf0]  ;;  %v13476_v48 = vld [vmem:[%s24386_s1 + $0x18a8] sm:$0xf] }
 0x30d   :  { %6780 = vmatpush.bf16.msra.mxu3 %v13381_v18  ;;  %6756 = vmatpush.bf16.msrb.mxu2 %v13093_v5  ;;  %v16178_v18 = vld [vmem:[%s24386_s1 + $0x16b4] sm:$0xf0]  ;;  %v13524_v5 = vld [vmem:[%s24386_s1 + $0x1908] sm:$0xf]  ;;  %v6146_v29 = vpack.c.b16 %v5850_v20, %v5850_v20  ;;  %v6501_v20 = vadd.f32 %v6500_v52, %v21691_v19  ;;  %v16132_v19 = vld [vmem:[%s24386_s1 + $0x154c] sm:$0xf] }
 0x30e   :  { %v13221_v43 = vor.u32 %v16178_v18, %v13220_v6  ;;  %v13525_v61 = vor.u32 %v16254_v33, %v13524_v5  ;;  %v16246_v18 = vld [vmem:[%s24386_s1 + $0x18d4] sm:$0xf0]  ;;  %v13813_v5 = vor.u32 %v16326_v12, %v13812_v22  ;;  %v13014_v52 = vld [vmem:[%s24386_s1 + $0x1518] sm:$0xf0] }
 0x30f   :  { %6766 = vmatpush.bf16.msrb.mxu1 %v13269_v2  ;;  %v6476_v2 = vpop.f32.mrf.mxu1  ;;  %6746 = vmatmul.bf16.vlgmr.msra.gmra.mxu0 %v17011_v8  ;;  %v6514_v6 = vadd.f32 %v6513_v31, %v6501_v20  ;;  %v13796_v31 = vld [vmem:[%s24386_s1 + $0x1b28] sm:$0xf]  ;;  %v16314_v22 = vld [vmem:[%s24386_s1 + $0x1af4] sm:$0xf0] }
 0x310   :  { %6790 = vmatpush.bf16.msrb.mxu0 %v13557_v50  ;;  %v13636_v2 = vld [vmem:[%s24386_s1 + $0x19e8] sm:$0xf]  ;;  %v14750_v4 = vld [vmem:[%s24386_s1 + $0x2058] sm:$0xf] }
 0x311   :  { %6781 = vmatpush.bf16.msra.mxu3 %v13365_v58  ;;  %6757 = vmatpush.bf16.msrb.mxu2 %v13077_v10  ;;  %v16174_v58 = vld [vmem:[%s24386_s1 + $0x1694] sm:$0xf0]  ;;  %v13652_v10 = vld [vmem:[%s24386_s1 + $0x1a08] sm:$0xf]  ;;  %v13637_v60 = vor.u32 %v16282_v34, %v13636_v2 }
 0x312   :  { %v13205_v50 = vor.u32 %v16174_v58, %v13204_v57  ;;  %v13653_v24 = vor.u32 %v16286_v13, %v13652_v10  ;;  %v13620_v57 = vld [vmem:[%s24386_s1 + $0x19c8] sm:$0xf]  ;;  %v16278_v58 = vld [vmem:[%s24386_s1 + $0x19d4] sm:$0xf0]  ;;  %v16124_v13 = vld [vmem:[%s24386_s1 + $0x150c] sm:$0xf] }
 0x313   :  { %6767 = vmatpush.bf16.msrb.mxu1 %v13253_v55  ;;  %v6447_v55 = vsel %vm1841_vm0, %v6146_v29, 0  ;;  %v13049_v29 = vor.u32 %v16132_v19, %v13046_v59  ;;  %v13621_v10 = vor.u32 %v16278_v58, %v13620_v57  ;;  %v16120_v19 = vld [vmem:[%s24386_s1 + $0x14ec] sm:$0xf]  ;;  %v12998_v59 = vld [vmem:[%s24386_s1 + $0x14f8] sm:$0xf0] }
 0x314   :  { %6791 = vmatpush.bf16.msrb.mxu0 %v13541_v30  ;;  %v13189_v30 = vor.u32 %v16170_v1, %v13188_v46  ;;  %v16238_v46 = vld [vmem:[%s24386_s1 + $0x1894] sm:$0xf0]  ;;  %v13604_v1 = vld [vmem:[%s24386_s1 + $0x19a8] sm:$0xf] }
 0x315   :  { %6782 = vmatpush.bf16.msra.mxu3 %v13349_v37  ;;  %6758 = vmatpush.bf16.msrb.mxu2 %v13061_v32  ;;  %v6515_v37 = vpop.f32.mrf.mxu3  ;;  %v13492_v32 = vld [vmem:[%s24386_s1 + $0x18c8] sm:$0xf]  ;;  %v16234_v34 = vld [vmem:[%s24386_s1 + $0x1874] sm:$0xf0] }
 0x316   :  { %v13493_v33 = vor.u32 %v16246_v18, %v13492_v32  ;;  %v13017_v37 = vor.u32 %v16124_v13, %v13014_v52  ;;  %v13444_v32 = vld [vmem:[%s24386_s1 + $0x1868] sm:$0xf] }
 0x317   :  { %6768 = vmatpush.bf16.msrb.mxu1 %v13237_v49  ;;  %v13509_v49 = vor.u32 %v16250_v3, %v13508_v26  ;;  %v13780_v26 = vld [vmem:[%s24386_s1 + $0x1b08] sm:$0xf]  ;;  %v13477_v3 = vor.u32 %v16242_v56, %v13476_v48  ;;  %v16116_v48 = vld [vmem:[%s24386_s1 + $0x14cc] sm:$0xf]  ;;  %v12982_v56 = vld [vmem:[%s24386_s1 + $0x14d8] sm:$0xf0] }
 0x318   :  { %6759 = vmatmul.bf16.vlgmr.msrb.gmra.mxu2 %v17013_v9  ;;  %6792 = vmatpush.bf16.msrb.mxu0 %v13525_v61  ;;  %v6502_v61 = vpop.f32.mrf.mxu0  ;;  %v13572_v58 = vld [vmem:[%s24386_s1 + $0x1968] sm:$0xf] }
 0x319   :  { %6803 = vmatpush.bf16.msra.mxu2 %v13685_v16  ;;  %6783 = vmatpush.bf16.msra.mxu3 %v13333_v41  ;;  %v13829_v16 = vor.u32 %v16330_v25, %v13828_v0  ;;  %v16322_v41 = vld [vmem:[%s24386_s1 + $0x1b34] sm:$0xf0]  ;;  %v13764_v25 = vld [vmem:[%s24386_s1 + $0x1ae8] sm:$0xf] }
 0x31a   :  { %v16274_v0 = vld [vmem:[%s24386_s1 + $0x19b4] sm:$0xf0]  ;;  %v13732_v13 = vld [vmem:[%s24386_s1 + $0x1aa8] sm:$0xf] }
 0x31b   :  { %6769 = vmatpush.bf16.msrb.mxu1 %v13221_v43  ;;  %v13030_v43 = vld [vmem:[%s24386_s1 + $0x1538] sm:$0xf0]  ;;  %v6526_v12 = vpop.f32.mrf.mxu1  ;;  %v6539_v18 = vpop.f32.mrf.mxu2  ;;  %v16266_v61 = vld [vmem:[%s24386_s1 + $0x1974] sm:$0xf0] }
 0x31c   :  { %6793 = vmatpush.bf16.msrb.mxu0 %v13509_v49  ;;  %v6527_v2 = vadd.f32 %v6526_v12, %v6514_v6  ;;  %v12790_v6 = vld [vmem:[%s24386_s1 + $0x1358] sm:$0xf0]  ;;  %v16060_v12 = vld [vmem:[%s24386_s1 + $0x130c] sm:$0xf] }
 0x31d   :  { %6804 = vmatpush.bf16.msra.mxu2 %v13669_v23  ;;  %6784 = vmatpush.bf16.msra.mxu3 %v13317_v39  ;;  %v13797_v23 = vor.u32 %v16322_v41, %v13796_v31  ;;  %v16318_v39 = vld [vmem:[%s24386_s1 + $0x1b14] sm:$0xf0]  ;;  %v13001_v31 = vor.u32 %v16120_v19, %v12998_v59  ;;  %v12902_v19 = vld [vmem:[%s24386_s1 + $0x1438] sm:$0xf0] }
 0x31e   :  { %v13781_v20 = vor.u32 %v16318_v39, %v13780_v26  ;;  %v6540_v41 = vadd.f32 %v6539_v18, %v6527_v2  ;;  %v16100_v26 = vld [vmem:[%s24386_s1 + $0x144c] sm:$0xf]  ;;  %v12918_v39 = vld [vmem:[%s24386_s1 + $0x1458] sm:$0xf0]  ;;  %v13716_v18 = vld [vmem:[%s24386_s1 + $0x1a88] sm:$0xf] }
 0x31f   :  { %6770 = vmatpush.bf16.msrb.mxu1 %v13205_v50  ;;  %v13460_v50 = vld [vmem:[%s24386_s1 + $0x1888] sm:$0xf]  ;;  %v16302_v2 = vld [vmem:[%s24386_s1 + $0x1a94] sm:$0xf0] }
 0x320   :  { %6785 = vmatmul.bf16.vlgmr.msra.gmra.mxu3 %v17200_v42  ;;  %6794 = vmatpush.bf16.msrb.mxu0 %v13493_v33  ;;  %v13461_v49 = vor.u32 %v16238_v46, %v13460_v50  ;;  %v13748_v33 = vld [vmem:[%s24386_s1 + $0x1ac8] sm:$0xf]  ;;  %v13573_v46 = vor.u32 %v16266_v61, %v13572_v58  ;;  %v16104_v58 = vld [vmem:[%s24386_s1 + $0x146c] sm:$0xf] }
 0x321   :  { %6835 = vmatpush.bf16.msrb.mxu3 %v6447_v55  ;;  %6805 = vmatpush.bf16.msra.mxu2 %v13653_v24  ;;  %v13033_v55 = vor.u32 %v16128_v62, %v13030_v43  ;;  %v13605_v24 = vor.u32 %v16274_v0, %v13604_v1  ;;  %v16310_v43 = vld [vmem:[%s24386_s1 + $0x1ad4] sm:$0xf0]  ;;  %v16112_v0 = vld [vmem:[%s24386_s1 + $0x14ac] sm:$0xf] }
 0x322   :  { %v16306_v1 = vld [vmem:[%s24386_s1 + $0x1ab4] sm:$0xf0] }
 0x323   :  { %6771 = vmatpush.bf16.msrb.mxu1 %v13189_v30  ;;  %v13588_v30 = vld [vmem:[%s24386_s1 + $0x1988] sm:$0xf]  ;;  %v6565_v52 = vpop.f32.mrf.mxu3  ;;  %v6528_v50 = vpop.f32.mrf.mxu1  ;;  %v13733_v59 = vor.u32 %v16306_v1, %v13732_v13  ;;  %v16260_v13 = vld [vmem:[%s24386_s1 + $0x194c] sm:$0xf] }
 0x324   :  { %6795 = vmatpush.bf16.msrb.mxu0 %v13477_v3  ;;  %v13749_v3 = vor.u32 %v16310_v43, %v13748_v33  ;;  %v16092_v33 = vld [vmem:[%s24386_s1 + $0x140c] sm:$0xf]  ;;  %v13717_v43 = vor.u32 %v16302_v2, %v13716_v18  ;;  %v13558_v50 = vld [vmem:[%s24386_s1 + $0x1958] sm:$0xf0] }
 0x325   :  { %6836 = vmatpush.bf16.msrb.mxu3 %v13829_v16  ;;  %6806 = vmatpush.bf16.msra.mxu2 %v13637_v60  ;;  %v16270_v16 = vld [vmem:[%s24386_s1 + $0x1994] sm:$0xf0]  ;;  %v13445_v60 = vor.u32 %v16234_v34, %v13444_v32  ;;  %v16108_v34 = vld [vmem:[%s24386_s1 + $0x148c] sm:$0xf]  ;;  %v13542_v2 = vld [vmem:[%s24386_s1 + $0x1938] sm:$0xf0] }
 0x326   :  { %6772 = vmatmul.bf16.vlgmr.msrb.gmra.mxu1 %v17208_v45  ;;  %v13589_v62 = vor.u32 %v16270_v16, %v13588_v30  ;;  %v12950_v30 = vld [vmem:[%s24386_s1 + $0x1498] sm:$0xf0]  ;;  %v16088_v1 = vld [vmem:[%s24386_s1 + $0x13ec] sm:$0xf] }
 0x327   :  { %6816 = vmatpush.bf16.msra.mxu1 %v13813_v5  ;;  %v16068_v5 = vld [vmem:[%s24386_s1 + $0x134c] sm:$0xf] }
 0x328   :  { %6796 = vmatpush.bf16.msrb.mxu0 %v13461_v49  ;;  %v12793_v57 = vor.u32 %v16068_v5, %v12790_v6  ;;  %v12758_v49 = vld [vmem:[%s24386_s1 + $0x1318] sm:$0xf0]  ;;  %v16056_v6 = vld [vmem:[%s24386_s1 + $0x12ec] sm:$0xf] }
 0x329   :  { %6868 = vmatpush.bf16.msra.mxu3 %v13049_v29  ;;  %6807 = vmatpush.bf16.msra.mxu2 %v13621_v10  ;;  %v13765_v29 = vor.u32 %v16314_v22, %v13764_v25  ;;  %v12985_v10 = vor.u32 %v16116_v48, %v12982_v56  ;;  %v12921_v22 = vor.u32 %v16100_v26, %v12918_v39  ;;  %v13700_v56 = vld [vmem:[%s24386_s1 + $0x1a68] sm:$0xf]  ;;  %v16256_v18 = vld [vmem:[%s24386_s1 + $0x192c] sm:$0xf] }
 0x32a   :  { %v12761_v16 = vor.u32 %v16060_v12, %v12758_v49  ;;  %v12953_v48 = vor.u32 %v16108_v34, %v12950_v30  ;;  %v13561_v12 = vor.u32 %v16260_v13, %v13558_v50  ;;  %v16160_v49 = vld [vmem:[%s24386_s1 + $0x162c] sm:$0xf]  ;;  %v12678_v50 = vld [vmem:[%s24386_s1 + $0x1278] sm:$0xf0] }
 0x32b   :  { %6817 = vmatpush.bf16.msra.mxu1 %v13797_v23  ;;  %v16064_v23 = vld [vmem:[%s24386_s1 + $0x132c] sm:$0xf]  ;;  %v6567_v61 = vpop.f32.mrf.mxu3  ;;  %v6578_v39 = vpop.f32.mrf.mxu1 }
 0x32c   :  { %6797 = vmatpush.bf16.msrb.mxu0 %v13445_v60  ;;  %v12886_v60 = vld [vmem:[%s24386_s1 + $0x1418] sm:$0xf0]  ;;  %v16048_v34 = vld [vmem:[%s24386_s1 + $0x12ac] sm:$0xf] }
 0x32d   :  { %6869 = vmatpush.bf16.msra.mxu3 %v13033_v55  ;;  %6808 = vmatpush.bf16.msra.mxu2 %v13605_v24  ;;  %v12774_v55 = vld [vmem:[%s24386_s1 + $0x1338] sm:$0xf0]  ;;  %v16096_v24 = vld [vmem:[%s24386_s1 + $0x142c] sm:$0xf] }
 0x32e   :  { %v12777_v25 = vor.u32 %v16064_v23, %v12774_v55  ;;  %v12905_v5 = vor.u32 %v16096_v24, %v12902_v19  ;;  %v16164_v23 = vld [vmem:[%s24386_s1 + $0x164c] sm:$0xf]  ;;  %v13174_v55 = vld [vmem:[%s24386_s1 + $0x1658] sm:$0xf0] }
 0x32f   :  { %6818 = vmatpush.bf16.msra.mxu1 %v13781_v20  ;;  %v12966_v20 = vld [vmem:[%s24386_s1 + $0x14b8] sm:$0xf0]  ;;  %6798 = vmatmul.bf16.vlgmr.msrb.gmra.mxu0 %v17189_v38  ;;  %v16040_v13 = vld [vmem:[%s24386_s1 + $0x126c] sm:$0xf] }
 0x330   :  { %6842 = vmatpush.bf16.msra.mxu0 %v12793_v57  ;;  %13836 = vmatmul.msk.bf16.vlgmr.msrb.gmra.mxu3 %vm1837_vm1, %v17318_v40  ;;  %v12969_v32 = vor.u32 %v16112_v0, %v12966_v20  ;;  %v16298_v57 = vld [vmem:[%s24386_s1 + $0x1a74] sm:$0xf0]  ;;  %v12870_v0 = vld [vmem:[%s24386_s1 + $0x13f8] sm:$0xf0] }
 0x331   :  { %6870 = vmatpush.bf16.msra.mxu3 %v13017_v37  ;;  %6809 = vmatpush.bf16.msra.mxu2 %v13589_v62  ;;  %v6541_v37 = vpop.f32.mrf.mxu2  ;;  %v13158_v24 = vld [vmem:[%s24386_s1 + $0x1638] sm:$0xf0] }
 0x332   :  { %v13701_v37 = vor.u32 %v16298_v57, %v13700_v56  ;;  %v12694_v56 = vld [vmem:[%s24386_s1 + $0x1298] sm:$0xf0]  ;;  %v16080_v57 = vld [vmem:[%s24386_s1 + $0x13ac] sm:$0xf] }
 0x333   :  { %6819 = vmatpush.bf16.msra.mxu1 %v13765_v29  ;;  %v6552_v29 = vpop.f32.mrf.mxu0 }
 0x334   :  { %6843 = vmatpush.bf16.msra.mxu0 %v12777_v25  ;;  %v6553_v62 = vadd.f32 %v6552_v29, %v6540_v41  ;;  %v12934_v41 = vld [vmem:[%s24386_s1 + $0x1478] sm:$0xf0] }
 0x335   :  { %6871 = vmatpush.bf16.msra.mxu3 %v13001_v31  ;;  %6810 = vmatpush.bf16.msra.mxu2 %v13573_v46  ;;  %v12742_v31 = vld [vmem:[%s24386_s1 + $0x12f8] sm:$0xf0]  ;;  %v16052_v46 = vld [vmem:[%s24386_s1 + $0x12cc] sm:$0xf]  ;;  %v12937_v25 = vor.u32 %v16104_v58, %v12934_v41 }
 0x336   :  { %v6566_v26 = vadd.f32 %v6565_v52, %v6553_v62  ;;  %v12726_v52 = vld [vmem:[%s24386_s1 + $0x12d8] sm:$0xf0] }
 0x337   :  { %6820 = vmatpush.bf16.msra.mxu1 %v13749_v3  ;;  %v12745_v3 = vor.u32 %v16056_v6, %v12742_v31  ;;  %v16156_v6 = vld [vmem:[%s24386_s1 + $0x160c] sm:$0xf]  ;;  %v13142_v29 = vld [vmem:[%s24386_s1 + $0x1618] sm:$0xf0]  ;;  %v12713_v31 = vor.u32 %v16048_v34, %v12710_v7 }
 0x338   :  { %6811 = vmatmul.bf16.vlgmr.msra.gmra.mxu2 %v17210_v47  ;;  %6844 = vmatpush.bf16.msra.mxu0 %v12761_v16  ;;  %v6579_v20 = vadd.f32 %v6578_v39, %v6566_v26  ;;  %v13161_v16 = vor.u32 %v16160_v49, %v13158_v24  ;;  %v13526_v62 = vld [vmem:[%s24386_s1 + $0x1918] sm:$0xf0]  ;;  %v13145_v61 = vor.u32 %v16156_v6, %v13142_v29  ;;  %v16192_v7 = vld [vmem:[%s24386_s1 + $0x172c] sm:$0xf] }
 0x339   :  { %6872 = vmatpush.bf16.msra.mxu3 %v12985_v10  ;;  %6855 = vmatpush.bf16.msrb.mxu2 %v12921_v22  ;;  %v12889_v10 = vor.u32 %v16092_v33, %v12886_v60  ;;  %v13177_v22 = vor.u32 %v16164_v23, %v13174_v55  ;;  %v16252_v60 = vld [vmem:[%s24386_s1 + $0x190c] sm:$0xf]  ;;  %v12838_v58 = vld [vmem:[%s24386_s1 + $0x13b8] sm:$0xf0] }
 0x33a   :  { %v22013_v19 = vmax.f32 %v4671_v53, %v6579_v20  ;;  %v12854_v53 = vld [vmem:[%s24386_s1 + $0x13d8] sm:$0xf0]  ;;  %v13529_v41 = vor.u32 %v16252_v60, %v13526_v62  ;;  %v16152_v23 = vld [vmem:[%s24386_s1 + $0x15ec] sm:$0xf]  ;;  %v12841_v39 = vor.u32 %v16080_v57, %v12838_v58 }
 0x33b   :  { %6821 = vmatpush.bf16.msra.mxu1 %v13733_v59  ;;  %v12729_v59 = vor.u32 %v16052_v46, %v12726_v52  ;;  %v6554_v30 = vpop.f32.mrf.mxu0  ;;  %v12857_v33 = vor.u32 %v16084_v44, %v12854_v53  ;;  %v13126_v55 = vld [vmem:[%s24386_s1 + $0x15f8] sm:$0xf0]  ;;  %v16076_v46 = vld [vmem:[%s24386_s1 + $0x138c] sm:$0xf]  ;;  %v22089_v20 = vpop.f32.mrf.mxu2 }
 0x33c   :  { %6845 = vmatpush.bf16.msra.mxu0 %v12745_v3  ;;  %v16248_v3 = vld [vmem:[%s24386_s1 + $0x18ec] sm:$0xf]  ;;  %v12822_v52 = vld [vmem:[%s24386_s1 + $0x1398] sm:$0xf0] }
 0x33d   :  { %6873 = vmatpush.bf16.msra.mxu3 %v12969_v32  ;;  %6856 = vmatpush.bf16.msrb.mxu2 %v12905_v5  ;;  %v12873_v32 = vor.u32 %v16088_v1, %v12870_v0  ;;  %v13545_v5 = vor.u32 %v16256_v18, %v13542_v2  ;;  %v16196_v1 = vld [vmem:[%s24386_s1 + $0x174c] sm:$0xf]  ;;  %v13302_v0 = vld [vmem:[%s24386_s1 + $0x1758] sm:$0xf0]  ;;  %v12825_v49 = vor.u32 %v16076_v46, %v12822_v52 }
 0x33e   :  { %v13110_v24 = vld [vmem:[%s24386_s1 + $0x15d8] sm:$0xf0]  ;;  %v13305_v18 = vor.u32 %v16196_v1, %v13302_v0  ;;  %v16072_v2 = vld [vmem:[%s24386_s1 + $0x136c] sm:$0xf] }
 0x33f   :  { %6822 = vmatpush.bf16.msra.mxu1 %v13717_v43  ;;  %v16044_v43 = vld [vmem:[%s24386_s1 + $0x128c] sm:$0xf]  ;;  %v12806_v34 = vld [vmem:[%s24386_s1 + $0x1378] sm:$0xf0] }
 0x340   :  { %6846 = vmatpush.bf16.msra.mxu0 %v12729_v59  ;;  %v12697_v26 = vor.u32 %v16044_v43, %v12694_v56  ;;  %v16244_v59 = vld [vmem:[%s24386_s1 + $0x18cc] sm:$0xf]  ;;  %v13286_v44 = vld [vmem:[%s24386_s1 + $0x1738] sm:$0xf0] }
 0x341   :  { %6874 = vmatpush.bf16.msra.mxu3 %v12953_v48  ;;  %6857 = vmatpush.bf16.msrb.mxu2 %v12889_v10  ;;  %v6580_v48 = vpop.f32.mrf.mxu1  ;;  %v13510_v10 = vld [vmem:[%s24386_s1 + $0x18f8] sm:$0xf0]  ;;  %v16228_v53 = vld [vmem:[%s24386_s1 + $0x184c] sm:$0xf] }
 0x342   :  { %v13430_v30 = vld [vmem:[%s24386_s1 + $0x1858] sm:$0xf0]  ;;  %v16144_v29 = vld [vmem:[%s24386_s1 + $0x15ac] sm:$0xf]  ;;  %v13289_v48 = vor.u32 %v16192_v7, %v13286_v44 }
 0x343   :  { %6823 = vmatpush.bf16.msra.mxu1 %v13701_v37  ;;  %v13129_v37 = vor.u32 %v16152_v23, %v13126_v55  ;;  %v13094_v60 = vld [vmem:[%s24386_s1 + $0x15b8] sm:$0xf0]  ;;  %v16240_v62 = vld [vmem:[%s24386_s1 + $0x18ac] sm:$0xf]  ;;  %v13433_v56 = vor.u32 %v16228_v53, %v13430_v30  ;;  %v6593_v23 = vpop.f32.mrf.mxu2 }
 0x344   :  { %6847 = vmatpush.bf16.msra.mxu0 %v12713_v31  ;;  %v22126_v31 = vpop.f32.mrf.mxu3  ;;  %v13478_v43 = vld [vmem:[%s24386_s1 + $0x18b8] sm:$0xf0]  ;;  %v16188_v57 = vld [vmem:[%s24386_s1 + $0x170c] sm:$0xf]  ;;  %v13097_v55 = vor.u32 %v16144_v29, %v13094_v60 }
 0x345   :  { %6875 = vmatpush.bf16.msra.mxu3 %v12937_v25  ;;  %6858 = vmatpush.bf16.msrb.mxu2 %v12873_v32  ;;  %v13513_v25 = vor.u32 %v16248_v3, %v13510_v10  ;;  %v13494_v32 = vld [vmem:[%s24386_s1 + $0x18d8] sm:$0xf0]  ;;  %v16236_v10 = vld [vmem:[%s24386_s1 + $0x188c] sm:$0xf] }
 0x346   :  { %6824 = vmatmul.bf16.vlgmr.msra.gmra.mxu1 %v17404_v28  ;;  %v13497_v6 = vor.u32 %v16244_v59, %v13494_v32  ;;  %v13270_v58 = vld [vmem:[%s24386_s1 + $0x1718] sm:$0xf0]  ;;  %v16184_v52 = vld [vmem:[%s24386_s1 + $0x16ec] sm:$0xf] }
 0x347   :  { %6881 = vmatpush.bf16.msrb.mxu1 %v13177_v22  ;;  %v16148_v22 = vld [vmem:[%s24386_s1 + $0x15cc] sm:$0xf]  ;;  %v13078_v3 = vld [vmem:[%s24386_s1 + $0x1598] sm:$0xf0] }
 0x348   :  { %6876 = vmatmul.bf16.vlgmr.msra.gmra.mxu3 %v17011_v8  ;;  %6848 = vmatpush.bf16.msra.mxu0 %v12697_v26  ;;  %v13481_v26 = vor.u32 %v16240_v62, %v13478_v43  ;;  %v13254_v1 = vld [vmem:[%s24386_s1 + $0x16f8] sm:$0xf0]  ;;  %v16220_v0 = vld [vmem:[%s24386_s1 + $0x180c] sm:$0xf] }
 0x349   :  { %6920 = vmatpush.bf16.msrb.mxu3 %v13561_v12  ;;  %6859 = vmatpush.bf16.msrb.mxu2 %v12857_v33  ;;  %v12681_v12 = vor.u32 %v16040_v13, %v12678_v50  ;;  %v12809_v33 = vor.u32 %v16072_v2, %v12806_v34  ;;  %v13462_v13 = vld [vmem:[%s24386_s1 + $0x1898] sm:$0xf0]  ;;  %v13273_v50 = vor.u32 %v16188_v57, %v13270_v58  ;;  %v16232_v32 = vld [vmem:[%s24386_s1 + $0x186c] sm:$0xf] }
 0x34a   :  { %v13062_v59 = vld [vmem:[%s24386_s1 + $0x1578] sm:$0xf0]  ;;  %v16292_v7 = vld [vmem:[%s24386_s1 + $0x1a4c] sm:$0xf]  ;;  %v13257_v53 = vor.u32 %v16184_v52, %v13254_v1 }
 0x34b   :  { %6882 = vmatpush.bf16.msrb.mxu1 %v13161_v16  ;;  %v22121_v16 = vpop.f32.mrf.mxu1  ;;  %v13446_v34 = vld [vmem:[%s24386_s1 + $0x1878] sm:$0xf0]  ;;  %v16288_v58 = vld [vmem:[%s24386_s1 + $0x1a2c] sm:$0xf] }
 0x34c   :  { %6849 = vmatpush.bf16.msra.mxu0 %v12681_v12  ;;  %v13465_v12 = vor.u32 %v16236_v10, %v13462_v13  ;;  %v13686_v44 = vld [vmem:[%s24386_s1 + $0x1a58] sm:$0xf0]  ;;  %v16284_v52 = vld [vmem:[%s24386_s1 + $0x1a0c] sm:$0xf] }
 0x34d   :  { %6921 = vmatpush.bf16.msrb.mxu3 %v13545_v5  ;;  %6860 = vmatpush.bf16.msrb.mxu2 %v12841_v39  ;;  %v13113_v5 = vor.u32 %v16148_v22, %v13110_v24  ;;  %v16140_v39 = vld [vmem:[%s24386_s1 + $0x158c] sm:$0xf]  ;;  %v13238_v29 = vld [vmem:[%s24386_s1 + $0x16d8] sm:$0xf0] }
 0x34e   :  { %v13081_v22 = vor.u32 %v16140_v39, %v13078_v3  ;;  %v16136_v24 = vld [vmem:[%s24386_s1 + $0x156c] sm:$0xf]  ;;  %v13382_v60 = vld [vmem:[%s24386_s1 + $0x17f8] sm:$0xf0] }
 0x34f   :  { %6883 = vmatpush.bf16.msrb.mxu1 %v13145_v61  ;;  %v16224_v61 = vld [vmem:[%s24386_s1 + $0x182c] sm:$0xf]  ;;  %6850 = vmatmul.bf16.vlgmr.msra.gmra.mxu0 %v17026_v15  ;;  %v13065_v43 = vor.u32 %v16136_v24, %v13062_v59  ;;  %v13366_v10 = vld [vmem:[%s24386_s1 + $0x17d8] sm:$0xf0] }
 0x350   :  { %6894 = vmatpush.bf16.msrb.mxu0 %v13305_v18  ;;  %v6632_v18 = vpop.f32.mrf.mxu3  ;;  %v16176_v39 = vld [vmem:[%s24386_s1 + $0x16ac] sm:$0xf]  ;;  %v13654_v1 = vld [vmem:[%s24386_s1 + $0x1a18] sm:$0xf0] }
 0x351   :  { %6922 = vmatpush.bf16.msrb.mxu3 %v13529_v41  ;;  %6861 = vmatpush.bf16.msrb.mxu2 %v12825_v49  ;;  %v13414_v41 = vld [vmem:[%s24386_s1 + $0x1838] sm:$0xf0]  ;;  %v6604_v49 = vpop.f32.mrf.mxu0  ;;  %v16212_v3 = vld [vmem:[%s24386_s1 + $0x17cc] sm:$0xf] }
 0x352   :  { %v13417_v46 = vor.u32 %v16224_v61, %v13414_v41  ;;  %v6605_v2 = vadd.f32 %v6604_v49, %v22089_v20  ;;  %v14246_v20 = vld [vmem:[%s24386_s1 + $0x1c70] sm:$0xf]  ;;  %v13670_v61 = vld [vmem:[%s24386_s1 + $0x1a38] sm:$0xf0]  ;;  %v16208_v24 = vld [vmem:[%s24386_s1 + $0x17ac] sm:$0xf] }
 0x353   :  { %6884 = vmatpush.bf16.msrb.mxu1 %v13129_v37  ;;  %v13398_v37 = vld [vmem:[%s24386_s1 + $0x1818] sm:$0xf0] }
 0x354   :  { %6895 = vmatpush.bf16.msrb.mxu0 %v13289_v48  ;;  %v13401_v30 = vor.u32 %v16220_v0, %v13398_v37  ;;  %v6618_v62 = vadd.f32 %v22121_v16, %v6605_v2  ;;  %v13449_v48 = vor.u32 %v16232_v32, %v13446_v34  ;;  %v13369_v37 = vor.u32 %v16212_v3, %v13366_v10  ;;  %v13206_v49 = vld [vmem:[%s24386_s1 + $0x1698] sm:$0xf0]  ;;  %v16280_v2 = vld [vmem:[%s24386_s1 + $0x19ec] sm:$0xf] }
 0x355   :  { %6923 = vmatpush.bf16.msrb.mxu3 %v13513_v25  ;;  %6862 = vmatpush.bf16.msrb.mxu2 %v12809_v33  ;;  %v6619_v25 = vpop.f32.mrf.mxu1  ;;  %v16216_v33 = vld [vmem:[%s24386_s1 + $0x17ec] sm:$0xf]  ;;  %v13350_v59 = vld [vmem:[%s24386_s1 + $0x17b8] sm:$0xf0]  ;;  %v13657_v32 = vor.u32 %v16284_v52, %v13654_v1 }
 0x356   :  { %v6631_v41 = vadd.f32 %v22126_v31, %v6618_v62  ;;  %v13385_v16 = vor.u32 %v16216_v33, %v13382_v60  ;;  %v13222_v31 = vld [vmem:[%s24386_s1 + $0x16b8] sm:$0xf0]  ;;  %v14214_v25 = vld [vmem:[%s24386_s1 + $0x1c30] sm:$0xf]  ;;  %v5851_v60 = vunpack.c.h.b16 %v21683_v63  ;;  %v16320_v3 = vld [vmem:[%s24386_s1 + $0x1b2c] sm:$0xf] }
 0x357   :  { %6885 = vmatpush.bf16.msrb.mxu1 %v13113_v5  ;;  %v16361_v5 = vld [vmem:[%s24386_s1 + $0x1c7c] sm:$0xf0]  ;;  %v13225_v0 = vor.u32 %v16176_v39, %v13222_v31  ;;  %v13638_v34 = vld [vmem:[%s24386_s1 + $0x19f8] sm:$0xf0]  ;;  %v16272_v52 = vld [vmem:[%s24386_s1 + $0x19ac] sm:$0xf] }
 0x358   :  { %6863 = vmatmul.bf16.vlgmr.msrb.gmra.mxu2 %v17024_v14  ;;  %6896 = vmatpush.bf16.msrb.mxu0 %v13273_v50  ;;  %v14247_v57 = vor.u32 %v16361_v5, %v14246_v20  ;;  %v13673_v50 = vor.u32 %v16288_v58, %v13670_v61  ;;  %v16168_v20 = vld [vmem:[%s24386_s1 + $0x166c] sm:$0xf]  ;;  %v13334_v33 = vld [vmem:[%s24386_s1 + $0x1798] sm:$0xf0]  ;;  %v6147_v31 = vpack.c.b16 %v5851_v60, %v5851_v60 }
 0x359   :  { %6924 = vmatpush.bf16.msrb.mxu3 %v13497_v6  ;;  %6907 = vmatpush.bf16.msra.mxu2 %v13433_v56  ;;  %v16180_v6 = vld [vmem:[%s24386_s1 + $0x16cc] sm:$0xf]  ;;  %v13689_v56 = vor.u32 %v16292_v7, %v13686_v44  ;;  %v6606_v13 = vpop.f32.mrf.mxu0  ;;  %v13353_v44 = vor.u32 %v16208_v24, %v13350_v59  ;;  %v13318_v39 = vld [vmem:[%s24386_s1 + $0x1778] sm:$0xf0] }
 0x35a   :  { %v13241_v23 = vor.u32 %v16180_v6, %v13238_v29  ;;  %v13190_v6 = vld [vmem:[%s24386_s1 + $0x1678] sm:$0xf0]  ;;  %v16204_v29 = vld [vmem:[%s24386_s1 + $0x178c] sm:$0xf] }
 0x35b   :  { %6886 = vmatpush.bf16.msrb.mxu1 %v13097_v55  ;;  %v14230_v55 = vld [vmem:[%s24386_s1 + $0x1c50] sm:$0xf]  ;;  %v6643_v5 = vpop.f32.mrf.mxu2  ;;  %v16276_v58 = vld [vmem:[%s24386_s1 + $0x19cc] sm:$0xf]  ;;  %v13193_v63 = vor.u32 %v16168_v20, %v13190_v6  ;;  %v13337_v61 = vor.u32 %v16204_v29, %v13334_v33  ;;  %v13798_v10 = vld [vmem:[%s24386_s1 + $0x1b38] sm:$0xf0] }
 0x35c   :  { %6897 = vmatpush.bf16.msrb.mxu0 %v13257_v53  ;;  %v14198_v53 = vld [vmem:[%s24386_s1 + $0x1c10] sm:$0xf]  ;;  %v22289_v62 = vadd.f32 %v6643_v5, %v6631_v41  ;;  %v13622_v41 = vld [vmem:[%s24386_s1 + $0x19d8] sm:$0xf0]  ;;  %v16316_v24 = vld [vmem:[%s24386_s1 + $0x1b0c] sm:$0xf] }
 0x35d   :  { %6925 = vmatpush.bf16.msrb.mxu3 %v13481_v26  ;;  %6908 = vmatpush.bf16.msra.mxu2 %v13417_v46  ;;  %v16357_v26 = vld [vmem:[%s24386_s1 + $0x1c5c] sm:$0xf0]  ;;  %v13590_v20 = vld [vmem:[%s24386_s1 + $0x1998] sm:$0xf0]  ;;  %v14150_v5 = vld [vmem:[%s24386_s1 + $0x1bb0] sm:$0xf] }
 0x35e   :  { %v14231_v46 = vor.u32 %v16357_v26, %v14230_v55  ;;  %v16200_v26 = vld [vmem:[%s24386_s1 + $0x176c] sm:$0xf]  ;;  %v16337_v6 = vld [vmem:[%s24386_s1 + $0x1bbc] sm:$0xf0] }
 0x35f   :  { %6887 = vmatpush.bf16.msrb.mxu1 %v13081_v22  ;;  %v16353_v22 = vld [vmem:[%s24386_s1 + $0x1c3c] sm:$0xf0] }
 0x360   :  { %6898 = vmatpush.bf16.msrb.mxu0 %v13241_v23  ;;  %v14215_v18 = vor.u32 %v16353_v22, %v14214_v25  ;;  %v14182_v23 = vld [vmem:[%s24386_s1 + $0x1bf0] sm:$0xf]  ;;  %v16341_v22 = vld [vmem:[%s24386_s1 + $0x1bdc] sm:$0xf0] }
 0x361   :  { %6926 = vmatpush.bf16.msrb.mxu3 %v13465_v12  ;;  %6909 = vmatpush.bf16.msra.mxu2 %v13401_v30  ;;  %v16172_v12 = vld [vmem:[%s24386_s1 + $0x168c] sm:$0xf]  ;;  %v16349_v30 = vld [vmem:[%s24386_s1 + $0x1c1c] sm:$0xf0]  ;;  %v14166_v25 = vld [vmem:[%s24386_s1 + $0x1bd0] sm:$0xf] }
 0x362   :  { %v13209_v7 = vor.u32 %v16172_v12, %v13206_v49  ;;  %v13801_v12 = vor.u32 %v16320_v3, %v13798_v10  ;;  %v6450_v49 = vsel %vm1841_vm0, %v6147_v31, 0  ;;  %v16333_v31 = vld [vmem:[%s24386_s1 + $0x1b9c] sm:$0xf0]  ;;  %v14374_v3 = vld [vmem:[%s24386_s1 + $0x1d70] sm:$0xf] }
 0x363   :  { %6888 = vmatpush.bf16.msrb.mxu1 %v13065_v43  ;;  %v16324_v43 = vld [vmem:[%s24386_s1 + $0x1b4c] sm:$0xf]  ;;  %v6669_v13 = vpop.f32.mrf.mxu1  ;;  %v22324_v1 = vpop.f32.mrf.mxu3 }
 0x364   :  { %6899 = vmatpush.bf16.msrb.mxu0 %v13225_v0  ;;  %v13321_v0 = vor.u32 %v16200_v26, %v13318_v39  ;;  %v6645_v59 = vpop.f32.mrf.mxu2  ;;  %v14134_v39 = vld [vmem:[%s24386_s1 + $0x1b90] sm:$0xf] }
 0x365   :  { %6927 = vmatpush.bf16.msrb.mxu3 %v13449_v48  ;;  %6910 = vmatpush.bf16.msra.mxu2 %v13385_v16  ;;  %v13814_v48 = vld [vmem:[%s24386_s1 + $0x1b58] sm:$0xf0]  ;;  %v16345_v16 = vld [vmem:[%s24386_s1 + $0x1bfc] sm:$0xf0] }
 0x366   :  { %6889 = vmatmul.bf16.vlgmr.msrb.gmra.mxu1 %v17013_v9  ;;  %v13817_v55 = vor.u32 %v16324_v43, %v13814_v48  ;;  %v16312_v43 = vld [vmem:[%s24386_s1 + $0x1aec] sm:$0xf]  ;;  %v13766_v48 = vld [vmem:[%s24386_s1 + $0x1af8] sm:$0xf0] }
 0x367   :  { %6933 = vmatpush.bf16.msra.mxu1 %v13689_v56  ;;  %v13641_v56 = vor.u32 %v16280_v2, %v13638_v34  ;;  %v13830_v2 = vld [vmem:[%s24386_s1 + $0x1b78] sm:$0xf0]  ;;  %v13769_v10 = vor.u32 %v16312_v43, %v13766_v48  ;;  %v16385_v48 = vld [vmem:[%s24386_s1 + $0x1d3c] sm:$0xf0] }
 0x368   :  { %6928 = vmatmul.bf16.vlgmr.msrb.gmra.mxu3 %v17189_v38  ;;  %6900 = vmatpush.bf16.msrb.mxu0 %v13209_v7  ;;  %v14167_v7 = vor.u32 %v16341_v22, %v14166_v25  ;;  %v13750_v25 = vld [vmem:[%s24386_s1 + $0x1ad8] sm:$0xf0] }
 0x369   :  { %8753 = vmatpush.bf16.msra.mxu3 %v14247_v57  ;;  %6911 = vmatpush.bf16.msra.mxu2 %v13369_v37  ;;  %v14199_v57 = vor.u32 %v16349_v30, %v14198_v53  ;;  %v13606_v37 = vld [vmem:[%s24386_s1 + $0x19b8] sm:$0xf0]  ;;  %v14502_v53 = vld [vmem:[%s24386_s1 + $0x1e70] sm:$0xf]  ;;  %v16425_v30 = vld [vmem:[%s24386_s1 + $0x1e7c] sm:$0xf0] }
 0x36a   :  { %v13609_v34 = vor.u32 %v16272_v52, %v13606_v37  ;;  %v14503_v60 = vor.u32 %v16425_v30, %v14502_v53  ;;  %v16308_v37 = vld [vmem:[%s24386_s1 + $0x1acc] sm:$0xf]  ;;  %v13734_v30 = vld [vmem:[%s24386_s1 + $0x1ab8] sm:$0xf0] }
 0x36b   :  { %6934 = vmatpush.bf16.msra.mxu1 %v13673_v50  ;;  %v13625_v50 = vor.u32 %v16276_v58, %v13622_v41  ;;  %v6656_v58 = vpop.f32.mrf.mxu0  ;;  %v13574_v41 = vld [vmem:[%s24386_s1 + $0x1978] sm:$0xf0]  ;;  %v16304_v53 = vld [vmem:[%s24386_s1 + $0x1aac] sm:$0xf] }
 0x36c   :  { %6901 = vmatpush.bf16.msrb.mxu0 %v13193_v63  ;;  %v6657_v26 = vadd.f32 %v6656_v58, %v22289_v62  ;;  %v16393_v62 = vld [vmem:[%s24386_s1 + $0x1d7c] sm:$0xf0]  ;;  %v13737_v43 = vor.u32 %v16304_v53, %v13734_v30  ;;  %v14614_v53 = vld [vmem:[%s24386_s1 + $0x1f50] sm:$0xf] }
 0x36d   :  { %8754 = vmatpush.bf16.msra.mxu3 %v14231_v46  ;;  %6912 = vmatpush.bf16.msra.mxu2 %v13353_v44  ;;  %v14183_v46 = vor.u32 %v16345_v16, %v14182_v23  ;;  %v16268_v44 = vld [vmem:[%s24386_s1 + $0x198c] sm:$0xf]  ;;  %v14486_v23 = vld [vmem:[%s24386_s1 + $0x1e50] sm:$0xf]  ;;  %v16421_v16 = vld [vmem:[%s24386_s1 + $0x1e5c] sm:$0xf0]  ;;  %v14375_v59 = vor.u32 %v16393_v62, %v14374_v3 }
 0x36e   :  { %v13593_v63 = vor.u32 %v16268_v44, %v13590_v20  ;;  %v6670_v52 = vadd.f32 %v6669_v13, %v6657_v26  ;;  %v16417_v13 = vld [vmem:[%s24386_s1 + $0x1e3c] sm:$0xf0]  ;;  %v14326_v26 = vld [vmem:[%s24386_s1 + $0x1d10] sm:$0xf] }
 0x36f   :  { %6935 = vmatpush.bf16.msra.mxu1 %v13657_v32  ;;  %v13782_v32 = vld [vmem:[%s24386_s1 + $0x1b18] sm:$0xf0]  ;;  %6902 = vmatmul.bf16.vlgmr.msrb.gmra.mxu0 %v17208_v45  ;;  %v14710_v3 = vld [vmem:[%s24386_s1 + $0x2010] sm:$0xf] }
 0x370   :  { %6946 = vmatpush.bf16.msra.mxu0 %v13817_v55  ;;  %v13785_v29 = vor.u32 %v16316_v24, %v13782_v32  ;;  %v6684_v55 = vpop.f32.mrf.mxu3  ;;  %v6683_v24 = vadd.f32 %v22324_v1, %v6670_v52  ;;  %v16485_v1 = vld [vmem:[%s24386_s1 + $0x205c] sm:$0xf0]  ;;  %v13702_v52 = vld [vmem:[%s24386_s1 + $0x1a78] sm:$0xf0] }
 0x371   :  { %8755 = vmatpush.bf16.msra.mxu3 %v14215_v18  ;;  %6913 = vmatpush.bf16.msra.mxu2 %v13337_v61  ;;  %v16328_v18 = vld [vmem:[%s24386_s1 + $0x1b6c] sm:$0xf]  ;;  %v14151_v61 = vor.u32 %v16337_v6, %v14150_v5  ;;  %v14454_v5 = vld [vmem:[%s24386_s1 + $0x1e10] sm:$0xf]  ;;  %v16413_v6 = vld [vmem:[%s24386_s1 + $0x1e1c] sm:$0xf0] }
 0x372   :  { %v13833_v33 = vor.u32 %v16328_v18, %v13830_v2  ;;  %v14358_v18 = vld [vmem:[%s24386_s1 + $0x1d50] sm:$0xf]  ;;  %v13753_v2 = vor.u32 %v16308_v37, %v13750_v25  ;;  %v14455_v58 = vor.u32 %v16413_v6, %v14454_v5  ;;  %v16401_v6 = vld [vmem:[%s24386_s1 + $0x1dbc] sm:$0xf0] }
 0x373   :  { %6936 = vmatpush.bf16.msra.mxu1 %v13641_v56  ;;  %v16264_v56 = vld [vmem:[%s24386_s1 + $0x196c] sm:$0xf]  ;;  %v6658_v20 = vpop.f32.mrf.mxu0  ;;  %v14406_v5 = vld [vmem:[%s24386_s1 + $0x1db0] sm:$0xf] }
 0x374   :  { %6947 = vmatpush.bf16.msra.mxu0 %v13801_v12  ;;  %v13577_v22 = vor.u32 %v16264_v56, %v13574_v41  ;;  %v14135_v12 = vor.u32 %v16333_v31, %v14134_v39  ;;  %v14726_v56 = vld [vmem:[%s24386_s1 + $0x2030] sm:$0xf]  ;;  %v16381_v31 = vld [vmem:[%s24386_s1 + $0x1d1c] sm:$0xf0] }
 0x375   :  { %8756 = vmatpush.bf16.msra.mxu3 %v14199_v57  ;;  %6914 = vmatpush.bf16.msra.mxu2 %v13321_v0  ;;  %v6671_v57 = vpop.f32.mrf.mxu1  ;;  %v14487_v0 = vor.u32 %v16421_v16, %v14486_v23  ;;  %v14438_v41 = vld [vmem:[%s24386_s1 + $0x1df0] sm:$0xf]  ;;  %v16409_v23 = vld [vmem:[%s24386_s1 + $0x1dfc] sm:$0xf0] }
 0x376   :  { %v16481_v57 = vld [vmem:[%s24386_s1 + $0x203c] sm:$0xf0] }
 0x377   :  { %6937 = vmatpush.bf16.msra.mxu1 %v13625_v50  ;;  %v14758_v50 = vld [vmem:[%s24386_s1 + $0x2070] sm:$0xf]  ;;  %v14727_v55 = vor.u32 %v16481_v57, %v14726_v56  ;;  %v16453_v20 = vld [vmem:[%s24386_s1 + $0x1f5c] sm:$0xf0] }
 0x378   :  { %6915 = vmatmul.bf16.vlgmr.msra.gmra.mxu2 %v17200_v42  ;;  %6948 = vmatpush.bf16.msra.mxu0 %v13785_v29  ;;  %v14678_v56 = vld [vmem:[%s24386_s1 + $0x1fd0] sm:$0xf]  ;;  %v16469_v57 = vld [vmem:[%s24386_s1 + $0x1fdc] sm:$0xf0] }
 0x379   :  { %8757 = vmatpush.bf16.msra.mxu3 %v14183_v46  ;;  %6965 = vmatpush.bf16.msrb.mxu2 %v6450_v49  ;;  %v16489_v46 = vld [vmem:[%s24386_s1 + $0x207c] sm:$0xf0]  ;;  %v14470_v49 = vld [vmem:[%s24386_s1 + $0x1e30] sm:$0xf] }
 0x37a   :  { %v14759_v32 = vor.u32 %v16489_v46, %v14758_v50  ;;  %v14471_v44 = vor.u32 %v16417_v13, %v14470_v49  ;;  %v14439_v50 = vor.u32 %v16409_v23, %v14438_v41  ;;  %v16296_v46 = vld [vmem:[%s24386_s1 + $0x1a6c] sm:$0xf]  ;;  %v16405_v49 = vld [vmem:[%s24386_s1 + $0x1ddc] sm:$0xf0]  ;;  %v14327_v13 = vor.u32 %v16381_v31, %v14326_v26 }
 0x37b   :  { %6938 = vmatpush.bf16.msra.mxu1 %v13609_v34  ;;  %v16389_v34 = vld [vmem:[%s24386_s1 + $0x1d5c] sm:$0xf0]  ;;  %v6695_v62 = vpop.f32.mrf.mxu2  ;;  %v6708_v25 = vpop.f32.mrf.mxu0 }
 0x37c   :  { %6949 = vmatpush.bf16.msra.mxu0 %v13769_v10  ;;  %v14359_v29 = vor.u32 %v16389_v34, %v14358_v18  ;;  %v16477_v10 = vld [vmem:[%s24386_s1 + $0x201c] sm:$0xf0]  ;;  %v6696_v37 = vadd.f32 %v6695_v62, %v6683_v24  ;;  %v13705_v24 = vor.u32 %v16296_v46, %v13702_v52  ;;  %v14310_v18 = vld [vmem:[%s24386_s1 + $0x1cf0] sm:$0xf] }
 0x37d   :  { %8758 = vmatpush.bf16.msra.mxu3 %v14167_v7  ;;  %6966 = vmatpush.bf16.msrb.mxu2 %v13833_v33  ;;  %v14742_v7 = vld [vmem:[%s24386_s1 + $0x2050] sm:$0xf]  ;;  %v16449_v41 = vld [vmem:[%s24386_s1 + $0x1f3c] sm:$0xf0] }
 0x37e   :  { %v14743_v33 = vor.u32 %v16485_v1, %v14742_v7  ;;  %v14694_v1 = vld [vmem:[%s24386_s1 + $0x1ff0] sm:$0xf]  ;;  %v16553_v31 = vld [vmem:[%s24386_s1 + $0x227c] sm:$0xf0] }
 0x37f   :  { %6939 = vmatpush.bf16.msra.mxu1 %v13593_v63  ;;  %v16300_v63 = vld [vmem:[%s24386_s1 + $0x1a8c] sm:$0xf]  ;;  %v16369_v62 = vld [vmem:[%s24386_s1 + $0x1cbc] sm:$0xf0]  ;;  %v14662_v52 = vld [vmem:[%s24386_s1 + $0x1fb0] sm:$0xf] }
 0x380   :  { %6950 = vmatpush.bf16.msra.mxu0 %v13753_v2  ;;  %v16377_v2 = vld [vmem:[%s24386_s1 + $0x1cfc] sm:$0xf0] }
 0x381   :  { %8779 = vmatpush.bf16.msra.mxu2 %v14503_v60  ;;  %8759 = vmatpush.bf16.msra.mxu3 %v14151_v61  ;;  %v14342_v60 = vld [vmem:[%s24386_s1 + $0x1d30] sm:$0xf]  ;;  %v13718_v61 = vld [vmem:[%s24386_s1 + $0x1a98] sm:$0xf0] }
 0x382   :  { %v14343_v16 = vor.u32 %v16385_v48, %v14342_v60  ;;  %v13721_v39 = vor.u32 %v16300_v63, %v13718_v61  ;;  %v14407_v48 = vor.u32 %v16401_v6, %v14406_v5  ;;  %v16617_v6 = vld [vmem:[%s24386_s1 + $0x247c] sm:$0xf0] }
 0x383   :  { %6940 = vmatpush.bf16.msra.mxu1 %v13577_v22  ;;  %v16457_v22 = vld [vmem:[%s24386_s1 + $0x1f7c] sm:$0xf0]  ;;  %v6734_v60 = vpop.f32.mrf.mxu3  ;;  %v6697_v63 = vpop.f32.mrf.mxu2 }
 0x384   :  { %6951 = vmatpush.bf16.msra.mxu0 %v13737_v43  ;;  %v14615_v43 = vor.u32 %v16453_v20, %v14614_v53  ;;  %v6710_v23 = vpop.f32.mrf.mxu0  ;;  %v16521_v53 = vld [vmem:[%s24386_s1 + $0x217c] sm:$0xf0]  ;;  %v15270_v20 = vld [vmem:[%s24386_s1 + $0x2470] sm:$0xf] }
 0x385   :  { %8780 = vmatpush.bf16.msra.mxu2 %v14487_v0  ;;  %8760 = vmatpush.bf16.msra.mxu3 %v14135_v12  ;;  %v14630_v0 = vld [vmem:[%s24386_s1 + $0x1f70] sm:$0xf]  ;;  %v16517_v63 = vld [vmem:[%s24386_s1 + $0x215c] sm:$0xf0] }
 0x386   :  { %6941 = vmatmul.bf16.vlgmr.msra.gmra.mxu1 %v17210_v47  ;;  %v14422_v12 = vld [vmem:[%s24386_s1 + $0x1dd0] sm:$0xf]  ;;  %v14631_v34 = vor.u32 %v16457_v22, %v14630_v0  ;;  %v16465_v0 = vld [vmem:[%s24386_s1 + $0x1fbc] sm:$0xf0] }
 0x387   :  { %8766 = vmatpush.bf16.msrb.mxu1 %v14375_v59  ;;  %v14711_v59 = vor.u32 %v16477_v10, %v14710_v3  ;;  %v14423_v7 = vor.u32 %v16405_v49, %v14422_v12  ;;  %v14679_v3 = vor.u32 %v16469_v57, %v14678_v56  ;;  %v14278_v10 = vld [vmem:[%s24386_s1 + $0x1cb0] sm:$0xf]  ;;  %v16445_v22 = vld [vmem:[%s24386_s1 + $0x1f1c] sm:$0xf0]  ;;  %v15271_v56 = vor.u32 %v16617_v6, %v15270_v20 }
 0x388   :  { %8761 = vmatmul.bf16.vlgmr.msra.gmra.mxu3 %v17026_v15  ;;  %6952 = vmatpush.bf16.msra.mxu0 %v13721_v39  ;;  %v15014_v39 = vld [vmem:[%s24386_s1 + $0x2270] sm:$0xf]  ;;  %v14279_v49 = vor.u32 %v16369_v62, %v14278_v10  ;;  %v16585_v6 = vld [vmem:[%s24386_s1 + $0x237c] sm:$0xf0] }
 0x389   :  { %8805 = vmatpush.bf16.msrb.mxu3 %v14759_v32  ;;  %8781 = vmatpush.bf16.msra.mxu2 %v14471_v44  ;;  %v6709_v32 = vadd.f32 %v6708_v25, %v6696_v37  ;;  %v16473_v44 = vld [vmem:[%s24386_s1 + $0x1ffc] sm:$0xf0]  ;;  %v15015_v37 = vor.u32 %v16553_v31, %v15014_v39  ;;  %v14582_v25 = vld [vmem:[%s24386_s1 + $0x1f10] sm:$0xf] }
 0x38a   :  { %13837 = vmatmul.msk.bf16.vlgmr.msrb.gmra.mxu2 %vm1837_vm1, %v17318_v40  ;;  %v14695_v54 = vor.u32 %v16473_v44, %v14694_v1  ;;  %v14583_v1 = vor.u32 %v16445_v22, %v14582_v25  ;;  %v14886_v44 = vld [vmem:[%s24386_s1 + $0x2170] sm:$0xf]  ;;  %v16437_v39 = vld [vmem:[%s24386_s1 + $0x1edc] sm:$0xf0] }
 0x38b   :  { %8767 = vmatpush.bf16.msrb.mxu1 %v14359_v29  ;;  %v22518_v30 = vmax.f32 %v4672_v21, %v6709_v32  ;;  %v6721_v29 = vpop.f32.mrf.mxu1  ;;  %v16373_v21 = vld [vmem:[%s24386_s1 + $0x1cdc] sm:$0xf0]  ;;  %v14966_v31 = vld [vmem:[%s24386_s1 + $0x2210] sm:$0xf] }
 0x38c   :  { %6953 = vmatpush.bf16.msra.mxu0 %v13705_v24  ;;  %v6735_v61 = vadd.f32 %v6734_v60, %v6721_v29  ;;  %v14295_v26 = vor.u32 %v16373_v21, %v14294_v11  ;;  %v16549_v32 = vld [vmem:[%s24386_s1 + $0x225c] sm:$0xf0]  ;;  %v14663_v24 = vor.u32 %v16465_v0, %v14662_v52  ;;  %v14566_v29 = vld [vmem:[%s24386_s1 + $0x1ef0] sm:$0xf] }
 0x38d   :  { %8806 = vmatpush.bf16.msrb.mxu3 %v14743_v33  ;;  %8782 = vmatpush.bf16.msra.mxu2 %v14455_v58  ;;  %v14311_v33 = vor.u32 %v16377_v2, %v14310_v18  ;;  %v14598_v58 = vld [vmem:[%s24386_s1 + $0x1f30] sm:$0xf]  ;;  %v16365_v18 = vld [vmem:[%s24386_s1 + $0x1c9c] sm:$0xf0] }
 0x38e   :  { %v14646_v2 = vld [vmem:[%s24386_s1 + $0x1f90] sm:$0xf]  ;;  %v16545_v21 = vld [vmem:[%s24386_s1 + $0x223c] sm:$0xf0] }
 0x38f   :  { %8768 = vmatpush.bf16.msrb.mxu1 %v14343_v16  ;;  %v14390_v16 = vld [vmem:[%s24386_s1 + $0x1d90] sm:$0xf]  ;;  %6954 = vmatmul.bf16.vlgmr.msra.gmra.mxu0 %v17404_v28  ;;  %v16433_v22 = vld [vmem:[%s24386_s1 + $0x1ebc] sm:$0xf0] }
 0x390   :  { %8792 = vmatpush.bf16.msrb.mxu0 %v14631_v34  ;;  %v16461_v34 = vld [vmem:[%s24386_s1 + $0x1f9c] sm:$0xf0]  ;;  %v14982_v11 = vld [vmem:[%s24386_s1 + $0x2230] sm:$0xf] }
 0x391   :  { %8807 = vmatpush.bf16.msrb.mxu3 %v14727_v55  ;;  %8783 = vmatpush.bf16.msra.mxu2 %v14439_v50  ;;  %v16397_v55 = vld [vmem:[%s24386_s1 + $0x1d9c] sm:$0xf0]  ;;  %v14599_v50 = vor.u32 %v16449_v41, %v14598_v58  ;;  %v14647_v60 = vor.u32 %v16461_v34, %v14646_v2  ;;  %v14870_v58 = vld [vmem:[%s24386_s1 + $0x2150] sm:$0xf] }
 0x392   :  { %v14391_v46 = vor.u32 %v16397_v55, %v14390_v16  ;;  %v15254_v41 = vld [vmem:[%s24386_s1 + $0x2450] sm:$0xf]  ;;  %v14983_v16 = vor.u32 %v16545_v21, %v14982_v11  ;;  %v16613_v55 = vld [vmem:[%s24386_s1 + $0x245c] sm:$0xf0] }
 0x393   :  { %8769 = vmatpush.bf16.msrb.mxu1 %v14327_v13  ;;  %v6723_v12 = vpop.f32.mrf.mxu1  ;;  %v14262_v13 = vld [vmem:[%s24386_s1 + $0x1c90] sm:$0xf]  ;;  %v15255_v10 = vor.u32 %v16613_v55, %v15254_v41  ;;  %v16509_v2 = vld [vmem:[%s24386_s1 + $0x211c] sm:$0xf0] }
 0x394   :  { %8793 = vmatpush.bf16.msrb.mxu0 %v14615_v43  ;;  %v14887_v43 = vor.u32 %v16521_v53, %v14886_v44  ;;  %v15238_v52 = vld [vmem:[%s24386_s1 + $0x2430] sm:$0xf]  ;;  %v16429_v53 = vld [vmem:[%s24386_s1 + $0x1e9c] sm:$0xf0] }
 0x395   :  { %8808 = vmatpush.bf16.msrb.mxu3 %v14711_v59  ;;  %8784 = vmatpush.bf16.msra.mxu2 %v14423_v7  ;;  %v14998_v59 = vld [vmem:[%s24386_s1 + $0x2250] sm:$0xf]  ;;  %v6736_v7 = vpop.f32.mrf.mxu3  ;;  %v16529_v55 = vld [vmem:[%s24386_s1 + $0x21bc] sm:$0xf0] }
 0x396   :  { %v14999_v5 = vor.u32 %v16549_v32, %v14998_v59  ;;  %v14534_v25 = vld [vmem:[%s24386_s1 + $0x1eb0] sm:$0xf]  ;;  %v16605_v7 = vld [vmem:[%s24386_s1 + $0x241c] sm:$0xf0] }
 0x397   :  { %8770 = vmatpush.bf16.msrb.mxu1 %v14311_v33  ;;  %v16441_v33 = vld [vmem:[%s24386_s1 + $0x1efc] sm:$0xf0]  ;;  %v14950_v12 = vld [vmem:[%s24386_s1 + $0x21f0] sm:$0xf] }
 0x398   :  { %8794 = vmatpush.bf16.msrb.mxu0 %v14599_v50  ;;  %v14567_v57 = vor.u32 %v16441_v33, %v14566_v29  ;;  %v14854_v50 = vld [vmem:[%s24386_s1 + $0x2130] sm:$0xf]  ;;  %v16533_v33 = vld [vmem:[%s24386_s1 + $0x21dc] sm:$0xf0] }
 0x399   :  { %8809 = vmatpush.bf16.msrb.mxu3 %v14695_v54  ;;  %8785 = vmatpush.bf16.msra.mxu2 %v14407_v48  ;;  %v14263_v54 = vor.u32 %v16365_v18, %v14262_v13  ;;  %v6747_v48 = vpop.f32.mrf.mxu0  ;;  %v14838_v59 = vld [vmem:[%s24386_s1 + $0x2110] sm:$0xf]  ;;  %v14535_v18 = vor.u32 %v16433_v22, %v14534_v25 }
 0x39a   :  { %v6748_v23 = vadd.f32 %v6747_v48, %v6735_v61  ;;  %v16541_v61 = vld [vmem:[%s24386_s1 + $0x221c] sm:$0xf0]  ;;  %v15222_v34 = vld [vmem:[%s24386_s1 + $0x2410] sm:$0xf]  ;;  %v14839_v11 = vor.u32 %v16509_v2, %v14838_v59 }
 0x39b   :  { %8771 = vmatpush.bf16.msrb.mxu1 %v14295_v26  ;;  %v14550_v26 = vld [vmem:[%s24386_s1 + $0x1ed0] sm:$0xf]  ;;  %v14967_v0 = vor.u32 %v16541_v61, %v14966_v31  ;;  %v15223_v21 = vor.u32 %v16605_v7, %v15222_v34  ;;  %v16505_v48 = vld [vmem:[%s24386_s1 + $0x20fc] sm:$0xf0] }
 0x39c   :  { %8795 = vmatpush.bf16.msrb.mxu0 %v14583_v1  ;;  %v14551_v62 = vor.u32 %v16437_v39, %v14550_v26  ;;  %v14518_v44 = vld [vmem:[%s24386_s1 + $0x1e90] sm:$0xf]  ;;  %v16525_v59 = vld [vmem:[%s24386_s1 + $0x219c] sm:$0xf0] }
 0x39d   :  { %8810 = vmatpush.bf16.msrb.mxu3 %v14679_v3  ;;  %8786 = vmatpush.bf16.msra.mxu2 %v14391_v46  ;;  %v14871_v3 = vor.u32 %v16517_v63, %v14870_v58  ;;  %v16513_v46 = vld [vmem:[%s24386_s1 + $0x213c] sm:$0xf0]  ;;  %v15142_v20 = vld [vmem:[%s24386_s1 + $0x2370] sm:$0xf] }
 0x39e   :  { %v14855_v13 = vor.u32 %v16513_v46, %v14854_v50  ;;  %v14934_v29 = vld [vmem:[%s24386_s1 + $0x21d0] sm:$0xf]  ;;  %v16601_v63 = vld [vmem:[%s24386_s1 + $0x23fc] sm:$0xf0] }
 0x39f   :  { %8772 = vmatpush.bf16.msrb.mxu1 %v14279_v49  ;;  %v16537_v49 = vld [vmem:[%s24386_s1 + $0x21fc] sm:$0xf0]  ;;  %v15206_v58 = vld [vmem:[%s24386_s1 + $0x23f0] sm:$0xf] }
 0x3a0   :  { %8787 = vmatmul.bf16.vlgmr.msra.gmra.mxu2 %v17011_v8  ;;  %8796 = vmatpush.bf16.msrb.mxu0 %v14567_v57  ;;  %v14951_v1 = vor.u32 %v16537_v49, %v14950_v12  ;;  %v14935_v57 = vor.u32 %v16533_v33, %v14934_v29  ;;  %v15126_v41 = vld [vmem:[%s24386_s1 + $0x2350] sm:$0xf]  ;;  %v15207_v61 = vor.u32 %v16601_v63, %v15206_v58  ;;  %v16577_v49 = vld [vmem:[%s24386_s1 + $0x233c] sm:$0xf0] }
 0x3a1   :  { %8831 = vmatpush.bf16.msrb.mxu2 %v15015_v37  ;;  %8811 = vmatpush.bf16.msrb.mxu3 %v14663_v24  ;;  %v16609_v37 = vld [vmem:[%s24386_s1 + $0x243c] sm:$0xf0]  ;;  %v6749_v32 = vpop.f32.mrf.mxu0  ;;  %v22745_v12 = vld [vmem:[%s24386_s1 + $0x24b0] sm:$0xff] }
 0x3a2   :  { %v15239_v24 = vor.u32 %v16609_v37, %v15238_v52  ;;  %v15110_v37 = vld [vmem:[%s24386_s1 + $0x2330] sm:$0xf]  ;;  %v16497_v7 = vld [vmem:[%s24386_s1 + $0x20bc] sm:$0xf0] }
 0x3a3   :  { %8773 = vmatpush.bf16.msrb.mxu1 %v14263_v54  ;;  %v6773_v26 = vpop.f32.mrf.mxu1  ;;  %v6786_v50 = vpop.f32.mrf.mxu3  ;;  %v14790_v34 = vld [vmem:[%s24386_s1 + $0x20b0] sm:$0xf]  ;;  %v16573_v33 = vld [vmem:[%s24386_s1 + $0x231c] sm:$0xf0] }
 0x3a4   :  { %8797 = vmatpush.bf16.msrb.mxu0 %v14551_v62  ;;  %v15190_v62 = vld [vmem:[%s24386_s1 + $0x23d0] sm:$0xf] }
 0x3a5   :  { %8832 = vmatpush.bf16.msrb.mxu2 %v14999_v5  ;;  %8812 = vmatpush.bf16.msrb.mxu3 %v14647_v60  ;;  %v6760_v5 = vpop.f32.mrf.mxu2  ;;  %v14519_v60 = vor.u32 %v16429_v53, %v14518_v44  ;;  %v15111_v44 = vor.u32 %v16577_v49, %v15110_v37  ;;  %v15094_v29 = vld [vmem:[%s24386_s1 + $0x2310] sm:$0xf]  ;;  %v16451_v49 = vld [vmem:[%s24386_s1 + $0x1f54] sm:$0xf] }
 0x3a6   :  { %8774 = vmatmul.bf16.vlgmr.msrb.gmra.mxu1 %v17024_v14  ;;  %v6761_v54 = vadd.f32 %v6760_v5, %v6748_v23  ;;  %v16581_v23 = vld [vmem:[%s24386_s1 + $0x235c] sm:$0xf0]  ;;  %v15095_v63 = vor.u32 %v16573_v33, %v15094_v29 }
 0x3a7   :  { %8818 = vmatpush.bf16.msra.mxu1 %v14887_v43  ;;  %v14822_v43 = vld [vmem:[%s24386_s1 + $0x20f0] sm:$0xf]  ;;  %v15127_v46 = vor.u32 %v16581_v23, %v15126_v41  ;;  %v16593_v5 = vld [vmem:[%s24386_s1 + $0x23bc] sm:$0xf0] }
 0x3a8   :  { %8813 = vmatmul.bf16.vlgmr.msrb.gmra.mxu3 %v17208_v45  ;;  %8798 = vmatpush.bf16.msrb.mxu0 %v14535_v18  ;;  %v14823_v39 = vor.u32 %v16505_v48, %v14822_v43  ;;  %v6774_v31 = vadd.f32 %v6773_v26, %v6761_v54  ;;  %v14248_v18 = vld [vmem:[%s24386_s1 + $0x1c80] sm:$0xf0]  ;;  %v14774_v48 = vld [vmem:[%s24386_s1 + $0x2090] sm:$0xf]  ;;  %v16589_v23 = vld [vmem:[%s24386_s1 + $0x239c] sm:$0xf0] }
 0x3a9   :  { %8857 = vmatpush.bf16.msra.mxu3 %v15271_v56  ;;  %8833 = vmatpush.bf16.msrb.mxu2 %v14983_v16  ;;  %v15143_v56 = vor.u32 %v16585_v6, %v15142_v20  ;;  %v14918_v16 = vld [vmem:[%s24386_s1 + $0x21b0] sm:$0xf]  ;;  %v14632_v26 = vld [vmem:[%s24386_s1 + $0x1f80] sm:$0xf0] }
 0x3aa   :  { %v14919_v52 = vor.u32 %v16529_v55, %v14918_v16  ;;  %v22740_v25 = vadd.f32 %v6786_v50, %v6774_v31  ;;  %v15174_v20 = vld [vmem:[%s24386_s1 + $0x23b0] sm:$0xf]  ;;  %v16455_v16 = vld [vmem:[%s24386_s1 + $0x1f74] sm:$0xf]  ;;  %v16569_v31 = vld [vmem:[%s24386_s1 + $0x22fc] sm:$0xf0] }
 0x3ab   :  { %8819 = vmatpush.bf16.msra.mxu1 %v14871_v3  ;;  %v14806_v3 = vld [vmem:[%s24386_s1 + $0x20d0] sm:$0xf]  ;;  %v6775_v54 = vpop.f32.mrf.mxu1  ;;  %v15175_v43 = vor.u32 %v16593_v5, %v15174_v20  ;;  %v6788_v58 = vpop.f32.mrf.mxu3  ;;  %v16447_v5 = vld [vmem:[%s24386_s1 + $0x1f34] sm:$0xf] }
 0x3ac   :  { %8799 = vmatpush.bf16.msrb.mxu0 %v14519_v60  ;;  %v14232_v60 = vld [vmem:[%s24386_s1 + $0x1c60] sm:$0xf0]  ;;  %v15158_v41 = vld [vmem:[%s24386_s1 + $0x2390] sm:$0xf]  ;;  %v6799_v37 = vpop.f32.mrf.mxu0  ;;  %v16443_v58 = vld [vmem:[%s24386_s1 + $0x1f14] sm:$0xf] }
 0x3ad   :  { %8858 = vmatpush.bf16.msra.mxu3 %v15255_v10  ;;  %8834 = vmatpush.bf16.msrb.mxu2 %v14967_v0  ;;  %v16501_v10 = vld [vmem:[%s24386_s1 + $0x20dc] sm:$0xf0]  ;;  %v6762_v22 = vpop.f32.mrf.mxu2  ;;  %v15046_v54 = vld [vmem:[%s24386_s1 + $0x22b0] sm:$0xf] }
 0x3ae   :  { %v16597_v0 = vld [vmem:[%s24386_s1 + $0x23dc] sm:$0xf0]  ;;  %v14807_v32 = vor.u32 %v16501_v10, %v14806_v3  ;;  %v16351_v3 = vld [vmem:[%s24386_s1 + $0x1c34] sm:$0xf]  ;;  %v14216_v10 = vld [vmem:[%s24386_s1 + $0x1c40] sm:$0xf0] }
 0x3af   :  { %8820 = vmatpush.bf16.msra.mxu1 %v14855_v13  ;;  %v14902_v13 = vld [vmem:[%s24386_s1 + $0x2190] sm:$0xf]  ;;  %8800 = vmatmul.bf16.vlgmr.msrb.gmra.mxu0 %v17013_v9  ;;  %v15191_v2 = vor.u32 %v16597_v0, %v15190_v62  ;;  %v15159_v62 = vor.u32 %v16589_v23, %v15158_v41  ;;  %v16621_v22 = vld [vmem:[%s24386_s1 + $0x249c] sm:$0xf0] }
 0x3b0   :  { %8844 = vmatpush.bf16.msra.mxu0 %v15143_v56  ;;  %v14903_v53 = vor.u32 %v16525_v59, %v14902_v13  ;;  %v16493_v56 = vld [vmem:[%s24386_s1 + $0x209c] sm:$0xf0]  ;;  %v14616_v13 = vld [vmem:[%s24386_s1 + $0x1f60] sm:$0xf0]  ;;  %v6800_v59 = vadd.f32 %v6799_v37, %v22740_v25  ;;  %v16347_v25 = vld [vmem:[%s24386_s1 + $0x1c14] sm:$0xf] }
 0x3b1   :  { %8859 = vmatpush.bf16.msra.mxu3 %v15239_v24  ;;  %8835 = vmatpush.bf16.msrb.mxu2 %v14951_v1  ;;  %v16359_v24 = vld [vmem:[%s24386_s1 + $0x1c74] sm:$0xf]  ;;  %v8149_v1 = vunpack.c.l.b16 %v22745_v12 }
 0x3b2   :  { %v14251_v6 = vor.u32 %v16359_v24, %v14248_v18  ;;  %v15062_v24 = vld [vmem:[%s24386_s1 + $0x22d0] sm:$0xf]  ;;  %v16565_v18 = vld [vmem:[%s24386_s1 + $0x22dc] sm:$0xf0] }
 0x3b3   :  { %8821 = vmatpush.bf16.msra.mxu1 %v14839_v11  ;;  %v14791_v11 = vor.u32 %v16497_v7, %v14790_v34  ;;  %v14504_v34 = vld [vmem:[%s24386_s1 + $0x1e80] sm:$0xf0]  ;;  %v15063_v20 = vor.u32 %v16565_v18, %v15062_v24 }
 0x3b4   :  { %8845 = vmatpush.bf16.msra.mxu0 %v15127_v46  ;;  %v15286_v46 = vld [vmem:[%s24386_s1 + $0x2490] sm:$0xf]  ;;  %v14200_v7 = vld [vmem:[%s24386_s1 + $0x1c20] sm:$0xf0]  ;;  %v6801_v41 = vpop.f32.mrf.mxu0 }
 0x3b5   :  { %8860 = vmatpush.bf16.msra.mxu3 %v15223_v21  ;;  %8836 = vmatpush.bf16.msrb.mxu2 %v14935_v57  ;;  %v16355_v21 = vld [vmem:[%s24386_s1 + $0x1c54] sm:$0xf]  ;;  %v8445_v57 = vpack.c.b16 %v8149_v1, %v8149_v1  ;;  %v15287_v1 = vor.u32 %v16621_v22, %v15286_v46  ;;  %v14203_v33 = vor.u32 %v16347_v25, %v14200_v7  ;;  %v14168_v46 = vld [vmem:[%s24386_s1 + $0x1be0] sm:$0xf0] }
 0x3b6   :  { %v14235_v55 = vor.u32 %v16355_v21, %v14232_v60  ;;  %v16419_v21 = vld [vmem:[%s24386_s1 + $0x1e54] sm:$0xf]  ;;  %v14488_v60 = vld [vmem:[%s24386_s1 + $0x1e60] sm:$0xf0] }
 0x3b7   :  { %8822 = vmatpush.bf16.msra.mxu1 %v14823_v39  ;;  %v15078_v39 = vld [vmem:[%s24386_s1 + $0x22f0] sm:$0xf]  ;;  %v8742_v50 = vsel %vm1841_vm0, %v8445_v57, 0  ;;  %v14491_v23 = vor.u32 %v16419_v21, %v14488_v60  ;;  %v14360_v25 = vld [vmem:[%s24386_s1 + $0x1d60] sm:$0xf0] }
 0x3b8   :  { %8846 = vmatpush.bf16.msra.mxu0 %v15111_v44  ;;  %v15079_v0 = vor.u32 %v16569_v31, %v15078_v39  ;;  %v22851_v44 = vpop.f32.mrf.mxu3  ;;  %v16415_v39 = vld [vmem:[%s24386_s1 + $0x1e34] sm:$0xf] }
 0x3b9   :  { %8861 = vmatpush.bf16.msra.mxu3 %v15207_v61  ;;  %8837 = vmatpush.bf16.msrb.mxu2 %v14919_v52  ;;  %v14775_v61 = vor.u32 %v16493_v56, %v14774_v48  ;;  %v14635_v52 = vor.u32 %v16455_v16, %v14632_v26  ;;  %v14184_v48 = vld [vmem:[%s24386_s1 + $0x1c00] sm:$0xf0]  ;;  %v16557_v26 = vld [vmem:[%s24386_s1 + $0x229c] sm:$0xf0]  ;;  %v16383_v60 = vld [vmem:[%s24386_s1 + $0x1d34] sm:$0xf] }
 0x3ba   :  { %v16487_v41 = vld [vmem:[%s24386_s1 + $0x2074] sm:$0xf] }
 0x3bb   :  { %8823 = vmatpush.bf16.msra.mxu1 %v14807_v32  ;;  %v14219_v32 = vor.u32 %v16351_v3, %v14216_v10  ;;  %v6812_v31 = vpop.f32.mrf.mxu2  ;;  %v16391_v3 = vld [vmem:[%s24386_s1 + $0x1d74] sm:$0xf]  ;;  %v14376_v10 = vld [vmem:[%s24386_s1 + $0x1d80] sm:$0xf0] }
 0x3bc   :  { %8847 = vmatpush.bf16.msra.mxu0 %v15095_v63  ;;  %v14584_v63 = vld [vmem:[%s24386_s1 + $0x1f20] sm:$0xf0] }
 0x3bd   :  { %8862 = vmatpush.bf16.msra.mxu3 %v15191_v2  ;;  %8838 = vmatpush.bf16.msrb.mxu2 %v14903_v53  ;;  %v16423_v2 = vld [vmem:[%s24386_s1 + $0x1e74] sm:$0xf]  ;;  %v14619_v53 = vor.u32 %v16451_v49, %v14616_v13  ;;  %v14379_v49 = vor.u32 %v16391_v3, %v14376_v10 }
 0x3be   :  { %v14507_v29 = vor.u32 %v16423_v2, %v14504_v34  ;;  %v16439_v13 = vld [vmem:[%s24386_s1 + $0x1ef4] sm:$0xf]  ;;  %v14456_v2 = vld [vmem:[%s24386_s1 + $0x1e20] sm:$0xf0] }
 0x3bf   :  { %8824 = vmatpush.bf16.msra.mxu1 %v14791_v11  ;;  %v16561_v11 = vld [vmem:[%s24386_s1 + $0x22bc] sm:$0xf0]  ;;  %v16387_v34 = vld [vmem:[%s24386_s1 + $0x1d54] sm:$0xf] }
 0x3c0   :  { %8839 = vmatmul.bf16.vlgmr.msrb.gmra.mxu2 %v17189_v38  ;;  %8848 = vmatpush.bf16.msra.mxu0 %v15079_v0  ;;  %v15047_v57 = vor.u32 %v16561_v11, %v15046_v54  ;;  %v14587_v0 = vor.u32 %v16443_v58, %v14584_v63  ;;  %v14552_v54 = vld [vmem:[%s24386_s1 + $0x1ee0] sm:$0xf0]  ;;  %v16407_v11 = vld [vmem:[%s24386_s1 + $0x1df4] sm:$0xf] }
 0x3c1   :  { %8883 = vmatpush.bf16.msra.mxu2 %v14251_v6  ;;  %8863 = vmatpush.bf16.msra.mxu3 %v15175_v43  ;;  %v14600_v6 = vld [vmem:[%s24386_s1 + $0x1f40] sm:$0xf0]  ;;  %v16343_v43 = vld [vmem:[%s24386_s1 + $0x1bf4] sm:$0xf] }
 0x3c2   :  { %v14603_v56 = vor.u32 %v16447_v5, %v14600_v6  ;;  %v14187_v16 = vor.u32 %v16343_v43, %v14184_v48  ;;  %v14344_v43 = vld [vmem:[%s24386_s1 + $0x1d40] sm:$0xf0] }
 0x3c3   :  { %8825 = vmatpush.bf16.msra.mxu1 %v14775_v61  ;;  %v14472_v61 = vld [vmem:[%s24386_s1 + $0x1e40] sm:$0xf0]  ;;  %v6825_v24 = vpop.f32.mrf.mxu1  ;;  %v6814_v48 = vpop.f32.mrf.mxu2 }
 0x3c4   :  { %8849 = vmatpush.bf16.msra.mxu0 %v15063_v20  ;;  %v14475_v22 = vor.u32 %v16415_v39, %v14472_v61  ;;  %v14136_v58 = vld [vmem:[%s24386_s1 + $0x1ba0] sm:$0xf0]  ;;  %v16551_v48 = vld [vmem:[%s24386_s1 + $0x2274] sm:$0xf] }
 0x3c5   :  { %8884 = vmatpush.bf16.msra.mxu2 %v14235_v55  ;;  %8864 = vmatpush.bf16.msra.mxu3 %v15159_v62  ;;  %v15030_v55 = vld [vmem:[%s24386_s1 + $0x2290] sm:$0xf]  ;;  %v6813_v62 = vadd.f32 %v6812_v31, %v6800_v59  ;;  %v14568_v59 = vld [vmem:[%s24386_s1 + $0x1f00] sm:$0xf0]  ;;  %v16379_v31 = vld [vmem:[%s24386_s1 + $0x1d14] sm:$0xf] }
 0x3c6   :  { %8826 = vmatmul.bf16.vlgmr.msra.gmra.mxu1 %v17200_v42  ;;  %v15031_v37 = vor.u32 %v16557_v26, %v15030_v55  ;;  %v14571_v20 = vor.u32 %v16439_v13, %v14568_v59  ;;  %v16403_v55 = vld [vmem:[%s24386_s1 + $0x1dd4] sm:$0xf]  ;;  %v14424_v39 = vld [vmem:[%s24386_s1 + $0x1de0] sm:$0xf0] }
 0x3c7   :  { %8876 = vmatpush.bf16.msrb.mxu1 %v8742_v50  ;;  %v16339_v50 = vld [vmem:[%s24386_s1 + $0x1bd4] sm:$0xf]  ;;  %v6826_v7 = vadd.f32 %v6825_v24, %v6813_v62  ;;  %v14328_v61 = vld [vmem:[%s24386_s1 + $0x1d20] sm:$0xf0]  ;;  %v14763_v62 = vor.u32 %v16487_v41, %v14760_v17 }
 0x3c8   :  { %8865 = vmatmul.bf16.vlgmr.msra.gmra.mxu3 %v17404_v28  ;;  %8850 = vmatpush.bf16.msra.mxu0 %v15047_v57  ;;  %v14171_v18 = vor.u32 %v16339_v50, %v14168_v46  ;;  %v16331_v57 = vld [vmem:[%s24386_s1 + $0x1b94] sm:$0xf]  ;;  %v14408_v59 = vld [vmem:[%s24386_s1 + $0x1dc0] sm:$0xf0] }
 0x3c9   :  { %8922 = vmatpush.bf16.msrb.mxu3 %v14635_v52  ;;  %8885 = vmatpush.bf16.msra.mxu2 %v14219_v32  ;;  %v6840_v52 = vpop.f32.mrf.mxu3  ;;  %v16411_v32 = vld [vmem:[%s24386_s1 + $0x1e14] sm:$0xf]  ;;  %v6839_v5 = vadd.f32 %v22851_v44, %v6826_v7  ;;  %v14440_v44 = vld [vmem:[%s24386_s1 + $0x1e00] sm:$0xf0]  ;;  %v14139_v26 = vor.u32 %v16331_v57, %v14136_v58 }
 0x3ca   :  { %v14459_v6 = vor.u32 %v16411_v32, %v14456_v2  ;;  %v14443_v27 = vor.u32 %v16407_v11, %v14440_v44  ;;  %v16483_v46 = vld [vmem:[%s24386_s1 + $0x2054] sm:$0xf]  ;;  %v14744_v52 = vld [vmem:[%s24386_s1 + $0x2060] sm:$0xf0] }
 0x3cb   :  { %8877 = vmatpush.bf16.msrb.mxu1 %v15287_v1  ;;  %v16335_v1 = vld [vmem:[%s24386_s1 + $0x1bb4] sm:$0xf]  ;;  %v6827_v3 = vpop.f32.mrf.mxu1  ;;  %v15144_v24 = vld [vmem:[%s24386_s1 + $0x2380] sm:$0xf0] }
 0x3cc   :  { %8851 = vmatpush.bf16.msra.mxu0 %v15031_v37  ;;  %v14331_v37 = vor.u32 %v16379_v31, %v14328_v61  ;;  %v16399_v13 = vld [vmem:[%s24386_s1 + $0x1db4] sm:$0xf]  ;;  %v15128_v11 = vld [vmem:[%s24386_s1 + $0x2360] sm:$0xf0] }
 0x3cd   :  { %8923 = vmatpush.bf16.msrb.mxu3 %v14619_v53  ;;  %8886 = vmatpush.bf16.msra.mxu2 %v14203_v33  ;;  %v14152_v53 = vld [vmem:[%s24386_s1 + $0x1bc0] sm:$0xf0]  ;;  %v16435_v33 = vld [vmem:[%s24386_s1 + $0x1ed4] sm:$0xf] }
 0x3ce   :  { %v14155_v21 = vor.u32 %v16335_v1, %v14152_v53  ;;  %v14555_v63 = vor.u32 %v16435_v33, %v14552_v54  ;;  %v16583_v32 = vld [vmem:[%s24386_s1 + $0x2374] sm:$0xf]  ;;  %v14728_v1 = vld [vmem:[%s24386_s1 + $0x2040] sm:$0xf0]  ;;  %v14411_v53 = vor.u32 %v16399_v13, %v14408_v59 }
 0x3cf   :  { %8909 = vmatpush.bf16.msra.mxu1 %v14507_v29  ;;  %v14363_v29 = vor.u32 %v16387_v34, %v14360_v25  ;;  %8852 = vmatmul.bf16.vlgmr.msra.gmra.mxu0 %v17210_v47  ;;  %v16375_v2 = vld [vmem:[%s24386_s1 + $0x1cf4] sm:$0xf]  ;;  %v14312_v34 = vld [vmem:[%s24386_s1 + $0x1d00] sm:$0xf0] }
 0x3d0   :  { %8896 = vmatpush.bf16.msrb.mxu0 %v14379_v49  ;;  %v14520_v49 = vld [vmem:[%s24386_s1 + $0x1ea0] sm:$0xf0]  ;;  %v16479_v7 = vld [vmem:[%s24386_s1 + $0x2034] sm:$0xf]  ;;  %v14315_v33 = vor.u32 %v16375_v2, %v14312_v34 }
 0x3d1   :  { %8924 = vmatpush.bf16.msrb.mxu3 %v14603_v56  ;;  %8887 = vmatpush.bf16.msra.mxu2 %v14187_v16  ;;  %v22955_v56 = vmax.f32 %v4673_v35, %v6839_v5  ;;  %v14347_v35 = vor.u32 %v16383_v60, %v14344_v43  ;;  %v14536_v16 = vld [vmem:[%s24386_s1 + $0x1ec0] sm:$0xf0]  ;;  %v22990_v10 = vpop.f32.mrf.mxu3  ;;  %v16395_v5 = vld [vmem:[%s24386_s1 + $0x1d94] sm:$0xf]  ;;  %v14731_v60 = vor.u32 %v16479_v7, %v14728_v1 }
 0x3d2   :  { %v16579_v54 = vld [vmem:[%s24386_s1 + $0x2354] sm:$0xf]  ;;  %v14296_v43 = vld [vmem:[%s24386_s1 + $0x1ce0] sm:$0xf0] }
 0x3d3   :  { %8910 = vmatpush.bf16.msra.mxu1 %v14491_v23  ;;  %v16431_v23 = vld [vmem:[%s24386_s1 + $0x1eb4] sm:$0xf]  ;;  %v15016_v57 = vld [vmem:[%s24386_s1 + $0x2280] sm:$0xf0]  ;;  %v15131_v17 = vor.u32 %v16579_v54, %v15128_v11 }
 0x3d4   :  { %8897 = vmatpush.bf16.msrb.mxu0 %v14363_v29  ;;  %v14539_v50 = vor.u32 %v16431_v23, %v14536_v16  ;;  %v6851_v29 = vpop.f32.mrf.mxu0  ;;  %v16475_v58 = vld [vmem:[%s24386_s1 + $0x2014] sm:$0xf]  ;;  %v15112_v16 = vld [vmem:[%s24386_s1 + $0x2340] sm:$0xf0] }
 0x3d5   :  { %8925 = vmatpush.bf16.msrb.mxu3 %v14587_v0  ;;  %8888 = vmatpush.bf16.msra.mxu2 %v14171_v18  ;;  %v14427_v0 = vor.u32 %v16403_v55, %v14424_v39  ;;  %v14747_v18 = vor.u32 %v16483_v46, %v14744_v52  ;;  %v16575_v23 = vld [vmem:[%s24386_s1 + $0x2334] sm:$0xf]  ;;  %v14280_v39 = vld [vmem:[%s24386_s1 + $0x1cc0] sm:$0xf0] }
 0x3d6   :  { %15300 = vmatmul.msk.bf16.vlgmr.msrb.gmra.mxu1 %vm1837_vm1, %v17318_v40  ;;  %v16367_v55 = vld [vmem:[%s24386_s1 + $0x1cb4] sm:$0xf]  ;;  %v15000_v61 = vld [vmem:[%s24386_s1 + $0x2260] sm:$0xf0] }
 0x3d7   :  { %8911 = vmatpush.bf16.msra.mxu1 %v14475_v22  ;;  %v16427_v22 = vld [vmem:[%s24386_s1 + $0x1e94] sm:$0xf]  ;;  %v14264_v13 = vld [vmem:[%s24386_s1 + $0x1ca0] sm:$0xf0] }
 0x3d8   :  { %8898 = vmatpush.bf16.msrb.mxu0 %v14347_v35  ;;  %v14523_v25 = vor.u32 %v16427_v22, %v14520_v49  ;;  %v15019_v35 = vor.u32 %v16551_v48, %v15016_v57  ;;  %v16547_v31 = vld [vmem:[%s24386_s1 + $0x2254] sm:$0xf]  ;;  %v15096_v22 = vld [vmem:[%s24386_s1 + $0x2320] sm:$0xf0] }
 0x3d9   :  { %8926 = vmatpush.bf16.msrb.mxu3 %v14571_v20  ;;  %8889 = vmatpush.bf16.msra.mxu2 %v14155_v21  ;;  %v15147_v20 = vor.u32 %v16583_v32, %v15144_v24  ;;  %v16371_v21 = vld [vmem:[%s24386_s1 + $0x1cd4] sm:$0xf]  ;;  %v6879_v44 = vpop.f32.mrf.mxu3  ;;  %v14984_v24 = vld [vmem:[%s24386_s1 + $0x2240] sm:$0xf0] }
 0x3da   :  { %v16471_v3 = vld [vmem:[%s24386_s1 + $0x1ff4] sm:$0xf]  ;;  %v14888_v34 = vld [vmem:[%s24386_s1 + $0x2180] sm:$0xf0] }
 0x3db   :  { %8912 = vmatpush.bf16.msra.mxu1 %v14459_v6  ;;  %v14392_v6 = vld [vmem:[%s24386_s1 + $0x1da0] sm:$0xf0]  ;;  %v16571_v46 = vld [vmem:[%s24386_s1 + $0x2314] sm:$0xf]  ;;  %v6864_v2 = vpop.f32.mrf.mxu2 }
 0x3dc   :  { %8899 = vmatpush.bf16.msrb.mxu0 %v14331_v37  ;;  %v14395_v41 = vor.u32 %v16395_v5, %v14392_v6  ;;  %v6853_v52 = vpop.f32.mrf.mxu0  ;;  %v15003_v37 = vor.u32 %v16547_v31, %v15000_v61  ;;  %v16363_v49 = vld [vmem:[%s24386_s1 + $0x1c94] sm:$0xf]  ;;  %v14680_v7 = vld [vmem:[%s24386_s1 + $0x1fe0] sm:$0xf0]  ;;  %v6865_v1 = vadd.f32 %v6864_v2, %v6851_v29 }
 0x3dd   :  { %8927 = vmatpush.bf16.msrb.mxu3 %v14555_v63  ;;  %8890 = vmatpush.bf16.msra.mxu2 %v14139_v26  ;;  %v14712_v63 = vld [vmem:[%s24386_s1 + $0x2020] sm:$0xf0]  ;;  %v16543_v32 = vld [vmem:[%s24386_s1 + $0x2234] sm:$0xf] }
 0x3de   :  { %v14715_v26 = vor.u32 %v16475_v58, %v14712_v63  ;;  %v14987_v5 = vor.u32 %v16543_v32, %v14984_v24  ;;  %v16567_v6 = vld [vmem:[%s24386_s1 + $0x22f4] sm:$0xf]  ;;  %v6878_v54 = vadd.f32 %v22990_v10, %v6865_v1  ;;  %v14968_v44 = vld [vmem:[%s24386_s1 + $0x2220] sm:$0xf0] }
 0x3df   :  { %8913 = vmatpush.bf16.msra.mxu1 %v14443_v27  ;;  %v14299_v27 = vor.u32 %v16371_v21, %v14296_v43  ;;  %v16539_v21 = vld [vmem:[%s24386_s1 + $0x2214] sm:$0xf]  ;;  %v14872_v10 = vld [vmem:[%s24386_s1 + $0x2160] sm:$0xf0] }
 0x3e0   :  { %8891 = vmatmul.bf16.vlgmr.msra.gmra.mxu2 %v17026_v15  ;;  %8900 = vmatpush.bf16.msrb.mxu0 %v14315_v33  ;;  %v15080_v33 = vld [vmem:[%s24386_s1 + $0x2300] sm:$0xf0]  ;;  %v16463_v48 = vld [vmem:[%s24386_s1 + $0x1fb4] sm:$0xf] }
 0x3e1   :  { %8935 = vmatpush.bf16.msrb.mxu2 %v14763_v62  ;;  %8928 = vmatpush.bf16.msrb.mxu3 %v14539_v50  ;;  %v14696_v62 = vld [vmem:[%s24386_s1 + $0x2000] sm:$0xf0]  ;;  %v15115_v50 = vor.u32 %v16575_v23, %v15112_v16  ;;  %v15083_v63 = vor.u32 %v16567_v6, %v15080_v33  ;;  %v16535_v16 = vld [vmem:[%s24386_s1 + $0x21f4] sm:$0xf] }
 0x3e2   :  { %v14699_v59 = vor.u32 %v16471_v3, %v14696_v62  ;;  %v14664_v57 = vld [vmem:[%s24386_s1 + $0x1fc0] sm:$0xf0]  ;;  %v16459_v61 = vld [vmem:[%s24386_s1 + $0x1f94] sm:$0xf] }
 0x3e3   :  { %8914 = vmatpush.bf16.msra.mxu1 %v14427_v0  ;;  %v14283_v0 = vor.u32 %v16367_v55, %v14280_v39  ;;  %v6890_v43 = vpop.f32.mrf.mxu1  ;;  %v14667_v23 = vor.u32 %v16463_v48, %v14664_v57  ;;  %v14952_v55 = vld [vmem:[%s24386_s1 + $0x2200] sm:$0xf0]  ;;  %v6866_v39 = vpop.f32.mrf.mxu2  ;;  %v16507_v2 = vld [vmem:[%s24386_s1 + $0x2114] sm:$0xf] }
 0x3e4   :  { %8901 = vmatpush.bf16.msrb.mxu0 %v14299_v27  ;;  %v23140_v58 = vadd.f32 %v6890_v43, %v6878_v54  ;;  %v15064_v27 = vld [vmem:[%s24386_s1 + $0x22e0] sm:$0xf0]  ;;  %v16527_v6 = vld [vmem:[%s24386_s1 + $0x21b4] sm:$0xf] }
 0x3e5   :  { %8936 = vmatpush.bf16.msrb.mxu2 %v14747_v18  ;;  %8929 = vmatpush.bf16.msrb.mxu3 %v14523_v25  ;;  %v16519_v18 = vld [vmem:[%s24386_s1 + $0x2174] sm:$0xf]  ;;  %v14856_v31 = vld [vmem:[%s24386_s1 + $0x2140] sm:$0xf0] }
 0x3e6   :  { %v16467_v25 = vld [vmem:[%s24386_s1 + $0x1fd4] sm:$0xf]  ;;  %v14891_v29 = vor.u32 %v16519_v18, %v14888_v34  ;;  %v14648_v3 = vld [vmem:[%s24386_s1 + $0x1fa0] sm:$0xf0] }
 0x3e7   :  { %8915 = vmatpush.bf16.msra.mxu1 %v14411_v53  ;;  %v15099_v53 = vor.u32 %v16571_v46, %v15096_v22  ;;  %v14683_v11 = vor.u32 %v16467_v25, %v14680_v7  ;;  %v15272_v46 = vld [vmem:[%s24386_s1 + $0x2480] sm:$0xf0]  ;;  %v16611_v7 = vld [vmem:[%s24386_s1 + $0x2454] sm:$0xf] }
 0x3e8   :  { %8930 = vmatmul.bf16.vlgmr.msrb.gmra.mxu3 %v17013_v9  ;;  %8902 = vmatpush.bf16.msrb.mxu0 %v14283_v0  ;;  %v14955_v0 = vor.u32 %v16535_v16, %v14952_v55  ;;  %v15048_v22 = vld [vmem:[%s24386_s1 + $0x22c0] sm:$0xf0]  ;;  %v14366_v55 = vld [vmem:[%s24386_s1 + $0x1d58] sm:$0xf]  ;;  %v16499_v39 = vld [vmem:[%s24386_s1 + $0x20d4] sm:$0xf] }
 0x3e9   :  { %8974 = vmatpush.bf16.msra.mxu3 %v15147_v20  ;;  %8937 = vmatpush.bf16.msrb.mxu2 %v14731_v60  ;;  %v14267_v20 = vor.u32 %v16363_v49, %v14264_v13  ;;  %v16515_v60 = vld [vmem:[%s24386_s1 + $0x2154] sm:$0xf]  ;;  %v14651_v13 = vor.u32 %v16459_v61, %v14648_v3  ;;  %v14936_v32 = vld [vmem:[%s24386_s1 + $0x21e0] sm:$0xf0]  ;;  %v16362_v3 = vld [vmem:[%s24386_s1 + $0x1c84] sm:$0xf0] }
 0x3ea   :  { %v14840_v34 = vld [vmem:[%s24386_s1 + $0x2120] sm:$0xf0] }
 0x3eb   :  { %8916 = vmatpush.bf16.msra.mxu1 %v14395_v41  ;;  %v14971_v41 = vor.u32 %v16539_v21, %v14968_v44  ;;  %v23173_v52 = vpop.f32.mrf.mxu3  ;;  %v6892_v24 = vpop.f32.mrf.mxu1  ;;  %v15256_v1 = vld [vmem:[%s24386_s1 + $0x2460] sm:$0xf0]  ;;  %v14843_v33 = vor.u32 %v16507_v2, %v14840_v34  ;;  %v16503_v44 = vld [vmem:[%s24386_s1 + $0x20f4] sm:$0xf]  ;;  %v14238_v2 = vld [vmem:[%s24386_s1 + $0x1c58] sm:$0xf] }
 0x3ec   :  { %8903 = vmatpush.bf16.msrb.mxu0 %v14267_v20  ;;  %v16555_v20 = vld [vmem:[%s24386_s1 + $0x2294] sm:$0xf]  ;;  %v14920_v54 = vld [vmem:[%s24386_s1 + $0x21c0] sm:$0xf0]  ;;  %v15259_v21 = vor.u32 %v16611_v7, %v15256_v1  ;;  %v16358_v34 = vld [vmem:[%s24386_s1 + $0x1c64] sm:$0xf0] }
 0x3ed   :  { %8975 = vmatpush.bf16.msra.mxu3 %v15131_v17  ;;  %8938 = vmatpush.bf16.msrb.mxu2 %v14715_v26  ;;  %v16563_v17 = vld [vmem:[%s24386_s1 + $0x22d4] sm:$0xf]  ;;  %v15240_v48 = vld [vmem:[%s24386_s1 + $0x2440] sm:$0xf0] }
 0x3ee   :  { %8917 = vmatmul.bf16.vlgmr.msra.gmra.mxu1 %v17011_v8  ;;  %v16511_v26 = vld [vmem:[%s24386_s1 + $0x2134] sm:$0xf]  ;;  %v15067_v62 = vor.u32 %v16563_v17, %v15064_v27  ;;  %v14808_v61 = vld [vmem:[%s24386_s1 + $0x20e0] sm:$0xf0] }
 0x3ef   :  { %8961 = vmatpush.bf16.msrb.mxu1 %v15019_v35  ;;  %v14875_v35 = vor.u32 %v16515_v60, %v14872_v10  ;;  %8904 = vmatmul.bf16.vlgmr.msrb.gmra.mxu0 %v17024_v14  ;;  %v14859_v49 = vor.u32 %v16511_v26, %v14856_v31  ;;  %v14824_v60 = vld [vmem:[%s24386_s1 + $0x2100] sm:$0xf0]  ;;  %v16607_v10 = vld [vmem:[%s24386_s1 + $0x2434] sm:$0xf]  ;;  %v16390_v26 = vld [vmem:[%s24386_s1 + $0x1d64] sm:$0xf0] }
 0x3f0   :  { %8948 = vmatpush.bf16.msra.mxu0 %v14891_v29  ;;  %v14382_v29 = vld [vmem:[%s24386_s1 + $0x1d78] sm:$0xf]  ;;  %v16523_v27 = vld [vmem:[%s24386_s1 + $0x2194] sm:$0xf]  ;;  %v14827_v16 = vor.u32 %v16503_v44, %v14824_v60  ;;  %v15243_v31 = vor.u32 %v16607_v10, %v15240_v48  ;;  %v16354_v60 = vld [vmem:[%s24386_s1 + $0x1c44] sm:$0xf0] }
 0x3f1   :  { %8976 = vmatpush.bf16.msra.mxu3 %v15115_v50  ;;  %8939 = vmatpush.bf16.msrb.mxu2 %v14699_v59  ;;  %v16615_v50 = vld [vmem:[%s24386_s1 + $0x2474] sm:$0xf]  ;;  %v14222_v44 = vld [vmem:[%s24386_s1 + $0x1c38] sm:$0xf]  ;;  %v15192_v48 = vld [vmem:[%s24386_s1 + $0x23e0] sm:$0xf0] }
 0x3f2   :  { %v16531_v59 = vld [vmem:[%s24386_s1 + $0x21d4] sm:$0xf]  ;;  %v15275_v18 = vor.u32 %v16615_v50, %v15272_v46  ;;  %v15224_v50 = vld [vmem:[%s24386_s1 + $0x2420] sm:$0xf0] }
 0x3f3   :  { %8962 = vmatpush.bf16.msrb.mxu1 %v15003_v37  ;;  %v16559_v37 = vld [vmem:[%s24386_s1 + $0x22b4] sm:$0xf]  ;;  %v6931_v57 = vpop.f32.mrf.mxu3 }
 0x3f4   :  { %8949 = vmatpush.bf16.msra.mxu0 %v14875_v35  ;;  %v15051_v25 = vor.u32 %v16559_v37, %v15048_v22  ;;  %v14904_v35 = vld [vmem:[%s24386_s1 + $0x21a0] sm:$0xf0]  ;;  %v14811_v37 = vor.u32 %v16499_v39, %v14808_v61  ;;  %v16595_v10 = vld [vmem:[%s24386_s1 + $0x23d4] sm:$0xf] }
 0x3f5   :  { %8977 = vmatpush.bf16.msra.mxu3 %v15099_v53  ;;  %8940 = vmatpush.bf16.msrb.mxu2 %v14683_v11  ;;  %v14939_v53 = vor.u32 %v16531_v59, %v14936_v32  ;;  %v16394_v11 = vld [vmem:[%s24386_s1 + $0x1d84] sm:$0xf0]  ;;  %v14907_v46 = vor.u32 %v16523_v27, %v14904_v35  ;;  %v16495_v59 = vld [vmem:[%s24386_s1 + $0x20b4] sm:$0xf]  ;;  %v8150_v32 = vunpack.c.h.b16 %v22745_v12  ;;  %v14318_v35 = vld [vmem:[%s24386_s1 + $0x1cf8] sm:$0xf] }
 0x3f6   :  { %v14383_v17 = vor.u32 %v16394_v11, %v14382_v29  ;;  %v16599_v12 = vld [vmem:[%s24386_s1 + $0x23f4] sm:$0xf]  ;;  %v15288_v61 = vld [vmem:[%s24386_s1 + $0x24a0] sm:$0xf0] }
 0x3f7   :  { %8963 = vmatpush.bf16.msrb.mxu1 %v14987_v5  ;;  %v15032_v5 = vld [vmem:[%s24386_s1 + $0x22a0] sm:$0xf0]  ;;  %v16619_v39 = vld [vmem:[%s24386_s1 + $0x2494] sm:$0xf] }
 0x3f8   :  { %8950 = vmatpush.bf16.msra.mxu0 %v14859_v49  ;;  %v15035_v43 = vor.u32 %v16555_v20, %v15032_v5  ;;  %v14350_v49 = vld [vmem:[%s24386_s1 + $0x1d38] sm:$0xf]  ;;  %v14239_v20 = vor.u32 %v16358_v34, %v14238_v2  ;;  %v16587_v2 = vld [vmem:[%s24386_s1 + $0x2394] sm:$0xf]  ;;  %v15160_v34 = vld [vmem:[%s24386_s1 + $0x23a0] sm:$0xf0] }
 0x3f9   :  { %8978 = vmatpush.bf16.msra.mxu3 %v15083_v63  ;;  %8941 = vmatpush.bf16.msrb.mxu2 %v14667_v23  ;;  %v6903_v63 = vpop.f32.mrf.mxu0  ;;  %v14334_v5 = vld [vmem:[%s24386_s1 + $0x1d18] sm:$0xf] }
 0x3fa   :  { %v6904_v23 = vadd.f32 %v6903_v63, %v23140_v58  ;;  %v14254_v58 = vld [vmem:[%s24386_s1 + $0x1c78] sm:$0xf] }
 0x3fb   :  { %8964 = vmatpush.bf16.msrb.mxu1 %v14971_v41  ;;  %v14923_v41 = vor.u32 %v16527_v6, %v14920_v54  ;;  %v14255_v22 = vor.u32 %v16362_v3, %v14254_v58  ;;  %v16382_v6 = vld [vmem:[%s24386_s1 + $0x1d24] sm:$0xf0]  ;;  %v8446_v54 = vpack.c.b16 %v8150_v32, %v8150_v32  ;;  %v6916_v29 = vpop.f32.mrf.mxu2  ;;  %v16591_v58 = vld [vmem:[%s24386_s1 + $0x23b4] sm:$0xf]  ;;  %v15176_v3 = vld [vmem:[%s24386_s1 + $0x23c0] sm:$0xf0] }
 0x3fc   :  { %8951 = vmatpush.bf16.msra.mxu0 %v14843_v33  ;;  %v16491_v33 = vld [vmem:[%s24386_s1 + $0x2094] sm:$0xf]  ;;  %v14335_v57 = vor.u32 %v16382_v6, %v14334_v5  ;;  %v14190_v32 = vld [vmem:[%s24386_s1 + $0x1bf8] sm:$0xf]  ;;  %v16370_v6 = vld [vmem:[%s24386_s1 + $0x1cc4] sm:$0xf0] }
 0x3fd   :  { %8979 = vmatpush.bf16.msra.mxu3 %v15067_v62  ;;  %8942 = vmatpush.bf16.msrb.mxu2 %v14651_v13  ;;  %v16603_v62 = vld [vmem:[%s24386_s1 + $0x2414] sm:$0xf]  ;;  %v16386_v13 = vld [vmem:[%s24386_s1 + $0x1d44] sm:$0xf0]  ;;  %v8745_v27 = vsel %vm1841_vm0, %v8446_v54, 0 }
 0x3fe   :  { %v15227_v24 = vor.u32 %v16603_v62, %v15224_v50  ;;  %v14351_v7 = vor.u32 %v16386_v13, %v14350_v49  ;;  %v14510_v50 = vld [vmem:[%s24386_s1 + $0x1e78] sm:$0xf]  ;;  %v15291_v13 = vor.u32 %v16619_v39, %v15288_v61 }
 0x3ff   :  { %8965 = vmatpush.bf16.msrb.mxu1 %v14955_v0  ;;  %v14367_v0 = vor.u32 %v16390_v26, %v14366_v55  ;;  %v15195_v55 = vor.u32 %v16595_v10, %v15192_v48  ;;  %v16350_v26 = vld [vmem:[%s24386_s1 + $0x1c24] sm:$0xf0]  ;;  %v14286_v5 = vld [vmem:[%s24386_s1 + $0x1cb8] sm:$0xf] }
 0x400   :  { %8943 = vmatmul.bf16.vlgmr.msrb.gmra.mxu2 %v17208_v45  ;;  %8952 = vmatpush.bf16.msra.mxu0 %v14827_v16  ;;  %v14174_v54 = vld [vmem:[%s24386_s1 + $0x1bd8] sm:$0xf]  ;;  %v16418_v10 = vld [vmem:[%s24386_s1 + $0x1e44] sm:$0xf0] }
 0x401   :  { %8987 = vmatpush.bf16.msra.mxu2 %v15275_v18  ;;  %8980 = vmatpush.bf16.msra.mxu3 %v15051_v25  ;;  %v14792_v18 = vld [vmem:[%s24386_s1 + $0x20c0] sm:$0xf0]  ;;  %v6905_v1 = vpop.f32.mrf.mxu0  ;;  %v14622_v48 = vld [vmem:[%s24386_s1 + $0x1f58] sm:$0xf] }
 0x402   :  { %v15208_v25 = vld [vmem:[%s24386_s1 + $0x2400] sm:$0xf0]  ;;  %v14638_v1 = vld [vmem:[%s24386_s1 + $0x1f78] sm:$0xf] }
 0x403   :  { %8966 = vmatpush.bf16.msrb.mxu1 %v14939_v53  ;;  %v14795_v53 = vor.u32 %v16495_v59, %v14792_v18  ;;  %v15211_v11 = vor.u32 %v16599_v12, %v15208_v25  ;;  %v6942_v16 = vpop.f32.mrf.mxu1  ;;  %v6918_v49 = vpop.f32.mrf.mxu2  ;;  %v15179_v59 = vor.u32 %v16591_v58, %v15176_v3  ;;  %v14494_v12 = vld [vmem:[%s24386_s1 + $0x1e58] sm:$0xf] }
 0x404   :  { %8953 = vmatpush.bf16.msra.mxu0 %v14811_v37  ;;  %v14302_v37 = vld [vmem:[%s24386_s1 + $0x1cd8] sm:$0xf] }
 0x405   :  { %8988 = vmatpush.bf16.msra.mxu2 %v15259_v21  ;;  %8981 = vmatpush.bf16.msra.mxu3 %v15035_v43  ;;  %v14776_v21 = vld [vmem:[%s24386_s1 + $0x20a0] sm:$0xf0]  ;;  %v6917_v43 = vadd.f32 %v6916_v29, %v6904_v23  ;;  %v16378_v23 = vld [vmem:[%s24386_s1 + $0x1d04] sm:$0xf0]  ;;  %v14462_v61 = vld [vmem:[%s24386_s1 + $0x1e18] sm:$0xf] }
 0x406   :  { %v14319_v62 = vor.u32 %v16378_v23, %v14318_v35  ;;  %v16342_v29 = vld [vmem:[%s24386_s1 + $0x1be4] sm:$0xf0]  ;;  %v14158_v35 = vld [vmem:[%s24386_s1 + $0x1bb8] sm:$0xf] }
 0x407   :  { %8967 = vmatpush.bf16.msrb.mxu1 %v14923_v41  ;;  %v6930_v63 = vadd.f32 %v23173_v52, %v6917_v43  ;;  %v14779_v41 = vor.u32 %v16491_v33, %v14776_v21  ;;  %v14206_v52 = vld [vmem:[%s24386_s1 + $0x1c18] sm:$0xf]  ;;  %v15163_v33 = vor.u32 %v16587_v2, %v15160_v34  ;;  %v14287_v43 = vor.u32 %v16370_v6, %v14286_v5  ;;  %v16338_v23 = vld [vmem:[%s24386_s1 + $0x1bc4] sm:$0xf0] }
 0x408   :  { %8982 = vmatmul.bf16.vlgmr.msra.gmra.mxu3 %v17210_v47  ;;  %8954 = vmatpush.bf16.msra.mxu0 %v14795_v53  ;;  %v16458_v53 = vld [vmem:[%s24386_s1 + $0x1f84] sm:$0xf0]  ;;  %v14142_v49 = vld [vmem:[%s24386_s1 + $0x1b98] sm:$0xf] }
 0x409   :  { %9026 = vmatpush.bf16.msrb.mxu3 %v14383_v17  ;;  %8989 = vmatpush.bf16.msra.mxu2 %v15243_v31  ;;  %v14223_v17 = vor.u32 %v16354_v60, %v14222_v44  ;;  %v23329_v31 = vadd.f32 %v6942_v16, %v6930_v63  ;;  %v14639_v44 = vor.u32 %v16458_v53, %v14638_v1  ;;  %v14478_v60 = vld [vmem:[%s24386_s1 + $0x1e38] sm:$0xf]  ;;  %v16490_v34 = vld [vmem:[%s24386_s1 + $0x2084] sm:$0xf0] }
 0x40a   :  { %v14894_v16 = vld [vmem:[%s24386_s1 + $0x2178] sm:$0xf]  ;;  %v16446_v1 = vld [vmem:[%s24386_s1 + $0x1f24] sm:$0xf0] }
 0x40b   :  { %8968 = vmatpush.bf16.msrb.mxu1 %v14907_v46  ;;  %v16426_v46 = vld [vmem:[%s24386_s1 + $0x1e84] sm:$0xf0]  ;;  %v23401_v63 = vpop.f32.mrf.mxu3  ;;  %v14766_v2 = vld [vmem:[%s24386_s1 + $0x2078] sm:$0xf] }
 0x40c   :  { %8955 = vmatpush.bf16.msra.mxu0 %v14779_v41  ;;  %v14511_v18 = vor.u32 %v16426_v46, %v14510_v50  ;;  %v14175_v41 = vor.u32 %v16342_v29, %v14174_v54  ;;  %v6955_v58 = vpop.f32.mrf.mxu0  ;;  %v14606_v50 = vld [vmem:[%s24386_s1 + $0x1f38] sm:$0xf]  ;;  %v16450_v46 = vld [vmem:[%s24386_s1 + $0x1f44] sm:$0xf0] }
 0x40d   :  { %9027 = vmatpush.bf16.msrb.mxu3 %v14367_v0  ;;  %8990 = vmatpush.bf16.msra.mxu2 %v15227_v24  ;;  %v14207_v0 = vor.u32 %v16350_v26, %v14206_v52  ;;  %v16346_v24 = vld [vmem:[%s24386_s1 + $0x1c04] sm:$0xf0]  ;;  %v6968_v52 = vpop.f32.mrf.mxu2  ;;  %v14479_v26 = vor.u32 %v16418_v10, %v14478_v60  ;;  %v14862_v54 = vld [vmem:[%s24386_s1 + $0x2138] sm:$0xf] }
 0x40e   :  { %8969 = vmatmul.bf16.vlgmr.msrb.gmra.mxu1 %v17189_v38  ;;  %v16514_v29 = vld [vmem:[%s24386_s1 + $0x2144] sm:$0xf0] }
 0x40f   :  { %9013 = vmatpush.bf16.msra.mxu1 %v14255_v22  ;;  %v16374_v22 = vld [vmem:[%s24386_s1 + $0x1ce4] sm:$0xf0]  ;;  %8956 = vmatmul.bf16.vlgmr.msra.gmra.mxu0 %v17200_v42 }
 0x410   :  { %9006 = vmatpush.bf16.msrb.mxu0 %v8745_v27  ;;  %v14303_v25 = vor.u32 %v16374_v22, %v14302_v37  ;;  %v16366_v27 = vld [vmem:[%s24386_s1 + $0x1ca4] sm:$0xf0]  ;;  %v14159_v37 = vor.u32 %v16338_v23, %v14158_v35 }
 0x411   :  { %9028 = vmatpush.bf16.msrb.mxu3 %v14351_v7  ;;  %8991 = vmatpush.bf16.msra.mxu2 %v15211_v11  ;;  %v16422_v7 = vld [vmem:[%s24386_s1 + $0x1e64] sm:$0xf0]  ;;  %v6944_v11 = vpop.f32.mrf.mxu1 }
 0x412   :  { %v14495_v21 = vor.u32 %v16422_v7, %v14494_v12  ;;  %v14446_v12 = vld [vmem:[%s24386_s1 + $0x1df8] sm:$0xf]  ;;  %v16406_v60 = vld [vmem:[%s24386_s1 + $0x1de4] sm:$0xf0] }
 0x413   :  { %9014 = vmatpush.bf16.msra.mxu1 %v14239_v20  ;;  %v14191_v20 = vor.u32 %v16346_v24, %v14190_v32  ;;  %v14590_v7 = vld [vmem:[%s24386_s1 + $0x1f18] sm:$0xf]  ;;  %v8764_v53 = vpop.f32.mrf.mxu3  ;;  %v16442_v10 = vld [vmem:[%s24386_s1 + $0x1f04] sm:$0xf0] }
 0x414   :  { %9007 = vmatpush.bf16.msrb.mxu0 %v15291_v13  ;;  %v16334_v13 = vld [vmem:[%s24386_s1 + $0x1ba4] sm:$0xf0] }
 0x415   :  { %9029 = vmatpush.bf16.msrb.mxu3 %v14335_v57  ;;  %8992 = vmatpush.bf16.msra.mxu2 %v15195_v55  ;;  %v16454_v57 = vld [vmem:[%s24386_s1 + $0x1f64] sm:$0xf0]  ;;  %v14143_v5 = vor.u32 %v16334_v13, %v14142_v49  ;;  %v14398_v49 = vld [vmem:[%s24386_s1 + $0x1d98] sm:$0xf] }
 0x416   :  { %v16522_v55 = vld [vmem:[%s24386_s1 + $0x2184] sm:$0xf0]  ;;  %v14623_v39 = vor.u32 %v16454_v57, %v14622_v48  ;;  %v6957_v48 = vpop.f32.mrf.mxu0  ;;  %v14863_v57 = vor.u32 %v16514_v29, %v14862_v54 }
 0x417   :  { %9015 = vmatpush.bf16.msra.mxu1 %v14223_v17  ;;  %v14270_v17 = vld [vmem:[%s24386_s1 + $0x1c98] sm:$0xf]  ;;  %v14895_v22 = vor.u32 %v16522_v55, %v14894_v16  ;;  %v16482_v55 = vld [vmem:[%s24386_s1 + $0x2044] sm:$0xf0] }
 0x418   :  { %9039 = vmatpush.bf16.msra.mxu0 %v14511_v18  ;;  %v14271_v3 = vor.u32 %v16366_v27, %v14270_v17  ;;  %v14607_v18 = vor.u32 %v16450_v46, %v14606_v50  ;;  %v14846_v17 = vld [vmem:[%s24386_s1 + $0x2118] sm:$0xf]  ;;  %v16510_v27 = vld [vmem:[%s24386_s1 + $0x2124] sm:$0xf0] }
 0x419   :  { %9030 = vmatpush.bf16.msrb.mxu3 %v14319_v62  ;;  %8993 = vmatpush.bf16.msra.mxu2 %v15179_v59  ;;  %v16414_v62 = vld [vmem:[%s24386_s1 + $0x1e24] sm:$0xf0]  ;;  %v14878_v59 = vld [vmem:[%s24386_s1 + $0x2158] sm:$0xf] }
 0x41a   :  { %v14463_v24 = vor.u32 %v16414_v62, %v14462_v61  ;;  %v14734_v16 = vld [vmem:[%s24386_s1 + $0x2038] sm:$0xf]  ;;  %v16438_v61 = vld [vmem:[%s24386_s1 + $0x1ee4] sm:$0xf0] }
 0x41b   :  { %9016 = vmatpush.bf16.msra.mxu1 %v14207_v0  ;;  %v6956_v0 = vadd.f32 %v6955_v58, %v23329_v31  ;;  %v16518_v31 = vld [vmem:[%s24386_s1 + $0x2164] sm:$0xf0]  ;;  %v14847_v58 = vor.u32 %v16510_v27, %v14846_v17  ;;  %v14830_v62 = vld [vmem:[%s24386_s1 + $0x20f8] sm:$0xf] }
 0x41c   :  { %9040 = vmatpush.bf16.msra.mxu0 %v14495_v21  ;;  %v14879_v6 = vor.u32 %v16518_v31, %v14878_v59  ;;  %v14591_v21 = vor.u32 %v16446_v1, %v14590_v7  ;;  %v16506_v50 = vld [vmem:[%s24386_s1 + $0x2104] sm:$0xf0]  ;;  %v14798_v48 = vld [vmem:[%s24386_s1 + $0x20b8] sm:$0xf] }
 0x41d   :  { %9031 = vmatpush.bf16.msrb.mxu3 %v14303_v25  ;;  %8994 = vmatpush.bf16.msra.mxu2 %v15163_v33  ;;  %v6969_v32 = vadd.f32 %v6968_v52, %v6956_v0  ;;  %v16410_v25 = vld [vmem:[%s24386_s1 + $0x1e04] sm:$0xf0]  ;;  %v14767_v33 = vor.u32 %v16490_v34, %v14766_v2  ;;  %v14414_v52 = vld [vmem:[%s24386_s1 + $0x1db8] sm:$0xf]  ;;  %v14831_v2 = vor.u32 %v16506_v50, %v14830_v62 }
 0x41e   :  { %v14447_v11 = vor.u32 %v16410_v25, %v14446_v12  ;;  %v16398_v31 = vld [vmem:[%s24386_s1 + $0x1da4] sm:$0xf0]  ;;  %v15022_v34 = vld [vmem:[%s24386_s1 + $0x2278] sm:$0xf] }
 0x41f   :  { %9017 = vmatpush.bf16.msra.mxu1 %v14191_v20  ;;  %v23468_v20 = vmax.f32 %v4674_v51, %v6969_v32  ;;  %v14430_v51 = vld [vmem:[%s24386_s1 + $0x1dd8] sm:$0xf]  ;;  %15301 = vmatmul.msk.bf16.vlgmr.msrb.gmra.mxu0 %vm1837_vm1, %v17318_v40  ;;  %v16554_v12 = vld [vmem:[%s24386_s1 + $0x2284] sm:$0xf0] }
 0x420   :  { %8995 = vmatmul.bf16.vlgmr.msra.gmra.mxu2 %v17404_v28  ;;  %9041 = vmatpush.bf16.msra.mxu0 %v14479_v26  ;;  %v14431_v35 = vor.u32 %v16406_v60, %v14430_v51  ;;  %v16402_v26 = vld [vmem:[%s24386_s1 + $0x1dc4] sm:$0xf0]  ;;  %v14542_v32 = vld [vmem:[%s24386_s1 + $0x1eb8] sm:$0xf]  ;;  %v15023_v29 = vor.u32 %v16554_v12, %v15022_v34 }
 0x421   :  { %9052 = vmatpush.bf16.msrb.mxu2 %v14639_v44  ;;  %9032 = vmatpush.bf16.msrb.mxu3 %v14287_v43  ;;  %v6970_v44 = vpop.f32.mrf.mxu2  ;;  %v14574_v43 = vld [vmem:[%s24386_s1 + $0x1ef8] sm:$0xf]  ;;  %v14415_v46 = vor.u32 %v16402_v26, %v14414_v52  ;;  %v16502_v1 = vld [vmem:[%s24386_s1 + $0x20e4] sm:$0xf0] }
 0x422   :  { %v14575_v23 = vor.u32 %v16442_v10, %v14574_v43  ;;  %v23556_v25 = vld [vmem:[%s24386_s1 + $0x24b8] sm:$0xff]  ;;  %v16474_v54 = vld [vmem:[%s24386_s1 + $0x2004] sm:$0xf0] }
 0x423   :  { %9018 = vmatpush.bf16.msra.mxu1 %v14175_v41  ;;  %v14751_v41 = vor.u32 %v16486_v36, %v14750_v4  ;;  %v8775_v13 = vpop.f32.mrf.mxu1  ;;  %v15006_v4 = vld [vmem:[%s24386_s1 + $0x2258] sm:$0xf]  ;;  %v8151_v36 = vunpack.c.l.b16 %v23556_v25  ;;  %v16550_v44 = vld [vmem:[%s24386_s1 + $0x2264] sm:$0xf0] }
 0x424   :  { %9042 = vmatpush.bf16.msra.mxu0 %v14463_v24  ;;  %v16434_v24 = vld [vmem:[%s24386_s1 + $0x1ec4] sm:$0xf0]  ;;  %v15150_v60 = vld [vmem:[%s24386_s1 + $0x2378] sm:$0xf] }
 0x425   :  { %9053 = vmatpush.bf16.msrb.mxu2 %v14623_v39  ;;  %9033 = vmatpush.bf16.msrb.mxu3 %v14271_v3  ;;  %v14558_v39 = vld [vmem:[%s24386_s1 + $0x1ed8] sm:$0xf]  ;;  %v14735_v3 = vor.u32 %v16482_v55, %v14734_v16  ;;  %v16586_v43 = vld [vmem:[%s24386_s1 + $0x2384] sm:$0xf0]  ;;  %v15007_v55 = vor.u32 %v16550_v44, %v15006_v4  ;;  %v14512_v4 = vld [vmem:[%s24386_s1 + $0x1e88] sm:$0xf0] }
 0x426   :  { %v14559_v0 = vor.u32 %v16438_v61, %v14558_v39  ;;  %v14686_v27 = vld [vmem:[%s24386_s1 + $0x1fd8] sm:$0xf]  ;;  %v15151_v52 = vor.u32 %v16586_v43, %v15150_v60  ;;  %v8447_v39 = vpack.c.b16 %v8151_v36, %v8151_v36  ;;  %v16582_v62 = vld [vmem:[%s24386_s1 + $0x2364] sm:$0xf0] }
 0x427   :  { %9019 = vmatpush.bf16.msra.mxu1 %v14159_v37  ;;  %v14718_v37 = vld [vmem:[%s24386_s1 + $0x2018] sm:$0xf]  ;;  %v16538_v44 = vld [vmem:[%s24386_s1 + $0x2204] sm:$0xf0] }
 0x428   :  { %9034 = vmatmul.bf16.vlgmr.msrb.gmra.mxu3 %v17024_v14  ;;  %9043 = vmatpush.bf16.msra.mxu0 %v14447_v11  ;;  %v14526_v11 = vld [vmem:[%s24386_s1 + $0x1e98] sm:$0xf]  ;;  %v16574_v43 = vld [vmem:[%s24386_s1 + $0x2324] sm:$0xf0] }
 0x429   :  { %9078 = vmatpush.bf16.msra.mxu3 %v14895_v22  ;;  %9054 = vmatpush.bf16.msrb.mxu2 %v14607_v18  ;;  %v16478_v22 = vld [vmem:[%s24386_s1 + $0x2024] sm:$0xf0]  ;;  %v8788_v59 = vpop.f32.mrf.mxu2  ;;  %v8776_v18 = vadd.f32 %v8775_v13, %v23401_v63  ;;  %v14814_v63 = vld [vmem:[%s24386_s1 + $0x20d8] sm:$0xf] }
 0x42a   :  { %v14719_v7 = vor.u32 %v16478_v22, %v14718_v37  ;;  %v14815_v51 = vor.u32 %v16502_v1, %v14814_v63  ;;  %v14990_v26 = vld [vmem:[%s24386_s1 + $0x2238] sm:$0xf]  ;;  %v16466_v22 = vld [vmem:[%s24386_s1 + $0x1fc4] sm:$0xf0] }
 0x42b   :  { %9020 = vmatpush.bf16.msra.mxu1 %v14143_v5  ;;  %v23564_v53 = vadd.f32 %v8788_v59, %v8776_v18  ;;  %v14399_v5 = vor.u32 %v16398_v31, %v14398_v49  ;;  %v14670_v37 = vld [vmem:[%s24386_s1 + $0x1fb8] sm:$0xf]  ;;  %v8748_v59 = vsel %vm1841_vm0, %v8447_v39, 0  ;;  %v16462_v63 = vld [vmem:[%s24386_s1 + $0x1fa4] sm:$0xf0] }
 0x42c   :  { %9044 = vmatpush.bf16.msra.mxu0 %v14431_v35  ;;  %v16470_v35 = vld [vmem:[%s24386_s1 + $0x1fe4] sm:$0xf0]  ;;  %v14974_v31 = vld [vmem:[%s24386_s1 + $0x2218] sm:$0xf]  ;;  %v8801_v34 = vpop.f32.mrf.mxu0  ;;  %v14671_v12 = vor.u32 %v16466_v22, %v14670_v37  ;;  %v16416_v22 = vld [vmem:[%s24386_s1 + $0x1e3c] sm:$0xf] }
 0x42d   :  { %9079 = vmatpush.bf16.msra.mxu3 %v14879_v6  ;;  %9055 = vmatpush.bf16.msrb.mxu2 %v14591_v21  ;;  %v14543_v6 = vor.u32 %v16434_v24, %v14542_v32  ;;  %v16430_v21 = vld [vmem:[%s24386_s1 + $0x1ea4] sm:$0xf0]  ;;  %v14687_v50 = vor.u32 %v16470_v35, %v14686_v27  ;;  %v15118_v18 = vld [vmem:[%s24386_s1 + $0x2338] sm:$0xf] }
 0x42e   :  { %9021 = vmatmul.bf16.vlgmr.msra.gmra.mxu1 %v17026_v15  ;;  %v14527_v17 = vor.u32 %v16430_v21, %v14526_v11  ;;  %v16542_v24 = vld [vmem:[%s24386_s1 + $0x2224] sm:$0xf0]  ;;  %v15294_v1 = vld [vmem:[%s24386_s1 + $0x2498] sm:$0xf] }
 0x42f   :  { %9065 = vmatpush.bf16.msrb.mxu1 %v14767_v33  ;;  %v14702_v33 = vld [vmem:[%s24386_s1 + $0x1ff8] sm:$0xf]  ;;  %v14975_v11 = vor.u32 %v16542_v24, %v14974_v31  ;;  %v16614_v27 = vld [vmem:[%s24386_s1 + $0x2464] sm:$0xf0] }
 0x430   :  { %9045 = vmatpush.bf16.msra.mxu0 %v14415_v46  ;;  %v14703_v10 = vor.u32 %v16474_v54, %v14702_v33  ;;  %v14782_v46 = vld [vmem:[%s24386_s1 + $0x2098] sm:$0xf]  ;;  %v16622_v33 = vld [vmem:[%s24386_s1 + $0x24a4] sm:$0xf0] }
 0x431   :  { %9080 = vmatpush.bf16.msra.mxu3 %v14863_v57  ;;  %9056 = vmatpush.bf16.msrb.mxu2 %v14575_v23  ;;  %v16498_v57 = vld [vmem:[%s24386_s1 + $0x20c4] sm:$0xf0]  ;;  %v8777_v23 = vpop.f32.mrf.mxu1  ;;  %v8790_v16 = vpop.f32.mrf.mxu2  ;;  %v15278_v54 = vld [vmem:[%s24386_s1 + $0x2478] sm:$0xf] }
 0x432   :  { %v14799_v61 = vor.u32 %v16498_v57, %v14798_v48  ;;  %v14958_v36 = vld [vmem:[%s24386_s1 + $0x21f8] sm:$0xf]  ;;  %v15295_v48 = vor.u32 %v16622_v33, %v15294_v1  ;;  %v16420_v16 = vld [vmem:[%s24386_s1 + $0x1e5c] sm:$0xf] }
 0x433   :  { %9066 = vmatpush.bf16.msrb.mxu1 %v14751_v41  ;;  %v8814_v41 = vpop.f32.mrf.mxu3  ;;  %v15102_v60 = vld [vmem:[%s24386_s1 + $0x2318] sm:$0xf]  ;;  %v14959_v35 = vor.u32 %v16538_v44, %v14958_v36  ;;  %v16412_v1 = vld [vmem:[%s24386_s1 + $0x1e1c] sm:$0xf] }
 0x434   :  { %9046 = vmatpush.bf16.msra.mxu0 %v14399_v5  ;;  %v8802_v5 = vadd.f32 %v8801_v34, %v23564_v53  ;;  %v16424_v53 = vld [vmem:[%s24386_s1 + $0x1e7c] sm:$0xf]  ;;  %v15103_v23 = vor.u32 %v16574_v43, %v15102_v60  ;;  %v15086_v39 = vld [vmem:[%s24386_s1 + $0x22f8] sm:$0xf]  ;;  %v16606_v34 = vld [vmem:[%s24386_s1 + $0x2424] sm:$0xf0] }
 0x435   :  { %9081 = vmatpush.bf16.msra.mxu3 %v14847_v58  ;;  %9057 = vmatpush.bf16.msrb.mxu2 %v14559_v0  ;;  %v16546_v58 = vld [vmem:[%s24386_s1 + $0x2244] sm:$0xf0]  ;;  %v15070_v31 = vld [vmem:[%s24386_s1 + $0x22d8] sm:$0xf] }
 0x436   :  { %v16494_v0 = vld [vmem:[%s24386_s1 + $0x20a4] sm:$0xf0]  ;;  %v14991_v49 = vor.u32 %v16546_v58, %v14990_v26  ;;  %v8803_v58 = vpop.f32.mrf.mxu0  ;;  %v15214_v60 = vld [vmem:[%s24386_s1 + $0x23f8] sm:$0xf] }
 0x437   :  { %9067 = vmatpush.bf16.msrb.mxu1 %v14735_v3  ;;  %v15134_v3 = vld [vmem:[%s24386_s1 + $0x2358] sm:$0xf]  ;;  %9047 = vmatmul.bf16.vlgmr.msra.gmra.mxu0 %v17011_v8  ;;  %v14783_v32 = vor.u32 %v16494_v0, %v14782_v46  ;;  %v16534_v26 = vld [vmem:[%s24386_s1 + $0x21e4] sm:$0xf0] }
 0x438   :  { %9091 = vmatpush.bf16.msrb.mxu0 %v15023_v29  ;;  %v15135_v13 = vor.u32 %v16582_v62, %v15134_v3  ;;  %v16618_v29 = vld [vmem:[%s24386_s1 + $0x2484] sm:$0xf0] }
 0x439   :  { %9082 = vmatpush.bf16.msra.mxu3 %v14831_v2  ;;  %9058 = vmatpush.bf16.msrb.mxu2 %v14543_v6  ;;  %v16578_v2 = vld [vmem:[%s24386_s1 + $0x2344] sm:$0xf0]  ;;  %v15279_v57 = vor.u32 %v16618_v29, %v15278_v54 }
 0x43a   :  { %v15119_v21 = vor.u32 %v16578_v2, %v15118_v18  ;;  %v16610_v46 = vld [vmem:[%s24386_s1 + $0x2444] sm:$0xf0]  ;;  %v15230_v2 = vld [vmem:[%s24386_s1 + $0x2418] sm:$0xf] }
 0x43b   :  { %9068 = vmatpush.bf16.msrb.mxu1 %v14719_v7  ;;  %v14654_v7 = vld [vmem:[%s24386_s1 + $0x1f98] sm:$0xf]  ;;  %v8816_v6 = vpop.f32.mrf.mxu3  ;;  %v16526_v29 = vld [vmem:[%s24386_s1 + $0x21a4] sm:$0xf0]  ;;  %v15231_v36 = vor.u32 %v16606_v34, %v15230_v2 }
 0x43c   :  { %9092 = vmatpush.bf16.msrb.mxu0 %v15007_v55  ;;  %v14496_v55 = vld [vmem:[%s24386_s1 + $0x1e68] sm:$0xf0]  ;;  %v14910_v6 = vld [vmem:[%s24386_s1 + $0x2198] sm:$0xf]  ;;  %v16594_v34 = vld [vmem:[%s24386_s1 + $0x23c4] sm:$0xf0] }
 0x43d   :  { %9083 = vmatpush.bf16.msra.mxu3 %v14815_v51  ;;  %9059 = vmatpush.bf16.msrb.mxu2 %v14527_v17  ;;  %v8815_v51 = vadd.f32 %v8814_v41, %v8802_v5  ;;  %v14515_v17 = vor.u32 %v16424_v53, %v14512_v4  ;;  %v15262_v41 = vld [vmem:[%s24386_s1 + $0x2458] sm:$0xf]  ;;  %v14499_v62 = vor.u32 %v16420_v16, %v14496_v55  ;;  %v14464_v5 = vld [vmem:[%s24386_s1 + $0x1e28] sm:$0xf0]  ;;  %v16360_v53 = vld [vmem:[%s24386_s1 + $0x1c7c] sm:$0xf] }
 0x43e   :  { %v15263_v3 = vor.u32 %v16614_v27, %v15262_v41  ;;  %v14256_v4 = vld [vmem:[%s24386_s1 + $0x1c88] sm:$0xf0]  ;;  %v14911_v43 = vor.u32 %v16526_v29, %v14910_v6  ;;  %v15038_v27 = vld [vmem:[%s24386_s1 + $0x2298] sm:$0xf]  ;;  %v16392_v55 = vld [vmem:[%s24386_s1 + $0x1d7c] sm:$0xf] }
 0x43f   :  { %9069 = vmatpush.bf16.msrb.mxu1 %v14703_v10  ;;  %v14655_v10 = vor.u32 %v16462_v63, %v14654_v7  ;;  %v14259_v41 = vor.u32 %v16360_v53, %v14256_v4  ;;  %v14240_v16 = vld [vmem:[%s24386_s1 + $0x1c68] sm:$0xf0]  ;;  %v15182_v2 = vld [vmem:[%s24386_s1 + $0x23b8] sm:$0xf] }
 0x440   :  { %9060 = vmatmul.bf16.vlgmr.msrb.gmra.mxu2 %v17013_v9  ;;  %9093 = vmatpush.bf16.msrb.mxu0 %v14991_v49  ;;  %v14480_v49 = vld [vmem:[%s24386_s1 + $0x1e48] sm:$0xf0]  ;;  %v15166_v4 = vld [vmem:[%s24386_s1 + $0x2398] sm:$0xf] }
 0x441   :  { %9104 = vmatpush.bf16.msra.mxu2 %v15151_v52  ;;  %9084 = vmatpush.bf16.msra.mxu3 %v14799_v61  ;;  %v14942_v52 = vld [vmem:[%s24386_s1 + $0x21d8] sm:$0xf]  ;;  %v16570_v61 = vld [vmem:[%s24386_s1 + $0x2304] sm:$0xf0]  ;;  %v14483_v18 = vor.u32 %v16416_v22, %v14480_v49  ;;  %v14352_v29 = vld [vmem:[%s24386_s1 + $0x1d48] sm:$0xf0] }
 0x442   :  { %v14943_v0 = vor.u32 %v16534_v26, %v14942_v52  ;;  %v15087_v37 = vor.u32 %v16570_v61, %v15086_v39  ;;  %v14384_v52 = vld [vmem:[%s24386_s1 + $0x1d88] sm:$0xf0]  ;;  %v15198_v61 = vld [vmem:[%s24386_s1 + $0x23d8] sm:$0xf] }
 0x443   :  { %9070 = vmatpush.bf16.msrb.mxu1 %v14687_v50  ;;  %v15246_v50 = vld [vmem:[%s24386_s1 + $0x2438] sm:$0xf]  ;;  %v8840_v33 = vpop.f32.mrf.mxu2  ;;  %v14387_v49 = vor.u32 %v16392_v55, %v14384_v52  ;;  %v16380_v55 = vld [vmem:[%s24386_s1 + $0x1d1c] sm:$0xf]  ;;  %v14336_v52 = vld [vmem:[%s24386_s1 + $0x1d28] sm:$0xf0] }
 0x444   :  { %9094 = vmatpush.bf16.msrb.mxu0 %v14975_v11  ;;  %v15247_v24 = vor.u32 %v16610_v46, %v15246_v50  ;;  %v15054_v11 = vld [vmem:[%s24386_s1 + $0x22b8] sm:$0xf]  ;;  %v16598_v50 = vld [vmem:[%s24386_s1 + $0x23e4] sm:$0xf0]  ;;  %v16404_v46 = vld [vmem:[%s24386_s1 + $0x1ddc] sm:$0xf] }
 0x445   :  { %9105 = vmatpush.bf16.msra.mxu2 %v15135_v13  ;;  %9085 = vmatpush.bf16.msra.mxu3 %v14783_v32  ;;  %v14926_v13 = vld [vmem:[%s24386_s1 + $0x21b8] sm:$0xf]  ;;  %v16566_v32 = vld [vmem:[%s24386_s1 + $0x22e4] sm:$0xf0] }
 0x446   :  { %v15071_v63 = vor.u32 %v16566_v32, %v15070_v31  ;;  %v16388_v31 = vld [vmem:[%s24386_s1 + $0x1d5c] sm:$0xf]  ;;  %v14368_v32 = vld [vmem:[%s24386_s1 + $0x1d68] sm:$0xf0] }
 0x447   :  { %9071 = vmatpush.bf16.msrb.mxu1 %v14671_v12  ;;  %v8827_v12 = vpop.f32.mrf.mxu1 }
 0x448   :  { %9086 = vmatmul.bf16.vlgmr.msra.gmra.mxu3 %v17200_v42  ;;  %9095 = vmatpush.bf16.msrb.mxu0 %v14959_v35  ;;  %v8828_v54 = vadd.f32 %v8827_v12, %v8815_v51  ;;  %v14467_v51 = vor.u32 %v16412_v1, %v14464_v5  ;;  %v16558_v35 = vld [vmem:[%s24386_s1 + $0x22a4] sm:$0xf0]  ;;  %v16400_v12 = vld [vmem:[%s24386_s1 + $0x1dbc] sm:$0xf]  ;;  %v14371_v1 = vor.u32 %v16388_v31, %v14368_v32  ;;  %v14320_v32 = vld [vmem:[%s24386_s1 + $0x1d08] sm:$0xf0] }
 0x449   :  { %9136 = vmatpush.bf16.msrb.mxu3 %v8748_v59  ;;  %9106 = vmatpush.bf16.msra.mxu2 %v15119_v21  ;;  %v16530_v59 = vld [vmem:[%s24386_s1 + $0x21c4] sm:$0xf0]  ;;  %v16348_v5 = vld [vmem:[%s24386_s1 + $0x1c1c] sm:$0xf] }
 0x44a   :  { %v14927_v7 = vor.u32 %v16530_v59, %v14926_v13  ;;  %v16562_v21 = vld [vmem:[%s24386_s1 + $0x22c4] sm:$0xf0]  ;;  %v8841_v44 = vadd.f32 %v8840_v33, %v8828_v54  ;;  %v16352_v13 = vld [vmem:[%s24386_s1 + $0x1c3c] sm:$0xf]  ;;  %v14224_v59 = vld [vmem:[%s24386_s1 + $0x1c48] sm:$0xf0] }
 0x44b   :  { %9072 = vmatpush.bf16.msrb.mxu1 %v14655_v10  ;;  %v15055_v10 = vor.u32 %v16562_v21, %v15054_v11  ;;  %v8866_v58 = vpop.f32.mrf.mxu3  ;;  %v14208_v33 = vld [vmem:[%s24386_s1 + $0x1c28] sm:$0xf0]  ;;  %v16384_v54 = vld [vmem:[%s24386_s1 + $0x1d3c] sm:$0xf]  ;;  %v15183_v21 = vor.u32 %v16594_v34, %v15182_v2 }
 0x44c   :  { %9096 = vmatpush.bf16.msrb.mxu0 %v14943_v0  ;;  %v14432_v0 = vld [vmem:[%s24386_s1 + $0x1de8] sm:$0xf0]  ;;  %v8853_v6 = vpop.f32.mrf.mxu0  ;;  %v16376_v31 = vld [vmem:[%s24386_s1 + $0x1cfc] sm:$0xf] }
 0x44d   :  { %9137 = vmatpush.bf16.msrb.mxu3 %v15295_v48  ;;  %9107 = vmatpush.bf16.msra.mxu2 %v15103_v23  ;;  %v16602_v48 = vld [vmem:[%s24386_s1 + $0x2404] sm:$0xf0]  ;;  %v16356_v23 = vld [vmem:[%s24386_s1 + $0x1c5c] sm:$0xf]  ;;  %v8854_v11 = vadd.f32 %v8853_v6, %v8841_v44  ;;  %v14400_v44 = vld [vmem:[%s24386_s1 + $0x1da8] sm:$0xf0] }
 0x44e   :  { %9073 = vmatmul.bf16.vlgmr.msrb.gmra.mxu1 %v17208_v45  ;;  %v15215_v26 = vor.u32 %v16602_v48, %v15214_v60  ;;  %v14243_v22 = vor.u32 %v16356_v23, %v14240_v16  ;;  %v16344_v23 = vld [vmem:[%s24386_s1 + $0x1bfc] sm:$0xf]  ;;  %v14192_v16 = vld [vmem:[%s24386_s1 + $0x1c08] sm:$0xf0] }
 0x44f   :  { %9117 = vmatpush.bf16.msra.mxu1 %v15279_v57  ;;  %v16408_v57 = vld [vmem:[%s24386_s1 + $0x1dfc] sm:$0xf]  ;;  %v8867_v48 = vadd.f32 %v8866_v58, %v8854_v11  ;;  %v14304_v11 = vld [vmem:[%s24386_s1 + $0x1ce8] sm:$0xf0] }
 0x450   :  { %9097 = vmatpush.bf16.msrb.mxu0 %v14927_v7  ;;  %v14416_v7 = vld [vmem:[%s24386_s1 + $0x1dc8] sm:$0xf0]  ;;  %v16448_v34 = vld [vmem:[%s24386_s1 + $0x1f3c] sm:$0xf] }
 0x451   :  { %9169 = vmatpush.bf16.msra.mxu3 %v14515_v17  ;;  %9108 = vmatpush.bf16.msra.mxu2 %v15087_v37  ;;  %v14448_v17 = vld [vmem:[%s24386_s1 + $0x1e08] sm:$0xf0]  ;;  %v8842_v37 = vpop.f32.mrf.mxu2  ;;  %v14419_v53 = vor.u32 %v16400_v12, %v14416_v7  ;;  %v16336_v6 = vld [vmem:[%s24386_s1 + $0x1bbc] sm:$0xf] }
 0x452   :  { %v14451_v39 = vor.u32 %v16408_v57, %v14448_v17  ;;  %v14211_v17 = vor.u32 %v16348_v5, %v14208_v33  ;;  %v14339_v37 = vor.u32 %v16380_v55, %v14336_v52  ;;  %v14608_v12 = vld [vmem:[%s24386_s1 + $0x1f48] sm:$0xf0] }
 0x453   :  { %9118 = vmatpush.bf16.msra.mxu1 %v15263_v3  ;;  %v8829_v3 = vpop.f32.mrf.mxu1  ;;  %v8868_v60 = vpop.f32.mrf.mxu3  ;;  %v14992_v5 = vld [vmem:[%s24386_s1 + $0x2248] sm:$0xf0] }
 0x454   :  { %9098 = vmatpush.bf16.msrb.mxu0 %v14911_v43  ;;  %v16456_v43 = vld [vmem:[%s24386_s1 + $0x1f7c] sm:$0xf] }
 0x455   :  { %9170 = vmatpush.bf16.msra.mxu3 %v14499_v62  ;;  %9109 = vmatpush.bf16.msra.mxu2 %v15071_v63  ;;  %v15039_v62 = vor.u32 %v16558_v35, %v15038_v27  ;;  %v14227_v63 = vor.u32 %v16352_v13, %v14224_v59  ;;  %v16552_v27 = vld [vmem:[%s24386_s1 + $0x227c] sm:$0xf]  ;;  %v15024_v35 = vld [vmem:[%s24386_s1 + $0x2288] sm:$0xf0] }
 0x456   :  { %v15027_v3 = vor.u32 %v16552_v27, %v15024_v35  ;;  %v16340_v13 = vld [vmem:[%s24386_s1 + $0x1bdc] sm:$0xf]  ;;  %v14176_v59 = vld [vmem:[%s24386_s1 + $0x1be8] sm:$0xf0] }
 0x457   :  { %9119 = vmatpush.bf16.msra.mxu1 %v15247_v24  ;;  %v15199_v24 = vor.u32 %v16598_v50, %v15198_v61  ;;  %9099 = vmatmul.bf16.vlgmr.msrb.gmra.mxu0 %v17189_v38  ;;  %v14624_v50 = vld [vmem:[%s24386_s1 + $0x1f68] sm:$0xf0]  ;;  %v14179_v7 = vor.u32 %v16340_v13, %v14176_v59 }
 0x458   :  { %9143 = vmatpush.bf16.msra.mxu0 %v14259_v41  ;;  %15302 = vmatmul.msk.bf16.vlgmr.msrb.gmra.mxu3 %vm1837_vm1, %v17318_v40  ;;  %v14355_v41 = vor.u32 %v16384_v54, %v14352_v29  ;;  %v14160_v54 = vld [vmem:[%s24386_s1 + $0x1bc8] sm:$0xf0]  ;;  %v16372_v29 = vld [vmem:[%s24386_s1 + $0x1cdc] sm:$0xf] }
 0x459   :  { %9171 = vmatpush.bf16.msra.mxu3 %v14483_v18  ;;  %9110 = vmatpush.bf16.msra.mxu2 %v15055_v10  ;;  %v14435_v18 = vor.u32 %v16404_v46, %v14432_v0  ;;  %v14640_v10 = vld [vmem:[%s24386_s1 + $0x1f88] sm:$0xf0]  ;;  %v14195_v0 = vor.u32 %v16344_v23, %v14192_v16  ;;  %v14307_v60 = vor.u32 %v16372_v29, %v14304_v11  ;;  %v16440_v16 = vld [vmem:[%s24386_s1 + $0x1efc] sm:$0xf] }
 0x45a   :  { %v14643_v58 = vor.u32 %v16456_v43, %v14640_v10  ;;  %v16332_v43 = vld [vmem:[%s24386_s1 + $0x1b9c] sm:$0xf]  ;;  %v14144_v10 = vld [vmem:[%s24386_s1 + $0x1ba8] sm:$0xf0] }
 0x45b   :  { %9120 = vmatpush.bf16.msra.mxu1 %v15231_v36  ;;  %v16590_v36 = vld [vmem:[%s24386_s1 + $0x23a4] sm:$0xf0]  ;;  %v8879_v57 = vpop.f32.mrf.mxu1  ;;  %v14147_v55 = vor.u32 %v16332_v43, %v14144_v10  ;;  %v16512_v43 = vld [vmem:[%s24386_s1 + $0x213c] sm:$0xf] }
 0x45c   :  { %9144 = vmatpush.bf16.msra.mxu0 %v14243_v22  ;;  %v16548_v22 = vld [vmem:[%s24386_s1 + $0x225c] sm:$0xf] }
 0x45d   :  { %9172 = vmatpush.bf16.msra.mxu3 %v14467_v51  ;;  %9111 = vmatpush.bf16.msra.mxu2 %v15039_v62  ;;  %v16396_v51 = vld [vmem:[%s24386_s1 + $0x1d9c] sm:$0xf] }
 0x45e   :  { %v14403_v61 = vor.u32 %v16396_v51, %v14400_v44  ;;  %v16452_v62 = vld [vmem:[%s24386_s1 + $0x1f5c] sm:$0xf]  ;;  %v14163_v51 = vor.u32 %v16336_v6, %v14160_v54  ;;  %v14976_v44 = vld [vmem:[%s24386_s1 + $0x2228] sm:$0xf0] }
 0x45f   :  { %9121 = vmatpush.bf16.msra.mxu1 %v15215_v26  ;;  %v23877_v26 = vadd.f32 %v8879_v57, %v8867_v48  ;;  %v16368_v48 = vld [vmem:[%s24386_s1 + $0x1cbc] sm:$0xf]  ;;  %v14288_v57 = vld [vmem:[%s24386_s1 + $0x1cc8] sm:$0xf0] }
 0x460   :  { %9112 = vmatmul.bf16.vlgmr.msra.gmra.mxu2 %v17210_v47  ;;  %9145 = vmatpush.bf16.msra.mxu0 %v14227_v63  ;;  %v14323_v63 = vor.u32 %v16376_v31, %v14320_v32  ;;  %v14291_v52 = vor.u32 %v16368_v48, %v14288_v57  ;;  %v16436_v32 = vld [vmem:[%s24386_s1 + $0x1edc] sm:$0xf] }
 0x461   :  { %9173 = vmatpush.bf16.msra.mxu3 %v14451_v39  ;;  %9156 = vmatpush.bf16.msrb.mxu2 %v14387_v49  ;;  %v15167_v39 = vor.u32 %v16590_v36, %v15166_v4  ;;  %v9273_v46 = vmax.f32 %v22013_v19, %v23877_v26  ;;  %v15008_v49 = vld [vmem:[%s24386_s1 + $0x2268] sm:$0xf0]  ;;  %v16444_v4 = vld [vmem:[%s24386_s1 + $0x1f1c] sm:$0xf] }
 0x462   :  { %v15011_v2 = vor.u32 %v16548_v22, %v15008_v49  ;;  %v14592_v36 = vld [vmem:[%s24386_s1 + $0x1f28] sm:$0xf0]  ;;  %v16520_v22 = vld [vmem:[%s24386_s1 + $0x217c] sm:$0xf] }
 0x463   :  { %9122 = vmatpush.bf16.msra.mxu1 %v15199_v24  ;;  %v8855_v24 = vpop.f32.mrf.mxu0  ;;  %v8881_v33 = vpop.f32.mrf.mxu1  ;;  %v14595_v35 = vor.u32 %v16444_v4, %v14592_v36  ;;  %v14896_v49 = vld [vmem:[%s24386_s1 + $0x2188] sm:$0xf0]  ;;  %v16516_v6 = vld [vmem:[%s24386_s1 + $0x215c] sm:$0xf] }
 0x464   :  { %9146 = vmatpush.bf16.msra.mxu0 %v14211_v17  ;;  %v16488_v17 = vld [vmem:[%s24386_s1 + $0x207c] sm:$0xf]  ;;  %v23961_v27 = vpop.f32.mrf.mxu2  ;;  %v14880_v33 = vld [vmem:[%s24386_s1 + $0x2168] sm:$0xf0] }
 0x465   :  { %9174 = vmatpush.bf16.msra.mxu3 %v14435_v18  ;;  %9157 = vmatpush.bf16.msrb.mxu2 %v14371_v1  ;;  %v14627_v18 = vor.u32 %v16452_v62, %v14624_v50  ;;  %v16544_v1 = vld [vmem:[%s24386_s1 + $0x223c] sm:$0xf]  ;;  %v14272_v50 = vld [vmem:[%s24386_s1 + $0x1ca8] sm:$0xf0] }
 0x466   :  { %v16364_v62 = vld [vmem:[%s24386_s1 + $0x1c9c] sm:$0xf]  ;;  %v14928_v36 = vld [vmem:[%s24386_s1 + $0x21c8] sm:$0xf0] }
 0x467   :  { %9123 = vmatpush.bf16.msra.mxu1 %v15183_v21  ;;  %v14611_v21 = vor.u32 %v16448_v34, %v14608_v12  ;;  %v16532_v34 = vld [vmem:[%s24386_s1 + $0x21dc] sm:$0xf]  ;;  %v14944_v12 = vld [vmem:[%s24386_s1 + $0x21e8] sm:$0xf0] }
 0x468   :  { %9147 = vmatpush.bf16.msra.mxu0 %v14195_v0  ;;  %v16484_v0 = vld [vmem:[%s24386_s1 + $0x205c] sm:$0xf]  ;;  %v14947_v11 = vor.u32 %v16532_v34, %v14944_v12  ;;  %v14688_v34 = vld [vmem:[%s24386_s1 + $0x1fe8] sm:$0xf0] }
 0x469   :  { %9175 = vmatpush.bf16.msra.mxu3 %v14419_v53  ;;  %9158 = vmatpush.bf16.msrb.mxu2 %v14355_v41  ;;  %v14995_v53 = vor.u32 %v16544_v1, %v14992_v5  ;;  %v14768_v41 = vld [vmem:[%s24386_s1 + $0x2088] sm:$0xf0]  ;;  %v16480_v1 = vld [vmem:[%s24386_s1 + $0x203c] sm:$0xf] }
 0x46a   :  { %v14736_v5 = vld [vmem:[%s24386_s1 + $0x2048] sm:$0xf0]  ;;  %v16528_v4 = vld [vmem:[%s24386_s1 + $0x21bc] sm:$0xf] }
 0x46b   :  { %9124 = vmatpush.bf16.msra.mxu1 %v15167_v39  ;;  %v14576_v39 = vld [vmem:[%s24386_s1 + $0x1f08] sm:$0xf0]  ;;  %v23993_v13 = vpop.f32.mrf.mxu1  ;;  %v23998_v24 = vpop.f32.mrf.mxu3  ;;  %v14931_v57 = vor.u32 %v16528_v4, %v14928_v36  ;;  %v16504_v12 = vld [vmem:[%s24386_s1 + $0x20fc] sm:$0xf] }
 0x46c   :  { %9148 = vmatpush.bf16.msra.mxu0 %v14179_v7  ;;  %v14579_v59 = vor.u32 %v16440_v16, %v14576_v39  ;;  %v8894_v54 = vpop.f32.mrf.mxu2  ;;  %v16524_v16 = vld [vmem:[%s24386_s1 + $0x219c] sm:$0xf]  ;;  %v14816_v4 = vld [vmem:[%s24386_s1 + $0x20e8] sm:$0xf0] }
 0x46d   :  { %9176 = vmatpush.bf16.msra.mxu3 %v14403_v61  ;;  %9159 = vmatpush.bf16.msrb.mxu2 %v14339_v37  ;;  %v16536_v61 = vld [vmem:[%s24386_s1 + $0x21fc] sm:$0xf]  ;;  %v14752_v37 = vld [vmem:[%s24386_s1 + $0x2068] sm:$0xf0] }
 0x46e   :  { %9125 = vmatmul.bf16.vlgmr.msra.gmra.mxu1 %v17404_v28  ;;  %v14755_v7 = vor.u32 %v16484_v0, %v14752_v37  ;;  %v16576_v54 = vld [vmem:[%s24386_s1 + $0x233c] sm:$0xf] }
 0x46f   :  { %9182 = vmatpush.bf16.msrb.mxu1 %v14643_v58  ;;  %v14960_v58 = vld [vmem:[%s24386_s1 + $0x2208] sm:$0xf0]  ;;  %v16600_v19 = vld [vmem:[%s24386_s1 + $0x23fc] sm:$0xf] }
 0x470   :  { %9177 = vmatmul.bf16.vlgmr.msra.gmra.mxu3 %v17011_v8  ;;  %v16540_v8 = vld [vmem:[%s24386_s1 + $0x221c] sm:$0xf]  ;;  %9149 = vmatpush.bf16.msra.mxu0 %v14163_v51  ;;  %v14963_v31 = vor.u32 %v16536_v61, %v14960_v58  ;;  %v14739_v51 = vor.u32 %v16480_v1, %v14736_v5  ;;  %v15152_v58 = vld [vmem:[%s24386_s1 + $0x2388] sm:$0xf0]  ;;  %v16629_v5 = vld [vmem:[%s24388_s3 + $0x30] sm:$0xff] }
 0x471   :  { %9221 = vmatpush.bf16.msrb.mxu3 %v15027_v3  ;;  %9160 = vmatpush.bf16.msrb.mxu2 %v14323_v63  ;;  %v14979_v23 = vor.u32 %v16540_v8, %v14976_v44  ;;  %v14771_v3 = vor.u32 %v16488_v17, %v14768_v41  ;;  %v14899_v63 = vor.u32 %v16520_v22, %v14896_v49  ;;  %v16476_v8 = vld [vmem:[%s24386_s1 + $0x201c] sm:$0xf]  ;;  %v14720_v44 = vld [vmem:[%s24386_s1 + $0x2028] sm:$0xf0]  ;;  %v24046_v17 = vpop.f32.mrf.mxu0 }
 0x472   :  { %v16428_v41 = vld [vmem:[%s24386_s1 + $0x1e9c] sm:$0xf] }
 0x473   :  { %9183 = vmatpush.bf16.msrb.mxu1 %v14627_v18  ;;  %v14275_v18 = vor.u32 %v16364_v62, %v14272_v50  ;;  %v8920_v10 = vpop.f32.mrf.mxu1  ;;  %v16584_v61 = vld [vmem:[%s24386_s1 + $0x237c] sm:$0xf]  ;;  %v14848_v50 = vld [vmem:[%s24386_s1 + $0x2128] sm:$0xf0] }
 0x474   :  { %9150 = vmatpush.bf16.msra.mxu0 %v14147_v55  ;;  %v14912_v55 = vld [vmem:[%s24386_s1 + $0x21a8] sm:$0xf0]  ;;  %v16508_v62 = vld [vmem:[%s24386_s1 + $0x211c] sm:$0xf]  ;;  %v15155_v22 = vor.u32 %v16584_v61, %v15152_v58 }
 0x475   :  { %9222 = vmatpush.bf16.msrb.mxu3 %v15011_v2  ;;  %9161 = vmatpush.bf16.msrb.mxu2 %v14307_v60  ;;  %v14560_v2 = vld [vmem:[%s24386_s1 + $0x1ee8] sm:$0xf0]  ;;  %v14883_v60 = vor.u32 %v16516_v6, %v14880_v33  ;;  %v14915_v37 = vor.u32 %v16524_v16, %v14912_v55  ;;  %v16630_v49 = vld [vmem:[%s24388_s3 + $0x38] sm:$0xff]  ;;  %v16627_v16 = vld [vmem:[%s24388_s3 + $0x20] sm:$0xff] }
 0x476   :  { %v14563_v29 = vor.u32 %v16436_v32, %v14560_v2  ;;  %v16580_v32 = vld [vmem:[%s24386_s1 + $0x235c] sm:$0xf]  ;;  %v15088_v61 = vld [vmem:[%s24386_s1 + $0x2308] sm:$0xf0] }
 0x477   :  { %9184 = vmatpush.bf16.msrb.mxu1 %v14611_v21  ;;  %v16432_v21 = vld [vmem:[%s24386_s1 + $0x1ebc] sm:$0xf]  ;;  %9151 = vmatmul.bf16.vlgmr.msra.gmra.mxu0 %v17026_v15  ;;  %v14864_v15 = vld [vmem:[%s24386_s1 + $0x2148] sm:$0xf0] }
 0x478   :  { %9195 = vmatpush.bf16.msrb.mxu0 %v14771_v3  ;;  %v14867_v39 = vor.u32 %v16512_v43, %v14864_v15  ;;  %v16472_v3 = vld [vmem:[%s24386_s1 + $0x1ffc] sm:$0xf]  ;;  %v14656_v15 = vld [vmem:[%s24386_s1 + $0x1fa8] sm:$0xf0] }
 0x479   :  { %9223 = vmatpush.bf16.msrb.mxu3 %v14995_v53  ;;  %9162 = vmatpush.bf16.msrb.mxu2 %v14291_v52  ;;  %v14544_v53 = vld [vmem:[%s24386_s1 + $0x1ec8] sm:$0xf0]  ;;  %v14723_v52 = vor.u32 %v16476_v8, %v14720_v44  ;;  %v16468_v2 = vld [vmem:[%s24386_s1 + $0x1fdc] sm:$0xf] }
 0x47a   :  { %v14547_v48 = vor.u32 %v16432_v21, %v14544_v53  ;;  %v14691_v6 = vor.u32 %v16468_v2, %v14688_v34  ;;  %v14672_v21 = vld [vmem:[%s24386_s1 + $0x1fc8] sm:$0xf0]  ;;  %v16500_v53 = vld [vmem:[%s24386_s1 + $0x20dc] sm:$0xf]  ;;  %v8906_v2 = vadd.f32 %v24046_v17, %v23961_v27 }
 0x47b   :  { %9185 = vmatpush.bf16.msrb.mxu1 %v14595_v35  ;;  %v8933_v35 = vpop.f32.mrf.mxu3  ;;  %v14819_v8 = vor.u32 %v16500_v53, %v14816_v4  ;;  %v16572_v44 = vld [vmem:[%s24386_s1 + $0x231c] sm:$0xf]  ;;  %v15296_v27 = vld [vmem:[%s24386_s1 + $0x24a8] sm:$0xf0] }
 0x47c   :  { %9196 = vmatpush.bf16.msrb.mxu0 %v14755_v7  ;;  %v14832_v7 = vld [vmem:[%s24386_s1 + $0x2108] sm:$0xf0]  ;;  %v16496_v10 = vld [vmem:[%s24386_s1 + $0x20bc] sm:$0xf]  ;;  %v8152_v35 = vunpack.c.h.b16 %v23556_v25 }
 0x47d   :  { %9224 = vmatpush.bf16.msrb.mxu3 %v14979_v23  ;;  %9163 = vmatpush.bf16.msrb.mxu2 %v14275_v18  ;;  %v14528_v23 = vld [vmem:[%s24386_s1 + $0x1ea8] sm:$0xf0]  ;;  %v14835_v33 = vor.u32 %v16504_v12, %v14832_v7  ;;  %v16492_v58 = vld [vmem:[%s24386_s1 + $0x209c] sm:$0xf] }
 0x47e   :  { %v14531_v0 = vor.u32 %v16428_v41, %v14528_v23  ;;  %v15136_v18 = vld [vmem:[%s24386_s1 + $0x2368] sm:$0xf0]  ;;  %v16608_v12 = vld [vmem:[%s24386_s1 + $0x243c] sm:$0xf] }
 0x47f   :  { %9186 = vmatpush.bf16.msrb.mxu1 %v14579_v59  ;;  %v15139_v1 = vor.u32 %v16580_v32, %v15136_v18  ;;  %v15280_v41 = vld [vmem:[%s24386_s1 + $0x2488] sm:$0xf0]  ;;  %v24190_v18 = vld [vmem:[%s24387_s2] sm:$0xf]  ;;  %v16604_v4 = vld [vmem:[%s24386_s1 + $0x241c] sm:$0xf] }
 0x480   :  { %9164 = vmatmul.bf16.vlgmr.msrb.gmra.mxu2 %v17024_v14  ;;  %9197 = vmatpush.bf16.msrb.mxu0 %v14739_v51  ;;  %v14704_v14 = vld [vmem:[%s24386_s1 + $0x2008] sm:$0xf0] }
 0x481   :  { %9225 = vmatpush.bf16.msrb.mxu3 %v14963_v31  ;;  %9208 = vmatpush.bf16.msra.mxu2 %v14899_v63  ;;  %v14707_v59 = vor.u32 %v16472_v3, %v14704_v14  ;;  %v14851_v31 = vor.u32 %v16508_v62, %v14848_v50  ;;  %v8907_v63 = vpop.f32.mrf.mxu0  ;;  %v16628_v51 = vld [vmem:[%s24388_s3 + $0x28] sm:$0xff]  ;;  %v16612_v14 = vld [vmem:[%s24386_s1 + $0x245c] sm:$0xf] }
 0x482   :  { %v14784_v3 = vld [vmem:[%s24386_s1 + $0x20a8] sm:$0xf0] }
 0x483   :  { %9187 = vmatpush.bf16.msrb.mxu1 %v14563_v29  ;;  %v15120_v29 = vld [vmem:[%s24386_s1 + $0x2348] sm:$0xf0]  ;;  %v24135_v43 = vpop.f32.mrf.mxu2 }
 0x484   :  { %9198 = vmatpush.bf16.msrb.mxu0 %v14723_v52  ;;  %v15123_v36 = vor.u32 %v16576_v54, %v15120_v29  ;;  %v15264_v62 = vld [vmem:[%s24386_s1 + $0x2468] sm:$0xf0]  ;;  %v16560_v54 = vld [vmem:[%s24386_s1 + $0x22bc] sm:$0xf] }
 0x485   :  { %9226 = vmatpush.bf16.msrb.mxu3 %v14947_v11  ;;  %9209 = vmatpush.bf16.msra.mxu2 %v14883_v60  ;;  %v16464_v11 = vld [vmem:[%s24386_s1 + $0x1fbc] sm:$0xf]  ;;  %v15072_v32 = vld [vmem:[%s24386_s1 + $0x22e8] sm:$0xf0]  ;;  %v15267_v34 = vor.u32 %v16612_v14, %v15264_v62 }
 0x486   :  { %v14675_v60 = vor.u32 %v16464_v11, %v14672_v21  ;;  %v15248_v7 = vld [vmem:[%s24386_s1 + $0x2448] sm:$0xf0]  ;;  %v8919_v11 = vadd.f32 %v23993_v13, %v8906_v2 }
 0x487   :  { %9188 = vmatpush.bf16.msrb.mxu1 %v14547_v48  ;;  %v14800_v48 = vld [vmem:[%s24386_s1 + $0x20c8] sm:$0xf0]  ;;  %v15251_v21 = vor.u32 %v16608_v12, %v15248_v7 }
 0x488   :  { %9199 = vmatpush.bf16.msrb.mxu0 %v14707_v59  ;;  %v14803_v52 = vor.u32 %v16496_v10, %v14800_v48  ;;  %v14787_v59 = vor.u32 %v16492_v58, %v14784_v3  ;;  %v15056_v29 = vld [vmem:[%s24386_s1 + $0x22c8] sm:$0xf0] }
 0x489   :  { %9227 = vmatpush.bf16.msrb.mxu3 %v14931_v57  ;;  %9210 = vmatpush.bf16.msra.mxu2 %v14867_v39  ;;  %v16616_v57 = vld [vmem:[%s24386_s1 + $0x247c] sm:$0xf]  ;;  %v16624_v13 = vld [vmem:[%s24388_s3 + $0x8] sm:$0xff] }
 0x48a   :  { %v16568_v39 = vld [vmem:[%s24386_s1 + $0x22fc] sm:$0xf]  ;;  %v15283_v25 = vor.u32 %v16616_v57, %v15280_v41  ;;  %v16636_v3 = vld [vmem:[%s24388_s3 + $0x68] sm:$0xff] }
 0x48b   :  { %9189 = vmatpush.bf16.msrb.mxu1 %v14531_v0  ;;  %v24174_v50 = vpop.f32.mrf.mxu1  ;;  %v8448_v0 = vpack.c.b16 %v8152_v35, %v8152_v35  ;;  %v8946_v63 = vpop.f32.mrf.mxu2  ;;  %v16596_v35 = vld [vmem:[%s24386_s1 + $0x23dc] sm:$0xf]  ;;  %v16644_v7 = vld [vmem:[%s24388_s3 + $0xa8] sm:$0xff] }
 0x48c   :  { %9200 = vmatpush.bf16.msrb.mxu0 %v14691_v6  ;;  %v16625_v6 = vld [vmem:[%s24388_s3 + $0x10] sm:$0xff] }
 0x48d   :  { %9228 = vmatpush.bf16.msrb.mxu3 %v14915_v37  ;;  %9211 = vmatpush.bf16.msra.mxu2 %v14851_v31  ;;  %v15091_v37 = vor.u32 %v16568_v39, %v15088_v61  ;;  %v16564_v31 = vld [vmem:[%s24386_s1 + $0x22dc] sm:$0xf] }
 0x48e   :  { %9190 = vmatmul.bf16.vlgmr.msrb.gmra.mxu1 %v17013_v9  ;;  %v15104_v9 = vld [vmem:[%s24386_s1 + $0x2328] sm:$0xf0]  ;;  %v15075_v17 = vor.u32 %v16564_v31, %v15072_v32  ;;  %v16592_v61 = vld [vmem:[%s24386_s1 + $0x23bc] sm:$0xf] }
 0x48f   :  { %9234 = vmatpush.bf16.msra.mxu1 %v15155_v22  ;;  %v15107_v23 = vor.u32 %v16572_v44, %v15104_v9  ;;  %v16626_v22 = vld [vmem:[%s24388_s3 + $0x18] sm:$0xff] }
 0x490   :  { %9229 = vmatmul.bf16.vlgmr.msrb.gmra.mxu3 %v17189_v38  ;;  %v16460_v38 = vld [vmem:[%s24386_s1 + $0x1f9c] sm:$0xf]  ;;  %9201 = vmatpush.bf16.msrb.mxu0 %v14675_v60  ;;  %v15059_v60 = vor.u32 %v16560_v54, %v15056_v29 }
 0x491   :  { %9507 = vmatpush.bf16.msra.mxu3 %v16630_v49  ;;  %9212 = vmatpush.bf16.msra.mxu2 %v14835_v33  ;;  %v14659_v55 = vor.u32 %v16460_v38, %v14656_v15  ;;  %v24179_v49 = vpop.f32.mrf.mxu3  ;;  %v9279_v33 = vperm.slane %v24190_v18, 0  ;;  %v16556_v9 = vld [vmem:[%s24386_s1 + $0x229c] sm:$0xf]  ;;  %v15040_v38 = vld [vmem:[%s24386_s1 + $0x22a8] sm:$0xf0]  ;;  %v8932_v15 = vadd.f32 %v23998_v24, %v8919_v11 }
 0x492   :  { %v15043_v26 = vor.u32 %v16556_v9, %v15040_v38  ;;  %v16638_v24 = vld [vmem:[%s24388_s3 + $0x78] sm:$0xff]  ;;  %v16639_v9 = vld [vmem:[%s24388_s3 + $0x80] sm:$0xff] }
 0x493   :  { %9235 = vmatpush.bf16.msra.mxu1 %v15139_v1  ;;  %v8751_v1 = vsel %vm1841_vm0, %v8448_v0, 0  ;;  %v9287_v44 = vadd.f32 %v9279_v33, %v9273_v46  ;;  %v16623_v46 = vld [vmem:[%s24388_s3] sm:$0xff]  ;;  %v8945_v57 = vadd.f32 %v24135_v43, %v8932_v15  ;;  %v16637_v43 = vld [vmem:[%s24388_s3 + $0x70] sm:$0xff]  ;;  %v16588_v0 = vld [vmem:[%s24386_s1 + $0x239c] sm:$0xf] }
 0x494   :  { %9202 = vmatpush.bf16.msrb.mxu0 %v14659_v55  ;;  %v16632_v33 = vld [vmem:[%s24388_s3 + $0x48] sm:$0xff] }
 0x495   :  { %9508 = vmatpush.bf16.msra.mxu3 %v16629_v5  ;;  %9213 = vmatpush.bf16.msra.mxu2 %v14819_v8  ;;  %v16620_v5 = vld [vmem:[%s24386_s1 + $0x249c] sm:$0xf]  ;;  %v9291_v48 = vmax.f32 %v9287_v44, 0.0 }
 0x496   :  { %v15299_v53 = vor.u32 %v16620_v5, %v15296_v27  ;;  %v16633_v5 = vld [vmem:[%s24388_s3 + $0x50] sm:$0xff] }
 0x497   :  { %9236 = vmatpush.bf16.msra.mxu1 %v15123_v36  ;;  %9203 = vmatmul.bf16.vlgmr.msrb.gmra.mxu0 %v17208_v45  ;;  %v15232_v45 = vld [vmem:[%s24386_s1 + $0x2428] sm:$0xf0]  ;;  %v8972_v36 = vpop.f32.mrf.mxu1 }
 0x498   :  { %9247 = vmatpush.bf16.msra.mxu0 %v15283_v25  ;;  %v15235_v10 = vor.u32 %v16604_v4, %v15232_v45  ;;  %v15184_v25 = vld [vmem:[%s24386_s1 + $0x23c8] sm:$0xf0]  ;;  %v16642_v45 = vld [vmem:[%s24388_s3 + $0x98] sm:$0xff] }
 0x499   :  { %9509 = vmatpush.bf16.msra.mxu3 %v16628_v51  ;;  %9214 = vmatpush.bf16.msra.mxu2 %v14803_v52  ;;  %v8957_v51 = vpop.f32.mrf.mxu0  ;;  %v8985_v8 = vpop.f32.mrf.mxu3  ;;  %v9295_v52 = vpack.c.bf16 %v9291_v48, %v9291_v48  ;;  %v15187_v14 = vor.u32 %v16592_v61, %v15184_v25 }
 0x49b   :  { %9237 = vmatpush.bf16.msra.mxu1 %v15107_v23  ;;  %v15200_v23 = vld [vmem:[%s24386_s1 + $0x23e8] sm:$0xf0] }
 0x49c   :  { %9248 = vmatpush.bf16.msra.mxu0 %v15267_v34  ;;  %v15203_v39 = vor.u32 %v16596_v35, %v15200_v23  ;;  %v16645_v34 = vld [vmem:[%s24388_s3 + $0xb0] sm:$0xff] }
 0x49d   :  { %9510 = vmatpush.bf16.msra.mxu3 %v16627_v16  ;;  %9215 = vmatpush.bf16.msra.mxu2 %v14787_v59  ;;  %v8958_v16 = vadd.f32 %v8957_v51, %v8945_v57  ;;  %v16635_v59 = vld [vmem:[%s24388_s3 + $0x60] sm:$0xff]  ;;  %v16641_v51 = vld [vmem:[%s24388_s3 + $0x90] sm:$0xff] }
 0x49f   :  { %9238 = vmatpush.bf16.msra.mxu1 %v15091_v37  ;;  %v8971_v58 = vadd.f32 %v24174_v50, %v8958_v16  ;;  %v15168_v50 = vld [vmem:[%s24386_s1 + $0x23a8] sm:$0xf0] }
 0x4a0   :  { %9216 = vmatmul.bf16.vlgmr.msra.gmra.mxu2 %v17200_v42  ;;  %9249 = vmatpush.bf16.msra.mxu0 %v15251_v21  ;;  %v15216_v42 = vld [vmem:[%s24386_s1 + $0x2408] sm:$0xf0]  ;;  %v15171_v32 = vor.u32 %v16588_v0, %v15168_v50 }
 0x4a1   :  { %9511 = vmatpush.bf16.msra.mxu3 %v16626_v22  ;;  %9266 = vmatpush.bf16.msrb.mxu2 %v8751_v1  ;;  %v15219_v41 = vor.u32 %v16600_v19, %v15216_v42  ;;  %v8959_v55 = vpop.f32.mrf.mxu0  ;;  %v8984_v37 = vadd.f32 %v24179_v49, %v8971_v58  ;;  %v16634_v49 = vld [vmem:[%s24388_s3 + $0x58] sm:$0xff] }
 0x4a3   :  { %9239 = vmatpush.bf16.msra.mxu1 %v15075_v17  ;;  %v8996_v62 = vpop.f32.mrf.mxu2  ;;  %v9280_v17 = vperm.slane %v24190_v18, 1 }
 0x4a4   :  { %9250 = vmatpush.bf16.msra.mxu0 %v15235_v10  ;;  %v8997_v31 = vadd.f32 %v8996_v62, %v8984_v37 }
 0x4a5   :  { %9512 = vmatpush.bf16.msra.mxu3 %v16625_v6  ;;  %9267 = vmatpush.bf16.msrb.mxu2 %v15299_v53 }
 0x4a7   :  { %9240 = vmatpush.bf16.msra.mxu1 %v15059_v60 }
 0x4a8   :  { %9251 = vmatpush.bf16.msra.mxu0 %v15219_v41 }
 0x4a9   :  { %9513 = vmatpush.bf16.msra.mxu3 %v16624_v13  ;;  %v9009_v22 = vpop.f32.mrf.mxu0  ;;  %v16640_v13 = vld [vmem:[%s24388_s3 + $0x88] sm:$0xff] }
 0x4aa   :  { %v9010_v12 = vadd.f32 %v9009_v22, %v8997_v31 }
 0x4ab   :  { %9241 = vmatpush.bf16.msra.mxu1 %v15043_v26  ;;  %v9022_v2 = vpop.f32.mrf.mxu1  ;;  %v8998_v63 = vpop.f32.mrf.mxu2 }
 0x4ac   :  { %9252 = vmatpush.bf16.msra.mxu0 %v15203_v39  ;;  %v9274_v27 = vmax.f32 %v22518_v30, %v9010_v12  ;;  %v16643_v30 = vld [vmem:[%s24388_s3 + $0xa0] sm:$0xff]  ;;  %v9281_v39 = vperm.slane %v24190_v18, 2 }
 0x4ad   :  { %9514 = vmatpush.bf16.msra.mxu3 %v16623_v46 }
 0x4ae   :  { %9242 = vmatmul.bf16.vlgmr.msra.gmra.mxu1 %v17210_v47  ;;  %v16646_v47 = vld [vmem:[%s24388_s3 + $0xb8] sm:$0xff]  ;;  %v9288_v54 = vadd.f32 %v9280_v17, %v9274_v27 }
 0x4af   :  { %9520 = vmatpush.bf16.msrb.mxu1 %v16638_v24  ;;  %9533 = vmatpush.bf16.msra.mxu2 %v16646_v47 }
 0x4b0   :  { %9515 = vmatmul.bf16.vlgmr.msra.gmra.mxu3 %v9295_v52  ;;  %15303 = vmatmul.msk.bf16.vlgmr.msrb.gmra.mxu2 %vm1837_vm1, %v17318_v40  ;;  %v9035_v40 = vpop.f32.mrf.mxu3  ;;  %v9292_v11 = vmax.f32 %v9288_v54, 0.0 }
 0x4b1   :  { %9253 = vmatpush.bf16.msra.mxu0 %v15187_v14  ;;  %v9011_v1 = vpop.f32.mrf.mxu0  ;;  %v9036_v38 = vadd.f32 %v9035_v40, %v9022_v2 }
 0x4b2   :  { %v9296_v53 = vpack.c.bf16 %v9292_v11, %v9292_v11 }
 0x4b3   :  { %9521 = vmatpush.bf16.msrb.mxu1 %v16637_v43  ;;  %9534 = vmatpush.bf16.msra.mxu2 %v16645_v34  ;;  %v9024_v6 = vpop.f32.mrf.mxu1 }
 0x4b5   :  { %9254 = vmatpush.bf16.msra.mxu0 %v15171_v32  ;;  %v16647_v32 = vld [vmem:[%s24388_s3 + $0xc0] sm:$0xff] }
 0x4b7   :  { %9522 = vmatpush.bf16.msrb.mxu1 %v16636_v3  ;;  %9535 = vmatpush.bf16.msra.mxu2 %v16644_v7 }
 0x4b8   :  { %9255 = vmatmul.bf16.vlgmr.msra.gmra.mxu0 %v17404_v28  ;;  %v9037_v29 = vpop.f32.mrf.mxu3  ;;  %v16631_v28 = vld [vmem:[%s24388_s3 + $0x40] sm:$0xff] }
 0x4b9   :  { %v9048_v21 = vpop.f32.mrf.mxu0  ;;  %9553 = vmatpush.bf16.msrb.mxu0 %v16647_v32 }
 0x4ba   :  { %v9049_v10 = vadd.f32 %v9048_v21, %v9036_v38 }
 0x4bb   :  { %9523 = vmatpush.bf16.msrb.mxu1 %v16635_v59  ;;  %9536 = vmatpush.bf16.msra.mxu2 %v16643_v30 }
 0x4bf   :  { %9524 = vmatpush.bf16.msrb.mxu1 %v16634_v49  ;;  %9537 = vmatpush.bf16.msra.mxu2 %v16642_v45  ;;  %v9282_v45 = vperm.slane %v24190_v18, 3  ;;  %v9575_v18 = vld [vmem:[%s24390_s5 + $0x38] sm:$0xf] }
 0x4c1   :  { %v9050_v4 = vpop.f32.mrf.mxu0 }
 0x4c3   :  { %9525 = vmatpush.bf16.msrb.mxu1 %v16633_v5  ;;  %v9061_v36 = vpop.f32.mrf.mxu2  ;;  %9538 = vmatpush.bf16.msra.mxu2 %v16641_v51 }
 0x4c4   :  { %v9062_v42 = vadd.f32 %v9061_v36, %v9049_v10 }
 0x4c7   :  { %9526 = vmatpush.bf16.msrb.mxu1 %v16632_v33  ;;  %9539 = vmatpush.bf16.msra.mxu2 %v16640_v13 }
 0x4cb   :  { %9527 = vmatpush.bf16.msrb.mxu1 %v16631_v28  ;;  %v9074_v60 = vpop.f32.mrf.mxu1  ;;  %v9087_v8 = vpop.f32.mrf.mxu3  ;;  %9540 = vmatpush.bf16.msra.mxu2 %v16639_v9 }
 0x4cc   :  { %v9063_v44 = vpop.f32.mrf.mxu2  ;;  %v9075_v46 = vadd.f32 %v9074_v60, %v9062_v42 }
 0x4cd   :  { %v16661_v44 = vld [vmem:[%s24389_s4] ss:$0 sm:$0xff] }
 0x4ce   :  { %9528 = vmatmul.bf16.vlgmr.msrb.gmra.mxu1 %v9296_v53  ;;  %v9088_v24 = vadd.f32 %v9087_v8, %v9075_v46  ;;  %v16654_v46 = vld [vmem:[%s24390_s5 + $0x30] sm:$0xff] }
 0x4d3   :  { %v9076_v15 = vpop.f32.mrf.mxu1  ;;  %v9089_v19 = vpop.f32.mrf.mxu3 }
 0x4d4   :  { %v9100_v26 = vpop.f32.mrf.mxu0 }
 0x4d5   :  { %v9101_v35 = vadd.f32 %v9100_v26, %v9088_v24  ;;  %v16652_v24 = vld [vmem:[%s24390_s5 + $0x20] sm:$0xff] }
 0x4db   :  { %v9139_v48 = vpop.f32.mrf.mxu3 }
 0x4dc   :  { %v9102_v57 = vpop.f32.mrf.mxu0 }
 0x4dd   :  { %v16651_v57 = vld [vmem:[%s24390_s5 + $0x18] sm:$0xff] }
 0x4e3   :  { %v9113_v41 = vpop.f32.mrf.mxu2  ;;  %v9141_v23 = vpop.f32.mrf.mxu3 }
 0x4e4   :  { %v9114_v16 = vadd.f32 %v9113_v41, %v9101_v35  ;;  %v16650_v41 = vld [vmem:[%s24390_s5 + $0x10] sm:$0xff] }
 0x4eb   :  { %v9126_v55 = vpop.f32.mrf.mxu1  ;;  %v9115_v61 = vpop.f32.mrf.mxu2 }
 0x4ec   :  { %v9127_v52 = vadd.f32 %v9126_v55, %v9114_v16  ;;  %v16649_v55 = vld [vmem:[%s24390_s5 + $0x8] sm:$0xff] }
 0x4ee   :  { %v9140_v43 = vadd.f32 %v9139_v48, %v9127_v52  ;;  %v16653_v48 = vld [vmem:[%s24390_s5 + $0x28] sm:$0xff]  ;;  %v16648_v52 = vld [vmem:[%s24390_s5] sm:$0xff] }
 0x4f0   :  { %v9275_v25 = vmax.f32 %v22955_v56, %v9140_v43  ;;  %v9657_v43 = vld [vmem:[%s24392_s7 + $0x28] sm:$0x3] }
 0x4f2   :  { %v9289_v3 = vadd.f32 %v9281_v39, %v9275_v25  ;;  %v9683_v39 = vunpack.c.l.b16 %v9657_v43 }
 0x4f3   :  { %v9178_v58 = vpop.f32.mrf.mxu3  ;;  %v9128_v47 = vpop.f32.mrf.mxu1 }
 0x4f4   :  { %v9293_v14 = vmax.f32 %v9289_v3, 0.0  ;;  %v9152_v50 = vpop.f32.mrf.mxu0  ;;  %v9689_v61 = vpack.c.b16 %v9683_v39, %v9683_v39  ;;  %v16658_v3 = vld [vmem:[%s24392_s7 + $0x18] sm:$0xff]  ;;  %v16657_v47 = vld [vmem:[%s24392_s7 + $0x10] sm:$0xff] }
 0x4f6   :  { %v9297_v62 = vpack.c.bf16 %v9293_v14, %v9293_v14  ;;  %v9701_v25 = vsel %vm9699_vm3, %v9689_v61, 0 }
 0x4f7   :  { %9705 = vmatpush.bf16.msra.mxu0 %v9701_v25 }
 0x4f8   :  { %9541 = vmatmul.bf16.vlgmr.msra.gmra.mxu2 %v9297_v62 }
 0x4fb   :  { %v9180_v0 = vpop.f32.mrf.mxu3 }
 0x4fc   :  { %v9154_v37 = vpop.f32.mrf.mxu0 }
 0x503   :  { %v9165_v22 = vpop.f32.mrf.mxu2 }
 0x504   :  { %v9166_v12 = vadd.f32 %v9165_v22, %v9152_v50  ;;  %v16656_v22 = vld [vmem:[%s24392_s7 + $0x8] sm:$0xff] }
 0x506   :  { %v9179_v7 = vadd.f32 %v9178_v58, %v9166_v12  ;;  %v16659_v58 = vld [vmem:[%s24392_s7 + $0x20] sm:$0xff] }
 0x507   :  { %9706 = vmatpush.bf16.msra.mxu0 %v16659_v58  ;;  %v16663_v12 = vld [vmem:[%s24393_s8] ss:$0 sm:$0xff] }
 0x50b   :  { %v9191_v59 = vpop.f32.mrf.mxu1  ;;  %v9167_v31 = vpop.f32.mrf.mxu2  ;;  %9707 = vmatpush.bf16.msra.mxu0 %v16658_v3 }
 0x50c   :  { %v9192_v1 = vadd.f32 %v9191_v59, %v9179_v7  ;;  %v16655_v59 = vld [vmem:[%s24392_s7] sm:$0xff] }
 0x50d   :  { %v16662_v31 = vld [vmem:[%s24391_s6] ss:$0 sm:$0xff] }
 0x50f   :  { %9708 = vmatpush.bf16.msra.mxu0 %v16657_v47 }
 0x513   :  { %v9230_v2 = vpop.f32.mrf.mxu3  ;;  %v9193_v34 = vpop.f32.mrf.mxu1  ;;  %9709 = vmatpush.bf16.msra.mxu0 %v16656_v22 }
 0x514   :  { %v9204_v49 = vpop.f32.mrf.mxu0 }
 0x515   :  { %v9205_v27 = vadd.f32 %v9204_v49, %v9192_v1 }
 0x517   :  { %9710 = vmatpush.bf16.msra.mxu0 %v16655_v59 }
 0x51b   :  { %v9232_v56 = vpop.f32.mrf.mxu3 }
 0x51c   :  { %v9206_v40 = vpop.f32.mrf.mxu0 }
 0x523   :  { %v9217_v63 = vpop.f32.mrf.mxu2 }
 0x524   :  { %v9218_v6 = vadd.f32 %v9217_v63, %v9205_v27 }
 0x526   :  { %v9231_v29 = vadd.f32 %v9230_v2, %v9218_v6 }
 0x52b   :  { %v9243_v5 = vpop.f32.mrf.mxu1  ;;  %v9219_v17 = vpop.f32.mrf.mxu2 }
 0x52c   :  { %v9244_v30 = vadd.f32 %v9243_v5, %v9231_v29 }
 0x533   :  { %v9516_v33 = vpop.f32.mrf.mxu3  ;;  %v9245_v54 = vpop.f32.mrf.mxu1 }
 0x534   :  { %v9269_v28 = vpop.f32.mrf.mxu2  ;;  %v9517_v38 = vadd.f32 %v16661_v44, %v9516_v33 }
 0x535   :  { %v9256_v11 = vpop.f32.mrf.mxu0 }
 0x536   :  { %v9257_v53 = vadd.f32 %v9256_v11, %v9244_v30 }
 0x538   :  { %v9270_v4 = vadd.f32 %v9269_v28, %v9257_v53 }
 0x53a   :  { %v9276_v36 = vmax.f32 %v23468_v20, %v9270_v4  ;;  %v9609_v20 = vunpack.c.l.b16 %v9575_v18 }
 0x53b   :  { %v9518_v21 = vpop.f32.mrf.mxu3 }
 0x53c   :  { %v9271_v51 = vpop.f32.mrf.mxu2  ;;  %v9290_v60 = vadd.f32 %v9282_v45, %v9276_v36  ;;  %v9617_v42 = vpack.c.b16 %v9609_v20, %v9609_v20 }
 0x53d   :  { %v9258_v13 = vpop.f32.mrf.mxu0 }
 0x53e   :  { %v9294_v8 = vmax.f32 %v9290_v60, 0.0  ;;  %v9630_v26 = vsel %vm1841_vm0, %v9617_v42, 0 }
 0x53f   :  { %9632 = vmatpush.bf16.msrb.mxu3 %v9630_v26 }
 0x540   :  { %v9298_v9 = vpack.c.bf16 %v9294_v8, %v9294_v8 }
 0x542   :  { %15404 = vmatmul.msk.bf16.vlgmr.msrb.gmra.mxu0 %vm9503_vm2, %v9298_v9 }
 0x543   :  { %9633 = vmatpush.bf16.msrb.mxu3 %v16654_v46 }
 0x547   :  { %9634 = vmatpush.bf16.msrb.mxu3 %v16653_v48 }
 0x54b   :  { %v9529_v15 = vpop.f32.mrf.mxu1  ;;  %9635 = vmatpush.bf16.msrb.mxu3 %v16652_v24 }
 0x54c   :  { %v9530_v10 = vadd.f32 %v9529_v15, %v9517_v38 }
 0x54f   :  { %9636 = vmatpush.bf16.msrb.mxu3 %v16651_v57 }
 0x553   :  { %v9531_v19 = vpop.f32.mrf.mxu1  ;;  %9637 = vmatpush.bf16.msrb.mxu3 %v16650_v41 }
 0x557   :  { %9638 = vmatpush.bf16.msrb.mxu3 %v16649_v55 }
 0x55b   :  { %9639 = vmatpush.bf16.msrb.mxu3 %v16648_v52 }
 0x57b   :  { %v9542_v35 = vpop.f32.mrf.mxu2 }
 0x57c   :  { %v9543_v23 = vadd.f32 %v9542_v35, %v9530_v10 }
 0x583   :  { %v9544_v16 = vpop.f32.mrf.mxu2 }
 0x5bf   :  { %v9555_v14 = vpop.f32.mrf.mxu0 }
 0x5c0   :  { %v9556_v62 = vadd.f32 %v9555_v14, %v9543_v23 }
 0x5c2   :  { %v9559_v0 = vmax.f32 %v9556_v62, 0.0 }
 0x5c4   :  { %v9560_v50 = vpack.c.bf16 %v9559_v0, %v9559_v0 }
 0x5c6   :  { %15433 = vmatmul.msk.bf16.vlgmr.msrb.gmra.mxu3 %vm9625_vm4, %v9560_v50 }
 0x5c7   :  { %v9557_v37 = vpop.f32.mrf.mxu0 }
 0x649   :  { %v9641_v32 = vpop.f32.mrf.mxu3 }
 0x64a   :  { %v9642_v2 = vadd.f32 %v16662_v31, %v9641_v32 }
 0x64c   :  { %v9645_v34 = vmax.f32 %v9642_v2, 0.0 }
 0x64e   :  { %v9646_v56 = vpack.c.bf16 %v9645_v34, %v9645_v34 }
 0x650   :  { %15454 = vmatmul.msk.bf16.vlgmr.msra.gmra.mxu0 %vm9695_vm5, %v9646_v56 }
 0x651   :  { %v9643_v49 = vpop.f32.mrf.mxu3 }
 0x6cd   :  { %v9712_v40 = vpop.f32.mrf.mxu0 }
 0x6ce   :  { %v9713_v7 = vadd.f32 %v16663_v12, %v9712_v40 }
 0x6d0   :  { %9717 = vst.msk [vmem:[#allocation2] sm:$0xff] %vm9716_vm6, %v9713_v7 }
 0x6d1   :  { %9728 = dma.vmem_to_hbm [thread:$0]  %s9724_s22, 128, %s9726_s24, [#allocation3]  }
 0x6d5   :  { %v9714_v63 = vpop.f32.mrf.mxu0 }
 0x6d6   :  { %16688 = dma.done.wait [#allocation3], 128  }
 0x6d7   :  { %16689 = vsyncadd [#allocation3], 4294967168 }
 0x6d8   :  { %9733 = vsyncpa [#allocation3], 1 }

</bundles_post_ra>
